<compile_context>
chip_gen: v5e
topology: v5e:2x2
jax: 0.10.0
libtpu: 0.0.40
codegen_flags: <defaults>
</compile_context>

<pallas_src>
import functools

import jax
import jax.numpy as jnp
from jax.experimental import pallas as pl
from jax.experimental.pallas import tpu as pltpu

NUM_BITS = 8
NUM_BITS_GRAD = 8
NUM_BITS_WEIGHT = 8
BN_EPS = 1e-5

BASE = 8
NUM_CLASSES = 10
FC_PAD = 128                       # fc logits padded to one full lane register
# (planes, stride) for layer1..layer4, one BasicBlock each.
ARCH = [(BASE, 1), (BASE * 2, 2), (BASE * 4, 2), (BASE * 8, 2)]


def _round_up(x, m):
    return ((x + m - 1) // m) * m


def _cpad(c):
    # Real channel count rounded to the bf16 sublane tile (16) -- NOT 128.
    return max(16, _round_up(c, 16))


# ---------------------------------------------------------------------------
# Layout helper: spatial pad + stride-phase decomposition + flatten (pure XLA
# reshape/transpose, no data duplication).  Within phase (r, c) the element at
# flat index q_h*wq + q_w is x_padded[s*q_h + r, s*q_w + c].  `wq` (per-phase
# row width) is forced by the caller so conv output row indexing lines up with
# the next stage's layout.
# ---------------------------------------------------------------------------

def _phase_flatten(x, stride, pad, wq, min_rows, pad_value=0.0):
    N, H, W, C = x.shape
    s = stride
    Hp = _round_up(H + 2 * pad, s)
    Wp = s * wq
    assert Wp >= W + 2 * pad
    xp = jnp.pad(x, ((0, 0), (pad, Hp - H - pad), (pad, Wp - W - pad), (0, 0)),
                 constant_values=pad_value)
    Hq = Hp // s
    L = Hq * wq
    Lpad = _round_up(max(L, min_rows), 8)
    ph = xp.reshape(N, Hq, s, wq, s, C).transpose(0, 2, 4, 1, 3, 5)
    ph = ph.reshape(N, s * s, L, C)
    ph = jnp.pad(ph, ((0, 0), (0, 0), (0, Lpad - L), (0, 0)),
                 constant_values=pad_value)
    return ph.reshape(N, s * s * Lpad, C), Lpad


# ---------------------------------------------------------------------------
# Pallas kernels
# ---------------------------------------------------------------------------

def _stem_kernel(a_ref, w_ref, b_ref, o_ref):
    """conv1 7x7/2 as a single im2col matmul; folded-BN bias + ReLU epilogue."""
    acc = jnp.dot(a_ref[0], w_ref[...], preferred_element_type=jnp.float32)
    o_ref[0] = jnp.maximum(acc + b_ref[...], 0.0).astype(o_ref.dtype)


def _pool_kernel(x_ref, o_ref, *, k, stride, wq, lpad, mpad):
    """3x3/2 max pool via shifted element-wise max (register-carried).  The
    input is post-ReLU so zero padding is equivalent to -inf padding."""
    s = stride
    acc = None
    for kh in range(k):
        for kw in range(k):
            off = ((kh % s) * s + (kw % s)) * lpad + (kh // s) * wq + (kw // s)
            a = x_ref[0, pl.ds(off, mpad), :]
            acc = a if acc is None else jnp.maximum(acc, a)
    o_ref[0] = acc


def _block_kernel(xph_ref, w1_ref, b1_ref, w2_ref, b2_ref, *rest,
                  s, wq, lpad, w2p, mpad, mrows, ow, base0, id_off, has_ds):
    """Fused BasicBlock: conv1(3x3,s)+ReLU -> conv2(3x3,1) -> +residual -> ReLU.
    The intermediate stays in a VMEM scratch laid out as conv2's zero-padded
    input (row width w2p == wq, so the relayout is one aligned store)."""
    if has_ds:
        wd_ref, bd_ref, o_ref, hbuf = rest
    else:
        o_ref, hbuf = rest

    # --- conv1: 9 taps, register accumulation ------------------------------
    acc = None
    for kh in range(3):
        for kw in range(3):
            off = ((kh % s) * s + (kw % s)) * lpad + (kh // s) * wq + (kw // s)
            a = xph_ref[0, pl.ds(off, mpad), :]
            d = jnp.dot(a, w1_ref[kh * 3 + kw],
                        preferred_element_type=jnp.float32)
            acc = d if acc is None else acc + d
    acc = jnp.maximum(acc + b1_ref[...], 0.0)

    # Zero the invalid rows/columns so they act as conv2's zero padding.
    r = jax.lax.broadcasted_iota(jnp.int32, acc.shape, 0)
    valid = jnp.logical_and(r % w2p < ow, r < mrows)
    acc = jnp.where(valid, acc, 0.0)

    # One aligned contiguous store turns conv1's output into conv2's padded
    # input layout (borders stay zero from the buffer clear).
    hbuf[...] = jnp.zeros_like(hbuf)
    hbuf[pl.ds(base0 + w2p + 1, mpad), :] = acc

    # --- conv2: 9 taps from the VMEM buffer, register accumulation ---------
    acc2 = None
    for kh in range(3):
        for kw in range(3):
            a = hbuf[pl.ds(base0 + kh * w2p + kw, mpad), :].astype(w2_ref.dtype)
            d = jnp.dot(a, w2_ref[kh * 3 + kw],
                        preferred_element_type=jnp.float32)
            acc2 = d if acc2 is None else acc2 + d
    acc2 = acc2 + b2_ref[...]

    # --- residual: 1x1 strided downsample conv, or identity ----------------
    aid = xph_ref[0, pl.ds(id_off, mpad), :]
    if has_ds:
        acc2 = (acc2 + jnp.dot(aid, wd_ref[...],
                               preferred_element_type=jnp.float32)
                + bd_ref[...])
    else:
        acc2 = acc2 + aid.astype(jnp.float32)

    o_ref[0] = jnp.maximum(acc2, 0.0).astype(o_ref.dtype)


def _avgpool_fc_kernel(x_ref, w_ref, b_ref, o_ref, *, hw):
    """Global average pool (XLU reduce) fused with the final fc layer."""
    xv = x_ref[...].astype(jnp.float32)                    # (NP, HW, C)
    pooled = jnp.sum(xv, axis=1) * (1.0 / hw)
    o_ref[...] = (jnp.dot(pooled, w_ref[...],
                          preferred_element_type=jnp.float32) + b_ref[...])


# ---------------------------------------------------------------------------
# Wrappers (pallas_call plumbing)
# ---------------------------------------------------------------------------

def conv1_stem(x, w, b):
    """x: (N,H,W,3) f32; w: (K,Co) bf16 im2col weight (BN folded); b: (1,Co)."""
    N, H, W, _ = x.shape
    kh_, kw_, s, pad = 7, 7, 2, 3
    OH = (H + 2 * pad - kh_) // s + 1
    OW = (W + 2 * pad - kw_) // s + 1
    xp = jnp.pad(x, ((0, 0), (pad, pad), (pad, pad), (0, 0)))
    cols = [xp[:, dh:dh + s * OH:s, dw:dw + s * OW:s, :]
            for dh in range(kh_) for dw in range(kw_)]
    a = jnp.concatenate(cols, axis=-1)                     # (N, OH, OW, 147)
    K, Co = w.shape
    a = jnp.pad(a, ((0, 0), (0, 0), (0, 0), (0, K - a.shape[-1])))
    a = a.astype(jnp.bfloat16).reshape(N, OH * OW, K)
    out = pl.pallas_call(
        _stem_kernel,
        out_shape=jax.ShapeDtypeStruct((N, OH * OW, Co), jnp.bfloat16),
        grid=(N,),
        in_specs=[pl.BlockSpec((1, OH * OW, K), lambda n: (n, 0, 0)),
                  pl.BlockSpec((K, Co), lambda n: (0, 0)),
                  pl.BlockSpec((1, Co), lambda n: (0, 0))],
        out_specs=pl.BlockSpec((1, OH * OW, Co), lambda n: (n, 0, 0)),
        compiler_params=pltpu.CompilerParams(
            dimension_semantics=("parallel",)),
    )(a, w, b)
    return out.reshape(N, OH, OW, Co)


def maxpool(x, k=3, stride=2, pad=1):
    N, H, W, C = x.shape
    s = stride
    OH = (H + 2 * pad - k) // s + 1
    OW = (W + 2 * pad - k) // s + 1
    wq = _round_up(W + 2 * pad, s) // s
    mrows = OH * wq
    mpad = _round_up(mrows, 8)
    d = (k - 1) // s
    xph, lpad = _phase_flatten(x, s, pad, wq, d * wq + d + mpad)
    out = pl.pallas_call(
        functools.partial(_pool_kernel, k=k, stride=s, wq=wq, lpad=lpad,
                          mpad=mpad),
        out_shape=jax.ShapeDtypeStruct((N, mpad, C), x.dtype),
        grid=(N,),
        in_specs=[pl.BlockSpec((1, s * s * lpad, C), lambda n: (n, 0, 0))],
        out_specs=pl.BlockSpec((1, mpad, C), lambda n: (n, 0, 0)),
        compiler_params=pltpu.CompilerParams(
            dimension_semantics=("parallel",)),
    )(xph)
    return out[:, :mrows, :].reshape(N, OH, wq, C)[:, :, :OW, :]


def basic_block(x, params, idx, stride):
    """One fused BasicBlock pallas_call.  x: (N,H,W,Cin) bf16 NHWC."""
    N, H, W, Cin = x.shape
    w1, b1 = params[f"l{idx}_w1"], params[f"l{idx}_b1"]
    w2, b2 = params[f"l{idx}_w2"], params[f"l{idx}_b2"]
    has_ds = f"l{idx}_wd" in params
    Cmid = w1.shape[-1]
    s = stride
    OH = (H + 2 - 3) // s + 1
    OW = (W + 2 - 3) // s + 1
    wq = OW + 2                # forced: conv1 output rows == conv2 padded rows
    w2p = wq
    mrows = OH * w2p
    mpad = _round_up(mrows, 8)
    min_rows = (2 // s) * wq + (2 // s) + mpad
    if s == 1:
        min_rows = max(min_rows, wq + 1 + mpad)
    xph, lpad = _phase_flatten(x, s, 1, wq, min_rows)
    base0 = (-(w2p + 1)) % 8                       # makes the hbuf store aligned
    hb = _round_up(base0 + 2 * w2p + 2 + mpad, 8)
    id_off = (wq + 1) if s == 1 else 3 * lpad      # identity / 1x1-ds read offset

    args = [xph, w1, b1, w2, b2]
    in_specs = [
        pl.BlockSpec((1, s * s * lpad, Cin), lambda n: (n, 0, 0)),
        pl.BlockSpec(w1.shape, lambda n: (0, 0, 0)),
        pl.BlockSpec(b1.shape, lambda n: (0, 0)),
        pl.BlockSpec(w2.shape, lambda n: (0, 0, 0)),
        pl.BlockSpec(b2.shape, lambda n: (0, 0)),
    ]
    if has_ds:
        wd, bd = params[f"l{idx}_wd"], params[f"l{idx}_bd"]
        args += [wd, bd]
        in_specs += [pl.BlockSpec(wd.shape, lambda n: (0, 0)),
                     pl.BlockSpec(bd.shape, lambda n: (0, 0))]

    kernel = functools.partial(_block_kernel, s=s, wq=wq, lpad=lpad, w2p=w2p,
                               mpad=mpad, mrows=mrows, ow=OW, base0=base0,
                               id_off=id_off, has_ds=has_ds)
    out = pl.pallas_call(
        kernel,
        out_shape=jax.ShapeDtypeStruct((N, mpad, Cmid), jnp.bfloat16),
        grid=(N,),
        in_specs=in_specs,
        out_specs=pl.BlockSpec((1, mpad, Cmid), lambda n: (n, 0, 0)),
        scratch_shapes=[pltpu.VMEM((hb, Cmid), jnp.float32)],
        compiler_params=pltpu.CompilerParams(
            dimension_semantics=("parallel",)),
    )(*args)
    return out[:, :mrows, :].reshape(N, OH, w2p, Cmid)[:, :, :OW, :]


def avgpool_fc(x, fc_w, fc_b, num_classes):
    N, H, W, C = x.shape
    hw = H * W
    NP = _round_up(N, 8)
    xf = jnp.pad(x.reshape(N, hw, C), ((0, NP - N), (0, 0), (0, 0)))
    KP = fc_w.shape[1]
    out = pl.pallas_call(
        functools.partial(_avgpool_fc_kernel, hw=hw),
        out_shape=jax.ShapeDtypeStruct((NP, KP), jnp.float32),
        grid=(1,),
        in_specs=[pl.BlockSpec((NP, hw, C), lambda i: (0, 0, 0)),
                  pl.BlockSpec((C, KP), lambda i: (0, 0)),
                  pl.BlockSpec((1, KP), lambda i: (0, 0))],
        out_specs=pl.BlockSpec((NP, KP), lambda i: (0, 0)),
    )(xf, fc_w, fc_b)
    return out[:N, :num_classes]


# ---------------------------------------------------------------------------
# Parameters (deterministic in-script init; BN folded; channels padded to 16)
# ---------------------------------------------------------------------------

def _conv_bn_params(key, kh, kw, ic, oc, ic_pad, oc_pad):
    fan_in = kh * kw * ic
    std = (2.0 / fan_in) ** 0.5
    w = std * jax.random.normal(key, (kh, kw, ic, oc), dtype=jnp.float32)
    # Fresh BatchNorm2d in eval mode: gamma=1, beta=0, mean=0, var=1.
    scale = 1.0 / jnp.sqrt(jnp.ones((oc,), jnp.float32) + BN_EPS)
    bias = jnp.zeros((oc,), jnp.float32)
    w = w * scale                       # fold BN scale into the conv weights
    w = jnp.pad(w, ((0, 0), (0, 0), (0, ic_pad - ic), (0, oc_pad - oc)))
    b = jnp.pad(bias, (0, oc_pad - oc)).reshape(1, oc_pad)
    return w.astype(jnp.bfloat16), b.astype(jnp.float32)


def init_params(key):
    keys = iter(jax.random.split(key, 32))
    p = {}
    # conv1 stem (7x7, 3->8), stored as im2col weight (K=160, 16).
    w, b = _conv_bn_params(next(keys), 7, 7, 3, BASE, 3, _cpad(BASE))
    k_real = 7 * 7 * 3
    k_pad = _round_up(k_real, 16)
    p["conv1_w"] = jnp.pad(w.reshape(k_real, _cpad(BASE)),
                           ((0, k_pad - k_real), (0, 0)))
    p["conv1_b"] = b
    inplanes = BASE
    for i, (planes, stride) in enumerate(ARCH, start=1):
        cin, cmid = _cpad(inplanes), _cpad(planes)
        w1, b1 = _conv_bn_params(next(keys), 3, 3, inplanes, planes, cin, cmid)
        p[f"l{i}_w1"], p[f"l{i}_b1"] = w1.reshape(9, cin, cmid), b1
        w2, b2 = _conv_bn_params(next(keys), 3, 3, planes, planes, cmid, cmid)
        p[f"l{i}_w2"], p[f"l{i}_b2"] = w2.reshape(9, cmid, cmid), b2
        if stride != 1 or inplanes != planes:
            wd, bd = _conv_bn_params(next(keys), 1, 1, inplanes, planes,
                                     cin, cmid)
            p[f"l{i}_wd"], p[f"l{i}_bd"] = wd.reshape(cin, cmid), bd
        inplanes = planes
    fc_in = inplanes
    std = (1.0 / fc_in) ** 0.5
    fcw = std * jax.random.normal(next(keys), (fc_in, NUM_CLASSES),
                                  dtype=jnp.float32)
    p["fc_w"] = jnp.pad(fcw, ((0, _cpad(fc_in) - fc_in),
                              (0, FC_PAD - NUM_CLASSES)))
    p["fc_b"] = jnp.zeros((1, FC_PAD), jnp.float32)
    return p


# ---------------------------------------------------------------------------
# Forward pass (mirrors ResNet.forward)
# ---------------------------------------------------------------------------

@jax.jit
def resnet_forward(params, x_nchw):
    x = jnp.transpose(x_nchw, (0, 2, 3, 1)).astype(jnp.float32)  # NCHW -> NHWC
    # conv1 + bn1 + relu (single fused im2col matmul kernel)
    x = conv1_stem(x, params["conv1_w"], params["conv1_b"])
    # maxpool 3x3 / 2
    x = maxpool(x, 3, 2, 1)
    # layer1..layer4: one fused pallas_call per BasicBlock
    for i, (_, stride) in enumerate(ARCH, start=1):
        x = basic_block(x, params, i, stride)
    # avgpool + flatten + fc (fused)
    return avgpool_fc(x, params["fc_w"], params["fc_b"], NUM_CLASSES)


if __name__ == "__main__":
    key = jax.random.PRNGKey(0)
    k_params, k_x = jax.random.split(key)
    params = init_params(k_params)

    # PyTorch-style NCHW input.
    x_nchw = jax.random.normal(k_x, (2, 3, 32, 32), dtype=jnp.float32)

    logits = resnet_forward(params, x_nchw)
    logits = jax.block_until_ready(logits)
    assert logits.shape == (2, NUM_CLASSES) and logits.dtype == jnp.float32
    print("KERNEL_OK")
</pallas_src>

<mosaic_0001>
module attributes {stable_mosaic.version = 11 : i64} {
  func.func @_stem_kernel(%arg0: i32, %arg1: memref<1x256x160xbf16, #tpu.memory_space<vmem>>, %arg2: memref<160x16xbf16, #tpu.memory_space<vmem>>, %arg3: memref<1x16xf32, #tpu.memory_space<vmem>>, %arg4: memref<1x256x16xbf16, #tpu.memory_space<vmem>>) attributes {dimension_semantics = [#tpu.dimension_semantics<parallel>], iteration_bounds = array<i64: 2>, scalar_prefetch = 0 : i64, scratch_operands = 0 : i64, tpu.core_type = #tpu.core_type<tc>, window_params = [{transform_indices = @transform_0, window_bounds = array<i64: 1, 256, 160>}, {pipeline_mode = #tpu.pipeline_mode<synchronous>, transform_indices = @transform_1, window_bounds = array<i64: 160, 16>}, {pipeline_mode = #tpu.pipeline_mode<synchronous>, transform_indices = @transform_2, window_bounds = array<i64: 1, 16>}, {transform_indices = @transform_3, window_bounds = array<i64: 1, 256, 16>}]} {
    %c0 = arith.constant 0 : index
    %c0_0 = arith.constant 0 : index
    %c0_1 = arith.constant 0 : index
    %0 = vector.load %arg1[%c0, %c0_0, %c0_1] : memref<1x256x160xbf16, #tpu.memory_space<vmem>>, vector<1x256x160xbf16>
    %1 = vector.shape_cast %0 : vector<1x256x160xbf16> to vector<256x160xbf16>
    %c0_2 = arith.constant 0 : index
    %c0_3 = arith.constant 0 : index
    %2 = vector.load %arg2[%c0_2, %c0_3] : memref<160x16xbf16, #tpu.memory_space<vmem>>, vector<160x16xbf16>
    %cst = arith.constant dense<0.000000e+00> : vector<256x16xf32>
    %3 = tpu.matmul %1, %2, %cst {dimension_numbers = #tpu.dot_dimension_numbers<[1], [0], [0], [1], [0, 0, 1, 1], [], []>} : vector<256x160xbf16>, vector<160x16xbf16>, vector<256x16xf32> -> vector<256x16xf32>
    %c0_4 = arith.constant 0 : index
    %c0_5 = arith.constant 0 : index
    %4 = vector.load %arg3[%c0_4, %c0_5] : memref<1x16xf32, #tpu.memory_space<vmem>>, vector<1x16xf32>
    %5 = vector.broadcast %4 : vector<1x16xf32> to vector<256x16xf32>
    %6 = arith.addf %3, %5 : vector<256x16xf32>
    %cst_6 = arith.constant 0.000000e+00 : f32
    %7 = vector.broadcast %cst_6 : f32 to vector<256x16xf32>
    %8 = arith.maximumf %6, %7 : vector<256x16xf32>
    %9 = arith.truncf %8 : vector<256x16xf32> to vector<256x16xbf16>
    %c0_7 = arith.constant 0 : index
    %c0_8 = arith.constant 0 : index
    %c0_9 = arith.constant 0 : index
    %10 = vector.load %arg4[%c0_7, %c0_8, %c0_9] : memref<1x256x16xbf16, #tpu.memory_space<vmem>>, vector<1x256x16xbf16>
    %11 = vector.shape_cast %10 : vector<1x256x16xbf16> to vector<256x16xbf16>
    %12 = vector.shape_cast %9 : vector<256x16xbf16> to vector<1x256x16xbf16>
    tpu.vector_store %arg4[%c0_7, %c0_8, %c0_9], %12 {strides = array<i32>} : memref<1x256x16xbf16, #tpu.memory_space<vmem>>, vector<1x256x16xbf16>,
    return
  }
  func.func @transform_0(%arg0: i32) -> (i32, i32, i32) {
    %c0_i32 = arith.constant 0 : i32
    %c0_i32_0 = arith.constant 0 : i32
    %c0_i32_1 = arith.constant 0 : i32
    return %arg0, %c0_i32, %c0_i32_0 : i32, i32, i32
  }
  func.func @transform_1(%arg0: i32) -> (i32, i32) {
    %c0_i32 = arith.constant 0 : i32
    %c0_i32_0 = arith.constant 0 : i32
    %c0_i32_1 = arith.constant 0 : i32
    return %c0_i32, %c0_i32_0 : i32, i32
  }
  func.func @transform_2(%arg0: i32) -> (i32, i32) {
    %c0_i32 = arith.constant 0 : i32
    %c0_i32_0 = arith.constant 0 : i32
    %c0_i32_1 = arith.constant 0 : i32
    return %c0_i32, %c0_i32_0 : i32, i32
  }
  func.func @transform_3(%arg0: i32) -> (i32, i32, i32) {
    %c0_i32 = arith.constant 0 : i32
    %c0_i32_0 = arith.constant 0 : i32
    %c0_i32_1 = arith.constant 0 : i32
    return %arg0, %c0_i32, %c0_i32_0 : i32, i32, i32
  }
}

module attributes {stable_mosaic.version = 11 : i64} {
  func.func @_pool_kernel(%arg0: i32, %arg1: memref<1x352x16xbf16, #tpu.memory_space<vmem>>, %arg2: memref<1x72x16xbf16, #tpu.memory_space<vmem>>) attributes {dimension_semantics = [#tpu.dimension_semantics<parallel>], iteration_bounds = array<i64: 2>, scalar_prefetch = 0 : i64, scratch_operands = 0 : i64, tpu.core_type = #tpu.core_type<tc>, window_params = [{transform_indices = @transform_0, window_bounds = array<i64: 1, 352, 16>}, {transform_indices = @transform_1, window_bounds = array<i64: 1, 72, 16>}]} {
    %c0 = arith.constant 0 : index
    %c0_0 = arith.constant 0 : index
    %c0_1 = arith.constant 0 : index
    %0 = vector.load %arg1[%c0, %c0_0, %c0_1] : memref<1x352x16xbf16, #tpu.memory_space<vmem>>, vector<1x72x16xbf16>
    %1 = vector.shape_cast %0 : vector<1x72x16xbf16> to vector<72x16xbf16>
    %c0_2 = arith.constant 0 : index
    %c88 = arith.constant 88 : index
    %c0_3 = arith.constant 0 : index
    %2 = vector.load %arg1[%c0_2, %c88, %c0_3] : memref<1x352x16xbf16, #tpu.memory_space<vmem>>, vector<1x72x16xbf16>
    %3 = vector.shape_cast %2 : vector<1x72x16xbf16> to vector<72x16xbf16>
    %4 = arith.maximumf %1, %3 : vector<72x16xbf16>
    %c0_4 = arith.constant 0 : index
    %c1 = arith.constant 1 : index
    %c0_5 = arith.constant 0 : index
    %5 = vector.load %arg1[%c0_4, %c1, %c0_5] : memref<1x352x16xbf16, #tpu.memory_space<vmem>>, vector<1x72x16xbf16>
    %6 = vector.shape_cast %5 : vector<1x72x16xbf16> to vector<72x16xbf16>
    %7 = arith.maximumf %4, %6 : vector<72x16xbf16>
    %c0_6 = arith.constant 0 : index
    %c176 = arith.constant 176 : index
    %c0_7 = arith.constant 0 : index
    %8 = vector.load %arg1[%c0_6, %c176, %c0_7] : memref<1x352x16xbf16, #tpu.memory_space<vmem>>, vector<1x72x16xbf16>
    %9 = vector.shape_cast %8 : vector<1x72x16xbf16> to vector<72x16xbf16>
    %10 = arith.maximumf %7, %9 : vector<72x16xbf16>
    %c0_8 = arith.constant 0 : index
    %c264 = arith.constant 264 : index
    %c0_9 = arith.constant 0 : index
    %11 = vector.load %arg1[%c0_8, %c264, %c0_9] : memref<1x352x16xbf16, #tpu.memory_space<vmem>>, vector<1x72x16xbf16>
    %12 = vector.shape_cast %11 : vector<1x72x16xbf16> to vector<72x16xbf16>
    %13 = arith.maximumf %10, %12 : vector<72x16xbf16>
    %c0_10 = arith.constant 0 : index
    %c177 = arith.constant 177 : index
    %c0_11 = arith.constant 0 : index
    %14 = vector.load %arg1[%c0_10, %c177, %c0_11] : memref<1x352x16xbf16, #tpu.memory_space<vmem>>, vector<1x72x16xbf16>
    %15 = vector.shape_cast %14 : vector<1x72x16xbf16> to vector<72x16xbf16>
    %16 = arith.maximumf %13, %15 : vector<72x16xbf16>
    %c0_12 = arith.constant 0 : index
    %c9 = arith.constant 9 : index
    %c0_13 = arith.constant 0 : index
    %17 = vector.load %arg1[%c0_12, %c9, %c0_13] : memref<1x352x16xbf16, #tpu.memory_space<vmem>>, vector<1x72x16xbf16>
    %18 = vector.shape_cast %17 : vector<1x72x16xbf16> to vector<72x16xbf16>
    %19 = arith.maximumf %16, %18 : vector<72x16xbf16>
    %c0_14 = arith.constant 0 : index
    %c97 = arith.constant 97 : index
    %c0_15 = arith.constant 0 : index
    %20 = vector.load %arg1[%c0_14, %c97, %c0_15] : memref<1x352x16xbf16, #tpu.memory_space<vmem>>, vector<1x72x16xbf16>
    %21 = vector.shape_cast %20 : vector<1x72x16xbf16> to vector<72x16xbf16>
    %22 = arith.maximumf %19, %21 : vector<72x16xbf16>
    %c0_16 = arith.constant 0 : index
    %c10 = arith.constant 10 : index
    %c0_17 = arith.constant 0 : index
    %23 = vector.load %arg1[%c0_16, %c10, %c0_17] : memref<1x352x16xbf16, #tpu.memory_space<vmem>>, vector<1x72x16xbf16>
    %24 = vector.shape_cast %23 : vector<1x72x16xbf16> to vector<72x16xbf16>
    %25 = arith.maximumf %22, %24 : vector<72x16xbf16>
    %c0_18 = arith.constant 0 : index
    %c0_19 = arith.constant 0 : index
    %c0_20 = arith.constant 0 : index
    %26 = vector.load %arg2[%c0_18, %c0_19, %c0_20] : memref<1x72x16xbf16, #tpu.memory_space<vmem>>, vector<1x72x16xbf16>
    %27 = vector.shape_cast %26 : vector<1x72x16xbf16> to vector<72x16xbf16>
    %28 = vector.shape_cast %25 : vector<72x16xbf16> to vector<1x72x16xbf16>
    tpu.vector_store %arg2[%c0_18, %c0_19, %c0_20], %28 {strides = array<i32>} : memref<1x72x16xbf16, #tpu.memory_space<vmem>>, vector<1x72x16xbf16>,
    return
  }
  func.func @transform_0(%arg0: i32) -> (i32, i32, i32) {
    %c0_i32 = arith.constant 0 : i32
    %c0_i32_0 = arith.constant 0 : i32
    %c0_i32_1 = arith.constant 0 : i32
    return %arg0, %c0_i32, %c0_i32_0 : i32, i32, i32
  }
  func.func @transform_1(%arg0: i32) -> (i32, i32, i32) {
    %c0_i32 = arith.constant 0 : i32
    %c0_i32_0 = arith.constant 0 : i32
    %c0_i32_1 = arith.constant 0 : i32
    return %arg0, %c0_i32, %c0_i32_0 : i32, i32, i32
  }
}

module attributes {stable_mosaic.version = 11 : i64} {
  func.func @_block_kernel(%arg0: i32, %arg1: memref<1x104x16xbf16, #tpu.memory_space<vmem>>, %arg2: memref<9x16x16xbf16, #tpu.memory_space<vmem>>, %arg3: memref<1x16xf32, #tpu.memory_space<vmem>>, %arg4: memref<9x16x16xbf16, #tpu.memory_space<vmem>>, %arg5: memref<1x16xf32, #tpu.memory_space<vmem>>, %arg6: memref<1x80x16xbf16, #tpu.memory_space<vmem>>, %arg7: memref<112x16xf32, #tpu.memory_space<vmem>>) attributes {dimension_semantics = [#tpu.dimension_semantics<parallel>], iteration_bounds = array<i64: 2>, scalar_prefetch = 0 : i64, scratch_operands = 1 : i64, tpu.core_type = #tpu.core_type<tc>, window_params = [{transform_indices = @transform_0, window_bounds = array<i64: 1, 104, 16>}, {pipeline_mode = #tpu.pipeline_mode<synchronous>, transform_indices = @transform_1, window_bounds = array<i64: 9, 16, 16>}, {pipeline_mode = #tpu.pipeline_mode<synchronous>, transform_indices = @transform_2, window_bounds = array<i64: 1, 16>}, {pipeline_mode = #tpu.pipeline_mode<synchronous>, transform_indices = @transform_3, window_bounds = array<i64: 9, 16, 16>}, {pipeline_mode = #tpu.pipeline_mode<synchronous>, transform_indices = @transform_4, window_bounds = array<i64: 1, 16>}, {transform_indices = @transform_5, window_bounds = array<i64: 1, 80, 16>}]} {
    %c0 = arith.constant 0 : index
    %c0_0 = arith.constant 0 : index
    %c0_1 = arith.constant 0 : index
    %0 = vector.load %arg1[%c0, %c0_0, %c0_1] : memref<1x104x16xbf16, #tpu.memory_space<vmem>>, vector<1x80x16xbf16>
    %1 = vector.shape_cast %0 : vector<1x80x16xbf16> to vector<80x16xbf16>
    %c0_2 = arith.constant 0 : index
    %c0_3 = arith.constant 0 : index
    %c0_4 = arith.constant 0 : index
    %2 = vector.load %arg2[%c0_2, %c0_3, %c0_4] : memref<9x16x16xbf16, #tpu.memory_space<vmem>>, vector<1x16x16xbf16>
    %3 = vector.shape_cast %2 : vector<1x16x16xbf16> to vector<16x16xbf16>
    %cst = arith.constant dense<0.000000e+00> : vector<80x16xf32>
    %4 = tpu.matmul %1, %3, %cst {dimension_numbers = #tpu.dot_dimension_numbers<[1], [0], [0], [1], [0, 0, 1, 1], [], []>} : vector<80x16xbf16>, vector<16x16xbf16>, vector<80x16xf32> -> vector<80x16xf32>
    %c0_5 = arith.constant 0 : index
    %c1 = arith.constant 1 : index
    %c0_6 = arith.constant 0 : index
    %5 = vector.load %arg1[%c0_5, %c1, %c0_6] : memref<1x104x16xbf16, #tpu.memory_space<vmem>>, vector<1x80x16xbf16>
    %6 = vector.shape_cast %5 : vector<1x80x16xbf16> to vector<80x16xbf16>
    %c1_7 = arith.constant 1 : index
    %c0_8 = arith.constant 0 : index
    %c0_9 = arith.constant 0 : index
    %7 = vector.load %arg2[%c1_7, %c0_8, %c0_9] : memref<9x16x16xbf16, #tpu.memory_space<vmem>>, vector<1x16x16xbf16>
    %8 = vector.shape_cast %7 : vector<1x16x16xbf16> to vector<16x16xbf16>
    %cst_10 = arith.constant dense<0.000000e+00> : vector<80x16xf32>
    %9 = tpu.matmul %6, %8, %cst_10 {dimension_numbers = #tpu.dot_dimension_numbers<[1], [0], [0], [1], [0, 0, 1, 1], [], []>} : vector<80x16xbf16>, vector<16x16xbf16>, vector<80x16xf32> -> vector<80x16xf32>
    %10 = arith.addf %4, %9 : vector<80x16xf32>
    %c0_11 = arith.constant 0 : index
    %c2 = arith.constant 2 : index
    %c0_12 = arith.constant 0 : index
    %11 = vector.load %arg1[%c0_11, %c2, %c0_12] : memref<1x104x16xbf16, #tpu.memory_space<vmem>>, vector<1x80x16xbf16>
    %12 = vector.shape_cast %11 : vector<1x80x16xbf16> to vector<80x16xbf16>
    %c2_13 = arith.constant 2 : index
    %c0_14 = arith.constant 0 : index
    %c0_15 = arith.constant 0 : index
    %13 = vector.load %arg2[%c2_13, %c0_14, %c0_15] : memref<9x16x16xbf16, #tpu.memory_space<vmem>>, vector<1x16x16xbf16>
    %14 = vector.shape_cast %13 : vector<1x16x16xbf16> to vector<16x16xbf16>
    %cst_16 = arith.constant dense<0.000000e+00> : vector<80x16xf32>
    %15 = tpu.matmul %12, %14, %cst_16 {dimension_numbers = #tpu.dot_dimension_numbers<[1], [0], [0], [1], [0, 0, 1, 1], [], []>} : vector<80x16xbf16>, vector<16x16xbf16>, vector<80x16xf32> -> vector<80x16xf32>
    %16 = arith.addf %10, %15 : vector<80x16xf32>
    %c0_17 = arith.constant 0 : index
    %c10 = arith.constant 10 : index
    %c0_18 = arith.constant 0 : index
    %17 = vector.load %arg1[%c0_17, %c10, %c0_18] : memref<1x104x16xbf16, #tpu.memory_space<vmem>>, vector<1x80x16xbf16>
    %18 = vector.shape_cast %17 : vector<1x80x16xbf16> to vector<80x16xbf16>
    %c3 = arith.constant 3 : index
    %c0_19 = arith.constant 0 : index
    %c0_20 = arith.constant 0 : index
    %19 = vector.load %arg2[%c3, %c0_19, %c0_20] : memref<9x16x16xbf16, #tpu.memory_space<vmem>>, vector<1x16x16xbf16>
    %20 = vector.shape_cast %19 : vector<1x16x16xbf16> to vector<16x16xbf16>
    %cst_21 = arith.constant dense<0.000000e+00> : vector<80x16xf32>
    %21 = tpu.matmul %18, %20, %cst_21 {dimension_numbers = #tpu.dot_dimension_numbers<[1], [0], [0], [1], [0, 0, 1, 1], [], []>} : vector<80x16xbf16>, vector<16x16xbf16>, vector<80x16xf32> -> vector<80x16xf32>
    %22 = arith.addf %16, %21 : vector<80x16xf32>
    %c0_22 = arith.constant 0 : index
    %c11 = arith.constant 11 : index
    %c0_23 = arith.constant 0 : index
    %23 = vector.load %arg1[%c0_22, %c11, %c0_23] : memref<1x104x16xbf16, #tpu.memory_space<vmem>>, vector<1x80x16xbf16>
    %24 = vector.shape_cast %23 : vector<1x80x16xbf16> to vector<80x16xbf16>
    %c4 = arith.constant 4 : index
    %c0_24 = arith.constant 0 : index
    %c0_25 = arith.constant 0 : index
    %25 = vector.load %arg2[%c4, %c0_24, %c0_25] : memref<9x16x16xbf16, #tpu.memory_space<vmem>>, vector<1x16x16xbf16>
    %26 = vector.shape_cast %25 : vector<1x16x16xbf16> to vector<16x16xbf16>
    %cst_26 = arith.constant dense<0.000000e+00> : vector<80x16xf32>
    %27 = tpu.matmul %24, %26, %cst_26 {dimension_numbers = #tpu.dot_dimension_numbers<[1], [0], [0], [1], [0, 0, 1, 1], [], []>} : vector<80x16xbf16>, vector<16x16xbf16>, vector<80x16xf32> -> vector<80x16xf32>
    %28 = arith.addf %22, %27 : vector<80x16xf32>
    %c0_27 = arith.constant 0 : index
    %c12 = arith.constant 12 : index
    %c0_28 = arith.constant 0 : index
    %29 = vector.load %arg1[%c0_27, %c12, %c0_28] : memref<1x104x16xbf16, #tpu.memory_space<vmem>>, vector<1x80x16xbf16>
    %30 = vector.shape_cast %29 : vector<1x80x16xbf16> to vector<80x16xbf16>
    %c5 = arith.constant 5 : index
    %c0_29 = arith.constant 0 : index
    %c0_30 = arith.constant 0 : index
    %31 = vector.load %arg2[%c5, %c0_29, %c0_30] : memref<9x16x16xbf16, #tpu.memory_space<vmem>>, vector<1x16x16xbf16>
    %32 = vector.shape_cast %31 : vector<1x16x16xbf16> to vector<16x16xbf16>
    %cst_31 = arith.constant dense<0.000000e+00> : vector<80x16xf32>
    %33 = tpu.matmul %30, %32, %cst_31 {dimension_numbers = #tpu.dot_dimension_numbers<[1], [0], [0], [1], [0, 0, 1, 1], [], []>} : vector<80x16xbf16>, vector<16x16xbf16>, vector<80x16xf32> -> vector<80x16xf32>
    %34 = arith.addf %28, %33 : vector<80x16xf32>
    %c0_32 = arith.constant 0 : index
    %c20 = arith.constant 20 : index
    %c0_33 = arith.constant 0 : index
    %35 = vector.load %arg1[%c0_32, %c20, %c0_33] : memref<1x104x16xbf16, #tpu.memory_space<vmem>>, vector<1x80x16xbf16>
    %36 = vector.shape_cast %35 : vector<1x80x16xbf16> to vector<80x16xbf16>
    %c6 = arith.constant 6 : index
    %c0_34 = arith.constant 0 : index
    %c0_35 = arith.constant 0 : index
    %37 = vector.load %arg2[%c6, %c0_34, %c0_35] : memref<9x16x16xbf16, #tpu.memory_space<vmem>>, vector<1x16x16xbf16>
    %38 = vector.shape_cast %37 : vector<1x16x16xbf16> to vector<16x16xbf16>
    %cst_36 = arith.constant dense<0.000000e+00> : vector<80x16xf32>
    %39 = tpu.matmul %36, %38, %cst_36 {dimension_numbers = #tpu.dot_dimension_numbers<[1], [0], [0], [1], [0, 0, 1, 1], [], []>} : vector<80x16xbf16>, vector<16x16xbf16>, vector<80x16xf32> -> vector<80x16xf32>
    %40 = arith.addf %34, %39 : vector<80x16xf32>
    %c0_37 = arith.constant 0 : index
    %c21 = arith.constant 21 : index
    %c0_38 = arith.constant 0 : index
    %41 = vector.load %arg1[%c0_37, %c21, %c0_38] : memref<1x104x16xbf16, #tpu.memory_space<vmem>>, vector<1x80x16xbf16>
    %42 = vector.shape_cast %41 : vector<1x80x16xbf16> to vector<80x16xbf16>
    %c7 = arith.constant 7 : index
    %c0_39 = arith.constant 0 : index
    %c0_40 = arith.constant 0 : index
    %43 = vector.load %arg2[%c7, %c0_39, %c0_40] : memref<9x16x16xbf16, #tpu.memory_space<vmem>>, vector<1x16x16xbf16>
    %44 = vector.shape_cast %43 : vector<1x16x16xbf16> to vector<16x16xbf16>
    %cst_41 = arith.constant dense<0.000000e+00> : vector<80x16xf32>
    %45 = tpu.matmul %42, %44, %cst_41 {dimension_numbers = #tpu.dot_dimension_numbers<[1], [0], [0], [1], [0, 0, 1, 1], [], []>} : vector<80x16xbf16>, vector<16x16xbf16>, vector<80x16xf32> -> vector<80x16xf32>
    %46 = arith.addf %40, %45 : vector<80x16xf32>
    %c0_42 = arith.constant 0 : index
    %c22 = arith.constant 22 : index
    %c0_43 = arith.constant 0 : index
    %47 = vector.load %arg1[%c0_42, %c22, %c0_43] : memref<1x104x16xbf16, #tpu.memory_space<vmem>>, vector<1x80x16xbf16>
    %48 = vector.shape_cast %47 : vector<1x80x16xbf16> to vector<80x16xbf16>
    %c8 = arith.constant 8 : index
    %c0_44 = arith.constant 0 : index
    %c0_45 = arith.constant 0 : index
    %49 = vector.load %arg2[%c8, %c0_44, %c0_45] : memref<9x16x16xbf16, #tpu.memory_space<vmem>>, vector<1x16x16xbf16>
    %50 = vector.shape_cast %49 : vector<1x16x16xbf16> to vector<16x16xbf16>
    %cst_46 = arith.constant dense<0.000000e+00> : vector<80x16xf32>
    %51 = tpu.matmul %48, %50, %cst_46 {dimension_numbers = #tpu.dot_dimension_numbers<[1], [0], [0], [1], [0, 0, 1, 1], [], []>} : vector<80x16xbf16>, vector<16x16xbf16>, vector<80x16xf32> -> vector<80x16xf32>
    %52 = arith.addf %46, %51 : vector<80x16xf32>
    %c0_47 = arith.constant 0 : index
    %c0_48 = arith.constant 0 : index
    %53 = vector.load %arg3[%c0_47, %c0_48] : memref<1x16xf32, #tpu.memory_space<vmem>>, vector<1x16xf32>
    %54 = vector.broadcast %53 : vector<1x16xf32> to vector<80x16xf32>
    %55 = arith.addf %52, %54 : vector<80x16xf32>
    %cst_49 = arith.constant 0.000000e+00 : f32
    %56 = vector.broadcast %cst_49 : f32 to vector<80x16xf32>
    %57 = arith.maximumf %55, %56 : vector<80x16xf32>
    %58 = tpu.iota {dimensions = array<i32: 0>} : vector<80x16xi32>
    %c10_i32 = arith.constant 10 : i32
    %c0_i32 = arith.constant 0 : i32
    %59 = arith.cmpi eq, %c10_i32, %c0_i32 : i32
    %c1_i32 = arith.constant 1 : i32
    %60 = arith.select %59, %c1_i32, %c10_i32 : i32
    %61 = vector.broadcast %60 : i32 to vector<80x16xi32>
    %62 = arith.remsi %58, %61 : vector<80x16xi32>
    %c0_i32_50 = arith.constant 0 : i32
    %63 = vector.broadcast %c0_i32_50 : i32 to vector<80x16xi32>
    %64 = arith.cmpi ne, %62, %63 : vector<80x16xi32>
    %c0_i32_51 = arith.constant 0 : i32
    %65 = vector.broadcast %c0_i32_51 : i32 to vector<80x16xi32>
    %66 = arith.cmpi slt, %62, %65 : vector<80x16xi32>
    %c0_i32_52 = arith.constant 0 : i32
    %67 = arith.cmpi slt, %60, %c0_i32_52 : i32
    %68 = vector.broadcast %67 : i1 to vector<80x16xi1>
    %69 = vector.broadcast %68 : vector<80x16xi1> to vector<80x16xi1>
    %70 = arith.xori %66, %69 : vector<80x16xi1>
    %71 = arith.andi %70, %64 : vector<80x16xi1>
    %72 = vector.broadcast %60 : i32 to vector<80x16xi32>
    %73 = arith.addi %62, %72 : vector<80x16xi32>
    %74 = arith.select %71, %73, %62 : vector<80x16xi1>, vector<80x16xi32>
    %c8_i32 = arith.constant 8 : i32
    %75 = vector.broadcast %c8_i32 : i32 to vector<80x16xi32>
    %76 = arith.cmpi slt, %74, %75 : vector<80x16xi32>
    %c80_i32 = arith.constant 80 : i32
    %77 = vector.broadcast %c80_i32 : i32 to vector<80x16xi32>
    %78 = arith.cmpi slt, %58, %77 : vector<80x16xi32>
    %79 = arith.andi %76, %78 : vector<80x16xi1>
    %cst_53 = arith.constant 0.000000e+00 : f32
    %80 = vector.broadcast %cst_53 : f32 to vector<80x16xf32>
    %81 = arith.select %79, %57, %80 : vector<80x16xi1>, vector<80x16xf32>
    %cst_54 = arith.constant 0.000000e+00 : f32
    %82 = vector.broadcast %cst_54 : f32 to vector<112x16xf32>
    %c0_55 = arith.constant 0 : index
    %c0_56 = arith.constant 0 : index
    %83 = vector.load %arg7[%c0_55, %c0_56] : memref<112x16xf32, #tpu.memory_space<vmem>>, vector<112x16xf32>
    tpu.vector_store %arg7[%c0_55, %c0_56], %82 {strides = array<i32>} : memref<112x16xf32, #tpu.memory_space<vmem>>, vector<112x16xf32>,
    %c16 = arith.constant 16 : index
    %c0_57 = arith.constant 0 : index
    %84 = vector.load %arg7[%c16, %c0_57] : memref<112x16xf32, #tpu.memory_space<vmem>>, vector<80x16xf32>
    tpu.vector_store %arg7[%c16, %c0_57], %81 {strides = array<i32>} : memref<112x16xf32, #tpu.memory_space<vmem>>, vector<80x16xf32>,
    %c5_58 = arith.constant 5 : index
    %c0_59 = arith.constant 0 : index
    %85 = vector.load %arg7[%c5_58, %c0_59] : memref<112x16xf32, #tpu.memory_space<vmem>>, vector<80x16xf32>
    %86 = arith.truncf %85 : vector<80x16xf32> to vector<80x16xbf16>
    %c0_60 = arith.constant 0 : index
    %c0_61 = arith.constant 0 : index
    %c0_62 = arith.constant 0 : index
    %87 = vector.load %arg4[%c0_60, %c0_61, %c0_62] : memref<9x16x16xbf16, #tpu.memory_space<vmem>>, vector<1x16x16xbf16>
    %88 = vector.shape_cast %87 : vector<1x16x16xbf16> to vector<16x16xbf16>
    %cst_63 = arith.constant dense<0.000000e+00> : vector<80x16xf32>
    %89 = tpu.matmul %86, %88, %cst_63 {dimension_numbers = #tpu.dot_dimension_numbers<[1], [0], [0], [1], [0, 0, 1, 1], [], []>} : vector<80x16xbf16>, vector<16x16xbf16>, vector<80x16xf32> -> vector<80x16xf32>
    %c6_64 = arith.constant 6 : index
    %c0_65 = arith.constant 0 : index
    %90 = vector.load %arg7[%c6_64, %c0_65] : memref<112x16xf32, #tpu.memory_space<vmem>>, vector<80x16xf32>
    %91 = arith.truncf %90 : vector<80x16xf32> to vector<80x16xbf16>
    %c1_66 = arith.constant 1 : index
    %c0_67 = arith.constant 0 : index
    %c0_68 = arith.constant 0 : index
    %92 = vector.load %arg4[%c1_66, %c0_67, %c0_68] : memref<9x16x16xbf16, #tpu.memory_space<vmem>>, vector<1x16x16xbf16>
    %93 = vector.shape_cast %92 : vector<1x16x16xbf16> to vector<16x16xbf16>
    %cst_69 = arith.constant dense<0.000000e+00> : vector<80x16xf32>
    %94 = tpu.matmul %91, %93, %cst_69 {dimension_numbers = #tpu.dot_dimension_numbers<[1], [0], [0], [1], [0, 0, 1, 1], [], []>} : vector<80x16xbf16>, vector<16x16xbf16>, vector<80x16xf32> -> vector<80x16xf32>
    %95 = arith.addf %89, %94 : vector<80x16xf32>
    %c7_70 = arith.constant 7 : index
    %c0_71 = arith.constant 0 : index
    %96 = vector.load %arg7[%c7_70, %c0_71] : memref<112x16xf32, #tpu.memory_space<vmem>>, vector<80x16xf32>
    %97 = arith.truncf %96 : vector<80x16xf32> to vector<80x16xbf16>
    %c2_72 = arith.constant 2 : index
    %c0_73 = arith.constant 0 : index
    %c0_74 = arith.constant 0 : index
    %98 = vector.load %arg4[%c2_72, %c0_73, %c0_74] : memref<9x16x16xbf16, #tpu.memory_space<vmem>>, vector<1x16x16xbf16>
    %99 = vector.shape_cast %98 : vector<1x16x16xbf16> to vector<16x16xbf16>
    %cst_75 = arith.constant dense<0.000000e+00> : vector<80x16xf32>
    %100 = tpu.matmul %97, %99, %cst_75 {dimension_numbers = #tpu.dot_dimension_numbers<[1], [0], [0], [1], [0, 0, 1, 1], [], []>} : vector<80x16xbf16>, vector<16x16xbf16>, vector<80x16xf32> -> vector<80x16xf32>
    %101 = arith.addf %95, %100 : vector<80x16xf32>
    %c15 = arith.constant 15 : index
    %c0_76 = arith.constant 0 : index
    %102 = vector.load %arg7[%c15, %c0_76] : memref<112x16xf32, #tpu.memory_space<vmem>>, vector<80x16xf32>
    %103 = arith.truncf %102 : vector<80x16xf32> to vector<80x16xbf16>
    %c3_77 = arith.constant 3 : index
    %c0_78 = arith.constant 0 : index
    %c0_79 = arith.constant 0 : index
    %104 = vector.load %arg4[%c3_77, %c0_78, %c0_79] : memref<9x16x16xbf16, #tpu.memory_space<vmem>>, vector<1x16x16xbf16>
    %105 = vector.shape_cast %104 : vector<1x16x16xbf16> to vector<16x16xbf16>
    %cst_80 = arith.constant dense<0.000000e+00> : vector<80x16xf32>
    %106 = tpu.matmul %103, %105, %cst_80 {dimension_numbers = #tpu.dot_dimension_numbers<[1], [0], [0], [1], [0, 0, 1, 1], [], []>} : vector<80x16xbf16>, vector<16x16xbf16>, vector<80x16xf32> -> vector<80x16xf32>
    %107 = arith.addf %101, %106 : vector<80x16xf32>
    %c16_81 = arith.constant 16 : index
    %c0_82 = arith.constant 0 : index
    %108 = vector.load %arg7[%c16_81, %c0_82] : memref<112x16xf32, #tpu.memory_space<vmem>>, vector<80x16xf32>
    %109 = arith.truncf %108 : vector<80x16xf32> to vector<80x16xbf16>
    %c4_83 = arith.constant 4 : index
    %c0_84 = arith.constant 0 : index
    %c0_85 = arith.constant 0 : index
    %110 = vector.load %arg4[%c4_83, %c0_84, %c0_85] : memref<9x16x16xbf16, #tpu.memory_space<vmem>>, vector<1x16x16xbf16>
    %111 = vector.shape_cast %110 : vector<1x16x16xbf16> to vector<16x16xbf16>
    %cst_86 = arith.constant dense<0.000000e+00> : vector<80x16xf32>
    %112 = tpu.matmul %109, %111, %cst_86 {dimension_numbers = #tpu.dot_dimension_numbers<[1], [0], [0], [1], [0, 0, 1, 1], [], []>} : vector<80x16xbf16>, vector<16x16xbf16>, vector<80x16xf32> -> vector<80x16xf32>
    %113 = arith.addf %107, %112 : vector<80x16xf32>
    %c17 = arith.constant 17 : index
    %c0_87 = arith.constant 0 : index
    %114 = vector.load %arg7[%c17, %c0_87] : memref<112x16xf32, #tpu.memory_space<vmem>>, vector<80x16xf32>
    %115 = arith.truncf %114 : vector<80x16xf32> to vector<80x16xbf16>
    %c5_88 = arith.constant 5 : index
    %c0_89 = arith.constant 0 : index
    %c0_90 = arith.constant 0 : index
    %116 = vector.load %arg4[%c5_88, %c0_89, %c0_90] : memref<9x16x16xbf16, #tpu.memory_space<vmem>>, vector<1x16x16xbf16>
    %117 = vector.shape_cast %116 : vector<1x16x16xbf16> to vector<16x16xbf16>
    %cst_91 = arith.constant dense<0.000000e+00> : vector<80x16xf32>
    %118 = tpu.matmul %115, %117, %cst_91 {dimension_numbers = #tpu.dot_dimension_numbers<[1], [0], [0], [1], [0, 0, 1, 1], [], []>} : vector<80x16xbf16>, vector<16x16xbf16>, vector<80x16xf32> -> vector<80x16xf32>
    %119 = arith.addf %113, %118 : vector<80x16xf32>
    %c25 = arith.constant 25 : index
    %c0_92 = arith.constant 0 : index
    %120 = vector.load %arg7[%c25, %c0_92] : memref<112x16xf32, #tpu.memory_space<vmem>>, vector<80x16xf32>
    %121 = arith.truncf %120 : vector<80x16xf32> to vector<80x16xbf16>
    %c6_93 = arith.constant 6 : index
    %c0_94 = arith.constant 0 : index
    %c0_95 = arith.constant 0 : index
    %122 = vector.load %arg4[%c6_93, %c0_94, %c0_95] : memref<9x16x16xbf16, #tpu.memory_space<vmem>>, vector<1x16x16xbf16>
    %123 = vector.shape_cast %122 : vector<1x16x16xbf16> to vector<16x16xbf16>
    %cst_96 = arith.constant dense<0.000000e+00> : vector<80x16xf32>
    %124 = tpu.matmul %121, %123, %cst_96 {dimension_numbers = #tpu.dot_dimension_numbers<[1], [0], [0], [1], [0, 0, 1, 1], [], []>} : vector<80x16xbf16>, vector<16x16xbf16>, vector<80x16xf32> -> vector<80x16xf32>
    %125 = arith.addf %119, %124 : vector<80x16xf32>
    %c26 = arith.constant 26 : index
    %c0_97 = arith.constant 0 : index
    %126 = vector.load %arg7[%c26, %c0_97] : memref<112x16xf32, #tpu.memory_space<vmem>>, vector<80x16xf32>
    %127 = arith.truncf %126 : vector<80x16xf32> to vector<80x16xbf16>
    %c7_98 = arith.constant 7 : index
    %c0_99 = arith.constant 0 : index
    %c0_100 = arith.constant 0 : index
    %128 = vector.load %arg4[%c7_98, %c0_99, %c0_100] : memref<9x16x16xbf16, #tpu.memory_space<vmem>>, vector<1x16x16xbf16>
    %129 = vector.shape_cast %128 : vector<1x16x16xbf16> to vector<16x16xbf16>
    %cst_101 = arith.constant dense<0.000000e+00> : vector<80x16xf32>
    %130 = tpu.matmul %127, %129, %cst_101 {dimension_numbers = #tpu.dot_dimension_numbers<[1], [0], [0], [1], [0, 0, 1, 1], [], []>} : vector<80x16xbf16>, vector<16x16xbf16>, vector<80x16xf32> -> vector<80x16xf32>
    %131 = arith.addf %125, %130 : vector<80x16xf32>
    %c27 = arith.constant 27 : index
    %c0_102 = arith.constant 0 : index
    %132 = vector.load %arg7[%c27, %c0_102] : memref<112x16xf32, #tpu.memory_space<vmem>>, vector<80x16xf32>
    %133 = arith.truncf %132 : vector<80x16xf32> to vector<80x16xbf16>
    %c8_103 = arith.constant 8 : index
    %c0_104 = arith.constant 0 : index
    %c0_105 = arith.constant 0 : index
    %134 = vector.load %arg4[%c8_103, %c0_104, %c0_105] : memref<9x16x16xbf16, #tpu.memory_space<vmem>>, vector<1x16x16xbf16>
    %135 = vector.shape_cast %134 : vector<1x16x16xbf16> to vector<16x16xbf16>
    %cst_106 = arith.constant dense<0.000000e+00> : vector<80x16xf32>
    %136 = tpu.matmul %133, %135, %cst_106 {dimension_numbers = #tpu.dot_dimension_numbers<[1], [0], [0], [1], [0, 0, 1, 1], [], []>} : vector<80x16xbf16>, vector<16x16xbf16>, vector<80x16xf32> -> vector<80x16xf32>
    %137 = arith.addf %131, %136 : vector<80x16xf32>
    %c0_107 = arith.constant 0 : index
    %c0_108 = arith.constant 0 : index
    %138 = vector.load %arg5[%c0_107, %c0_108] : memref<1x16xf32, #tpu.memory_space<vmem>>, vector<1x16xf32>
    %139 = vector.broadcast %138 : vector<1x16xf32> to vector<80x16xf32>
    %140 = arith.addf %137, %139 : vector<80x16xf32>
    %c0_109 = arith.constant 0 : index
    %c11_110 = arith.constant 11 : index
    %c0_111 = arith.constant 0 : index
    %141 = vector.load %arg1[%c0_109, %c11_110, %c0_111] : memref<1x104x16xbf16, #tpu.memory_space<vmem>>, vector<1x80x16xbf16>
    %142 = vector.shape_cast %141 : vector<1x80x16xbf16> to vector<80x16xbf16>
    %143 = arith.extf %142 : vector<80x16xbf16> to vector<80x16xf32>
    %144 = arith.addf %140, %143 : vector<80x16xf32>
    %cst_112 = arith.constant 0.000000e+00 : f32
    %145 = vector.broadcast %cst_112 : f32 to vector<80x16xf32>
    %146 = arith.maximumf %144, %145 : vector<80x16xf32>
    %147 = arith.truncf %146 : vector<80x16xf32> to vector<80x16xbf16>
    %c0_113 = arith.constant 0 : index
    %c0_114 = arith.constant 0 : index
    %c0_115 = arith.constant 0 : index
    %148 = vector.load %arg6[%c0_113, %c0_114, %c0_115] : memref<1x80x16xbf16, #tpu.memory_space<vmem>>, vector<1x80x16xbf16>
    %149 = vector.shape_cast %148 : vector<1x80x16xbf16> to vector<80x16xbf16>
    %150 = vector.shape_cast %147 : vector<80x16xbf16> to vector<1x80x16xbf16>
    tpu.vector_store %arg6[%c0_113, %c0_114, %c0_115], %150 {strides = array<i32>} : memref<1x80x16xbf16, #tpu.memory_space<vmem>>, vector<1x80x16xbf16>,
    return
  }
  func.func @transform_0(%arg0: i32) -> (i32, i32, i32) {
    %c0_i32 = arith.constant 0 : i32
    %c0_i32_0 = arith.constant 0 : i32
    %c0_i32_1 = arith.constant 0 : i32
    return %arg0, %c0_i32, %c0_i32_0 : i32, i32, i32
  }
  func.func @transform_1(%arg0: i32) -> (i32, i32, i32) {
    %c0_i32 = arith.constant 0 : i32
    %c0_i32_0 = arith.constant 0 : i32
    %c0_i32_1 = arith.constant 0 : i32
    %c0_i32_2 = arith.constant 0 : i32
    return %c0_i32, %c0_i32_0, %c0_i32_1 : i32, i32, i32
  }
  func.func @transform_2(%arg0: i32) -> (i32, i32) {
    %c0_i32 = arith.constant 0 : i32
    %c0_i32_0 = arith.constant 0 : i32
    %c0_i32_1 = arith.constant 0 : i32
    return %c0_i32, %c0_i32_0 : i32, i32
  }
  func.func @transform_3(%arg0: i32) -> (i32, i32, i32) {
    %c0_i32 = arith.constant 0 : i32
    %c0_i32_0 = arith.constant 0 : i32
    %c0_i32_1 = arith.constant 0 : i32
    %c0_i32_2 = arith.constant 0 : i32
    return %c0_i32, %c0_i32_0, %c0_i32_1 : i32, i32, i32
  }
  func.func @transform_4(%arg0: i32) -> (i32, i32) {
    %c0_i32 = arith.constant 0 : i32
    %c0_i32_0 = arith.constant 0 : i32
    %c0_i32_1 = arith.constant 0 : i32
    return %c0_i32, %c0_i32_0 : i32, i32
  }
  func.func @transform_5(%arg0: i32) -> (i32, i32, i32) {
    %c0_i32 = arith.constant 0 : i32
    %c0_i32_0 = arith.constant 0 : i32
    %c0_i32_1 = arith.constant 0 : i32
    return %arg0, %c0_i32, %c0_i32_0 : i32, i32, i32
  }
}

module attributes {stable_mosaic.version = 11 : i64} {
  func.func @_block_kernel(%arg0: i32, %arg1: memref<1x128x16xbf16, #tpu.memory_space<vmem>>, %arg2: memref<9x16x16xbf16, #tpu.memory_space<vmem>>, %arg3: memref<1x16xf32, #tpu.memory_space<vmem>>, %arg4: memref<9x16x16xbf16, #tpu.memory_space<vmem>>, %arg5: memref<1x16xf32, #tpu.memory_space<vmem>>, %arg6: memref<16x16xbf16, #tpu.memory_space<vmem>>, %arg7: memref<1x16xf32, #tpu.memory_space<vmem>>, %arg8: memref<1x24x16xbf16, #tpu.memory_space<vmem>>, %arg9: memref<40x16xf32, #tpu.memory_space<vmem>>) attributes {dimension_semantics = [#tpu.dimension_semantics<parallel>], iteration_bounds = array<i64: 2>, scalar_prefetch = 0 : i64, scratch_operands = 1 : i64, tpu.core_type = #tpu.core_type<tc>, window_params = [{transform_indices = @transform_0, window_bounds = array<i64: 1, 128, 16>}, {pipeline_mode = #tpu.pipeline_mode<synchronous>, transform_indices = @transform_1, window_bounds = array<i64: 9, 16, 16>}, {pipeline_mode = #tpu.pipeline_mode<synchronous>, transform_indices = @transform_2, window_bounds = array<i64: 1, 16>}, {pipeline_mode = #tpu.pipeline_mode<synchronous>, transform_indices = @transform_3, window_bounds = array<i64: 9, 16, 16>}, {pipeline_mode = #tpu.pipeline_mode<synchronous>, transform_indices = @transform_4, window_bounds = array<i64: 1, 16>}, {pipeline_mode = #tpu.pipeline_mode<synchronous>, transform_indices = @transform_5, window_bounds = array<i64: 16, 16>}, {pipeline_mode = #tpu.pipeline_mode<synchronous>, transform_indices = @transform_6, window_bounds = array<i64: 1, 16>}, {transform_indices = @transform_7, window_bounds = array<i64: 1, 24, 16>}]} {
    %c0 = arith.constant 0 : index
    %c0_0 = arith.constant 0 : index
    %c0_1 = arith.constant 0 : index
    %0 = vector.load %arg1[%c0, %c0_0, %c0_1] : memref<1x128x16xbf16, #tpu.memory_space<vmem>>, vector<1x24x16xbf16>
    %1 = vector.shape_cast %0 : vector<1x24x16xbf16> to vector<24x16xbf16>
    %c0_2 = arith.constant 0 : index
    %c0_3 = arith.constant 0 : index
    %c0_4 = arith.constant 0 : index
    %2 = vector.load %arg2[%c0_2, %c0_3, %c0_4] : memref<9x16x16xbf16, #tpu.memory_space<vmem>>, vector<1x16x16xbf16>
    %3 = vector.shape_cast %2 : vector<1x16x16xbf16> to vector<16x16xbf16>
    %cst = arith.constant dense<0.000000e+00> : vector<24x16xf32>
    %4 = tpu.matmul %1, %3, %cst {dimension_numbers = #tpu.dot_dimension_numbers<[1], [0], [0], [1], [0, 0, 1, 1], [], []>} : vector<24x16xbf16>, vector<16x16xbf16>, vector<24x16xf32> -> vector<24x16xf32>
    %c0_5 = arith.constant 0 : index
    %c32 = arith.constant 32 : index
    %c0_6 = arith.constant 0 : index
    %5 = vector.load %arg1[%c0_5, %c32, %c0_6] : memref<1x128x16xbf16, #tpu.memory_space<vmem>>, vector<1x24x16xbf16>
    %6 = vector.shape_cast %5 : vector<1x24x16xbf16> to vector<24x16xbf16>
    %c1 = arith.constant 1 : index
    %c0_7 = arith.constant 0 : index
    %c0_8 = arith.constant 0 : index
    %7 = vector.load %arg2[%c1, %c0_7, %c0_8] : memref<9x16x16xbf16, #tpu.memory_space<vmem>>, vector<1x16x16xbf16>
    %8 = vector.shape_cast %7 : vector<1x16x16xbf16> to vector<16x16xbf16>
    %cst_9 = arith.constant dense<0.000000e+00> : vector<24x16xf32>
    %9 = tpu.matmul %6, %8, %cst_9 {dimension_numbers = #tpu.dot_dimension_numbers<[1], [0], [0], [1], [0, 0, 1, 1], [], []>} : vector<24x16xbf16>, vector<16x16xbf16>, vector<24x16xf32> -> vector<24x16xf32>
    %10 = arith.addf %4, %9 : vector<24x16xf32>
    %c0_10 = arith.constant 0 : index
    %c1_11 = arith.constant 1 : index
    %c0_12 = arith.constant 0 : index
    %11 = vector.load %arg1[%c0_10, %c1_11, %c0_12] : memref<1x128x16xbf16, #tpu.memory_space<vmem>>, vector<1x24x16xbf16>
    %12 = vector.shape_cast %11 : vector<1x24x16xbf16> to vector<24x16xbf16>
    %c2 = arith.constant 2 : index
    %c0_13 = arith.constant 0 : index
    %c0_14 = arith.constant 0 : index
    %13 = vector.load %arg2[%c2, %c0_13, %c0_14] : memref<9x16x16xbf16, #tpu.memory_space<vmem>>, vector<1x16x16xbf16>
    %14 = vector.shape_cast %13 : vector<1x16x16xbf16> to vector<16x16xbf16>
    %cst_15 = arith.constant dense<0.000000e+00> : vector<24x16xf32>
    %15 = tpu.matmul %12, %14, %cst_15 {dimension_numbers = #tpu.dot_dimension_numbers<[1], [0], [0], [1], [0, 0, 1, 1], [], []>} : vector<24x16xbf16>, vector<16x16xbf16>, vector<24x16xf32> -> vector<24x16xf32>
    %16 = arith.addf %10, %15 : vector<24x16xf32>
    %c0_16 = arith.constant 0 : index
    %c64 = arith.constant 64 : index
    %c0_17 = arith.constant 0 : index
    %17 = vector.load %arg1[%c0_16, %c64, %c0_17] : memref<1x128x16xbf16, #tpu.memory_space<vmem>>, vector<1x24x16xbf16>
    %18 = vector.shape_cast %17 : vector<1x24x16xbf16> to vector<24x16xbf16>
    %c3 = arith.constant 3 : index
    %c0_18 = arith.constant 0 : index
    %c0_19 = arith.constant 0 : index
    %19 = vector.load %arg2[%c3, %c0_18, %c0_19] : memref<9x16x16xbf16, #tpu.memory_space<vmem>>, vector<1x16x16xbf16>
    %20 = vector.shape_cast %19 : vector<1x16x16xbf16> to vector<16x16xbf16>
    %cst_20 = arith.constant dense<0.000000e+00> : vector<24x16xf32>
    %21 = tpu.matmul %18, %20, %cst_20 {dimension_numbers = #tpu.dot_dimension_numbers<[1], [0], [0], [1], [0, 0, 1, 1], [], []>} : vector<24x16xbf16>, vector<16x16xbf16>, vector<24x16xf32> -> vector<24x16xf32>
    %22 = arith.addf %16, %21 : vector<24x16xf32>
    %c0_21 = arith.constant 0 : index
    %c96 = arith.constant 96 : index
    %c0_22 = arith.constant 0 : index
    %23 = vector.load %arg1[%c0_21, %c96, %c0_22] : memref<1x128x16xbf16, #tpu.memory_space<vmem>>, vector<1x24x16xbf16>
    %24 = vector.shape_cast %23 : vector<1x24x16xbf16> to vector<24x16xbf16>
    %c4 = arith.constant 4 : index
    %c0_23 = arith.constant 0 : index
    %c0_24 = arith.constant 0 : index
    %25 = vector.load %arg2[%c4, %c0_23, %c0_24] : memref<9x16x16xbf16, #tpu.memory_space<vmem>>, vector<1x16x16xbf16>
    %26 = vector.shape_cast %25 : vector<1x16x16xbf16> to vector<16x16xbf16>
    %cst_25 = arith.constant dense<0.000000e+00> : vector<24x16xf32>
    %27 = tpu.matmul %24, %26, %cst_25 {dimension_numbers = #tpu.dot_dimension_numbers<[1], [0], [0], [1], [0, 0, 1, 1], [], []>} : vector<24x16xbf16>, vector<16x16xbf16>, vector<24x16xf32> -> vector<24x16xf32>
    %28 = arith.addf %22, %27 : vector<24x16xf32>
    %c0_26 = arith.constant 0 : index
    %c65 = arith.constant 65 : index
    %c0_27 = arith.constant 0 : index
    %29 = vector.load %arg1[%c0_26, %c65, %c0_27] : memref<1x128x16xbf16, #tpu.memory_space<vmem>>, vector<1x24x16xbf16>
    %30 = vector.shape_cast %29 : vector<1x24x16xbf16> to vector<24x16xbf16>
    %c5 = arith.constant 5 : index
    %c0_28 = arith.constant 0 : index
    %c0_29 = arith.constant 0 : index
    %31 = vector.load %arg2[%c5, %c0_28, %c0_29] : memref<9x16x16xbf16, #tpu.memory_space<vmem>>, vector<1x16x16xbf16>
    %32 = vector.shape_cast %31 : vector<1x16x16xbf16> to vector<16x16xbf16>
    %cst_30 = arith.constant dense<0.000000e+00> : vector<24x16xf32>
    %33 = tpu.matmul %30, %32, %cst_30 {dimension_numbers = #tpu.dot_dimension_numbers<[1], [0], [0], [1], [0, 0, 1, 1], [], []>} : vector<24x16xbf16>, vector<16x16xbf16>, vector<24x16xf32> -> vector<24x16xf32>
    %34 = arith.addf %28, %33 : vector<24x16xf32>
    %c0_31 = arith.constant 0 : index
    %c6 = arith.constant 6 : index
    %c0_32 = arith.constant 0 : index
    %35 = vector.load %arg1[%c0_31, %c6, %c0_32] : memref<1x128x16xbf16, #tpu.memory_space<vmem>>, vector<1x24x16xbf16>
    %36 = vector.shape_cast %35 : vector<1x24x16xbf16> to vector<24x16xbf16>
    %c6_33 = arith.constant 6 : index
    %c0_34 = arith.constant 0 : index
    %c0_35 = arith.constant 0 : index
    %37 = vector.load %arg2[%c6_33, %c0_34, %c0_35] : memref<9x16x16xbf16, #tpu.memory_space<vmem>>, vector<1x16x16xbf16>
    %38 = vector.shape_cast %37 : vector<1x16x16xbf16> to vector<16x16xbf16>
    %cst_36 = arith.constant dense<0.000000e+00> : vector<24x16xf32>
    %39 = tpu.matmul %36, %38, %cst_36 {dimension_numbers = #tpu.dot_dimension_numbers<[1], [0], [0], [1], [0, 0, 1, 1], [], []>} : vector<24x16xbf16>, vector<16x16xbf16>, vector<24x16xf32> -> vector<24x16xf32>
    %40 = arith.addf %34, %39 : vector<24x16xf32>
    %c0_37 = arith.constant 0 : index
    %c38 = arith.constant 38 : index
    %c0_38 = arith.constant 0 : index
    %41 = vector.load %arg1[%c0_37, %c38, %c0_38] : memref<1x128x16xbf16, #tpu.memory_space<vmem>>, vector<1x24x16xbf16>
    %42 = vector.shape_cast %41 : vector<1x24x16xbf16> to vector<24x16xbf16>
    %c7 = arith.constant 7 : index
    %c0_39 = arith.constant 0 : index
    %c0_40 = arith.constant 0 : index
    %43 = vector.load %arg2[%c7, %c0_39, %c0_40] : memref<9x16x16xbf16, #tpu.memory_space<vmem>>, vector<1x16x16xbf16>
    %44 = vector.shape_cast %43 : vector<1x16x16xbf16> to vector<16x16xbf16>
    %cst_41 = arith.constant dense<0.000000e+00> : vector<24x16xf32>
    %45 = tpu.matmul %42, %44, %cst_41 {dimension_numbers = #tpu.dot_dimension_numbers<[1], [0], [0], [1], [0, 0, 1, 1], [], []>} : vector<24x16xbf16>, vector<16x16xbf16>, vector<24x16xf32> -> vector<24x16xf32>
    %46 = arith.addf %40, %45 : vector<24x16xf32>
    %c0_42 = arith.constant 0 : index
    %c7_43 = arith.constant 7 : index
    %c0_44 = arith.constant 0 : index
    %47 = vector.load %arg1[%c0_42, %c7_43, %c0_44] : memref<1x128x16xbf16, #tpu.memory_space<vmem>>, vector<1x24x16xbf16>
    %48 = vector.shape_cast %47 : vector<1x24x16xbf16> to vector<24x16xbf16>
    %c8 = arith.constant 8 : index
    %c0_45 = arith.constant 0 : index
    %c0_46 = arith.constant 0 : index
    %49 = vector.load %arg2[%c8, %c0_45, %c0_46] : memref<9x16x16xbf16, #tpu.memory_space<vmem>>, vector<1x16x16xbf16>
    %50 = vector.shape_cast %49 : vector<1x16x16xbf16> to vector<16x16xbf16>
    %cst_47 = arith.constant dense<0.000000e+00> : vector<24x16xf32>
    %51 = tpu.matmul %48, %50, %cst_47 {dimension_numbers = #tpu.dot_dimension_numbers<[1], [0], [0], [1], [0, 0, 1, 1], [], []>} : vector<24x16xbf16>, vector<16x16xbf16>, vector<24x16xf32> -> vector<24x16xf32>
    %52 = arith.addf %46, %51 : vector<24x16xf32>
    %c0_48 = arith.constant 0 : index
    %c0_49 = arith.constant 0 : index
    %53 = vector.load %arg3[%c0_48, %c0_49] : memref<1x16xf32, #tpu.memory_space<vmem>>, vector<1x16xf32>
    %54 = vector.broadcast %53 : vector<1x16xf32> to vector<24x16xf32>
    %55 = arith.addf %52, %54 : vector<24x16xf32>
    %cst_50 = arith.constant 0.000000e+00 : f32
    %56 = vector.broadcast %cst_50 : f32 to vector<24x16xf32>
    %57 = arith.maximumf %55, %56 : vector<24x16xf32>
    %58 = tpu.iota {dimensions = array<i32: 0>} : vector<24x16xi32>
    %c6_i32 = arith.constant 6 : i32
    %c0_i32 = arith.constant 0 : i32
    %59 = arith.cmpi eq, %c6_i32, %c0_i32 : i32
    %c1_i32 = arith.constant 1 : i32
    %60 = arith.select %59, %c1_i32, %c6_i32 : i32
    %61 = vector.broadcast %60 : i32 to vector<24x16xi32>
    %62 = arith.remsi %58, %61 : vector<24x16xi32>
    %c0_i32_51 = arith.constant 0 : i32
    %63 = vector.broadcast %c0_i32_51 : i32 to vector<24x16xi32>
    %64 = arith.cmpi ne, %62, %63 : vector<24x16xi32>
    %c0_i32_52 = arith.constant 0 : i32
    %65 = vector.broadcast %c0_i32_52 : i32 to vector<24x16xi32>
    %66 = arith.cmpi slt, %62, %65 : vector<24x16xi32>
    %c0_i32_53 = arith.constant 0 : i32
    %67 = arith.cmpi slt, %60, %c0_i32_53 : i32
    %68 = vector.broadcast %67 : i1 to vector<24x16xi1>
    %69 = vector.broadcast %68 : vector<24x16xi1> to vector<24x16xi1>
    %70 = arith.xori %66, %69 : vector<24x16xi1>
    %71 = arith.andi %70, %64 : vector<24x16xi1>
    %72 = vector.broadcast %60 : i32 to vector<24x16xi32>
    %73 = arith.addi %62, %72 : vector<24x16xi32>
    %74 = arith.select %71, %73, %62 : vector<24x16xi1>, vector<24x16xi32>
    %c4_i32 = arith.constant 4 : i32
    %75 = vector.broadcast %c4_i32 : i32 to vector<24x16xi32>
    %76 = arith.cmpi slt, %74, %75 : vector<24x16xi32>
    %c24_i32 = arith.constant 24 : i32
    %77 = vector.broadcast %c24_i32 : i32 to vector<24x16xi32>
    %78 = arith.cmpi slt, %58, %77 : vector<24x16xi32>
    %79 = arith.andi %76, %78 : vector<24x16xi1>
    %cst_54 = arith.constant 0.000000e+00 : f32
    %80 = vector.broadcast %cst_54 : f32 to vector<24x16xf32>
    %81 = arith.select %79, %57, %80 : vector<24x16xi1>, vector<24x16xf32>
    %cst_55 = arith.constant 0.000000e+00 : f32
    %82 = vector.broadcast %cst_55 : f32 to vector<40x16xf32>
    %c0_56 = arith.constant 0 : index
    %c0_57 = arith.constant 0 : index
    %83 = vector.load %arg9[%c0_56, %c0_57] : memref<40x16xf32, #tpu.memory_space<vmem>>, vector<40x16xf32>
    tpu.vector_store %arg9[%c0_56, %c0_57], %82 {strides = array<i32>} : memref<40x16xf32, #tpu.memory_space<vmem>>, vector<40x16xf32>,
    %c8_58 = arith.constant 8 : index
    %c0_59 = arith.constant 0 : index
    %84 = vector.load %arg9[%c8_58, %c0_59] : memref<40x16xf32, #tpu.memory_space<vmem>>, vector<24x16xf32>
    tpu.vector_store %arg9[%c8_58, %c0_59], %81 {strides = array<i32>} : memref<40x16xf32, #tpu.memory_space<vmem>>, vector<24x16xf32>,
    %c1_60 = arith.constant 1 : index
    %c0_61 = arith.constant 0 : index
    %85 = vector.load %arg9[%c1_60, %c0_61] : memref<40x16xf32, #tpu.memory_space<vmem>>, vector<24x16xf32>
    %86 = arith.truncf %85 : vector<24x16xf32> to vector<24x16xbf16>
    %c0_62 = arith.constant 0 : index
    %c0_63 = arith.constant 0 : index
    %c0_64 = arith.constant 0 : index
    %87 = vector.load %arg4[%c0_62, %c0_63, %c0_64] : memref<9x16x16xbf16, #tpu.memory_space<vmem>>, vector<1x16x16xbf16>
    %88 = vector.shape_cast %87 : vector<1x16x16xbf16> to vector<16x16xbf16>
    %cst_65 = arith.constant dense<0.000000e+00> : vector<24x16xf32>
    %89 = tpu.matmul %86, %88, %cst_65 {dimension_numbers = #tpu.dot_dimension_numbers<[1], [0], [0], [1], [0, 0, 1, 1], [], []>} : vector<24x16xbf16>, vector<16x16xbf16>, vector<24x16xf32> -> vector<24x16xf32>
    %c2_66 = arith.constant 2 : index
    %c0_67 = arith.constant 0 : index
    %90 = vector.load %arg9[%c2_66, %c0_67] : memref<40x16xf32, #tpu.memory_space<vmem>>, vector<24x16xf32>
    %91 = arith.truncf %90 : vector<24x16xf32> to vector<24x16xbf16>
    %c1_68 = arith.constant 1 : index
    %c0_69 = arith.constant 0 : index
    %c0_70 = arith.constant 0 : index
    %92 = vector.load %arg4[%c1_68, %c0_69, %c0_70] : memref<9x16x16xbf16, #tpu.memory_space<vmem>>, vector<1x16x16xbf16>
    %93 = vector.shape_cast %92 : vector<1x16x16xbf16> to vector<16x16xbf16>
    %cst_71 = arith.constant dense<0.000000e+00> : vector<24x16xf32>
    %94 = tpu.matmul %91, %93, %cst_71 {dimension_numbers = #tpu.dot_dimension_numbers<[1], [0], [0], [1], [0, 0, 1, 1], [], []>} : vector<24x16xbf16>, vector<16x16xbf16>, vector<24x16xf32> -> vector<24x16xf32>
    %95 = arith.addf %89, %94 : vector<24x16xf32>
    %c3_72 = arith.constant 3 : index
    %c0_73 = arith.constant 0 : index
    %96 = vector.load %arg9[%c3_72, %c0_73] : memref<40x16xf32, #tpu.memory_space<vmem>>, vector<24x16xf32>
    %97 = arith.truncf %96 : vector<24x16xf32> to vector<24x16xbf16>
    %c2_74 = arith.constant 2 : index
    %c0_75 = arith.constant 0 : index
    %c0_76 = arith.constant 0 : index
    %98 = vector.load %arg4[%c2_74, %c0_75, %c0_76] : memref<9x16x16xbf16, #tpu.memory_space<vmem>>, vector<1x16x16xbf16>
    %99 = vector.shape_cast %98 : vector<1x16x16xbf16> to vector<16x16xbf16>
    %cst_77 = arith.constant dense<0.000000e+00> : vector<24x16xf32>
    %100 = tpu.matmul %97, %99, %cst_77 {dimension_numbers = #tpu.dot_dimension_numbers<[1], [0], [0], [1], [0, 0, 1, 1], [], []>} : vector<24x16xbf16>, vector<16x16xbf16>, vector<24x16xf32> -> vector<24x16xf32>
    %101 = arith.addf %95, %100 : vector<24x16xf32>
    %c7_78 = arith.constant 7 : index
    %c0_79 = arith.constant 0 : index
    %102 = vector.load %arg9[%c7_78, %c0_79] : memref<40x16xf32, #tpu.memory_space<vmem>>, vector<24x16xf32>
    %103 = arith.truncf %102 : vector<24x16xf32> to vector<24x16xbf16>
    %c3_80 = arith.constant 3 : index
    %c0_81 = arith.constant 0 : index
    %c0_82 = arith.constant 0 : index
    %104 = vector.load %arg4[%c3_80, %c0_81, %c0_82] : memref<9x16x16xbf16, #tpu.memory_space<vmem>>, vector<1x16x16xbf16>
    %105 = vector.shape_cast %104 : vector<1x16x16xbf16> to vector<16x16xbf16>
    %cst_83 = arith.constant dense<0.000000e+00> : vector<24x16xf32>
    %106 = tpu.matmul %103, %105, %cst_83 {dimension_numbers = #tpu.dot_dimension_numbers<[1], [0], [0], [1], [0, 0, 1, 1], [], []>} : vector<24x16xbf16>, vector<16x16xbf16>, vector<24x16xf32> -> vector<24x16xf32>
    %107 = arith.addf %101, %106 : vector<24x16xf32>
    %c8_84 = arith.constant 8 : index
    %c0_85 = arith.constant 0 : index
    %108 = vector.load %arg9[%c8_84, %c0_85] : memref<40x16xf32, #tpu.memory_space<vmem>>, vector<24x16xf32>
    %109 = arith.truncf %108 : vector<24x16xf32> to vector<24x16xbf16>
    %c4_86 = arith.constant 4 : index
    %c0_87 = arith.constant 0 : index
    %c0_88 = arith.constant 0 : index
    %110 = vector.load %arg4[%c4_86, %c0_87, %c0_88] : memref<9x16x16xbf16, #tpu.memory_space<vmem>>, vector<1x16x16xbf16>
    %111 = vector.shape_cast %110 : vector<1x16x16xbf16> to vector<16x16xbf16>
    %cst_89 = arith.constant dense<0.000000e+00> : vector<24x16xf32>
    %112 = tpu.matmul %109, %111, %cst_89 {dimension_numbers = #tpu.dot_dimension_numbers<[1], [0], [0], [1], [0, 0, 1, 1], [], []>} : vector<24x16xbf16>, vector<16x16xbf16>, vector<24x16xf32> -> vector<24x16xf32>
    %113 = arith.addf %107, %112 : vector<24x16xf32>
    %c9 = arith.constant 9 : index
    %c0_90 = arith.constant 0 : index
    %114 = vector.load %arg9[%c9, %c0_90] : memref<40x16xf32, #tpu.memory_space<vmem>>, vector<24x16xf32>
    %115 = arith.truncf %114 : vector<24x16xf32> to vector<24x16xbf16>
    %c5_91 = arith.constant 5 : index
    %c0_92 = arith.constant 0 : index
    %c0_93 = arith.constant 0 : index
    %116 = vector.load %arg4[%c5_91, %c0_92, %c0_93] : memref<9x16x16xbf16, #tpu.memory_space<vmem>>, vector<1x16x16xbf16>
    %117 = vector.shape_cast %116 : vector<1x16x16xbf16> to vector<16x16xbf16>
    %cst_94 = arith.constant dense<0.000000e+00> : vector<24x16xf32>
    %118 = tpu.matmul %115, %117, %cst_94 {dimension_numbers = #tpu.dot_dimension_numbers<[1], [0], [0], [1], [0, 0, 1, 1], [], []>} : vector<24x16xbf16>, vector<16x16xbf16>, vector<24x16xf32> -> vector<24x16xf32>
    %119 = arith.addf %113, %118 : vector<24x16xf32>
    %c13 = arith.constant 13 : index
    %c0_95 = arith.constant 0 : index
    %120 = vector.load %arg9[%c13, %c0_95] : memref<40x16xf32, #tpu.memory_space<vmem>>, vector<24x16xf32>
    %121 = arith.truncf %120 : vector<24x16xf32> to vector<24x16xbf16>
    %c6_96 = arith.constant 6 : index
    %c0_97 = arith.constant 0 : index
    %c0_98 = arith.constant 0 : index
    %122 = vector.load %arg4[%c6_96, %c0_97, %c0_98] : memref<9x16x16xbf16, #tpu.memory_space<vmem>>, vector<1x16x16xbf16>
    %123 = vector.shape_cast %122 : vector<1x16x16xbf16> to vector<16x16xbf16>
    %cst_99 = arith.constant dense<0.000000e+00> : vector<24x16xf32>
    %124 = tpu.matmul %121, %123, %cst_99 {dimension_numbers = #tpu.dot_dimension_numbers<[1], [0], [0], [1], [0, 0, 1, 1], [], []>} : vector<24x16xbf16>, vector<16x16xbf16>, vector<24x16xf32> -> vector<24x16xf32>
    %125 = arith.addf %119, %124 : vector<24x16xf32>
    %c14 = arith.constant 14 : index
    %c0_100 = arith.constant 0 : index
    %126 = vector.load %arg9[%c14, %c0_100] : memref<40x16xf32, #tpu.memory_space<vmem>>, vector<24x16xf32>
    %127 = arith.truncf %126 : vector<24x16xf32> to vector<24x16xbf16>
    %c7_101 = arith.constant 7 : index
    %c0_102 = arith.constant 0 : index
    %c0_103 = arith.constant 0 : index
    %128 = vector.load %arg4[%c7_101, %c0_102, %c0_103] : memref<9x16x16xbf16, #tpu.memory_space<vmem>>, vector<1x16x16xbf16>
    %129 = vector.shape_cast %128 : vector<1x16x16xbf16> to vector<16x16xbf16>
    %cst_104 = arith.constant dense<0.000000e+00> : vector<24x16xf32>
    %130 = tpu.matmul %127, %129, %cst_104 {dimension_numbers = #tpu.dot_dimension_numbers<[1], [0], [0], [1], [0, 0, 1, 1], [], []>} : vector<24x16xbf16>, vector<16x16xbf16>, vector<24x16xf32> -> vector<24x16xf32>
    %131 = arith.addf %125, %130 : vector<24x16xf32>
    %c15 = arith.constant 15 : index
    %c0_105 = arith.constant 0 : index
    %132 = vector.load %arg9[%c15, %c0_105] : memref<40x16xf32, #tpu.memory_space<vmem>>, vector<24x16xf32>
    %133 = arith.truncf %132 : vector<24x16xf32> to vector<24x16xbf16>
    %c8_106 = arith.constant 8 : index
    %c0_107 = arith.constant 0 : index
    %c0_108 = arith.constant 0 : index
    %134 = vector.load %arg4[%c8_106, %c0_107, %c0_108] : memref<9x16x16xbf16, #tpu.memory_space<vmem>>, vector<1x16x16xbf16>
    %135 = vector.shape_cast %134 : vector<1x16x16xbf16> to vector<16x16xbf16>
    %cst_109 = arith.constant dense<0.000000e+00> : vector<24x16xf32>
    %136 = tpu.matmul %133, %135, %cst_109 {dimension_numbers = #tpu.dot_dimension_numbers<[1], [0], [0], [1], [0, 0, 1, 1], [], []>} : vector<24x16xbf16>, vector<16x16xbf16>, vector<24x16xf32> -> vector<24x16xf32>
    %137 = arith.addf %131, %136 : vector<24x16xf32>
    %c0_110 = arith.constant 0 : index
    %c0_111 = arith.constant 0 : index
    %138 = vector.load %arg5[%c0_110, %c0_111] : memref<1x16xf32, #tpu.memory_space<vmem>>, vector<1x16xf32>
    %139 = vector.broadcast %138 : vector<1x16xf32> to vector<24x16xf32>
    %140 = arith.addf %137, %139 : vector<24x16xf32>
    %c0_112 = arith.constant 0 : index
    %c96_113 = arith.constant 96 : index
    %c0_114 = arith.constant 0 : index
    %141 = vector.load %arg1[%c0_112, %c96_113, %c0_114] : memref<1x128x16xbf16, #tpu.memory_space<vmem>>, vector<1x24x16xbf16>
    %142 = vector.shape_cast %141 : vector<1x24x16xbf16> to vector<24x16xbf16>
    %c0_115 = arith.constant 0 : index
    %c0_116 = arith.constant 0 : index
    %143 = vector.load %arg6[%c0_115, %c0_116] : memref<16x16xbf16, #tpu.memory_space<vmem>>, vector<16x16xbf16>
    %cst_117 = arith.constant dense<0.000000e+00> : vector<24x16xf32>
    %144 = tpu.matmul %142, %143, %cst_117 {dimension_numbers = #tpu.dot_dimension_numbers<[1], [0], [0], [1], [0, 0, 1, 1], [], []>} : vector<24x16xbf16>, vector<16x16xbf16>, vector<24x16xf32> -> vector<24x16xf32>
    %145 = arith.addf %140, %144 : vector<24x16xf32>
    %c0_118 = arith.constant 0 : index
    %c0_119 = arith.constant 0 : index
    %146 = vector.load %arg7[%c0_118, %c0_119] : memref<1x16xf32, #tpu.memory_space<vmem>>, vector<1x16xf32>
    %147 = vector.broadcast %146 : vector<1x16xf32> to vector<24x16xf32>
    %148 = arith.addf %145, %147 : vector<24x16xf32>
    %cst_120 = arith.constant 0.000000e+00 : f32
    %149 = vector.broadcast %cst_120 : f32 to vector<24x16xf32>
    %150 = arith.maximumf %148, %149 : vector<24x16xf32>
    %151 = arith.truncf %150 : vector<24x16xf32> to vector<24x16xbf16>
    %c0_121 = arith.constant 0 : index
    %c0_122 = arith.constant 0 : index
    %c0_123 = arith.constant 0 : index
    %152 = vector.load %arg8[%c0_121, %c0_122, %c0_123] : memref<1x24x16xbf16, #tpu.memory_space<vmem>>, vector<1x24x16xbf16>
    %153 = vector.shape_cast %152 : vector<1x24x16xbf16> to vector<24x16xbf16>
    %154 = vector.shape_cast %151 : vector<24x16xbf16> to vector<1x24x16xbf16>
    tpu.vector_store %arg8[%c0_121, %c0_122, %c0_123], %154 {strides = array<i32>} : memref<1x24x16xbf16, #tpu.memory_space<vmem>>, vector<1x24x16xbf16>,
    return
  }
  func.func @transform_0(%arg0: i32) -> (i32, i32, i32) {
    %c0_i32 = arith.constant 0 : i32
    %c0_i32_0 = arith.constant 0 : i32
    %c0_i32_1 = arith.constant 0 : i32
    return %arg0, %c0_i32, %c0_i32_0 : i32, i32, i32
  }
  func.func @transform_1(%arg0: i32) -> (i32, i32, i32) {
    %c0_i32 = arith.constant 0 : i32
    %c0_i32_0 = arith.constant 0 : i32
    %c0_i32_1 = arith.constant 0 : i32
    %c0_i32_2 = arith.constant 0 : i32
    return %c0_i32, %c0_i32_0, %c0_i32_1 : i32, i32, i32
  }
  func.func @transform_2(%arg0: i32) -> (i32, i32) {
    %c0_i32 = arith.constant 0 : i32
    %c0_i32_0 = arith.constant 0 : i32
    %c0_i32_1 = arith.constant 0 : i32
    return %c0_i32, %c0_i32_0 : i32, i32
  }
  func.func @transform_3(%arg0: i32) -> (i32, i32, i32) {
    %c0_i32 = arith.constant 0 : i32
    %c0_i32_0 = arith.constant 0 : i32
    %c0_i32_1 = arith.constant 0 : i32
    %c0_i32_2 = arith.constant 0 : i32
    return %c0_i32, %c0_i32_0, %c0_i32_1 : i32, i32, i32
  }
  func.func @transform_4(%arg0: i32) -> (i32, i32) {
    %c0_i32 = arith.constant 0 : i32
    %c0_i32_0 = arith.constant 0 : i32
    %c0_i32_1 = arith.constant 0 : i32
    return %c0_i32, %c0_i32_0 : i32, i32
  }
  func.func @transform_5(%arg0: i32) -> (i32, i32) {
    %c0_i32 = arith.constant 0 : i32
    %c0_i32_0 = arith.constant 0 : i32
    %c0_i32_1 = arith.constant 0 : i32
    return %c0_i32, %c0_i32_0 : i32, i32
  }
  func.func @transform_6(%arg0: i32) -> (i32, i32) {
    %c0_i32 = arith.constant 0 : i32
    %c0_i32_0 = arith.constant 0 : i32
    %c0_i32_1 = arith.constant 0 : i32
    return %c0_i32, %c0_i32_0 : i32, i32
  }
  func.func @transform_7(%arg0: i32) -> (i32, i32, i32) {
    %c0_i32 = arith.constant 0 : i32
    %c0_i32_0 = arith.constant 0 : i32
    %c0_i32_1 = arith.constant 0 : i32
    return %arg0, %c0_i32, %c0_i32_0 : i32, i32, i32
  }
}

module attributes {stable_mosaic.version = 11 : i64} {
  func.func @_block_kernel(%arg0: i32, %arg1: memref<1x64x16xbf16, #tpu.memory_space<vmem>>, %arg2: memref<9x16x32xbf16, #tpu.memory_space<vmem>>, %arg3: memref<1x32xf32, #tpu.memory_space<vmem>>, %arg4: memref<9x32x32xbf16, #tpu.memory_space<vmem>>, %arg5: memref<1x32xf32, #tpu.memory_space<vmem>>, %arg6: memref<16x32xbf16, #tpu.memory_space<vmem>>, %arg7: memref<1x32xf32, #tpu.memory_space<vmem>>, %arg8: memref<1x8x32xbf16, #tpu.memory_space<vmem>>, %arg9: memref<24x32xf32, #tpu.memory_space<vmem>>) attributes {dimension_semantics = [#tpu.dimension_semantics<parallel>], iteration_bounds = array<i64: 2>, scalar_prefetch = 0 : i64, scratch_operands = 1 : i64, tpu.core_type = #tpu.core_type<tc>, window_params = [{transform_indices = @transform_0, window_bounds = array<i64: 1, 64, 16>}, {pipeline_mode = #tpu.pipeline_mode<synchronous>, transform_indices = @transform_1, window_bounds = array<i64: 9, 16, 32>}, {pipeline_mode = #tpu.pipeline_mode<synchronous>, transform_indices = @transform_2, window_bounds = array<i64: 1, 32>}, {pipeline_mode = #tpu.pipeline_mode<synchronous>, transform_indices = @transform_3, window_bounds = array<i64: 9, 32, 32>}, {pipeline_mode = #tpu.pipeline_mode<synchronous>, transform_indices = @transform_4, window_bounds = array<i64: 1, 32>}, {pipeline_mode = #tpu.pipeline_mode<synchronous>, transform_indices = @transform_5, window_bounds = array<i64: 16, 32>}, {pipeline_mode = #tpu.pipeline_mode<synchronous>, transform_indices = @transform_6, window_bounds = array<i64: 1, 32>}, {transform_indices = @transform_7, window_bounds = array<i64: 1, 8, 32>}]} {
    %c0 = arith.constant 0 : index
    %c0_0 = arith.constant 0 : index
    %c0_1 = arith.constant 0 : index
    %0 = vector.load %arg1[%c0, %c0_0, %c0_1] : memref<1x64x16xbf16, #tpu.memory_space<vmem>>, vector<1x8x16xbf16>
    %1 = vector.shape_cast %0 : vector<1x8x16xbf16> to vector<8x16xbf16>
    %c0_2 = arith.constant 0 : index
    %c0_3 = arith.constant 0 : index
    %c0_4 = arith.constant 0 : index
    %2 = vector.load %arg2[%c0_2, %c0_3, %c0_4] : memref<9x16x32xbf16, #tpu.memory_space<vmem>>, vector<1x16x32xbf16>
    %3 = vector.shape_cast %2 : vector<1x16x32xbf16> to vector<16x32xbf16>
    %cst = arith.constant dense<0.000000e+00> : vector<8x32xf32>
    %4 = tpu.matmul %1, %3, %cst {dimension_numbers = #tpu.dot_dimension_numbers<[1], [0], [0], [1], [0, 0, 1, 1], [], []>} : vector<8x16xbf16>, vector<16x32xbf16>, vector<8x32xf32> -> vector<8x32xf32>
    %c0_5 = arith.constant 0 : index
    %c16 = arith.constant 16 : index
    %c0_6 = arith.constant 0 : index
    %5 = vector.load %arg1[%c0_5, %c16, %c0_6] : memref<1x64x16xbf16, #tpu.memory_space<vmem>>, vector<1x8x16xbf16>
    %6 = vector.shape_cast %5 : vector<1x8x16xbf16> to vector<8x16xbf16>
    %c1 = arith.constant 1 : index
    %c0_7 = arith.constant 0 : index
    %c0_8 = arith.constant 0 : index
    %7 = vector.load %arg2[%c1, %c0_7, %c0_8] : memref<9x16x32xbf16, #tpu.memory_space<vmem>>, vector<1x16x32xbf16>
    %8 = vector.shape_cast %7 : vector<1x16x32xbf16> to vector<16x32xbf16>
    %cst_9 = arith.constant dense<0.000000e+00> : vector<8x32xf32>
    %9 = tpu.matmul %6, %8, %cst_9 {dimension_numbers = #tpu.dot_dimension_numbers<[1], [0], [0], [1], [0, 0, 1, 1], [], []>} : vector<8x16xbf16>, vector<16x32xbf16>, vector<8x32xf32> -> vector<8x32xf32>
    %10 = arith.addf %4, %9 : vector<8x32xf32>
    %c0_10 = arith.constant 0 : index
    %c1_11 = arith.constant 1 : index
    %c0_12 = arith.constant 0 : index
    %11 = vector.load %arg1[%c0_10, %c1_11, %c0_12] : memref<1x64x16xbf16, #tpu.memory_space<vmem>>, vector<1x8x16xbf16>
    %12 = vector.shape_cast %11 : vector<1x8x16xbf16> to vector<8x16xbf16>
    %c2 = arith.constant 2 : index
    %c0_13 = arith.constant 0 : index
    %c0_14 = arith.constant 0 : index
    %13 = vector.load %arg2[%c2, %c0_13, %c0_14] : memref<9x16x32xbf16, #tpu.memory_space<vmem>>, vector<1x16x32xbf16>
    %14 = vector.shape_cast %13 : vector<1x16x32xbf16> to vector<16x32xbf16>
    %cst_15 = arith.constant dense<0.000000e+00> : vector<8x32xf32>
    %15 = tpu.matmul %12, %14, %cst_15 {dimension_numbers = #tpu.dot_dimension_numbers<[1], [0], [0], [1], [0, 0, 1, 1], [], []>} : vector<8x16xbf16>, vector<16x32xbf16>, vector<8x32xf32> -> vector<8x32xf32>
    %16 = arith.addf %10, %15 : vector<8x32xf32>
    %c0_16 = arith.constant 0 : index
    %c32 = arith.constant 32 : index
    %c0_17 = arith.constant 0 : index
    %17 = vector.load %arg1[%c0_16, %c32, %c0_17] : memref<1x64x16xbf16, #tpu.memory_space<vmem>>, vector<1x8x16xbf16>
    %18 = vector.shape_cast %17 : vector<1x8x16xbf16> to vector<8x16xbf16>
    %c3 = arith.constant 3 : index
    %c0_18 = arith.constant 0 : index
    %c0_19 = arith.constant 0 : index
    %19 = vector.load %arg2[%c3, %c0_18, %c0_19] : memref<9x16x32xbf16, #tpu.memory_space<vmem>>, vector<1x16x32xbf16>
    %20 = vector.shape_cast %19 : vector<1x16x32xbf16> to vector<16x32xbf16>
    %cst_20 = arith.constant dense<0.000000e+00> : vector<8x32xf32>
    %21 = tpu.matmul %18, %20, %cst_20 {dimension_numbers = #tpu.dot_dimension_numbers<[1], [0], [0], [1], [0, 0, 1, 1], [], []>} : vector<8x16xbf16>, vector<16x32xbf16>, vector<8x32xf32> -> vector<8x32xf32>
    %22 = arith.addf %16, %21 : vector<8x32xf32>
    %c0_21 = arith.constant 0 : index
    %c48 = arith.constant 48 : index
    %c0_22 = arith.constant 0 : index
    %23 = vector.load %arg1[%c0_21, %c48, %c0_22] : memref<1x64x16xbf16, #tpu.memory_space<vmem>>, vector<1x8x16xbf16>
    %24 = vector.shape_cast %23 : vector<1x8x16xbf16> to vector<8x16xbf16>
    %c4 = arith.constant 4 : index
    %c0_23 = arith.constant 0 : index
    %c0_24 = arith.constant 0 : index
    %25 = vector.load %arg2[%c4, %c0_23, %c0_24] : memref<9x16x32xbf16, #tpu.memory_space<vmem>>, vector<1x16x32xbf16>
    %26 = vector.shape_cast %25 : vector<1x16x32xbf16> to vector<16x32xbf16>
    %cst_25 = arith.constant dense<0.000000e+00> : vector<8x32xf32>
    %27 = tpu.matmul %24, %26, %cst_25 {dimension_numbers = #tpu.dot_dimension_numbers<[1], [0], [0], [1], [0, 0, 1, 1], [], []>} : vector<8x16xbf16>, vector<16x32xbf16>, vector<8x32xf32> -> vector<8x32xf32>
    %28 = arith.addf %22, %27 : vector<8x32xf32>
    %c0_26 = arith.constant 0 : index
    %c33 = arith.constant 33 : index
    %c0_27 = arith.constant 0 : index
    %29 = vector.load %arg1[%c0_26, %c33, %c0_27] : memref<1x64x16xbf16, #tpu.memory_space<vmem>>, vector<1x8x16xbf16>
    %30 = vector.shape_cast %29 : vector<1x8x16xbf16> to vector<8x16xbf16>
    %c5 = arith.constant 5 : index
    %c0_28 = arith.constant 0 : index
    %c0_29 = arith.constant 0 : index
    %31 = vector.load %arg2[%c5, %c0_28, %c0_29] : memref<9x16x32xbf16, #tpu.memory_space<vmem>>, vector<1x16x32xbf16>
    %32 = vector.shape_cast %31 : vector<1x16x32xbf16> to vector<16x32xbf16>
    %cst_30 = arith.constant dense<0.000000e+00> : vector<8x32xf32>
    %33 = tpu.matmul %30, %32, %cst_30 {dimension_numbers = #tpu.dot_dimension_numbers<[1], [0], [0], [1], [0, 0, 1, 1], [], []>} : vector<8x16xbf16>, vector<16x32xbf16>, vector<8x32xf32> -> vector<8x32xf32>
    %34 = arith.addf %28, %33 : vector<8x32xf32>
    %c0_31 = arith.constant 0 : index
    %c4_32 = arith.constant 4 : index
    %c0_33 = arith.constant 0 : index
    %35 = vector.load %arg1[%c0_31, %c4_32, %c0_33] : memref<1x64x16xbf16, #tpu.memory_space<vmem>>, vector<1x8x16xbf16>
    %36 = vector.shape_cast %35 : vector<1x8x16xbf16> to vector<8x16xbf16>
    %c6 = arith.constant 6 : index
    %c0_34 = arith.constant 0 : index
    %c0_35 = arith.constant 0 : index
    %37 = vector.load %arg2[%c6, %c0_34, %c0_35] : memref<9x16x32xbf16, #tpu.memory_space<vmem>>, vector<1x16x32xbf16>
    %38 = vector.shape_cast %37 : vector<1x16x32xbf16> to vector<16x32xbf16>
    %cst_36 = arith.constant dense<0.000000e+00> : vector<8x32xf32>
    %39 = tpu.matmul %36, %38, %cst_36 {dimension_numbers = #tpu.dot_dimension_numbers<[1], [0], [0], [1], [0, 0, 1, 1], [], []>} : vector<8x16xbf16>, vector<16x32xbf16>, vector<8x32xf32> -> vector<8x32xf32>
    %40 = arith.addf %34, %39 : vector<8x32xf32>
    %c0_37 = arith.constant 0 : index
    %c20 = arith.constant 20 : index
    %c0_38 = arith.constant 0 : index
    %41 = vector.load %arg1[%c0_37, %c20, %c0_38] : memref<1x64x16xbf16, #tpu.memory_space<vmem>>, vector<1x8x16xbf16>
    %42 = vector.shape_cast %41 : vector<1x8x16xbf16> to vector<8x16xbf16>
    %c7 = arith.constant 7 : index
    %c0_39 = arith.constant 0 : index
    %c0_40 = arith.constant 0 : index
    %43 = vector.load %arg2[%c7, %c0_39, %c0_40] : memref<9x16x32xbf16, #tpu.memory_space<vmem>>, vector<1x16x32xbf16>
    %44 = vector.shape_cast %43 : vector<1x16x32xbf16> to vector<16x32xbf16>
    %cst_41 = arith.constant dense<0.000000e+00> : vector<8x32xf32>
    %45 = tpu.matmul %42, %44, %cst_41 {dimension_numbers = #tpu.dot_dimension_numbers<[1], [0], [0], [1], [0, 0, 1, 1], [], []>} : vector<8x16xbf16>, vector<16x32xbf16>, vector<8x32xf32> -> vector<8x32xf32>
    %46 = arith.addf %40, %45 : vector<8x32xf32>
    %c0_42 = arith.constant 0 : index
    %c5_43 = arith.constant 5 : index
    %c0_44 = arith.constant 0 : index
    %47 = vector.load %arg1[%c0_42, %c5_43, %c0_44] : memref<1x64x16xbf16, #tpu.memory_space<vmem>>, vector<1x8x16xbf16>
    %48 = vector.shape_cast %47 : vector<1x8x16xbf16> to vector<8x16xbf16>
    %c8 = arith.constant 8 : index
    %c0_45 = arith.constant 0 : index
    %c0_46 = arith.constant 0 : index
    %49 = vector.load %arg2[%c8, %c0_45, %c0_46] : memref<9x16x32xbf16, #tpu.memory_space<vmem>>, vector<1x16x32xbf16>
    %50 = vector.shape_cast %49 : vector<1x16x32xbf16> to vector<16x32xbf16>
    %cst_47 = arith.constant dense<0.000000e+00> : vector<8x32xf32>
    %51 = tpu.matmul %48, %50, %cst_47 {dimension_numbers = #tpu.dot_dimension_numbers<[1], [0], [0], [1], [0, 0, 1, 1], [], []>} : vector<8x16xbf16>, vector<16x32xbf16>, vector<8x32xf32> -> vector<8x32xf32>
    %52 = arith.addf %46, %51 : vector<8x32xf32>
    %c0_48 = arith.constant 0 : index
    %c0_49 = arith.constant 0 : index
    %53 = vector.load %arg3[%c0_48, %c0_49] : memref<1x32xf32, #tpu.memory_space<vmem>>, vector<1x32xf32>
    %54 = vector.broadcast %53 : vector<1x32xf32> to vector<8x32xf32>
    %55 = arith.addf %52, %54 : vector<8x32xf32>
    %cst_50 = arith.constant 0.000000e+00 : f32
    %56 = vector.broadcast %cst_50 : f32 to vector<8x32xf32>
    %57 = arith.maximumf %55, %56 : vector<8x32xf32>
    %58 = tpu.iota {dimensions = array<i32: 0>} : vector<8x32xi32>
    %c4_i32 = arith.constant 4 : i32
    %c0_i32 = arith.constant 0 : i32
    %59 = arith.cmpi eq, %c4_i32, %c0_i32 : i32
    %c1_i32 = arith.constant 1 : i32
    %60 = arith.select %59, %c1_i32, %c4_i32 : i32
    %61 = vector.broadcast %60 : i32 to vector<8x32xi32>
    %62 = arith.remsi %58, %61 : vector<8x32xi32>
    %c0_i32_51 = arith.constant 0 : i32
    %63 = vector.broadcast %c0_i32_51 : i32 to vector<8x32xi32>
    %64 = arith.cmpi ne, %62, %63 : vector<8x32xi32>
    %c0_i32_52 = arith.constant 0 : i32
    %65 = vector.broadcast %c0_i32_52 : i32 to vector<8x32xi32>
    %66 = arith.cmpi slt, %62, %65 : vector<8x32xi32>
    %c0_i32_53 = arith.constant 0 : i32
    %67 = arith.cmpi slt, %60, %c0_i32_53 : i32
    %68 = vector.broadcast %67 : i1 to vector<8x32xi1>
    %69 = vector.broadcast %68 : vector<8x32xi1> to vector<8x32xi1>
    %70 = arith.xori %66, %69 : vector<8x32xi1>
    %71 = arith.andi %70, %64 : vector<8x32xi1>
    %72 = vector.broadcast %60 : i32 to vector<8x32xi32>
    %73 = arith.addi %62, %72 : vector<8x32xi32>
    %74 = arith.select %71, %73, %62 : vector<8x32xi1>, vector<8x32xi32>
    %c2_i32 = arith.constant 2 : i32
    %75 = vector.broadcast %c2_i32 : i32 to vector<8x32xi32>
    %76 = arith.cmpi slt, %74, %75 : vector<8x32xi32>
    %c8_i32 = arith.constant 8 : i32
    %77 = vector.broadcast %c8_i32 : i32 to vector<8x32xi32>
    %78 = arith.cmpi slt, %58, %77 : vector<8x32xi32>
    %79 = arith.andi %76, %78 : vector<8x32xi1>
    %cst_54 = arith.constant 0.000000e+00 : f32
    %80 = vector.broadcast %cst_54 : f32 to vector<8x32xf32>
    %81 = arith.select %79, %57, %80 : vector<8x32xi1>, vector<8x32xf32>
    %cst_55 = arith.constant 0.000000e+00 : f32
    %82 = vector.broadcast %cst_55 : f32 to vector<24x32xf32>
    %c0_56 = arith.constant 0 : index
    %c0_57 = arith.constant 0 : index
    %83 = vector.load %arg9[%c0_56, %c0_57] : memref<24x32xf32, #tpu.memory_space<vmem>>, vector<24x32xf32>
    tpu.vector_store %arg9[%c0_56, %c0_57], %82 {strides = array<i32>} : memref<24x32xf32, #tpu.memory_space<vmem>>, vector<24x32xf32>,
    %c8_58 = arith.constant 8 : index
    %c0_59 = arith.constant 0 : index
    %84 = vector.load %arg9[%c8_58, %c0_59] : memref<24x32xf32, #tpu.memory_space<vmem>>, vector<8x32xf32>
    tpu.vector_store %arg9[%c8_58, %c0_59], %81 {strides = array<i32>} : memref<24x32xf32, #tpu.memory_space<vmem>>, vector<8x32xf32>,
    %c3_60 = arith.constant 3 : index
    %c0_61 = arith.constant 0 : index
    %85 = vector.load %arg9[%c3_60, %c0_61] : memref<24x32xf32, #tpu.memory_space<vmem>>, vector<8x32xf32>
    %86 = arith.truncf %85 : vector<8x32xf32> to vector<8x32xbf16>
    %c0_62 = arith.constant 0 : index
    %c0_63 = arith.constant 0 : index
    %c0_64 = arith.constant 0 : index
    %87 = vector.load %arg4[%c0_62, %c0_63, %c0_64] : memref<9x32x32xbf16, #tpu.memory_space<vmem>>, vector<1x32x32xbf16>
    %88 = vector.shape_cast %87 : vector<1x32x32xbf16> to vector<32x32xbf16>
    %cst_65 = arith.constant dense<0.000000e+00> : vector<8x32xf32>
    %89 = tpu.matmul %86, %88, %cst_65 {dimension_numbers = #tpu.dot_dimension_numbers<[1], [0], [0], [1], [0, 0, 1, 1], [], []>} : vector<8x32xbf16>, vector<32x32xbf16>, vector<8x32xf32> -> vector<8x32xf32>
    %c4_66 = arith.constant 4 : index
    %c0_67 = arith.constant 0 : index
    %90 = vector.load %arg9[%c4_66, %c0_67] : memref<24x32xf32, #tpu.memory_space<vmem>>, vector<8x32xf32>
    %91 = arith.truncf %90 : vector<8x32xf32> to vector<8x32xbf16>
    %c1_68 = arith.constant 1 : index
    %c0_69 = arith.constant 0 : index
    %c0_70 = arith.constant 0 : index
    %92 = vector.load %arg4[%c1_68, %c0_69, %c0_70] : memref<9x32x32xbf16, #tpu.memory_space<vmem>>, vector<1x32x32xbf16>
    %93 = vector.shape_cast %92 : vector<1x32x32xbf16> to vector<32x32xbf16>
    %cst_71 = arith.constant dense<0.000000e+00> : vector<8x32xf32>
    %94 = tpu.matmul %91, %93, %cst_71 {dimension_numbers = #tpu.dot_dimension_numbers<[1], [0], [0], [1], [0, 0, 1, 1], [], []>} : vector<8x32xbf16>, vector<32x32xbf16>, vector<8x32xf32> -> vector<8x32xf32>
    %95 = arith.addf %89, %94 : vector<8x32xf32>
    %c5_72 = arith.constant 5 : index
    %c0_73 = arith.constant 0 : index
    %96 = vector.load %arg9[%c5_72, %c0_73] : memref<24x32xf32, #tpu.memory_space<vmem>>, vector<8x32xf32>
    %97 = arith.truncf %96 : vector<8x32xf32> to vector<8x32xbf16>
    %c2_74 = arith.constant 2 : index
    %c0_75 = arith.constant 0 : index
    %c0_76 = arith.constant 0 : index
    %98 = vector.load %arg4[%c2_74, %c0_75, %c0_76] : memref<9x32x32xbf16, #tpu.memory_space<vmem>>, vector<1x32x32xbf16>
    %99 = vector.shape_cast %98 : vector<1x32x32xbf16> to vector<32x32xbf16>
    %cst_77 = arith.constant dense<0.000000e+00> : vector<8x32xf32>
    %100 = tpu.matmul %97, %99, %cst_77 {dimension_numbers = #tpu.dot_dimension_numbers<[1], [0], [0], [1], [0, 0, 1, 1], [], []>} : vector<8x32xbf16>, vector<32x32xbf16>, vector<8x32xf32> -> vector<8x32xf32>
    %101 = arith.addf %95, %100 : vector<8x32xf32>
    %c7_78 = arith.constant 7 : index
    %c0_79 = arith.constant 0 : index
    %102 = vector.load %arg9[%c7_78, %c0_79] : memref<24x32xf32, #tpu.memory_space<vmem>>, vector<8x32xf32>
    %103 = arith.truncf %102 : vector<8x32xf32> to vector<8x32xbf16>
    %c3_80 = arith.constant 3 : index
    %c0_81 = arith.constant 0 : index
    %c0_82 = arith.constant 0 : index
    %104 = vector.load %arg4[%c3_80, %c0_81, %c0_82] : memref<9x32x32xbf16, #tpu.memory_space<vmem>>, vector<1x32x32xbf16>
    %105 = vector.shape_cast %104 : vector<1x32x32xbf16> to vector<32x32xbf16>
    %cst_83 = arith.constant dense<0.000000e+00> : vector<8x32xf32>
    %106 = tpu.matmul %103, %105, %cst_83 {dimension_numbers = #tpu.dot_dimension_numbers<[1], [0], [0], [1], [0, 0, 1, 1], [], []>} : vector<8x32xbf16>, vector<32x32xbf16>, vector<8x32xf32> -> vector<8x32xf32>
    %107 = arith.addf %101, %106 : vector<8x32xf32>
    %c8_84 = arith.constant 8 : index
    %c0_85 = arith.constant 0 : index
    %108 = vector.load %arg9[%c8_84, %c0_85] : memref<24x32xf32, #tpu.memory_space<vmem>>, vector<8x32xf32>
    %109 = arith.truncf %108 : vector<8x32xf32> to vector<8x32xbf16>
    %c4_86 = arith.constant 4 : index
    %c0_87 = arith.constant 0 : index
    %c0_88 = arith.constant 0 : index
    %110 = vector.load %arg4[%c4_86, %c0_87, %c0_88] : memref<9x32x32xbf16, #tpu.memory_space<vmem>>, vector<1x32x32xbf16>
    %111 = vector.shape_cast %110 : vector<1x32x32xbf16> to vector<32x32xbf16>
    %cst_89 = arith.constant dense<0.000000e+00> : vector<8x32xf32>
    %112 = tpu.matmul %109, %111, %cst_89 {dimension_numbers = #tpu.dot_dimension_numbers<[1], [0], [0], [1], [0, 0, 1, 1], [], []>} : vector<8x32xbf16>, vector<32x32xbf16>, vector<8x32xf32> -> vector<8x32xf32>
    %113 = arith.addf %107, %112 : vector<8x32xf32>
    %c9 = arith.constant 9 : index
    %c0_90 = arith.constant 0 : index
    %114 = vector.load %arg9[%c9, %c0_90] : memref<24x32xf32, #tpu.memory_space<vmem>>, vector<8x32xf32>
    %115 = arith.truncf %114 : vector<8x32xf32> to vector<8x32xbf16>
    %c5_91 = arith.constant 5 : index
    %c0_92 = arith.constant 0 : index
    %c0_93 = arith.constant 0 : index
    %116 = vector.load %arg4[%c5_91, %c0_92, %c0_93] : memref<9x32x32xbf16, #tpu.memory_space<vmem>>, vector<1x32x32xbf16>
    %117 = vector.shape_cast %116 : vector<1x32x32xbf16> to vector<32x32xbf16>
    %cst_94 = arith.constant dense<0.000000e+00> : vector<8x32xf32>
    %118 = tpu.matmul %115, %117, %cst_94 {dimension_numbers = #tpu.dot_dimension_numbers<[1], [0], [0], [1], [0, 0, 1, 1], [], []>} : vector<8x32xbf16>, vector<32x32xbf16>, vector<8x32xf32> -> vector<8x32xf32>
    %119 = arith.addf %113, %118 : vector<8x32xf32>
    %c11 = arith.constant 11 : index
    %c0_95 = arith.constant 0 : index
    %120 = vector.load %arg9[%c11, %c0_95] : memref<24x32xf32, #tpu.memory_space<vmem>>, vector<8x32xf32>
    %121 = arith.truncf %120 : vector<8x32xf32> to vector<8x32xbf16>
    %c6_96 = arith.constant 6 : index
    %c0_97 = arith.constant 0 : index
    %c0_98 = arith.constant 0 : index
    %122 = vector.load %arg4[%c6_96, %c0_97, %c0_98] : memref<9x32x32xbf16, #tpu.memory_space<vmem>>, vector<1x32x32xbf16>
    %123 = vector.shape_cast %122 : vector<1x32x32xbf16> to vector<32x32xbf16>
    %cst_99 = arith.constant dense<0.000000e+00> : vector<8x32xf32>
    %124 = tpu.matmul %121, %123, %cst_99 {dimension_numbers = #tpu.dot_dimension_numbers<[1], [0], [0], [1], [0, 0, 1, 1], [], []>} : vector<8x32xbf16>, vector<32x32xbf16>, vector<8x32xf32> -> vector<8x32xf32>
    %125 = arith.addf %119, %124 : vector<8x32xf32>
    %c12 = arith.constant 12 : index
    %c0_100 = arith.constant 0 : index
    %126 = vector.load %arg9[%c12, %c0_100] : memref<24x32xf32, #tpu.memory_space<vmem>>, vector<8x32xf32>
    %127 = arith.truncf %126 : vector<8x32xf32> to vector<8x32xbf16>
    %c7_101 = arith.constant 7 : index
    %c0_102 = arith.constant 0 : index
    %c0_103 = arith.constant 0 : index
    %128 = vector.load %arg4[%c7_101, %c0_102, %c0_103] : memref<9x32x32xbf16, #tpu.memory_space<vmem>>, vector<1x32x32xbf16>
    %129 = vector.shape_cast %128 : vector<1x32x32xbf16> to vector<32x32xbf16>
    %cst_104 = arith.constant dense<0.000000e+00> : vector<8x32xf32>
    %130 = tpu.matmul %127, %129, %cst_104 {dimension_numbers = #tpu.dot_dimension_numbers<[1], [0], [0], [1], [0, 0, 1, 1], [], []>} : vector<8x32xbf16>, vector<32x32xbf16>, vector<8x32xf32> -> vector<8x32xf32>
    %131 = arith.addf %125, %130 : vector<8x32xf32>
    %c13 = arith.constant 13 : index
    %c0_105 = arith.constant 0 : index
    %132 = vector.load %arg9[%c13, %c0_105] : memref<24x32xf32, #tpu.memory_space<vmem>>, vector<8x32xf32>
    %133 = arith.truncf %132 : vector<8x32xf32> to vector<8x32xbf16>
    %c8_106 = arith.constant 8 : index
    %c0_107 = arith.constant 0 : index
    %c0_108 = arith.constant 0 : index
    %134 = vector.load %arg4[%c8_106, %c0_107, %c0_108] : memref<9x32x32xbf16, #tpu.memory_space<vmem>>, vector<1x32x32xbf16>
    %135 = vector.shape_cast %134 : vector<1x32x32xbf16> to vector<32x32xbf16>
    %cst_109 = arith.constant dense<0.000000e+00> : vector<8x32xf32>
    %136 = tpu.matmul %133, %135, %cst_109 {dimension_numbers = #tpu.dot_dimension_numbers<[1], [0], [0], [1], [0, 0, 1, 1], [], []>} : vector<8x32xbf16>, vector<32x32xbf16>, vector<8x32xf32> -> vector<8x32xf32>
    %137 = arith.addf %131, %136 : vector<8x32xf32>
    %c0_110 = arith.constant 0 : index
    %c0_111 = arith.constant 0 : index
    %138 = vector.load %arg5[%c0_110, %c0_111] : memref<1x32xf32, #tpu.memory_space<vmem>>, vector<1x32xf32>
    %139 = vector.broadcast %138 : vector<1x32xf32> to vector<8x32xf32>
    %140 = arith.addf %137, %139 : vector<8x32xf32>
    %c0_112 = arith.constant 0 : index
    %c48_113 = arith.constant 48 : index
    %c0_114 = arith.constant 0 : index
    %141 = vector.load %arg1[%c0_112, %c48_113, %c0_114] : memref<1x64x16xbf16, #tpu.memory_space<vmem>>, vector<1x8x16xbf16>
    %142 = vector.shape_cast %141 : vector<1x8x16xbf16> to vector<8x16xbf16>
    %c0_115 = arith.constant 0 : index
    %c0_116 = arith.constant 0 : index
    %143 = vector.load %arg6[%c0_115, %c0_116] : memref<16x32xbf16, #tpu.memory_space<vmem>>, vector<16x32xbf16>
    %cst_117 = arith.constant dense<0.000000e+00> : vector<8x32xf32>
    %144 = tpu.matmul %142, %143, %cst_117 {dimension_numbers = #tpu.dot_dimension_numbers<[1], [0], [0], [1], [0, 0, 1, 1], [], []>} : vector<8x16xbf16>, vector<16x32xbf16>, vector<8x32xf32> -> vector<8x32xf32>
    %145 = arith.addf %140, %144 : vector<8x32xf32>
    %c0_118 = arith.constant 0 : index
    %c0_119 = arith.constant 0 : index
    %146 = vector.load %arg7[%c0_118, %c0_119] : memref<1x32xf32, #tpu.memory_space<vmem>>, vector<1x32xf32>
    %147 = vector.broadcast %146 : vector<1x32xf32> to vector<8x32xf32>
    %148 = arith.addf %145, %147 : vector<8x32xf32>
    %cst_120 = arith.constant 0.000000e+00 : f32
    %149 = vector.broadcast %cst_120 : f32 to vector<8x32xf32>
    %150 = arith.maximumf %148, %149 : vector<8x32xf32>
    %151 = arith.truncf %150 : vector<8x32xf32> to vector<8x32xbf16>
    %c0_121 = arith.constant 0 : index
    %c0_122 = arith.constant 0 : index
    %c0_123 = arith.constant 0 : index
    %152 = vector.load %arg8[%c0_121, %c0_122, %c0_123] : memref<1x8x32xbf16, #tpu.memory_space<vmem>>, vector<1x8x32xbf16>
    %153 = vector.shape_cast %152 : vector<1x8x32xbf16> to vector<8x32xbf16>
    %154 = vector.shape_cast %151 : vector<8x32xbf16> to vector<1x8x32xbf16>
    tpu.vector_store %arg8[%c0_121, %c0_122, %c0_123], %154 {strides = array<i32>} : memref<1x8x32xbf16, #tpu.memory_space<vmem>>, vector<1x8x32xbf16>,
    return
  }
  func.func @transform_0(%arg0: i32) -> (i32, i32, i32) {
    %c0_i32 = arith.constant 0 : i32
    %c0_i32_0 = arith.constant 0 : i32
    %c0_i32_1 = arith.constant 0 : i32
    return %arg0, %c0_i32, %c0_i32_0 : i32, i32, i32
  }
  func.func @transform_1(%arg0: i32) -> (i32, i32, i32) {
    %c0_i32 = arith.constant 0 : i32
    %c0_i32_0 = arith.constant 0 : i32
    %c0_i32_1 = arith.constant 0 : i32
    %c0_i32_2 = arith.constant 0 : i32
    return %c0_i32, %c0_i32_0, %c0_i32_1 : i32, i32, i32
  }
  func.func @transform_2(%arg0: i32) -> (i32, i32) {
    %c0_i32 = arith.constant 0 : i32
    %c0_i32_0 = arith.constant 0 : i32
    %c0_i32_1 = arith.constant 0 : i32
    return %c0_i32, %c0_i32_0 : i32, i32
  }
  func.func @transform_3(%arg0: i32) -> (i32, i32, i32) {
    %c0_i32 = arith.constant 0 : i32
    %c0_i32_0 = arith.constant 0 : i32
    %c0_i32_1 = arith.constant 0 : i32
    %c0_i32_2 = arith.constant 0 : i32
    return %c0_i32, %c0_i32_0, %c0_i32_1 : i32, i32, i32
  }
  func.func @transform_4(%arg0: i32) -> (i32, i32) {
    %c0_i32 = arith.constant 0 : i32
    %c0_i32_0 = arith.constant 0 : i32
    %c0_i32_1 = arith.constant 0 : i32
    return %c0_i32, %c0_i32_0 : i32, i32
  }
  func.func @transform_5(%arg0: i32) -> (i32, i32) {
    %c0_i32 = arith.constant 0 : i32
    %c0_i32_0 = arith.constant 0 : i32
    %c0_i32_1 = arith.constant 0 : i32
    return %c0_i32, %c0_i32_0 : i32, i32
  }
  func.func @transform_6(%arg0: i32) -> (i32, i32) {
    %c0_i32 = arith.constant 0 : i32
    %c0_i32_0 = arith.constant 0 : i32
    %c0_i32_1 = arith.constant 0 : i32
    return %c0_i32, %c0_i32_0 : i32, i32
  }
  func.func @transform_7(%arg0: i32) -> (i32, i32, i32) {
    %c0_i32 = arith.constant 0 : i32
    %c0_i32_0 = arith.constant 0 : i32
    %c0_i32_1 = arith.constant 0 : i32
    return %arg0, %c0_i32, %c0_i32_0 : i32, i32, i32
  }
}

module attributes {stable_mosaic.version = 11 : i64} {
  func.func @_block_kernel(%arg0: i32, %arg1: memref<1x64x32xbf16, #tpu.memory_space<vmem>>, %arg2: memref<9x32x64xbf16, #tpu.memory_space<vmem>>, %arg3: memref<1x64xf32, #tpu.memory_space<vmem>>, %arg4: memref<9x64x64xbf16, #tpu.memory_space<vmem>>, %arg5: memref<1x64xf32, #tpu.memory_space<vmem>>, %arg6: memref<32x64xbf16, #tpu.memory_space<vmem>>, %arg7: memref<1x64xf32, #tpu.memory_space<vmem>>, %arg8: memref<1x8x64xbf16, #tpu.memory_space<vmem>>, %arg9: memref<24x64xf32, #tpu.memory_space<vmem>>) attributes {dimension_semantics = [#tpu.dimension_semantics<parallel>], iteration_bounds = array<i64: 2>, scalar_prefetch = 0 : i64, scratch_operands = 1 : i64, tpu.core_type = #tpu.core_type<tc>, window_params = [{transform_indices = @transform_0, window_bounds = array<i64: 1, 64, 32>}, {pipeline_mode = #tpu.pipeline_mode<synchronous>, transform_indices = @transform_1, window_bounds = array<i64: 9, 32, 64>}, {pipeline_mode = #tpu.pipeline_mode<synchronous>, transform_indices = @transform_2, window_bounds = array<i64: 1, 64>}, {pipeline_mode = #tpu.pipeline_mode<synchronous>, transform_indices = @transform_3, window_bounds = array<i64: 9, 64, 64>}, {pipeline_mode = #tpu.pipeline_mode<synchronous>, transform_indices = @transform_4, window_bounds = array<i64: 1, 64>}, {pipeline_mode = #tpu.pipeline_mode<synchronous>, transform_indices = @transform_5, window_bounds = array<i64: 32, 64>}, {pipeline_mode = #tpu.pipeline_mode<synchronous>, transform_indices = @transform_6, window_bounds = array<i64: 1, 64>}, {transform_indices = @transform_7, window_bounds = array<i64: 1, 8, 64>}]} {
    %c0 = arith.constant 0 : index
    %c0_0 = arith.constant 0 : index
    %c0_1 = arith.constant 0 : index
    %0 = vector.load %arg1[%c0, %c0_0, %c0_1] : memref<1x64x32xbf16, #tpu.memory_space<vmem>>, vector<1x8x32xbf16>
    %1 = vector.shape_cast %0 : vector<1x8x32xbf16> to vector<8x32xbf16>
    %c0_2 = arith.constant 0 : index
    %c0_3 = arith.constant 0 : index
    %c0_4 = arith.constant 0 : index
    %2 = vector.load %arg2[%c0_2, %c0_3, %c0_4] : memref<9x32x64xbf16, #tpu.memory_space<vmem>>, vector<1x32x64xbf16>
    %3 = vector.shape_cast %2 : vector<1x32x64xbf16> to vector<32x64xbf16>
    %cst = arith.constant dense<0.000000e+00> : vector<8x64xf32>
    %4 = tpu.matmul %1, %3, %cst {dimension_numbers = #tpu.dot_dimension_numbers<[1], [0], [0], [1], [0, 0, 1, 1], [], []>} : vector<8x32xbf16>, vector<32x64xbf16>, vector<8x64xf32> -> vector<8x64xf32>
    %c0_5 = arith.constant 0 : index
    %c16 = arith.constant 16 : index
    %c0_6 = arith.constant 0 : index
    %5 = vector.load %arg1[%c0_5, %c16, %c0_6] : memref<1x64x32xbf16, #tpu.memory_space<vmem>>, vector<1x8x32xbf16>
    %6 = vector.shape_cast %5 : vector<1x8x32xbf16> to vector<8x32xbf16>
    %c1 = arith.constant 1 : index
    %c0_7 = arith.constant 0 : index
    %c0_8 = arith.constant 0 : index
    %7 = vector.load %arg2[%c1, %c0_7, %c0_8] : memref<9x32x64xbf16, #tpu.memory_space<vmem>>, vector<1x32x64xbf16>
    %8 = vector.shape_cast %7 : vector<1x32x64xbf16> to vector<32x64xbf16>
    %cst_9 = arith.constant dense<0.000000e+00> : vector<8x64xf32>
    %9 = tpu.matmul %6, %8, %cst_9 {dimension_numbers = #tpu.dot_dimension_numbers<[1], [0], [0], [1], [0, 0, 1, 1], [], []>} : vector<8x32xbf16>, vector<32x64xbf16>, vector<8x64xf32> -> vector<8x64xf32>
    %10 = arith.addf %4, %9 : vector<8x64xf32>
    %c0_10 = arith.constant 0 : index
    %c1_11 = arith.constant 1 : index
    %c0_12 = arith.constant 0 : index
    %11 = vector.load %arg1[%c0_10, %c1_11, %c0_12] : memref<1x64x32xbf16, #tpu.memory_space<vmem>>, vector<1x8x32xbf16>
    %12 = vector.shape_cast %11 : vector<1x8x32xbf16> to vector<8x32xbf16>
    %c2 = arith.constant 2 : index
    %c0_13 = arith.constant 0 : index
    %c0_14 = arith.constant 0 : index
    %13 = vector.load %arg2[%c2, %c0_13, %c0_14] : memref<9x32x64xbf16, #tpu.memory_space<vmem>>, vector<1x32x64xbf16>
    %14 = vector.shape_cast %13 : vector<1x32x64xbf16> to vector<32x64xbf16>
    %cst_15 = arith.constant dense<0.000000e+00> : vector<8x64xf32>
    %15 = tpu.matmul %12, %14, %cst_15 {dimension_numbers = #tpu.dot_dimension_numbers<[1], [0], [0], [1], [0, 0, 1, 1], [], []>} : vector<8x32xbf16>, vector<32x64xbf16>, vector<8x64xf32> -> vector<8x64xf32>
    %16 = arith.addf %10, %15 : vector<8x64xf32>
    %c0_16 = arith.constant 0 : index
    %c32 = arith.constant 32 : index
    %c0_17 = arith.constant 0 : index
    %17 = vector.load %arg1[%c0_16, %c32, %c0_17] : memref<1x64x32xbf16, #tpu.memory_space<vmem>>, vector<1x8x32xbf16>
    %18 = vector.shape_cast %17 : vector<1x8x32xbf16> to vector<8x32xbf16>
    %c3 = arith.constant 3 : index
    %c0_18 = arith.constant 0 : index
    %c0_19 = arith.constant 0 : index
    %19 = vector.load %arg2[%c3, %c0_18, %c0_19] : memref<9x32x64xbf16, #tpu.memory_space<vmem>>, vector<1x32x64xbf16>
    %20 = vector.shape_cast %19 : vector<1x32x64xbf16> to vector<32x64xbf16>
    %cst_20 = arith.constant dense<0.000000e+00> : vector<8x64xf32>
    %21 = tpu.matmul %18, %20, %cst_20 {dimension_numbers = #tpu.dot_dimension_numbers<[1], [0], [0], [1], [0, 0, 1, 1], [], []>} : vector<8x32xbf16>, vector<32x64xbf16>, vector<8x64xf32> -> vector<8x64xf32>
    %22 = arith.addf %16, %21 : vector<8x64xf32>
    %c0_21 = arith.constant 0 : index
    %c48 = arith.constant 48 : index
    %c0_22 = arith.constant 0 : index
    %23 = vector.load %arg1[%c0_21, %c48, %c0_22] : memref<1x64x32xbf16, #tpu.memory_space<vmem>>, vector<1x8x32xbf16>
    %24 = vector.shape_cast %23 : vector<1x8x32xbf16> to vector<8x32xbf16>
    %c4 = arith.constant 4 : index
    %c0_23 = arith.constant 0 : index
    %c0_24 = arith.constant 0 : index
    %25 = vector.load %arg2[%c4, %c0_23, %c0_24] : memref<9x32x64xbf16, #tpu.memory_space<vmem>>, vector<1x32x64xbf16>
    %26 = vector.shape_cast %25 : vector<1x32x64xbf16> to vector<32x64xbf16>
    %cst_25 = arith.constant dense<0.000000e+00> : vector<8x64xf32>
    %27 = tpu.matmul %24, %26, %cst_25 {dimension_numbers = #tpu.dot_dimension_numbers<[1], [0], [0], [1], [0, 0, 1, 1], [], []>} : vector<8x32xbf16>, vector<32x64xbf16>, vector<8x64xf32> -> vector<8x64xf32>
    %28 = arith.addf %22, %27 : vector<8x64xf32>
    %c0_26 = arith.constant 0 : index
    %c33 = arith.constant 33 : index
    %c0_27 = arith.constant 0 : index
    %29 = vector.load %arg1[%c0_26, %c33, %c0_27] : memref<1x64x32xbf16, #tpu.memory_space<vmem>>, vector<1x8x32xbf16>
    %30 = vector.shape_cast %29 : vector<1x8x32xbf16> to vector<8x32xbf16>
    %c5 = arith.constant 5 : index
    %c0_28 = arith.constant 0 : index
    %c0_29 = arith.constant 0 : index
    %31 = vector.load %arg2[%c5, %c0_28, %c0_29] : memref<9x32x64xbf16, #tpu.memory_space<vmem>>, vector<1x32x64xbf16>
    %32 = vector.shape_cast %31 : vector<1x32x64xbf16> to vector<32x64xbf16>
    %cst_30 = arith.constant dense<0.000000e+00> : vector<8x64xf32>
    %33 = tpu.matmul %30, %32, %cst_30 {dimension_numbers = #tpu.dot_dimension_numbers<[1], [0], [0], [1], [0, 0, 1, 1], [], []>} : vector<8x32xbf16>, vector<32x64xbf16>, vector<8x64xf32> -> vector<8x64xf32>
    %34 = arith.addf %28, %33 : vector<8x64xf32>
    %c0_31 = arith.constant 0 : index
    %c3_32 = arith.constant 3 : index
    %c0_33 = arith.constant 0 : index
    %35 = vector.load %arg1[%c0_31, %c3_32, %c0_33] : memref<1x64x32xbf16, #tpu.memory_space<vmem>>, vector<1x8x32xbf16>
    %36 = vector.shape_cast %35 : vector<1x8x32xbf16> to vector<8x32xbf16>
    %c6 = arith.constant 6 : index
    %c0_34 = arith.constant 0 : index
    %c0_35 = arith.constant 0 : index
    %37 = vector.load %arg2[%c6, %c0_34, %c0_35] : memref<9x32x64xbf16, #tpu.memory_space<vmem>>, vector<1x32x64xbf16>
    %38 = vector.shape_cast %37 : vector<1x32x64xbf16> to vector<32x64xbf16>
    %cst_36 = arith.constant dense<0.000000e+00> : vector<8x64xf32>
    %39 = tpu.matmul %36, %38, %cst_36 {dimension_numbers = #tpu.dot_dimension_numbers<[1], [0], [0], [1], [0, 0, 1, 1], [], []>} : vector<8x32xbf16>, vector<32x64xbf16>, vector<8x64xf32> -> vector<8x64xf32>
    %40 = arith.addf %34, %39 : vector<8x64xf32>
    %c0_37 = arith.constant 0 : index
    %c19 = arith.constant 19 : index
    %c0_38 = arith.constant 0 : index
    %41 = vector.load %arg1[%c0_37, %c19, %c0_38] : memref<1x64x32xbf16, #tpu.memory_space<vmem>>, vector<1x8x32xbf16>
    %42 = vector.shape_cast %41 : vector<1x8x32xbf16> to vector<8x32xbf16>
    %c7 = arith.constant 7 : index
    %c0_39 = arith.constant 0 : index
    %c0_40 = arith.constant 0 : index
    %43 = vector.load %arg2[%c7, %c0_39, %c0_40] : memref<9x32x64xbf16, #tpu.memory_space<vmem>>, vector<1x32x64xbf16>
    %44 = vector.shape_cast %43 : vector<1x32x64xbf16> to vector<32x64xbf16>
    %cst_41 = arith.constant dense<0.000000e+00> : vector<8x64xf32>
    %45 = tpu.matmul %42, %44, %cst_41 {dimension_numbers = #tpu.dot_dimension_numbers<[1], [0], [0], [1], [0, 0, 1, 1], [], []>} : vector<8x32xbf16>, vector<32x64xbf16>, vector<8x64xf32> -> vector<8x64xf32>
    %46 = arith.addf %40, %45 : vector<8x64xf32>
    %c0_42 = arith.constant 0 : index
    %c4_43 = arith.constant 4 : index
    %c0_44 = arith.constant 0 : index
    %47 = vector.load %arg1[%c0_42, %c4_43, %c0_44] : memref<1x64x32xbf16, #tpu.memory_space<vmem>>, vector<1x8x32xbf16>
    %48 = vector.shape_cast %47 : vector<1x8x32xbf16> to vector<8x32xbf16>
    %c8 = arith.constant 8 : index
    %c0_45 = arith.constant 0 : index
    %c0_46 = arith.constant 0 : index
    %49 = vector.load %arg2[%c8, %c0_45, %c0_46] : memref<9x32x64xbf16, #tpu.memory_space<vmem>>, vector<1x32x64xbf16>
    %50 = vector.shape_cast %49 : vector<1x32x64xbf16> to vector<32x64xbf16>
    %cst_47 = arith.constant dense<0.000000e+00> : vector<8x64xf32>
    %51 = tpu.matmul %48, %50, %cst_47 {dimension_numbers = #tpu.dot_dimension_numbers<[1], [0], [0], [1], [0, 0, 1, 1], [], []>} : vector<8x32xbf16>, vector<32x64xbf16>, vector<8x64xf32> -> vector<8x64xf32>
    %52 = arith.addf %46, %51 : vector<8x64xf32>
    %c0_48 = arith.constant 0 : index
    %c0_49 = arith.constant 0 : index
    %53 = vector.load %arg3[%c0_48, %c0_49] : memref<1x64xf32, #tpu.memory_space<vmem>>, vector<1x64xf32>
    %54 = vector.broadcast %53 : vector<1x64xf32> to vector<8x64xf32>
    %55 = arith.addf %52, %54 : vector<8x64xf32>
    %cst_50 = arith.constant 0.000000e+00 : f32
    %56 = vector.broadcast %cst_50 : f32 to vector<8x64xf32>
    %57 = arith.maximumf %55, %56 : vector<8x64xf32>
    %58 = tpu.iota {dimensions = array<i32: 0>} : vector<8x64xi32>
    %c3_i32 = arith.constant 3 : i32
    %c0_i32 = arith.constant 0 : i32
    %59 = arith.cmpi eq, %c3_i32, %c0_i32 : i32
    %c1_i32 = arith.constant 1 : i32
    %60 = arith.select %59, %c1_i32, %c3_i32 : i32
    %61 = vector.broadcast %60 : i32 to vector<8x64xi32>
    %62 = arith.remsi %58, %61 : vector<8x64xi32>
    %c0_i32_51 = arith.constant 0 : i32
    %63 = vector.broadcast %c0_i32_51 : i32 to vector<8x64xi32>
    %64 = arith.cmpi ne, %62, %63 : vector<8x64xi32>
    %c0_i32_52 = arith.constant 0 : i32
    %65 = vector.broadcast %c0_i32_52 : i32 to vector<8x64xi32>
    %66 = arith.cmpi slt, %62, %65 : vector<8x64xi32>
    %c0_i32_53 = arith.constant 0 : i32
    %67 = arith.cmpi slt, %60, %c0_i32_53 : i32
    %68 = vector.broadcast %67 : i1 to vector<8x64xi1>
    %69 = vector.broadcast %68 : vector<8x64xi1> to vector<8x64xi1>
    %70 = arith.xori %66, %69 : vector<8x64xi1>
    %71 = arith.andi %70, %64 : vector<8x64xi1>
    %72 = vector.broadcast %60 : i32 to vector<8x64xi32>
    %73 = arith.addi %62, %72 : vector<8x64xi32>
    %74 = arith.select %71, %73, %62 : vector<8x64xi1>, vector<8x64xi32>
    %c1_i32_54 = arith.constant 1 : i32
    %75 = vector.broadcast %c1_i32_54 : i32 to vector<8x64xi32>
    %76 = arith.cmpi slt, %74, %75 : vector<8x64xi32>
    %c3_i32_55 = arith.constant 3 : i32
    %77 = vector.broadcast %c3_i32_55 : i32 to vector<8x64xi32>
    %78 = arith.cmpi slt, %58, %77 : vector<8x64xi32>
    %79 = arith.andi %76, %78 : vector<8x64xi1>
    %cst_56 = arith.constant 0.000000e+00 : f32
    %80 = vector.broadcast %cst_56 : f32 to vector<8x64xf32>
    %81 = arith.select %79, %57, %80 : vector<8x64xi1>, vector<8x64xf32>
    %cst_57 = arith.constant 0.000000e+00 : f32
    %82 = vector.broadcast %cst_57 : f32 to vector<24x64xf32>
    %c0_58 = arith.constant 0 : index
    %c0_59 = arith.constant 0 : index
    %83 = vector.load %arg9[%c0_58, %c0_59] : memref<24x64xf32, #tpu.memory_space<vmem>>, vector<24x64xf32>
    tpu.vector_store %arg9[%c0_58, %c0_59], %82 {strides = array<i32>} : memref<24x64xf32, #tpu.memory_space<vmem>>, vector<24x64xf32>,
    %c8_60 = arith.constant 8 : index
    %c0_61 = arith.constant 0 : index
    %84 = vector.load %arg9[%c8_60, %c0_61] : memref<24x64xf32, #tpu.memory_space<vmem>>, vector<8x64xf32>
    tpu.vector_store %arg9[%c8_60, %c0_61], %81 {strides = array<i32>} : memref<24x64xf32, #tpu.memory_space<vmem>>, vector<8x64xf32>,
    %c4_62 = arith.constant 4 : index
    %c0_63 = arith.constant 0 : index
    %85 = vector.load %arg9[%c4_62, %c0_63] : memref<24x64xf32, #tpu.memory_space<vmem>>, vector<8x64xf32>
    %86 = arith.truncf %85 : vector<8x64xf32> to vector<8x64xbf16>
    %c0_64 = arith.constant 0 : index
    %c0_65 = arith.constant 0 : index
    %c0_66 = arith.constant 0 : index
    %87 = vector.load %arg4[%c0_64, %c0_65, %c0_66] : memref<9x64x64xbf16, #tpu.memory_space<vmem>>, vector<1x64x64xbf16>
    %88 = vector.shape_cast %87 : vector<1x64x64xbf16> to vector<64x64xbf16>
    %cst_67 = arith.constant dense<0.000000e+00> : vector<8x64xf32>
    %89 = tpu.matmul %86, %88, %cst_67 {dimension_numbers = #tpu.dot_dimension_numbers<[1], [0], [0], [1], [0, 0, 1, 1], [], []>} : vector<8x64xbf16>, vector<64x64xbf16>, vector<8x64xf32> -> vector<8x64xf32>
    %c5_68 = arith.constant 5 : index
    %c0_69 = arith.constant 0 : index
    %90 = vector.load %arg9[%c5_68, %c0_69] : memref<24x64xf32, #tpu.memory_space<vmem>>, vector<8x64xf32>
    %91 = arith.truncf %90 : vector<8x64xf32> to vector<8x64xbf16>
    %c1_70 = arith.constant 1 : index
    %c0_71 = arith.constant 0 : index
    %c0_72 = arith.constant 0 : index
    %92 = vector.load %arg4[%c1_70, %c0_71, %c0_72] : memref<9x64x64xbf16, #tpu.memory_space<vmem>>, vector<1x64x64xbf16>
    %93 = vector.shape_cast %92 : vector<1x64x64xbf16> to vector<64x64xbf16>
    %cst_73 = arith.constant dense<0.000000e+00> : vector<8x64xf32>
    %94 = tpu.matmul %91, %93, %cst_73 {dimension_numbers = #tpu.dot_dimension_numbers<[1], [0], [0], [1], [0, 0, 1, 1], [], []>} : vector<8x64xbf16>, vector<64x64xbf16>, vector<8x64xf32> -> vector<8x64xf32>
    %95 = arith.addf %89, %94 : vector<8x64xf32>
    %c6_74 = arith.constant 6 : index
    %c0_75 = arith.constant 0 : index
    %96 = vector.load %arg9[%c6_74, %c0_75] : memref<24x64xf32, #tpu.memory_space<vmem>>, vector<8x64xf32>
    %97 = arith.truncf %96 : vector<8x64xf32> to vector<8x64xbf16>
    %c2_76 = arith.constant 2 : index
    %c0_77 = arith.constant 0 : index
    %c0_78 = arith.constant 0 : index
    %98 = vector.load %arg4[%c2_76, %c0_77, %c0_78] : memref<9x64x64xbf16, #tpu.memory_space<vmem>>, vector<1x64x64xbf16>
    %99 = vector.shape_cast %98 : vector<1x64x64xbf16> to vector<64x64xbf16>
    %cst_79 = arith.constant dense<0.000000e+00> : vector<8x64xf32>
    %100 = tpu.matmul %97, %99, %cst_79 {dimension_numbers = #tpu.dot_dimension_numbers<[1], [0], [0], [1], [0, 0, 1, 1], [], []>} : vector<8x64xbf16>, vector<64x64xbf16>, vector<8x64xf32> -> vector<8x64xf32>
    %101 = arith.addf %95, %100 : vector<8x64xf32>
    %c7_80 = arith.constant 7 : index
    %c0_81 = arith.constant 0 : index
    %102 = vector.load %arg9[%c7_80, %c0_81] : memref<24x64xf32, #tpu.memory_space<vmem>>, vector<8x64xf32>
    %103 = arith.truncf %102 : vector<8x64xf32> to vector<8x64xbf16>
    %c3_82 = arith.constant 3 : index
    %c0_83 = arith.constant 0 : index
    %c0_84 = arith.constant 0 : index
    %104 = vector.load %arg4[%c3_82, %c0_83, %c0_84] : memref<9x64x64xbf16, #tpu.memory_space<vmem>>, vector<1x64x64xbf16>
    %105 = vector.shape_cast %104 : vector<1x64x64xbf16> to vector<64x64xbf16>
    %cst_85 = arith.constant dense<0.000000e+00> : vector<8x64xf32>
    %106 = tpu.matmul %103, %105, %cst_85 {dimension_numbers = #tpu.dot_dimension_numbers<[1], [0], [0], [1], [0, 0, 1, 1], [], []>} : vector<8x64xbf16>, vector<64x64xbf16>, vector<8x64xf32> -> vector<8x64xf32>
    %107 = arith.addf %101, %106 : vector<8x64xf32>
    %c8_86 = arith.constant 8 : index
    %c0_87 = arith.constant 0 : index
    %108 = vector.load %arg9[%c8_86, %c0_87] : memref<24x64xf32, #tpu.memory_space<vmem>>, vector<8x64xf32>
    %109 = arith.truncf %108 : vector<8x64xf32> to vector<8x64xbf16>
    %c4_88 = arith.constant 4 : index
    %c0_89 = arith.constant 0 : index
    %c0_90 = arith.constant 0 : index
    %110 = vector.load %arg4[%c4_88, %c0_89, %c0_90] : memref<9x64x64xbf16, #tpu.memory_space<vmem>>, vector<1x64x64xbf16>
    %111 = vector.shape_cast %110 : vector<1x64x64xbf16> to vector<64x64xbf16>
    %cst_91 = arith.constant dense<0.000000e+00> : vector<8x64xf32>
    %112 = tpu.matmul %109, %111, %cst_91 {dimension_numbers = #tpu.dot_dimension_numbers<[1], [0], [0], [1], [0, 0, 1, 1], [], []>} : vector<8x64xbf16>, vector<64x64xbf16>, vector<8x64xf32> -> vector<8x64xf32>
    %113 = arith.addf %107, %112 : vector<8x64xf32>
    %c9 = arith.constant 9 : index
    %c0_92 = arith.constant 0 : index
    %114 = vector.load %arg9[%c9, %c0_92] : memref<24x64xf32, #tpu.memory_space<vmem>>, vector<8x64xf32>
    %115 = arith.truncf %114 : vector<8x64xf32> to vector<8x64xbf16>
    %c5_93 = arith.constant 5 : index
    %c0_94 = arith.constant 0 : index
    %c0_95 = arith.constant 0 : index
    %116 = vector.load %arg4[%c5_93, %c0_94, %c0_95] : memref<9x64x64xbf16, #tpu.memory_space<vmem>>, vector<1x64x64xbf16>
    %117 = vector.shape_cast %116 : vector<1x64x64xbf16> to vector<64x64xbf16>
    %cst_96 = arith.constant dense<0.000000e+00> : vector<8x64xf32>
    %118 = tpu.matmul %115, %117, %cst_96 {dimension_numbers = #tpu.dot_dimension_numbers<[1], [0], [0], [1], [0, 0, 1, 1], [], []>} : vector<8x64xbf16>, vector<64x64xbf16>, vector<8x64xf32> -> vector<8x64xf32>
    %119 = arith.addf %113, %118 : vector<8x64xf32>
    %c10 = arith.constant 10 : index
    %c0_97 = arith.constant 0 : index
    %120 = vector.load %arg9[%c10, %c0_97] : memref<24x64xf32, #tpu.memory_space<vmem>>, vector<8x64xf32>
    %121 = arith.truncf %120 : vector<8x64xf32> to vector<8x64xbf16>
    %c6_98 = arith.constant 6 : index
    %c0_99 = arith.constant 0 : index
    %c0_100 = arith.constant 0 : index
    %122 = vector.load %arg4[%c6_98, %c0_99, %c0_100] : memref<9x64x64xbf16, #tpu.memory_space<vmem>>, vector<1x64x64xbf16>
    %123 = vector.shape_cast %122 : vector<1x64x64xbf16> to vector<64x64xbf16>
    %cst_101 = arith.constant dense<0.000000e+00> : vector<8x64xf32>
    %124 = tpu.matmul %121, %123, %cst_101 {dimension_numbers = #tpu.dot_dimension_numbers<[1], [0], [0], [1], [0, 0, 1, 1], [], []>} : vector<8x64xbf16>, vector<64x64xbf16>, vector<8x64xf32> -> vector<8x64xf32>
    %125 = arith.addf %119, %124 : vector<8x64xf32>
    %c11 = arith.constant 11 : index
    %c0_102 = arith.constant 0 : index
    %126 = vector.load %arg9[%c11, %c0_102] : memref<24x64xf32, #tpu.memory_space<vmem>>, vector<8x64xf32>
    %127 = arith.truncf %126 : vector<8x64xf32> to vector<8x64xbf16>
    %c7_103 = arith.constant 7 : index
    %c0_104 = arith.constant 0 : index
    %c0_105 = arith.constant 0 : index
    %128 = vector.load %arg4[%c7_103, %c0_104, %c0_105] : memref<9x64x64xbf16, #tpu.memory_space<vmem>>, vector<1x64x64xbf16>
    %129 = vector.shape_cast %128 : vector<1x64x64xbf16> to vector<64x64xbf16>
    %cst_106 = arith.constant dense<0.000000e+00> : vector<8x64xf32>
    %130 = tpu.matmul %127, %129, %cst_106 {dimension_numbers = #tpu.dot_dimension_numbers<[1], [0], [0], [1], [0, 0, 1, 1], [], []>} : vector<8x64xbf16>, vector<64x64xbf16>, vector<8x64xf32> -> vector<8x64xf32>
    %131 = arith.addf %125, %130 : vector<8x64xf32>
    %c12 = arith.constant 12 : index
    %c0_107 = arith.constant 0 : index
    %132 = vector.load %arg9[%c12, %c0_107] : memref<24x64xf32, #tpu.memory_space<vmem>>, vector<8x64xf32>
    %133 = arith.truncf %132 : vector<8x64xf32> to vector<8x64xbf16>
    %c8_108 = arith.constant 8 : index
    %c0_109 = arith.constant 0 : index
    %c0_110 = arith.constant 0 : index
    %134 = vector.load %arg4[%c8_108, %c0_109, %c0_110] : memref<9x64x64xbf16, #tpu.memory_space<vmem>>, vector<1x64x64xbf16>
    %135 = vector.shape_cast %134 : vector<1x64x64xbf16> to vector<64x64xbf16>
    %cst_111 = arith.constant dense<0.000000e+00> : vector<8x64xf32>
    %136 = tpu.matmul %133, %135, %cst_111 {dimension_numbers = #tpu.dot_dimension_numbers<[1], [0], [0], [1], [0, 0, 1, 1], [], []>} : vector<8x64xbf16>, vector<64x64xbf16>, vector<8x64xf32> -> vector<8x64xf32>
    %137 = arith.addf %131, %136 : vector<8x64xf32>
    %c0_112 = arith.constant 0 : index
    %c0_113 = arith.constant 0 : index
    %138 = vector.load %arg5[%c0_112, %c0_113] : memref<1x64xf32, #tpu.memory_space<vmem>>, vector<1x64xf32>
    %139 = vector.broadcast %138 : vector<1x64xf32> to vector<8x64xf32>
    %140 = arith.addf %137, %139 : vector<8x64xf32>
    %c0_114 = arith.constant 0 : index
    %c48_115 = arith.constant 48 : index
    %c0_116 = arith.constant 0 : index
    %141 = vector.load %arg1[%c0_114, %c48_115, %c0_116] : memref<1x64x32xbf16, #tpu.memory_space<vmem>>, vector<1x8x32xbf16>
    %142 = vector.shape_cast %141 : vector<1x8x32xbf16> to vector<8x32xbf16>
    %c0_117 = arith.constant 0 : index
    %c0_118 = arith.constant 0 : index
    %143 = vector.load %arg6[%c0_117, %c0_118] : memref<32x64xbf16, #tpu.memory_space<vmem>>, vector<32x64xbf16>
    %cst_119 = arith.constant dense<0.000000e+00> : vector<8x64xf32>
    %144 = tpu.matmul %142, %143, %cst_119 {dimension_numbers = #tpu.dot_dimension_numbers<[1], [0], [0], [1], [0, 0, 1, 1], [], []>} : vector<8x32xbf16>, vector<32x64xbf16>, vector<8x64xf32> -> vector<8x64xf32>
    %145 = arith.addf %140, %144 : vector<8x64xf32>
    %c0_120 = arith.constant 0 : index
    %c0_121 = arith.constant 0 : index
    %146 = vector.load %arg7[%c0_120, %c0_121] : memref<1x64xf32, #tpu.memory_space<vmem>>, vector<1x64xf32>
    %147 = vector.broadcast %146 : vector<1x64xf32> to vector<8x64xf32>
    %148 = arith.addf %145, %147 : vector<8x64xf32>
    %cst_122 = arith.constant 0.000000e+00 : f32
    %149 = vector.broadcast %cst_122 : f32 to vector<8x64xf32>
    %150 = arith.maximumf %148, %149 : vector<8x64xf32>
    %151 = arith.truncf %150 : vector<8x64xf32> to vector<8x64xbf16>
    %c0_123 = arith.constant 0 : index
    %c0_124 = arith.constant 0 : index
    %c0_125 = arith.constant 0 : index
    %152 = vector.load %arg8[%c0_123, %c0_124, %c0_125] : memref<1x8x64xbf16, #tpu.memory_space<vmem>>, vector<1x8x64xbf16>
    %153 = vector.shape_cast %152 : vector<1x8x64xbf16> to vector<8x64xbf16>
    %154 = vector.shape_cast %151 : vector<8x64xbf16> to vector<1x8x64xbf16>
    tpu.vector_store %arg8[%c0_123, %c0_124, %c0_125], %154 {strides = array<i32>} : memref<1x8x64xbf16, #tpu.memory_space<vmem>>, vector<1x8x64xbf16>,
    return
  }
  func.func @transform_0(%arg0: i32) -> (i32, i32, i32) {
    %c0_i32 = arith.constant 0 : i32
    %c0_i32_0 = arith.constant 0 : i32
    %c0_i32_1 = arith.constant 0 : i32
    return %arg0, %c0_i32, %c0_i32_0 : i32, i32, i32
  }
  func.func @transform_1(%arg0: i32) -> (i32, i32, i32) {
    %c0_i32 = arith.constant 0 : i32
    %c0_i32_0 = arith.constant 0 : i32
    %c0_i32_1 = arith.constant 0 : i32
    %c0_i32_2 = arith.constant 0 : i32
    return %c0_i32, %c0_i32_0, %c0_i32_1 : i32, i32, i32
  }
  func.func @transform_2(%arg0: i32) -> (i32, i32) {
    %c0_i32 = arith.constant 0 : i32
    %c0_i32_0 = arith.constant 0 : i32
    %c0_i32_1 = arith.constant 0 : i32
    return %c0_i32, %c0_i32_0 : i32, i32
  }
  func.func @transform_3(%arg0: i32) -> (i32, i32, i32) {
    %c0_i32 = arith.constant 0 : i32
    %c0_i32_0 = arith.constant 0 : i32
    %c0_i32_1 = arith.constant 0 : i32
    %c0_i32_2 = arith.constant 0 : i32
    return %c0_i32, %c0_i32_0, %c0_i32_1 : i32, i32, i32
  }
  func.func @transform_4(%arg0: i32) -> (i32, i32) {
    %c0_i32 = arith.constant 0 : i32
    %c0_i32_0 = arith.constant 0 : i32
    %c0_i32_1 = arith.constant 0 : i32
    return %c0_i32, %c0_i32_0 : i32, i32
  }
  func.func @transform_5(%arg0: i32) -> (i32, i32) {
    %c0_i32 = arith.constant 0 : i32
    %c0_i32_0 = arith.constant 0 : i32
    %c0_i32_1 = arith.constant 0 : i32
    return %c0_i32, %c0_i32_0 : i32, i32
  }
  func.func @transform_6(%arg0: i32) -> (i32, i32) {
    %c0_i32 = arith.constant 0 : i32
    %c0_i32_0 = arith.constant 0 : i32
    %c0_i32_1 = arith.constant 0 : i32
    return %c0_i32, %c0_i32_0 : i32, i32
  }
  func.func @transform_7(%arg0: i32) -> (i32, i32, i32) {
    %c0_i32 = arith.constant 0 : i32
    %c0_i32_0 = arith.constant 0 : i32
    %c0_i32_1 = arith.constant 0 : i32
    return %arg0, %c0_i32, %c0_i32_0 : i32, i32, i32
  }
}

module attributes {stable_mosaic.version = 11 : i64} {
  func.func @_avgpool_fc_kernel(%arg0: i32, %arg1: memref<8x1x64xbf16, #tpu.memory_space<vmem>>, %arg2: memref<64x128xf32, #tpu.memory_space<vmem>>, %arg3: memref<1x128xf32, #tpu.memory_space<vmem>>, %arg4: memref<8x128xf32, #tpu.memory_space<vmem>>) attributes {dimension_semantics = [#tpu.dimension_semantics<arbitrary>], iteration_bounds = array<i64: 1>, scalar_prefetch = 0 : i64, scratch_operands = 0 : i64, tpu.core_type = #tpu.core_type<tc>, window_params = [{pipeline_mode = #tpu.pipeline_mode<synchronous>, transform_indices = @transform_0, window_bounds = array<i64: 8, 1, 64>}, {pipeline_mode = #tpu.pipeline_mode<synchronous>, transform_indices = @transform_1, window_bounds = array<i64: 64, 128>}, {pipeline_mode = #tpu.pipeline_mode<synchronous>, transform_indices = @transform_2, window_bounds = array<i64: 1, 128>}, {pipeline_mode = #tpu.pipeline_mode<synchronous>, transform_indices = @transform_3, window_bounds = array<i64: 8, 128>}]} {
    %c0 = arith.constant 0 : index
    %c0_0 = arith.constant 0 : index
    %c0_1 = arith.constant 0 : index
    %0 = vector.load %arg1[%c0, %c0_0, %c0_1] : memref<8x1x64xbf16, #tpu.memory_space<vmem>>, vector<8x1x64xbf16>
    %1 = arith.extf %0 : vector<8x1x64xbf16> to vector<8x1x64xf32>
    %cst = arith.constant dense<0.000000e+00> : vector<8x64xf32>
    %2 = vector.multi_reduction <add>, %1, %cst [1] : vector<8x1x64xf32> to vector<8x64xf32>
    %cst_2 = arith.constant 1.000000e+00 : f32
    %3 = vector.broadcast %cst_2 : f32 to vector<8x64xf32>
    %4 = arith.mulf %2, %3 : vector<8x64xf32>
    %c0_3 = arith.constant 0 : index
    %c0_4 = arith.constant 0 : index
    %5 = vector.load %arg2[%c0_3, %c0_4] : memref<64x128xf32, #tpu.memory_space<vmem>>, vector<64x128xf32>
    %cst_5 = arith.constant dense<0.000000e+00> : vector<8x128xf32>
    %6 = tpu.matmul %4, %5, %cst_5 {dimension_numbers = #tpu.dot_dimension_numbers<[1], [0], [0], [1], [0, 0, 1, 1], [], []>} : vector<8x64xf32>, vector<64x128xf32>, vector<8x128xf32> -> vector<8x128xf32>
    %c0_6 = arith.constant 0 : index
    %c0_7 = arith.constant 0 : index
    %7 = vector.load %arg3[%c0_6, %c0_7] : memref<1x128xf32, #tpu.memory_space<vmem>>, vector<1x128xf32>
    %8 = vector.broadcast %7 : vector<1x128xf32> to vector<8x128xf32>
    %9 = arith.addf %6, %8 : vector<8x128xf32>
    %c0_8 = arith.constant 0 : index
    %c0_9 = arith.constant 0 : index
    %10 = vector.load %arg4[%c0_8, %c0_9] : memref<8x128xf32, #tpu.memory_space<vmem>>, vector<8x128xf32>
    tpu.vector_store %arg4[%c0_8, %c0_9], %9 {strides = array<i32>} : memref<8x128xf32, #tpu.memory_space<vmem>>, vector<8x128xf32>,
    return
  }
  func.func @transform_0(%arg0: i32) -> (i32, i32, i32) {
    %c0_i32 = arith.constant 0 : i32
    %c0_i32_0 = arith.constant 0 : i32
    %c0_i32_1 = arith.constant 0 : i32
    %c0_i32_2 = arith.constant 0 : i32
    return %c0_i32, %c0_i32_0, %c0_i32_1 : i32, i32, i32
  }
  func.func @transform_1(%arg0: i32) -> (i32, i32) {
    %c0_i32 = arith.constant 0 : i32
    %c0_i32_0 = arith.constant 0 : i32
    %c0_i32_1 = arith.constant 0 : i32
    return %c0_i32, %c0_i32_0 : i32, i32
  }
  func.func @transform_2(%arg0: i32) -> (i32, i32) {
    %c0_i32 = arith.constant 0 : i32
    %c0_i32_0 = arith.constant 0 : i32
    %c0_i32_1 = arith.constant 0 : i32
    return %c0_i32, %c0_i32_0 : i32, i32
  }
  func.func @transform_3(%arg0: i32) -> (i32, i32) {
    %c0_i32 = arith.constant 0 : i32
    %c0_i32_0 = arith.constant 0 : i32
    %c0_i32_1 = arith.constant 0 : i32
    return %c0_i32, %c0_i32_0 : i32, i32
  }
}

</mosaic_0001>

<bundles_post_ra>
// kernel: resnet_forward.7
= control target key start
LH: loop header
LB: loop body
LE: loop exit
PB: predicated region body
PF: predicated region fallthrough
CT: control target
= control target key end

     0   :  { %s1097_s12 = smov 0   ;;  %s1339_s0 = inlined_call_operand.vmem [shape: bf16[2,256,160], index: 0, kind: input, shape index: {}]   ;;  %s1340_s1 = inlined_call_operand.vmem [shape: bf16[160,16], index: 1, kind: input, shape index: {}]   ;;  %s1341_s2 = inlined_call_operand.vmem [shape: f32[1,16], index: 2, kind: input, shape index: {}]   ;;  %s1342_s3 = inlined_call_operand.vmem [shape: bf16[2,256,16], index: 3, kind: output, shape index: {}]  }
   0x1 LB: > { %s811_s13 = sadd.s32 4294967295, %s1075_s12   ;;  %p815_p0 = scmp.ge.s32.totalorder %s1075_s12, 1  ;;  %s1075_s12 = sphi %s1097_s12, %s13_s12  }
   0x2   : > { %p137_p1 = scmp.lt.s32.totalorder %s1075_s12, 3 }
   0x4   : > { %p138_p2 = pnand %p815_p0, %p137_p1 }
   0x5   : > { %p161_p3 = scmp.lt.s32.totalorder (!%p138_p2), %s811_s13, 1 }
   0x6   : > { %141 = sbr.rel (%p138_p2) target bundleno = 305 (0x131), region = 32 }
   0xb   : > { %v1047_v0 = vld [vmem:[%s1340_s1 + $0x38] sm:$0xff]  ;;  %v1049_v1 = vld [vmem:[%s1340_s1 + $0x48] sm:$0xff]  ;;  %v1046_v2 = vld [vmem:[%s1340_s1 + $0x30] sm:$0xff]  ;;  %s1344_s13 = smov (!%p161_p3, %s811_s13), 1  ;;  %vm432_vm0 = vcmask 261120   ;;  %vm723_vm1 = vcmask 125952  }
   0xc   : > { %481 = vmatpush.bf16.msra.mxu0 %v1047_v0  ;;  %1050 = vmatpush.bf16.msra.mxu2 %v1047_v0  ;;  %v1048_v3 = vld [vmem:[%s1340_s1 + $0x40] sm:$0xff]  ;;  %s1006_s22 = sshll.u32 %s1344_s13, 8  ;;  %v1045_v6 = vld [vmem:[%s1340_s1 + $0x28] sm:$0xff]  ;;  %v1043_v12 = vld [vmem:[%s1340_s1 + $0x18] sm:$0xff]  ;;  %s1007_s15 = sshll.u32 %s1344_s13, 7 }
   0xd   : > { %576 = vmatpush.bf16.msra.mxu1 %v1049_v1  ;;  %1058 = vmatpush.bf16.msra.mxu3 %v1049_v1  ;;  %s1123_s25 = scalar_lea.vmem %s1339_s0, %s1006_s22  ;;  %v1044_v10 = vld [vmem:[%s1340_s1 + $0x20] sm:$0xff]  ;;  %v1042_v13 = vld [vmem:[%s1340_s1 + $0x10] sm:$0xff]  ;;  %v1041_v17 = vld [vmem:[%s1340_s1 + $0x8] sm:$0xff]  ;;  %s1233_s18 = scalar_lea.vmem %s1342_s3, %s1007_s15 }
   0xe   : > { %v1008_v4 = vld [vmem:[%s1123_s25 + $0x4] sm:$0xf]  ;;  %v824_v5 = vld [vmem:[%s1123_s25 + $0x8] sm:$0xf0]  ;;  %v1026_v8 = vld [vmem:[%s1123_s25 + $0x94] sm:$0xf] }
   0xf   : > { %v827_v7 = vor.u32 %v1008_v4, %v824_v5  ;;  %v896_v9 = vld [vmem:[%s1123_s25 + $0x98] sm:$0xf0]  ;;  %v1010_v14 = vld [vmem:[%s1123_s25 + $0x14] sm:$0xf]  ;;  %v1028_v18 = vld [vmem:[%s1123_s25 + $0xa4] sm:$0xf] }
  0x10   : > { %482 = vmatpush.bf16.msra.mxu0 %v1046_v2  ;;  %1051 = vmatpush.bf16.msra.mxu2 %v1046_v2  ;;  %v899_v11 = vor.u32 %v1026_v8, %v896_v9  ;;  %v832_v15 = vld [vmem:[%s1123_s25 + $0x18] sm:$0xf0]  ;;  %v904_v19 = vld [vmem:[%s1123_s25 + $0xa8] sm:$0xf0]  ;;  %v1040_v20 = vld [vmem:[%s1340_s1] sm:$0xff] }
  0x11   : > { %577 = vmatpush.bf16.msra.mxu1 %v1048_v3  ;;  %1059 = vmatpush.bf16.msra.mxu3 %v1048_v3  ;;  %v835_v16 = vor.u32 %v1010_v14, %v832_v15  ;;  %v822_v21 = vld [vmem:[%s1123_s25] sm:$0xf]  ;;  %v1009_v22 = vld [vmem:[%s1123_s25 + $0x4] sm:$0xf0]  ;;  %v907_v23 = vor.u32 %v1028_v18, %v904_v19  ;;  %v1012_v28 = vld [vmem:[%s1123_s25 + $0x24] sm:$0xf] }
  0x12   : > { %v886_v24 = vld [vmem:[%s1123_s25 + $0x80] sm:$0xf]  ;;  %v1025_v25 = vld [vmem:[%s1123_s25 + $0x84] sm:$0xf0]  ;;  %v823_v26 = vor.u32 %v1009_v22, %v822_v21  ;;  %v840_v29 = vld [vmem:[%s1123_s25 + $0x28] sm:$0xf0] }
  0x13   : > { %v887_v27 = vor.u32 %v1025_v25, %v886_v24  ;;  %v843_v30 = vor.u32 %v1012_v28, %v840_v29  ;;  %v1030_v31 = vld [vmem:[%s1123_s25 + $0xb4] sm:$0xf]  ;;  %v912_v32 = vld [vmem:[%s1123_s25 + $0xb8] sm:$0xf0]  ;;  %v830_v33 = vld [vmem:[%s1123_s25 + $0x10] sm:$0xf] }
  0x14   : > { %988 = vmatmul.msk.bf16.vlgmr.msra.gmra.mxu1 %vm432_vm0, %v827_v7  ;;  %483 = vmatpush.bf16.msra.mxu0 %v1045_v6  ;;  %v1011_v34 = vld [vmem:[%s1123_s25 + $0x14] sm:$0xf0]  ;;  %v915_v35 = vor.u32 %v1030_v31, %v912_v32  ;;  %v894_v36 = vld [vmem:[%s1123_s25 + $0x90] sm:$0xf]  ;;  %v1014_v40 = vld [vmem:[%s1123_s25 + $0x34] sm:$0xf] }
  0x15   : > { %1052 = vmatpush.bf16.msra.mxu2 %v1045_v6  ;;  %997 = vmatmul.msk.bf16.vlgmr.msra.gmra.mxu3 %vm432_vm0, %v899_v11  ;;  %v1027_v37 = vld [vmem:[%s1123_s25 + $0x94] sm:$0xf0]  ;;  %v831_v38 = vor.u32 %v1011_v34, %v830_v33  ;;  %v848_v41 = vld [vmem:[%s1123_s25 + $0x38] sm:$0xf0]  ;;  %v1032_v43 = vld [vmem:[%s1123_s25 + $0xc4] sm:$0xf] }
  0x16   : > { %v895_v39 = vor.u32 %v1027_v37, %v894_v36  ;;  %v851_v42 = vor.u32 %v1014_v40, %v848_v41  ;;  %v920_v44 = vld [vmem:[%s1123_s25 + $0xc8] sm:$0xf0]  ;;  %v838_v45 = vld [vmem:[%s1123_s25 + $0x20] sm:$0xf]  ;;  %v1013_v46 = vld [vmem:[%s1123_s25 + $0x24] sm:$0xf0] }
  0x17   : > { %v923_v47 = vor.u32 %v1032_v43, %v920_v44  ;;  %v902_v48 = vld [vmem:[%s1123_s25 + $0xa0] sm:$0xf]  ;;  %v1029_v49 = vld [vmem:[%s1123_s25 + $0xa4] sm:$0xf0]  ;;  %v839_v50 = vor.u32 %v1013_v46, %v838_v45  ;;  %v1016_v52 = vld [vmem:[%s1123_s25 + $0x44] sm:$0xf] }
  0x18   : > { %484 = vmatpush.bf16.msra.mxu0 %v1044_v10  ;;  %v903_v51 = vor.u32 %v1029_v49, %v902_v48  ;;  %v856_v53 = vld [vmem:[%s1123_s25 + $0x48] sm:$0xf0]  ;;  %v1034_v55 = vld [vmem:[%s1123_s25 + $0xd4] sm:$0xf]  ;;  %v928_v56 = vld [vmem:[%s1123_s25 + $0xd8] sm:$0xf0] }
  0x19   : > { %1053 = vmatpush.bf16.msra.mxu2 %v1044_v10  ;;  %v859_v54 = vor.u32 %v1016_v52, %v856_v53  ;;  %v846_v57 = vld [vmem:[%s1123_s25 + $0x30] sm:$0xf]  ;;  %v1015_v58 = vld [vmem:[%s1123_s25 + $0x34] sm:$0xf0]  ;;  %v931_v59 = vor.u32 %v1034_v55, %v928_v56  ;;  %v1018_v0 = vld [vmem:[%s1123_s25 + $0x54] sm:$0xf] }
  0x1a   : > { %v910_v60 = vld [vmem:[%s1123_s25 + $0xb0] sm:$0xf]  ;;  %v1031_v61 = vld [vmem:[%s1123_s25 + $0xb4] sm:$0xf0]  ;;  %v847_v62 = vor.u32 %v1015_v58, %v846_v57  ;;  %v864_v1 = vld [vmem:[%s1123_s25 + $0x58] sm:$0xf0] }
  0x1b   : > { %v911_v63 = vor.u32 %v1031_v61, %v910_v60  ;;  %v867_v2 = vor.u32 %v1018_v0, %v864_v1  ;;  %v1036_v3 = vld [vmem:[%s1123_s25 + $0xe4] sm:$0xf]  ;;  %v936_v4 = vld [vmem:[%s1123_s25 + $0xe8] sm:$0xf0]  ;;  %v854_v5 = vld [vmem:[%s1123_s25 + $0x40] sm:$0xf] }
  0x1c   : > { %485 = vmatpush.bf16.msra.mxu0 %v1043_v12  ;;  %v1017_v6 = vld [vmem:[%s1123_s25 + $0x44] sm:$0xf0]  ;;  %v939_v7 = vor.u32 %v1036_v3, %v936_v4  ;;  %v918_v8 = vld [vmem:[%s1123_s25 + $0xc0] sm:$0xf]  ;;  %v1038_v15 = vld [vmem:[%s1123_s25 + $0xf4] sm:$0xf] }
  0x1d   : > { %1054 = vmatpush.bf16.msra.mxu2 %v1043_v12  ;;  %v1033_v9 = vld [vmem:[%s1123_s25 + $0xc4] sm:$0xf0]  ;;  %v855_v10 = vor.u32 %v1017_v6, %v854_v5  ;;  %v1020_v12 = vld [vmem:[%s1123_s25 + $0x64] sm:$0xf]  ;;  %v1019_v18 = vld [vmem:[%s1123_s25 + $0x54] sm:$0xf0] }
  0x1e   : > { %v919_v11 = vor.u32 %v1033_v9, %v918_v8  ;;  %v1035_v21 = vld [vmem:[%s1123_s25 + $0xd4] sm:$0xf0]  ;;  %v1022_v24 = vld [vmem:[%s1123_s25 + $0x74] sm:$0xf]  ;;  %v880_v25 = vld [vmem:[%s1123_s25 + $0x78] sm:$0xf0] }
  0x1f   : > { %v1021_v28 = vld [vmem:[%s1123_s25 + $0x64] sm:$0xf0]  ;;  %v934_v29 = vld [vmem:[%s1123_s25 + $0xe0] sm:$0xf]  ;;  %v1024_v33 = vld [vmem:[%s1123_s25 + $0x84] sm:$0xf] }
  0x20   : > { %486 = vmatpush.bf16.msra.mxu0 %v1042_v13  ;;  %v888_v34 = vld [vmem:[%s1123_s25 + $0x88] sm:$0xf0]  ;;  %v878_v37 = vld [vmem:[%s1123_s25 + $0x70] sm:$0xf]  ;;  %v1039_v40 = vld [vmem:[%s1123_s25 + $0xf4] sm:$0xf0] }
  0x21   : > { %1055 = vmatpush.bf16.msra.mxu2 %v1042_v13  ;;  %v872_v13 = vld [vmem:[%s1123_s25 + $0x68] sm:$0xf0]  ;;  %v1226_v45 = vld [vmem:[%s1341_s2] ss:$0 sm:$0xff] }
  0x22   : > { %v875_v14 = vor.u32 %v1020_v12, %v872_v13 }
  0x24   : > { %989 = vmatmul.msk.bf16.gmra.mxu1 %vm432_vm0, %v835_v16  ;;  %487 = vmatpush.bf16.msra.mxu0 %v1041_v17  ;;  %v944_v16 = vld [vmem:[%s1123_s25 + $0xf8] sm:$0xf0] }
  0x25   : > { %1056 = vmatpush.bf16.msra.mxu2 %v1041_v17  ;;  %998 = vmatmul.msk.bf16.gmra.mxu3 %vm432_vm0, %v907_v23  ;;  %v862_v17 = vld [vmem:[%s1123_s25 + $0x50] sm:$0xf]  ;;  %v947_v19 = vor.u32 %v1038_v15, %v944_v16 }
  0x26   : > { %v863_v22 = vor.u32 %v1019_v18, %v862_v17 }
  0x28   : > { %488 = vmatpush.bf16.msra.mxu0 %v1040_v20 }
  0x29   : > { %1057 = vmatpush.bf16.msra.mxu2 %v1040_v20  ;;  %v926_v20 = vld [vmem:[%s1123_s25 + $0xd0] sm:$0xf] }
  0x2a   : > { %v927_v23 = vor.u32 %v1035_v21, %v926_v20 }
  0x2b   : > { %489 = vmatmul.bf16.vlgmr.msra.gmra.mxu0 %v823_v26  ;;  %v883_v26 = vor.u32 %v1022_v24, %v880_v25 }
  0x2c   : > { %529 = vmatmul.bf16.vlgmr.msra.gmra.mxu2 %v887_v27  ;;  %v870_v27 = vld [vmem:[%s1123_s25 + $0x60] sm:$0xf] }
  0x2d   : > { %v871_v31 = vor.u32 %v1021_v28, %v870_v27 }
  0x34   : > { %990 = vmatmul.msk.bf16.gmra.mxu1 %vm432_vm0, %v843_v30  ;;  %v1037_v30 = vld [vmem:[%s1123_s25 + $0xe4] sm:$0xf0] }
  0x35   : > { %999 = vmatmul.msk.bf16.gmra.mxu3 %vm432_vm0, %v915_v35  ;;  %v935_v32 = vor.u32 %v1037_v30, %v934_v29  ;;  %v891_v35 = vor.u32 %v1024_v33, %v888_v34 }
  0x3b   : > { %494 = vmatmul.bf16.gmra.mxu0 %v831_v38  ;;  %v1023_v38 = vld [vmem:[%s1123_s25 + $0x74] sm:$0xf0] }
  0x3c   : > { %534 = vmatmul.bf16.gmra.mxu2 %v895_v39  ;;  %v942_v39 = vld [vmem:[%s1123_s25 + $0xf0] sm:$0xf]  ;;  %v879_v41 = vor.u32 %v1023_v38, %v878_v37 }
  0x44   : > { %991 = vmatmul.msk.bf16.gmra.mxu1 %vm432_vm0, %v851_v42  ;;  %v943_v42 = vor.u32 %v1039_v40, %v942_v39 }
  0x45   : > { %1000 = vmatmul.msk.bf16.gmra.mxu3 %vm432_vm0, %v923_v47 }
  0x4b   : > { %499 = vmatmul.bf16.gmra.mxu0 %v839_v50 }
  0x4c   : > { %539 = vmatmul.bf16.gmra.mxu2 %v903_v51 }
  0x54   : > { %992 = vmatmul.msk.bf16.gmra.mxu1 %vm432_vm0, %v859_v54 }
  0x55   : > { %1001 = vmatmul.msk.bf16.gmra.mxu3 %vm432_vm0, %v931_v59 }
  0x5b   : > { %504 = vmatmul.bf16.gmra.mxu0 %v847_v62 }
  0x5c   : > { %544 = vmatmul.bf16.gmra.mxu2 %v911_v63 }
  0x64   : > { %993 = vmatmul.msk.bf16.gmra.mxu1 %vm432_vm0, %v867_v2 }
  0x65   : > { %1002 = vmatmul.msk.bf16.gmra.mxu3 %vm432_vm0, %v939_v7 }
  0x6b   : > { %509 = vmatmul.bf16.gmra.mxu0 %v855_v10 }
  0x6c   : > { %549 = vmatmul.bf16.gmra.mxu2 %v919_v11 }
  0x74   : > { %994 = vmatmul.msk.bf16.gmra.mxu1 %vm432_vm0, %v875_v14 }
  0x75   : > { %1003 = vmatmul.msk.bf16.gmra.mxu3 %vm432_vm0, %v947_v19 }
  0x7b   : > { %514 = vmatmul.bf16.gmra.mxu0 %v863_v22 }
  0x7c   : > { %554 = vmatmul.bf16.gmra.mxu2 %v927_v23 }
  0x84   : > { %995 = vmatmul.msk.bf16.gmra.mxu1 %vm432_vm0, %v883_v26 }
  0x8b   : > { %519 = vmatmul.bf16.gmra.mxu0 %v871_v31 }
  0x8c   : > { %559 = vmatmul.bf16.gmra.mxu2 %v935_v32 }
  0x91   : > { %v579_v36 = vpop.f32.mrf.mxu1 }
  0x94   : > { %996 = vmatmul.msk.bf16.gmra.mxu1 %vm432_vm0, %v891_v35 }
  0x98   : > { %v624_v46 = vpop.f32.mrf.mxu3 }
  0x99   : > { %v581_v43 = vpop.f32.mrf.mxu1 }
  0x9b   : > { %524 = vmatmul.bf16.gmra.mxu0 %v879_v41 }
  0x9c   : > { %564 = vmatmul.bf16.gmra.mxu2 %v943_v42 }
  0xa0   : > { %v626_v57 = vpop.f32.mrf.mxu3 }
  0xa1   : > { %v584_v44 = vpop.f32.mrf.mxu1 }
  0xa8   : > { %v490_v47 = vpop.f32.mrf.mxu0  ;;  %v629_v2 = vpop.f32.mrf.mxu3 }
  0xa9   : > { %v491_v48 = vadd.f32 %v1226_v45, %v490_v47  ;;  %v586_v49 = vpop.f32.mrf.mxu1 }
  0xab   : > { %v580_v50 = vadd.f32 %v579_v36, %v491_v48 }
  0xad   : > { %v659_v51 = vmax.f32 %v580_v50, 0.0 }
  0xaf   : > { %v691_v52 = vpack.c.bf16 %v659_v51, %v659_v51  ;;  %v1235_v53 = vpop.f32.mrf.mxu2 }
  0xb0   : > { %v492_v54 = vpop.f32.mrf.mxu0  ;;  %v631_v14 = vpop.f32.mrf.mxu3 }
  0xb1   : > { %724 = vst.msk [vmem:[%s1233_s18] sm:$0xf] %vm723_vm1, %v691_v52  ;;  %v493_v55 = vadd.f32 %v1226_v45, %v492_v54  ;;  %v589_v56 = vpop.f32.mrf.mxu1 }
  0xb3   : > { %v582_v58 = vadd.f32 %v581_v43, %v493_v55 }
  0xb5   : > { %v660_v59 = vmax.f32 %v582_v58, 0.0 }
  0xb7   : > { %v692_v60 = vpack.c.bf16 %v660_v59, %v660_v59  ;;  %v1240_v61 = vpop.f32.mrf.mxu2 }
  0xb8   : > { %v495_v62 = vpop.f32.mrf.mxu0  ;;  %v634_v29 = vpop.f32.mrf.mxu3 }
  0xb9   : > { %725 = vst.msk [vmem:[%s1233_s18 + $0x4] sm:$0xf] %vm723_vm1, %v692_v60  ;;  %v496_v63 = vadd.f32 %v1226_v45, %v495_v62  ;;  %v591_v0 = vpop.f32.mrf.mxu1 }
  0xbb   : > { %v585_v1 = vadd.f32 %v584_v44, %v496_v63 }
  0xbd   : > { %v661_v3 = vmax.f32 %v585_v1, 0.0 }
  0xbf   : > { %v693_v4 = vpack.c.bf16 %v661_v3, %v661_v3  ;;  %v535_v5 = vpop.f32.mrf.mxu2 }
  0xc0   : > { %v536_v6 = vadd.f32 %v1226_v45, %v535_v5  ;;  %v497_v7 = vpop.f32.mrf.mxu0 }
  0xc1   : > { %726 = vst.msk [vmem:[%s1233_s18 + $0x8] sm:$0xf] %vm723_vm1, %v693_v4  ;;  %v498_v8 = vadd.f32 %v1226_v45, %v497_v7  ;;  %v594_v9 = vpop.f32.mrf.mxu1 }
  0xc2   : > { %v625_v10 = vadd.f32 %v624_v46, %v536_v6  ;;  %v636_v46 = vpop.f32.mrf.mxu3 }
  0xc3   : > { %v587_v11 = vadd.f32 %v586_v49, %v498_v8 }
  0xc4   : > { %v677_v12 = vmax.f32 %v625_v10, 0.0 }
  0xc5   : > { %v662_v13 = vmax.f32 %v587_v11, 0.0 }
  0xc6   : > { %v709_v15 = vpack.c.bf16 %v677_v12, %v677_v12 }
  0xc7   : > { %v694_v16 = vpack.c.bf16 %v662_v13, %v662_v13  ;;  %v537_v17 = vpop.f32.mrf.mxu2 }
  0xc8   : > { %742 = vst.msk [vmem:[%s1233_s18 + $0x48] sm:$0xf] %vm723_vm1, %v709_v15  ;;  %v538_v18 = vadd.f32 %v1226_v45, %v537_v17  ;;  %v500_v19 = vpop.f32.mrf.mxu0 }
  0xc9   : > { %727 = vst.msk [vmem:[%s1233_s18 + $0xc] sm:$0xf] %vm723_vm1, %v694_v16  ;;  %v501_v20 = vadd.f32 %v1226_v45, %v500_v19  ;;  %v596_v21 = vpop.f32.mrf.mxu1 }
  0xca   : > { %v627_v22 = vadd.f32 %v626_v57, %v538_v18  ;;  %v639_v62 = vpop.f32.mrf.mxu3 }
  0xcb   : > { %v590_v23 = vadd.f32 %v589_v56, %v501_v20 }
  0xcc   : > { %v678_v24 = vmax.f32 %v627_v22, 0.0 }
  0xcd   : > { %v663_v25 = vmax.f32 %v590_v23, 0.0 }
  0xce   : > { %v710_v26 = vpack.c.bf16 %v678_v24, %v678_v24 }
  0xcf   : > { %v695_v27 = vpack.c.bf16 %v663_v25, %v663_v25  ;;  %v540_v28 = vpop.f32.mrf.mxu2 }
  0xd0   : > { %743 = vst.msk [vmem:[%s1233_s18 + $0x4c] sm:$0xf] %vm723_vm1, %v710_v26  ;;  %v541_v30 = vadd.f32 %v1226_v45, %v540_v28  ;;  %v502_v31 = vpop.f32.mrf.mxu0 }
  0xd1   : > { %728 = vst.msk [vmem:[%s1233_s18 + $0x10] sm:$0xf] %vm723_vm1, %v695_v27  ;;  %v503_v32 = vadd.f32 %v1226_v45, %v502_v31  ;;  %v599_v33 = vpop.f32.mrf.mxu1 }
  0xd2   : > { %v630_v34 = vadd.f32 %v629_v2, %v541_v30  ;;  %v641_v12 = vpop.f32.mrf.mxu3 }
  0xd3   : > { %v592_v35 = vadd.f32 %v591_v0, %v503_v32 }
  0xd4   : > { %v679_v36 = vmax.f32 %v630_v34, 0.0 }
  0xd5   : > { %v664_v37 = vmax.f32 %v592_v35, 0.0 }
  0xd6   : > { %v711_v38 = vpack.c.bf16 %v679_v36, %v679_v36 }
  0xd7   : > { %v696_v39 = vpack.c.bf16 %v664_v37, %v664_v37  ;;  %v542_v40 = vpop.f32.mrf.mxu2 }
  0xd8   : > { %744 = vst.msk [vmem:[%s1233_s18 + $0x50] sm:$0xf] %vm723_vm1, %v711_v38  ;;  %v543_v41 = vadd.f32 %v1226_v45, %v542_v40  ;;  %v505_v42 = vpop.f32.mrf.mxu0 }
  0xd9   : > { %729 = vst.msk [vmem:[%s1233_s18 + $0x14] sm:$0xf] %vm723_vm1, %v696_v39  ;;  %v506_v43 = vadd.f32 %v1226_v45, %v505_v42  ;;  %v601_v44 = vpop.f32.mrf.mxu1 }
  0xda   : > { %v632_v47 = vadd.f32 %v631_v14, %v543_v41  ;;  %v644_v27 = vpop.f32.mrf.mxu3 }
  0xdb   : > { %v595_v48 = vadd.f32 %v594_v9, %v506_v43 }
  0xdc   : > { %v680_v49 = vmax.f32 %v632_v47, 0.0 }
  0xdd   : > { %v665_v50 = vmax.f32 %v595_v48, 0.0 }
  0xde   : > { %v712_v51 = vpack.c.bf16 %v680_v49, %v680_v49 }
  0xdf   : > { %v697_v52 = vpack.c.bf16 %v665_v50, %v665_v50  ;;  %v545_v54 = vpop.f32.mrf.mxu2 }
  0xe0   : > { %745 = vst.msk [vmem:[%s1233_s18 + $0x54] sm:$0xf] %vm723_vm1, %v712_v51  ;;  %v546_v55 = vadd.f32 %v1226_v45, %v545_v54  ;;  %v507_v56 = vpop.f32.mrf.mxu0 }
  0xe1   : > { %730 = vst.msk [vmem:[%s1233_s18 + $0x18] sm:$0xf] %vm723_vm1, %v697_v52  ;;  %v508_v57 = vadd.f32 %v1226_v45, %v507_v56  ;;  %v604_v58 = vpop.f32.mrf.mxu1 }
  0xe2   : > { %v635_v59 = vadd.f32 %v634_v29, %v546_v55  ;;  %v646_v43 = vpop.f32.mrf.mxu3 }
  0xe3   : > { %v597_v60 = vadd.f32 %v596_v21, %v508_v57 }
  0xe4   : > { %v681_v63 = vmax.f32 %v635_v59, 0.0 }
  0xe5   : > { %v666_v0 = vmax.f32 %v597_v60, 0.0 }
  0xe6   : > { %v713_v1 = vpack.c.bf16 %v681_v63, %v681_v63 }
  0xe7   : > { %v698_v2 = vpack.c.bf16 %v666_v0, %v666_v0  ;;  %v547_v3 = vpop.f32.mrf.mxu2 }
  0xe8   : > { %746 = vst.msk [vmem:[%s1233_s18 + $0x58] sm:$0xf] %vm723_vm1, %v713_v1  ;;  %v548_v4 = vadd.f32 %v1226_v45, %v547_v3  ;;  %v510_v5 = vpop.f32.mrf.mxu0 }
  0xe9   : > { %731 = vst.msk [vmem:[%s1233_s18 + $0x1c] sm:$0xf] %vm723_vm1, %v698_v2  ;;  %v511_v6 = vadd.f32 %v1226_v45, %v510_v5  ;;  %v606_v7 = vpop.f32.mrf.mxu1  ;;  %v531_v2 = vadd.f32 %v1226_v45, %v1235_v53 }
  0xea   : > { %v637_v8 = vadd.f32 %v636_v46, %v548_v4  ;;  %v649_v59 = vpop.f32.mrf.mxu3 }
  0xeb   : > { %v600_v9 = vadd.f32 %v599_v33, %v511_v6 }
  0xec   : > { %v682_v10 = vmax.f32 %v637_v8, 0.0 }
  0xed   : > { %v667_v11 = vmax.f32 %v600_v9, 0.0 }
  0xee   : > { %v714_v13 = vpack.c.bf16 %v682_v10, %v682_v10 }
  0xef   : > { %v699_v14 = vpack.c.bf16 %v667_v11, %v667_v11  ;;  %v550_v15 = vpop.f32.mrf.mxu2 }
  0xf0   : > { %747 = vst.msk [vmem:[%s1233_s18 + $0x5c] sm:$0xf] %vm723_vm1, %v714_v13  ;;  %v551_v16 = vadd.f32 %v1226_v45, %v550_v15  ;;  %v512_v17 = vpop.f32.mrf.mxu0 }
  0xf1   : > { %732 = vst.msk [vmem:[%s1233_s18 + $0x20] sm:$0xf] %vm723_vm1, %v699_v14  ;;  %v513_v18 = vadd.f32 %v1226_v45, %v512_v17  ;;  %v609_v19 = vpop.f32.mrf.mxu1  ;;  %v533_v17 = vadd.f32 %v1226_v45, %v1240_v61 }
  0xf2   : > { %v640_v20 = vadd.f32 %v639_v62, %v551_v16  ;;  %v651_v53 = vpop.f32.mrf.mxu3 }
  0xf3   : > { %v602_v21 = vadd.f32 %v601_v44, %v513_v18 }
  0xf4   : > { %v683_v22 = vmax.f32 %v640_v20, 0.0 }
  0xf5   : > { %v668_v23 = vmax.f32 %v602_v21, 0.0 }
  0xf6   : > { %v715_v24 = vpack.c.bf16 %v683_v22, %v683_v22 }
  0xf7   : > { %v700_v25 = vpack.c.bf16 %v668_v23, %v668_v23  ;;  %v552_v26 = vpop.f32.mrf.mxu2 }
  0xf8   : > { %748 = vst.msk [vmem:[%s1233_s18 + $0x60] sm:$0xf] %vm723_vm1, %v715_v24  ;;  %v553_v28 = vadd.f32 %v1226_v45, %v552_v26  ;;  %v515_v29 = vpop.f32.mrf.mxu0 }
  0xf9   : > { %733 = vst.msk [vmem:[%s1233_s18 + $0x24] sm:$0xf] %vm723_vm1, %v700_v25  ;;  %v516_v30 = vadd.f32 %v1226_v45, %v515_v29  ;;  %v611_v31 = vpop.f32.mrf.mxu1 }
  0xfa   : > { %v642_v32 = vadd.f32 %v641_v12, %v553_v28 }
  0xfb   : > { %v605_v33 = vadd.f32 %v604_v58, %v516_v30  ;;  %v654_v30 = vpop.f32.mrf.mxu3 }
  0xfc   : > { %v684_v34 = vmax.f32 %v642_v32, 0.0 }
  0xfd   : > { %v669_v35 = vmax.f32 %v605_v33, 0.0 }
  0xfe   : > { %v716_v36 = vpack.c.bf16 %v684_v34, %v684_v34 }
  0xff   : > { %v701_v37 = vpack.c.bf16 %v669_v35, %v669_v35  ;;  %v555_v38 = vpop.f32.mrf.mxu2 }
 0x100   : > { %749 = vst.msk [vmem:[%s1233_s18 + $0x64] sm:$0xf] %vm723_vm1, %v716_v36  ;;  %v556_v39 = vadd.f32 %v1226_v45, %v555_v38  ;;  %v517_v40 = vpop.f32.mrf.mxu0 }
 0x101   : > { %734 = vst.msk [vmem:[%s1233_s18 + $0x28] sm:$0xf] %vm723_vm1, %v701_v37  ;;  %v518_v41 = vadd.f32 %v1226_v45, %v517_v40  ;;  %v614_v42 = vpop.f32.mrf.mxu1 }
 0x102   : > { %v645_v44 = vadd.f32 %v644_v27, %v556_v39 }
 0x103   : > { %v607_v46 = vadd.f32 %v606_v7, %v518_v41 }
 0x104   : > { %v685_v47 = vmax.f32 %v645_v44, 0.0 }
 0x105   : > { %v670_v48 = vmax.f32 %v607_v46, 0.0 }
 0x106   : > { %v717_v49 = vpack.c.bf16 %v685_v47, %v685_v47 }
 0x107   : > { %v702_v50 = vpack.c.bf16 %v670_v48, %v670_v48  ;;  %v557_v51 = vpop.f32.mrf.mxu2 }
 0x108   : > { %750 = vst.msk [vmem:[%s1233_s18 + $0x68] sm:$0xf] %vm723_vm1, %v717_v49  ;;  %v558_v52 = vadd.f32 %v1226_v45, %v557_v51  ;;  %v520_v54 = vpop.f32.mrf.mxu0 }
 0x109   : > { %735 = vst.msk [vmem:[%s1233_s18 + $0x2c] sm:$0xf] %vm723_vm1, %v702_v50  ;;  %v521_v55 = vadd.f32 %v1226_v45, %v520_v54  ;;  %v616_v56 = vpop.f32.mrf.mxu1 }
 0x10a   : > { %v647_v57 = vadd.f32 %v646_v43, %v558_v52  ;;  %v656_v43 = vpop.f32.mrf.mxu3 }
 0x10b   : > { %v610_v58 = vadd.f32 %v609_v19, %v521_v55 }
 0x10c   : > { %v686_v60 = vmax.f32 %v647_v57, 0.0 }
 0x10d   : > { %v671_v62 = vmax.f32 %v610_v58, 0.0 }
 0x10e   : > { %v718_v63 = vpack.c.bf16 %v686_v60, %v686_v60 }
 0x10f   : > { %v703_v0 = vpack.c.bf16 %v671_v62, %v671_v62  ;;  %v560_v1 = vpop.f32.mrf.mxu2 }
 0x110   : > { %751 = vst.msk [vmem:[%s1233_s18 + $0x6c] sm:$0xf] %vm723_vm1, %v718_v63  ;;  %v561_v3 = vadd.f32 %v1226_v45, %v560_v1  ;;  %v522_v4 = vpop.f32.mrf.mxu0 }
 0x111   : > { %736 = vst.msk [vmem:[%s1233_s18 + $0x30] sm:$0xf] %vm723_vm1, %v703_v0  ;;  %v523_v5 = vadd.f32 %v1226_v45, %v522_v4  ;;  %v619_v6 = vpop.f32.mrf.mxu1 }
 0x112   : > { %v650_v7 = vadd.f32 %v649_v59, %v561_v3  ;;  %v620_v8 = vadd.f32 %v619_v6, %v531_v2 }
 0x113   : > { %v612_v9 = vadd.f32 %v611_v31, %v523_v5 }
 0x114   : > { %v687_v10 = vmax.f32 %v650_v7, 0.0  ;;  %v675_v11 = vmax.f32 %v620_v8, 0.0 }
 0x115   : > { %v672_v12 = vmax.f32 %v612_v9, 0.0 }
 0x116   : > { %v719_v13 = vpack.c.bf16 %v687_v10, %v687_v10  ;;  %v707_v14 = vpack.c.bf16 %v675_v11, %v675_v11 }
 0x117   : > { %v704_v15 = vpack.c.bf16 %v672_v12, %v672_v12  ;;  %v562_v16 = vpop.f32.mrf.mxu2 }
 0x118   : > { %752 = vst.msk [vmem:[%s1233_s18 + $0x70] sm:$0xf] %vm723_vm1, %v719_v13  ;;  %v563_v18 = vadd.f32 %v1226_v45, %v562_v16  ;;  %v525_v19 = vpop.f32.mrf.mxu0 }
 0x119   : > { %737 = vst.msk [vmem:[%s1233_s18 + $0x34] sm:$0xf] %vm723_vm1, %v704_v15  ;;  %v526_v20 = vadd.f32 %v1226_v45, %v525_v19  ;;  %v621_v21 = vpop.f32.mrf.mxu1 }
 0x11a   : > { %740 = vst.msk [vmem:[%s1233_s18 + $0x40] sm:$0xf] %vm723_vm1, %v707_v14  ;;  %v652_v22 = vadd.f32 %v651_v53, %v563_v18  ;;  %v622_v23 = vadd.f32 %v621_v21, %v533_v17 }
 0x11b   : > { %v615_v24 = vadd.f32 %v614_v42, %v526_v20 }
 0x11c   : > { %v688_v25 = vmax.f32 %v652_v22, 0.0  ;;  %v676_v61 = vmax.f32 %v622_v23, 0.0 }
 0x11d   : > { %v673_v26 = vmax.f32 %v615_v24, 0.0 }
 0x11e   : > { %v720_v27 = vpack.c.bf16 %v688_v25, %v688_v25  ;;  %v708_v28 = vpack.c.bf16 %v676_v61, %v676_v61 }
 0x11f   : > { %v705_v29 = vpack.c.bf16 %v673_v26, %v673_v26  ;;  %v565_v31 = vpop.f32.mrf.mxu2 }
 0x120   : > { %753 = vst.msk [vmem:[%s1233_s18 + $0x74] sm:$0xf] %vm723_vm1, %v720_v27  ;;  %v566_v32 = vadd.f32 %v1226_v45, %v565_v31  ;;  %v527_v33 = vpop.f32.mrf.mxu0 }
 0x121   : > { %738 = vst.msk [vmem:[%s1233_s18 + $0x38] sm:$0xf] %vm723_vm1, %v705_v29  ;;  %v528_v34 = vadd.f32 %v1226_v45, %v527_v33 }
 0x122   : > { %741 = vst.msk [vmem:[%s1233_s18 + $0x44] sm:$0xf] %vm723_vm1, %v708_v28  ;;  %v655_v35 = vadd.f32 %v654_v30, %v566_v32 }
 0x123   : > { %v617_v36 = vadd.f32 %v616_v56, %v528_v34 }
 0x124   : > { %v689_v37 = vmax.f32 %v655_v35, 0.0 }
 0x125   : > { %v674_v38 = vmax.f32 %v617_v36, 0.0 }
 0x126   : > { %v721_v39 = vpack.c.bf16 %v689_v37, %v689_v37 }
 0x127   : > { %v706_v40 = vpack.c.bf16 %v674_v38, %v674_v38  ;;  %v567_v41 = vpop.f32.mrf.mxu2 }
 0x128   : > { %754 = vst.msk [vmem:[%s1233_s18 + $0x78] sm:$0xf] %vm723_vm1, %v721_v39  ;;  %v568_v42 = vadd.f32 %v1226_v45, %v567_v41 }
 0x129   : > { %739 = vst.msk [vmem:[%s1233_s18 + $0x3c] sm:$0xf] %vm723_vm1, %v706_v40 }
 0x12a   : > { %v657_v44 = vadd.f32 %v656_v43, %v568_v42 }
 0x12c   : > { %v690_v46 = vmax.f32 %v657_v44, 0.0 }
 0x12e   : > { %v722_v47 = vpack.c.bf16 %v690_v46, %v690_v46 }
 0x130   : > { %755 = vst.msk [vmem:[%s1233_s18 + $0x7c] sm:$0xf] %vm723_vm1, %v722_v47 }
 0x131 PF: > { %s13_s12 = sadd.s32 1, %s1075_s12  }
 0x132   : > { %p10_p4 = scmp.ge.s32.totalorder %s13_s12, 4  }
 0x134   :  { %12 = sbr.rel (!%p10_p4) target bundleno = 1 (0x1), region = 62 }

// kernel: resnet_forward.8
= control target key start
LH: loop header
LB: loop body
LE: loop exit
PB: predicated region body
PF: predicated region fallthrough
CT: control target
= control target key end

     0   :  { %s744_s6 = smov 0   ;;  %s883_s0 = inlined_call_operand.vmem [shape: bf16[2,352,16], index: 0, kind: input, shape index: {}]   ;;  %s884_s1 = inlined_call_operand.vmem [shape: bf16[2,72,16], index: 1, kind: output, shape index: {}]  }
   0x1 LB: > { %s628_s7 = sadd.s32 4294967295, %s732_s6   ;;  %p632_p0 = scmp.ge.s32.totalorder %s732_s6, 1  ;;  %s732_s6 = sphi %s744_s6, %s11_s6  }
   0x2   : > { %p87_p1 = scmp.lt.s32.totalorder %s732_s6, 3 }
   0x4   : > { %p88_p2 = pnand %p632_p0, %p87_p1 }
   0x5   : > { %p107_p3 = scmp.lt.s32.totalorder (!%p88_p2), %s628_s7, 1 }
   0x6   : > { %91 = sbr.rel (%p88_p2) target bundleno = 78 (0x4e), region = 24 }
   0xb   : > { %s886_s7 = smov (!%p107_p3, %s628_s7), 1  ;;  %vm192_vm0 = vcmask 1046528   ;;  %vm516_vm1 = vcmask 1045504   ;;  %vm563_vm2 = vcmask 125952  }
   0xc   : > { %s716_s8 = smul.u32 176, %s886_s7 }
   0xd   : > { %s717_s12 = smul.u32 36, %s886_s7 }
   0xe   : > { %s758_s11 = scalar_lea.vmem %s883_s0, %s716_s8 }
   0xf   : > { %v638_v0 = vld [vmem:[%s758_s11] sm:$0xff]   ;;  %v701_v1 = vld [vmem:[%s758_s11 + $0x8] sm:$0xff]   ;;  %v704_v6 = vld [vmem:[%s758_s11 + $0x30] sm:$0xff]   ;;  %s803_s15 = scalar_lea.vmem %s884_s1, %s717_s12 }
  0x10   : > { %v126_v2 = vld [vmem:[%s758_s11 + $0x2c] sm:$0xf]  ;;  %v639_v3 = vunpack.c.l.bf16 %v638_v0  ;;  %v640_v4 = vunpack.c.h.bf16 %v638_v0  ;;  %v643_v5 = vunpack.c.l.bf16 %v701_v1  ;;  %v708_v8 = vld [vmem:[%s758_s11 + $0x58] sm:$0xff]   ;;  %v284_v9 = vld [vmem:[%s758_s11 + $0x84] sm:$0xf]  ;;  %v655_v10 = vunpack.c.l.bf16 %v704_v6 }
  0x11   : > { %v144_v7 = vunpack.c.l.bf16 %v126_v2  ;;  %v656_v11 = vunpack.c.h.bf16 %v704_v6  ;;  %v671_v12 = vunpack.c.l.bf16 %v708_v8  ;;  %v672_v13 = vunpack.c.h.bf16 %v708_v8  ;;  %v504_v18 = vld [vmem:[%s758_s11 + $0x4] sm:$0xe]  ;;  %v768_v23 = vld [vmem:[%s758_s11 + $0x38] sm:$0xff]   ;;  %v712_v33 = vld [vmem:[%s758_s11 + $0x88] sm:$0xff]  }
  0x12   : > { %v193_v15 = vrot.slane %v639_v3, 1  ;;  %v194_v16 = vrot.slane %v640_v4, 1  ;;  %v196_v17 = vrot.slane %v643_v5, 1  ;;  %v154_v19 = vmax.f32 %v640_v4, %v655_v10  ;;  %v709_v32 = vld [vmem:[%s758_s11 + $0x60] sm:$0xff]   ;;  %v702_v38 = vld [vmem:[%s758_s11 + $0x10] sm:$0xff]  }
  0x13   : > { %v153_v14 = vmax.f32 %v639_v3, %v144_v7  ;;  %v302_v20 = vunpack.c.l.bf16 %v284_v9  ;;  %v350_v21 = vrot.slane %v671_v12, 1  ;;  %v351_v22 = vrot.slane %v672_v13, 1 }
  0x14   : > { %v195_v24 = vsel %vm192_vm0, %v193_v15, %v194_v16  ;;  %v197_v25 = vsel %vm192_vm0, %v194_v16, %v196_v17  ;;  %v458_v26 = vrot.slane %v655_v10, 1  ;;  %v459_v27 = vrot.slane %v656_v11, 1 }
  0x15   : > { %v221_v28 = vmax.f32 %v153_v14, %v195_v24  ;;  %v222_v29 = vmax.f32 %v154_v19, %v197_v25  ;;  %v352_v30 = vsel %vm192_vm0, %v350_v21, %v351_v22  ;;  %v514_v31 = vunpack.c.l.bf16 %v504_v18 }
  0x16   : > { %v460_v34 = vsel %vm192_vm0, %v458_v26, %v459_v27  ;;  %v518_v35 = vrot.slane %v643_v5, 2  ;;  %v644_v36 = vunpack.c.h.bf16 %v701_v1  ;;  %v659_v37 = vunpack.c.l.bf16 %v768_v23 }
  0x17   : > { %v266_v39 = vmax.f32 %v221_v28, %v671_v12  ;;  %v267_v40 = vmax.f32 %v222_v29, %v672_v13  ;;  %v517_v41 = vrot.slane %v514_v31, 2  ;;  %v155_v42 = vmax.f32 %v643_v5, %v656_v11  ;;  %v706_v11 = vld [vmem:[%s758_s11 + $0x40] sm:$0xff]   ;;  %v792_v12 = vld [vmem:[%s758_s11 + $0x68] sm:$0xff]  }
  0x18   : > { %v198_v43 = vrot.slane %v644_v36, 1  ;;  %v675_v44 = vunpack.c.l.bf16 %v709_v32  ;;  %v687_v45 = vunpack.c.l.bf16 %v712_v33  ;;  %v461_v46 = vrot.slane %v659_v37, 1 }
  0x19   : > { %v311_v47 = vmax.f32 %v266_v39, %v302_v20  ;;  %v519_v48 = vsel %vm516_vm1, %v517_v41, %v518_v35  ;;  %v520_v49 = vrot.slane %v644_v36, 2  ;;  %v779_v50 = vunpack.c.l.bf16 %v702_v38 }
  0x1a   : > { %v199_v51 = vsel %vm192_vm0, %v196_v17, %v198_v43  ;;  %v312_v52 = vmax.f32 %v267_v40, %v687_v45  ;;  %v353_v53 = vrot.slane %v675_v44, 1  ;;  %v462_v54 = vsel %vm192_vm0, %v459_v27, %v461_v46  ;;  %v713_v17 = vld [vmem:[%s758_s11 + $0x90] sm:$0xff]  }
  0x1b   : > { %v378_v55 = vmax.f32 %v311_v47, %v352_v30  ;;  %v223_v56 = vmax.f32 %v155_v42, %v199_v51  ;;  %v521_v57 = vsel %vm516_vm1, %v518_v35, %v520_v49  ;;  %v660_v58 = vunpack.c.h.bf16 %v768_v23  ;;  %v703_v30 = vld [vmem:[%s758_s11 + $0x18] sm:$0xff]  }
  0x1c   : > { %v354_v59 = vsel %vm192_vm0, %v351_v22, %v353_v53  ;;  %v156_v60 = vmax.f32 %v644_v36, %v659_v37  ;;  %v200_v61 = vrot.slane %v779_v50, 1  ;;  %v676_v62 = vunpack.c.h.bf16 %v709_v32 }
  0x1d   : > { %v417_v63 = vmax.f32 %v378_v55, %v197_v25  ;;  %v268_v0 = vmax.f32 %v223_v56, %v675_v44  ;;  %v379_v1 = vmax.f32 %v312_v52, %v354_v59  ;;  %v688_v2 = vunpack.c.h.bf16 %v712_v33  ;;  %v825_v59 = vld [vmem:[%s758_s11 + $0x70] sm:$0xff]  }
  0x1e   : > { %v201_v3 = vsel %vm192_vm0, %v198_v43, %v200_v61  ;;  %v355_v4 = vrot.slane %v676_v62, 1  ;;  %v463_v5 = vrot.slane %v660_v58, 1  ;;  %v522_v6 = vrot.slane %v779_v50, 2 }
  0x1f   : > { %v486_v7 = vmax.f32 %v417_v63, %v460_v34  ;;  %v418_v8 = vmax.f32 %v379_v1, %v199_v51  ;;  %v224_v9 = vmax.f32 %v156_v60, %v201_v3  ;;  %v313_v10 = vmax.f32 %v268_v0, %v688_v2  ;;  %v714_v0 = vld [vmem:[%s758_s11 + $0x98] sm:$0xff]  }
  0x20   : > { %v356_v13 = vsel %vm192_vm0, %v353_v53, %v355_v4  ;;  %v464_v14 = vsel %vm192_vm0, %v461_v46, %v463_v5  ;;  %v523_v15 = vsel %vm516_vm1, %v520_v49, %v522_v6  ;;  %v797_v16 = vunpack.c.h.bf16 %v702_v38 }
  0x21   : > { %v545_v18 = vmax.f32 %v486_v7, %v519_v48  ;;  %v487_v19 = vmax.f32 %v418_v8, %v462_v54  ;;  %v269_v20 = vmax.f32 %v224_v9, %v676_v62  ;;  %v380_v21 = vmax.f32 %v313_v10, %v356_v13  ;;  %v707_v54 = vld [vmem:[%s758_s11 + $0x48] sm:$0xff]   ;;  %v125_v13 = vld [vmem:[%s758_s11 + $0x20] sm:$0xff]  }
  0x22   : > { %v663_v22 = vunpack.c.l.bf16 %v706_v11  ;;  %v157_v23 = vmax.f32 %v779_v50, %v660_v58  ;;  %v202_v24 = vrot.slane %v797_v16, 1  ;;  %v679_v25 = vunpack.c.l.bf16 %v792_v12 }
  0x23   : > { %v554_v26 = vpack.c.bf16 %v545_v18, %v545_v18  ;;  %v546_v27 = vmax.f32 %v487_v19, %v521_v57  ;;  %v419_v28 = vmax.f32 %v380_v21, %v201_v3  ;;  %v691_v29 = vunpack.c.l.bf16 %v713_v17 }
  0x24   : > { %v203_v31 = vsel %vm192_vm0, %v200_v61, %v202_v24  ;;  %v357_v32 = vrot.slane %v679_v25, 1  ;;  %v465_v33 = vrot.slane %v663_v22, 1  ;;  %v524_v34 = vrot.slane %v797_v16, 2 }
  0x25   : > { %564 = vst.msk [vmem:[%s803_s15] sm:$0xf] %vm563_vm2, %v554_v26  ;;  %v555_v35 = vpack.c.bf16 %v546_v27, %v546_v27  ;;  %v488_v36 = vmax.f32 %v419_v28, %v464_v14  ;;  %v225_v37 = vmax.f32 %v157_v23, %v203_v31  ;;  %v314_v38 = vmax.f32 %v269_v20, %v691_v29 }
  0x26   : > { %v358_v39 = vsel %vm192_vm0, %v355_v4, %v357_v32  ;;  %v466_v40 = vsel %vm192_vm0, %v463_v5, %v465_v33  ;;  %v651_v41 = vunpack.c.l.bf16 %v703_v30  ;;  %v664_v45 = vunpack.c.h.bf16 %v706_v11 }
  0x27   : > { %565 = vst.msk [vmem:[%s803_s15 + $0x4] sm:$0xf] %vm563_vm2, %v555_v35  ;;  %v547_v42 = vmax.f32 %v488_v36, %v523_v15  ;;  %v270_v43 = vmax.f32 %v225_v37, %v679_v25  ;;  %v381_v44 = vmax.f32 %v314_v38, %v358_v39  ;;  %v158_v46 = vmax.f32 %v797_v16, %v663_v22  ;;  %v715_v39 = vld [vmem:[%s758_s11 + $0xa0] sm:$0xff]  }
  0x28   : > { %v204_v47 = vrot.slane %v651_v41, 1  ;;  %v680_v48 = vunpack.c.h.bf16 %v792_v12  ;;  %v692_v49 = vunpack.c.h.bf16 %v713_v17  ;;  %v525_v52 = vsel %vm516_vm1, %v522_v6, %v524_v34 }
  0x29   : > { %v556_v50 = vpack.c.bf16 %v547_v42, %v547_v42  ;;  %v420_v51 = vmax.f32 %v381_v44, %v203_v31  ;;  %v467_v53 = vrot.slane %v664_v45, 1  ;;  %v822_v58 = vunpack.c.h.bf16 %v703_v30  ;;  %v247_v30 = vld [vmem:[%s758_s11 + $0x78] sm:$0xf]  ;;  %v435_v44 = vld [vmem:[%s758_s11 + $0x50] sm:$0xf] }
  0x2a   : > { %v205_v55 = vsel %vm192_vm0, %v202_v24, %v204_v47  ;;  %v315_v56 = vmax.f32 %v270_v43, %v692_v49  ;;  %v359_v57 = vrot.slane %v680_v48, 1  ;;  %v526_v63 = vrot.slane %v651_v41, 2 }
  0x2b   : > { %566 = vst.msk [vmem:[%s803_s15 + $0x8] sm:$0xf] %vm563_vm2, %v556_v50  ;;  %v489_v60 = vmax.f32 %v420_v51, %v466_v40  ;;  %v226_v61 = vmax.f32 %v158_v46, %v205_v55  ;;  %v468_v62 = vsel %vm192_vm0, %v465_v33, %v467_v53  ;;  %v667_v2 = vunpack.c.l.bf16 %v707_v54 }
  0x2c   : > { %v360_v1 = vsel %vm192_vm0, %v357_v32, %v359_v57  ;;  %v159_v3 = vmax.f32 %v651_v41, %v664_v45  ;;  %v206_v4 = vrot.slane %v822_v58, 1  ;;  %v683_v8 = vunpack.c.l.bf16 %v825_v59  ;;  %v171_v45 = vld [vmem:[%s758_s11 + $0x24] sm:$0x1] }
  0x2d   : > { %v548_v5 = vmax.f32 %v489_v60, %v525_v52  ;;  %v271_v6 = vmax.f32 %v226_v61, %v680_v48  ;;  %v382_v7 = vmax.f32 %v315_v56, %v360_v1  ;;  %v695_v10 = vunpack.c.l.bf16 %v714_v0 }
  0x2e   : > { %v207_v9 = vsel %vm192_vm0, %v204_v47, %v206_v4  ;;  %v469_v11 = vrot.slane %v667_v2, 1  ;;  %v528_v12 = vrot.slane %v822_v58, 2  ;;  %v361_v17 = vrot.slane %v683_v8, 1 }
  0x2f   : > { %v557_v14 = vpack.c.bf16 %v548_v5, %v548_v5  ;;  %v421_v15 = vmax.f32 %v382_v7, %v205_v55  ;;  %v227_v16 = vmax.f32 %v159_v3, %v207_v9  ;;  %v527_v18 = vsel %vm516_vm1, %v524_v34, %v526_v63  ;;  %v397_v3 = vld [vmem:[%s758_s11 + $0x28] sm:$0x1] }
  0x30   : > { %v316_v19 = vmax.f32 %v271_v6, %v695_v10  ;;  %v470_v20 = vsel %vm192_vm0, %v467_v53, %v469_v11  ;;  %v668_v21 = vunpack.c.h.bf16 %v707_v54  ;;  %v362_v24 = vsel %vm192_vm0, %v359_v57, %v361_v17 }
  0x31   : > { %567 = vst.msk [vmem:[%s803_s15 + $0xc] sm:$0xf] %vm563_vm2, %v557_v14  ;;  %v490_v22 = vmax.f32 %v421_v15, %v468_v62  ;;  %v272_v23 = vmax.f32 %v227_v16, %v683_v8  ;;  %v842_v25 = vunpack.c.l.bf16 %v125_v13  ;;  %v160_v27 = vmax.f32 %v822_v58, %v667_v2  ;;  %v329_v62 = vld [vmem:[%s758_s11 + $0x7c] sm:$0x1] }
  0x32   : > { %v383_v26 = vmax.f32 %v316_v19, %v362_v24  ;;  %v684_v28 = vunpack.c.h.bf16 %v825_v59  ;;  %v696_v29 = vunpack.c.h.bf16 %v714_v0  ;;  %v529_v32 = vsel %vm516_vm1, %v526_v63, %v528_v12 }
  0x33   : > { %v549_v31 = vmax.f32 %v490_v22, %v527_v18  ;;  %v208_v33 = vrot.slane %v842_v25, 1  ;;  %v471_v34 = vrot.slane %v668_v21, 1  ;;  %v161_v36 = vmax.f32 %v842_v25, %v668_v21 }
  0x34   : > { %v422_v35 = vmax.f32 %v383_v26, %v207_v9  ;;  %v317_v37 = vmax.f32 %v272_v23, %v696_v29  ;;  %v363_v38 = vrot.slane %v684_v28, 1  ;;  %v530_v42 = vrot.slane %v842_v25, 2 }
  0x35   : > { %v558_v40 = vpack.c.bf16 %v549_v31, %v549_v31  ;;  %v209_v41 = vsel %vm192_vm0, %v206_v4, %v208_v33  ;;  %v265_v43 = vunpack.c.l.bf16 %v247_v30  ;;  %v472_v49 = vsel %vm192_vm0, %v469_v11, %v471_v34  ;;  %v436_v4 = vld [vmem:[%s758_s11 + $0x54] sm:$0x1] }
  0x36   : > { %v491_v46 = vmax.f32 %v422_v35, %v470_v20  ;;  %v228_v47 = vmax.f32 %v160_v27, %v209_v41  ;;  %v364_v48 = vsel %vm192_vm0, %v361_v17, %v363_v38  ;;  %v699_v51 = vunpack.c.l.bf16 %v715_v39 }
  0x37   : > { %568 = vst.msk [vmem:[%s803_s15 + $0x10] sm:$0xf] %vm563_vm2, %v558_v40  ;;  %v384_v50 = vmax.f32 %v317_v37, %v364_v48  ;;  %v365_v52 = vrot.slane %v265_v43, 1  ;;  %v407_v53 = vunpack.c.h.bf16 %v125_v13  ;;  %v446_v56 = vunpack.c.l.bf16 %v435_v44 }
  0x38   : > { %v550_v54 = vmax.f32 %v491_v46, %v529_v32  ;;  %v273_v55 = vmax.f32 %v228_v47, %v684_v28  ;;  %v181_v57 = vunpack.c.l.bf16 %v171_v45  ;;  %v531_v59 = vsel %vm516_vm1, %v528_v12, %v530_v42 }
  0x39   : > { %v423_v58 = vmax.f32 %v384_v50, %v209_v41  ;;  %v366_v60 = vsel %vm192_vm0, %v363_v38, %v365_v52  ;;  %v411_v61 = vrot.slane %v407_v53, 1  ;;  %v473_v1 = vrot.slane %v446_v56, 1 }
  0x3a   : > { %v559_v63 = vpack.c.bf16 %v550_v54, %v550_v54  ;;  %v318_v0 = vmax.f32 %v273_v55, %v699_v51  ;;  %v210_v2 = vrot.slane %v181_v57, 1  ;;  %v532_v7 = vrot.slane %v407_v53, 2 }
  0x3b   : > { %v492_v5 = vmax.f32 %v423_v58, %v472_v49  ;;  %v412_v6 = vsel %vm192_vm0, %v208_v33, %v411_v61  ;;  %v700_v8 = vunpack.c.h.bf16 %v715_v39  ;;  %v474_v10 = vsel %vm192_vm0, %v471_v34, %v473_v1 }
  0x3c   : > { %569 = vst.msk [vmem:[%s803_s15 + $0x14] sm:$0xf] %vm563_vm2, %v559_v63  ;;  %v385_v9 = vmax.f32 %v318_v0, %v366_v60  ;;  %v211_v11 = vsel %vm192_vm0, %v208_v33, %v210_v2  ;;  %v339_v12 = vunpack.c.l.bf16 %v329_v62  ;;  %v408_v15 = vunpack.c.l.bf16 %v397_v3 }
  0x3d   : > { %v551_v13 = vmax.f32 %v492_v5, %v531_v59  ;;  %v229_v14 = vmax.f32 %v161_v36, %v211_v11  ;;  %v447_v16 = vunpack.c.l.bf16 %v436_v4  ;;  %v533_v20 = vsel %vm516_vm1, %v530_v42, %v532_v7 }
  0x3e   : > { %v424_v17 = vmax.f32 %v385_v9, %v412_v6  ;;  %v367_v18 = vrot.slane %v339_v12, 1  ;;  %v413_v22 = vrot.slane %v408_v15, 1  ;;  %v534_v29 = vrot.slane %v408_v15, 2 }
  0x3f   : > { %v560_v19 = vpack.c.bf16 %v551_v13, %v551_v13  ;;  %v274_v21 = vmax.f32 %v229_v14, %v265_v43  ;;  %v475_v25 = vrot.slane %v447_v16, 1 }
  0x40   : > { %v493_v23 = vmax.f32 %v424_v17, %v474_v10  ;;  %v368_v24 = vsel %vm192_vm0, %v365_v52, %v367_v18  ;;  %v414_v28 = vsel %vm192_vm0, %v411_v61, %v413_v22  ;;  %v535_v34 = vsel %vm516_vm1, %v532_v7, %v534_v29 }
  0x41   : > { %570 = vst.msk [vmem:[%s803_s15 + $0x18] sm:$0xf] %vm563_vm2, %v560_v19  ;;  %v319_v26 = vmax.f32 %v274_v21, %v700_v8  ;;  %v476_v32 = vsel %vm192_vm0, %v473_v1, %v475_v25 }
  0x42   : > { %v552_v27 = vmax.f32 %v493_v23, %v533_v20 }
  0x43   : > { %v386_v30 = vmax.f32 %v319_v26, %v368_v24 }
  0x44   : > { %v561_v31 = vpack.c.bf16 %v552_v27, %v552_v27 }
  0x45   : > { %v425_v33 = vmax.f32 %v386_v30, %v414_v28 }
  0x46   : > { %571 = vst.msk [vmem:[%s803_s15 + $0x1c] sm:$0xf] %vm563_vm2, %v561_v31 }
  0x47   : > { %v494_v35 = vmax.f32 %v425_v33, %v476_v32 }
  0x49   : > { %v553_v36 = vmax.f32 %v494_v35, %v535_v34 }
  0x4b   : > { %v562_v37 = vpack.c.bf16 %v553_v36, %v553_v36 }
  0x4d   : > { %572 = vst.msk [vmem:[%s803_s15 + $0x20] sm:$0xf] %vm563_vm2, %v562_v37 }
  0x4e PF: > { %s11_s6 = sadd.s32 1, %s732_s6  }
  0x4f   : > { %p8_p4 = scmp.ge.s32.totalorder %s11_s6, 4  }
  0x51   :  { %10 = sbr.rel (!%p8_p4) target bundleno = 1 (0x1), region = 54 }

// kernel: resnet_forward.9
= control target key start
LH: loop header
LB: loop body
LE: loop exit
PB: predicated region body
PF: predicated region fallthrough
CT: control target
= control target key end

     0   :  { %s2865_s18 = smov 0   ;;  %s3693_s0 = inlined_call_operand.vmem [shape: bf16[2,104,16], index: 0, kind: input, shape index: {}]   ;;  %s3694_s1 = inlined_call_operand.vmem [shape: bf16[9,16,16], index: 1, kind: input, shape index: {}]   ;;  %s3695_s2 = inlined_call_operand.vmem [shape: f32[1,16], index: 2, kind: input, shape index: {}]   ;;  %s3696_s3 = inlined_call_operand.vmem [shape: bf16[9,16,16], index: 3, kind: input, shape index: {}]   ;;  %s3697_s4 = inlined_call_operand.vmem [shape: f32[1,16], index: 4, kind: input, shape index: {}]   ;;  %s3698_s5 = inlined_call_operand.vmem [shape: bf16[2,80,16], index: 5, kind: output, shape index: {}]  }
   0x1 LB: > { %s2501_s19 = sadd.s32 4294967295, %s2831_s18   ;;  %p2505_p0 = scmp.ge.s32.totalorder %s2831_s18, 1  ;;  %s2831_s18 = sphi %s2865_s18, %s15_s18  }
   0x2   : > { %p187_p1 = scmp.lt.s32.totalorder %s2831_s18, 3 }
   0x4   : > { %p188_p2 = pnand %p2505_p0, %p187_p1 }
   0x5   : > { %p215_p3 = scmp.lt.s32.totalorder (!%p188_p2), %s2501_s19, 1 }
   0x6   : > { %191 = sbr.rel (%p188_p2) target bundleno = 663 (0x297), region = 40 }
   0xb   : > { %v2757_v0 = vld [vmem:[%s3694_s1 + $0x8] sm:$0xff]  ;;  %v2756_v1 = vld [vmem:[%s3694_s1] sm:$0xff]  ;;  %v2758_v3 = vld [vmem:[%s3694_s1 + $0x10] sm:$0xff]  ;;  %s3722_s19 = smov (!%p215_p3, %s2501_s19), 1  ;;  %vm321_vm0 = vcmask 130048   ;;  %vm428_vm2 = vcmask 1046528  }
   0xc   : > { %v2764_v2 = vld [vmem:[%s3694_s1 + $0x20] sm:$0xff]  ;;  %v2763_v4 = vld [vmem:[%s3694_s1 + $0x18] sm:$0xff]  ;;  %344 = vmatpush.bf16.msra.mxu0 %v2757_v0  ;;  %394 = vmatpush.bf16.msra.mxu1 %v2756_v1  ;;  %s2811_s30 = smul.u32 52, %s3722_s19  ;;  %vm270_vm1 = vsmask.f32 7424  ;;  %v2770_v26 = vld [vmem:[%s3694_s1 + $0x30] sm:$0xff] }
   0xd   : > { %2810 = vmatpush.bf16.msra.mxu3 %v2756_v1  ;;  %2809 = vmatpush.bf16.msra.mxu2 %v2757_v0  ;;  %v2771_v27 = vld [vmem:[%s3694_s1 + $0x38] sm:$0xff]  ;;  %v2765_v28 = vld [vmem:[%s3694_s1 + $0x28] sm:$0xff]  ;;  %v2772_v46 = vld [vmem:[%s3694_s1 + $0x40] sm:$0xff]  ;;  %vm756_vm3 = vcmask 1045504   ;;  %vm630_vm4 = vsmask.f32 6400 }
   0xe   : > { %s2894_s8 = scalar_lea.vmem %s3693_s0, %s2811_s30  ;;  %vm958_vm5 = vsmask.f32 5376  ;;  %vm1084_vm6 = vcmask 1044480   ;;  %s2812_s17 = smul.u32 40, %s3722_s19 }
   0xf   : > { %v2783_v5 = vld [vmem:[%s2894_s8] sm:$0xff]   ;;  %v2898_v6 = vld [vmem:[%s2894_s8 + $0x8] sm:$0xff]  ;;  %v2901_v7 = vld [vmem:[%s2894_s8 + $0x18] sm:$0xff] }
  0x10   : > { %712 = vmatpush.bf16.msrb.mxu0 %v2764_v2  ;;  %v272_v8 = vshrl.u32 %v2783_v5, 16  ;;  %v274_v9 = vshll.u32 %v2783_v5, 16  ;;  %2539 = vmatmul.msk.bf16.vlgmr.msra.gmra.mxu1 %vm321_vm0, %v2783_v5  ;;  %v2905_v10 = vld [vmem:[%s2894_s8 + $0x20] sm:$0xff]  ;;  %v279_v11 = vshll.u32 %v2898_v6, 16  ;;  %v295_v12 = vshll.u32 %v2901_v7, 16  ;;  %v2918_v25 = vld [vmem:[%s2894_s8 + $0x10] sm:$0xff]  ;;  %s3639_s22 = scalar_lea.vmem %s3698_s5, %s2812_s17 }
  0x11   : > { %468 = vmatpush.bf16.msrb.mxu2 %v2758_v3  ;;  %586 = vmatpush.bf16.msrb.mxu3 %v2763_v4  ;;  %v299_v13 = vshrl.u32 %v2901_v7, 16  ;;  %v303_v15 = vshll.u32 %v2905_v10, 16  ;;  %v238_v16 = vld [vmem:[%s2894_s8 + $0x28] sm:$0x1]  ;;  %v283_v30 = vshrl.u32 %v2898_v6, 16  ;;  %v287_v31 = vshll.u32 %v2918_v25, 16 }
  0x12   : > { %2542 = vmatmul.msk.bf16.vlgmr.msra.gmra.mxu3 %vm321_vm0, %v2901_v7  ;;  %v276_v14 = vrot.slane %v274_v9, 1  ;;  %v281_v17 = vrot.slane %v279_v11, 1  ;;  %v297_v18 = vrot.slane %v295_v12, 1  ;;  %v263_v22 = vunpack.c.l.b16 %v238_v16  ;;  %796 = vmatpush.bf16.msrb.mxu1 %v2765_v28  ;;  %v505_v34 = vld [vmem:[%s2894_s8 + $0x4] sm:$0xe]  ;;  %v2938_v35 = vld [vmem:[%s2894_s8 + $0x8] sm:$0xff]  }
  0x13   : > { %v305_v20 = vrot.slane %v303_v15, 1  ;;  %v307_v32 = vshrl.u32 %v2905_v10, 16  ;;  %v289_v37 = vrot.slane %v287_v31, 1  ;;  %v530_v40 = vunpack.c.l.b16 %v505_v34  ;;  %v2948_v44 = vld [vmem:[%s2894_s8 + $0xc] sm:$0xff]  ;;  %v2802_v49 = vld [vmem:[%s2894_s8] sm:$0xf0] }
  0x14   : > { %v277_v19 = vor.u32 %v276_v14, %v272_v8  ;;  %v301_v21 = vor.u32 %v299_v13, %v297_v18  ;;  %v2930_v29 = vpack.c.b16 %v263_v22, %v263_v22  ;;  %v285_v36 = vor.u32 %v283_v30, %v281_v17  ;;  %v2803_v50 = vld [vmem:[%s2894_s8] sm:$0xe]  ;;  %v749_v54 = vld [vmem:[%s2894_s8 + $0x4] sm:$0xc]  ;;  %v2760_v62 = vld [vmem:[%s2894_s8 + $0x14] sm:$0xff] }
  0x15   : > { %1040 = vmatpush.bf16.msra.mxu3 %v2771_v27  ;;  %v309_v38 = vor.u32 %v307_v32, %v305_v20  ;;  %v531_v41 = vunpack.c.l.b16 %v2938_v35  ;;  %v548_v48 = vrot.slane %v2948_v44, 1  ;;  %v291_v51 = vshrl.u32 %v2918_v25, 16  ;;  %v2762_v34 = vld [vmem:[%s2894_s8 + $0x24] sm:$0xff] }
  0x16   : > { %v282_v23 = vsel %vm270_vm1, %v277_v19, %v281_v17  ;;  %v306_v24 = vsel %vm270_vm1, %v301_v21, %v305_v20  ;;  %v311_v33 = vshll.u32 %v2930_v29, 16  ;;  %v290_v42 = vsel %vm270_vm1, %v285_v36, %v289_v37  ;;  %v2761_v21 = vld [vmem:[%s2894_s8 + $0x1c] sm:$0xff] }
  0x17   : > { %2530 = vmatmul.msk.bf16.vlgmr.msra.gmra.mxu0 %vm321_vm0, %v282_v23  ;;  %2533 = vmatmul.msk.bf16.vlgmr.msra.gmra.mxu2 %vm321_vm0, %v306_v24  ;;  %v541_v45 = vpack.c.b16 %v531_v41, %v530_v40  ;;  %v2804_v52 = vor.u32 %v2803_v50, %v2802_v49  ;;  %v293_v55 = vor.u32 %v291_v51, %v289_v37  ;;  %v430_v57 = vrot.slane %v2898_v6, 1  ;;  %v833_v49 = vld [vmem:[%s2894_s8 + $0x8] sm:$0xc] }
  0x18   : > { %914 = vmatpush.bf16.msra.mxu2 %v2770_v26  ;;  %v313_v39 = vrot.slane %v311_v33, 1  ;;  %1124 = vmatpush.bf16.msra.mxu0 %v2772_v46  ;;  %v754_v58 = vunpack.c.l.b16 %v749_v54  ;;  %v640_v1 = vshrl.u32 %v2948_v44, 16  ;;  %v643_v2 = vshll.u32 %v2948_v44, 16 }
  0x19   : > { %v547_v47 = vrot.slane %v541_v45, 1  ;;  %v429_v56 = vrot.slane %v2804_v52, 1  ;;  %v298_v59 = vsel %vm270_vm1, %v293_v55, %v297_v18  ;;  %v632_v63 = vshrl.u32 %v541_v45, 16 }
  0x1a   : > { %v314_v43 = vsel %vm270_vm1, %v309_v38, %v313_v39  ;;  %v755_v61 = vpack.c.b16 %v531_v41, %v754_v58  ;;  %v635_v0 = vshll.u32 %v541_v45, 16  ;;  %v758_v4 = vrot.slane %v2948_v44, 2  ;;  %v515_v45 = vld [vmem:[%s2894_s8 + $0x2c] sm:$0x1] }
  0x1b   : > { %v549_v53 = vsel %vm428_vm2, %v547_v47, %v548_v48  ;;  %v431_v60 = vsel %vm428_vm2, %v429_v56, %v430_v57  ;;  %v550_v5 = vrot.slane %v2760_v62, 1  ;;  %v642_v9 = vrot.slane %v640_v1, 1 }
  0x1c   : > { %v757_v3 = vrot.slane %v755_v61, 2  ;;  %v637_v8 = vrot.slane %v635_v0, 2  ;;  %v645_v11 = vrot.slane %v643_v2, 2  ;;  %v432_v16 = vrot.slane %v2918_v25, 1  ;;  %v3011_v61 = vld [vmem:[%s2894_s8 + $0x10] sm:$0xff] }
  0x1d   : > { %v551_v13 = vsel %vm428_vm2, %v548_v48, %v550_v5  ;;  %v434_v19 = vrot.slane %v2901_v7, 1  ;;  %v436_v20 = vrot.slane %v2905_v10, 1  ;;  %v649_v23 = vshrl.u32 %v2760_v62, 16 }
  0x1e   : > { %v759_v12 = vsel %vm756_vm3, %v757_v3, %v758_v4  ;;  %v646_v15 = vor.u32 %v645_v11, %v642_v9  ;;  %v433_v18 = vsel %vm428_vm2, %v430_v57, %v432_v16  ;;  %v652_v24 = vshll.u32 %v2760_v62, 16 }
  0x1f   : > { %v437_v22 = vsel %vm428_vm2, %v434_v19, %v436_v20  ;;  %v760_v26 = vrot.slane %v2760_v62, 2  ;;  %v651_v27 = vrot.slane %v649_v23, 1  ;;  %v435_v32 = vsel %vm428_vm2, %v432_v16, %v434_v19 }
  0x20   : > { %2540 = vmatmul.msk.bf16.gmra.mxu1 %vm321_vm0, %v2898_v6  ;;  %v634_v6 = vrot.slane %v632_v63, 1  ;;  %v654_v28 = vrot.slane %v652_v24, 2  ;;  %v438_v33 = vrot.slane %v2930_v29, 1  ;;  %v658_v37 = vshrl.u32 %v2761_v21, 16 }
  0x21   : > { %v761_v30 = vsel %vm756_vm3, %v758_v4, %v760_v26  ;;  %v661_v38 = vshll.u32 %v2761_v21, 16  ;;  %v762_v39 = vrot.slane %v2761_v21, 2  ;;  %v554_v40 = vrot.slane %v2762_v34, 1 }
  0x22   : > { %2543 = vmatmul.msk.bf16.gmra.mxu3 %vm321_vm0, %v2905_v10  ;;  %v638_v14 = vor.u32 %v637_v8, %v634_v6  ;;  %v655_v31 = vor.u32 %v654_v28, %v651_v27  ;;  %v439_v36 = vsel %vm428_vm2, %v436_v20, %v438_v33  ;;  %v660_v41 = vrot.slane %v658_v37, 1 }
  0x23   : > { %v540_v46 = vunpack.c.l.b16 %v515_v45  ;;  %v667_v50 = vshrl.u32 %v2762_v34, 16  ;;  %v670_v51 = vshll.u32 %v2762_v34, 16  ;;  %v764_v52 = vrot.slane %v2762_v34, 2 }
  0x24   : > { %v647_v17 = vsel %vm630_vm4, %v638_v14, %v646_v15  ;;  %v656_v10 = vsel %vm630_vm4, %v646_v15, %v655_v31  ;;  %v858_v54 = vunpack.c.l.b16 %v833_v49  ;;  %v859_v55 = vunpack.c.h.b16 %v2938_v35 }
  0x25   : > { %v546_v48 = vpack.c.b16 %v540_v46, %v540_v46  ;;  %v669_v56 = vrot.slane %v667_v50, 1  ;;  %v672_v57 = vrot.slane %v670_v51, 2  ;;  %v765_v58 = vsel %vm756_vm3, %v762_v39, %v764_v52 }
  0x26   : > { %v869_v62 = vpack.c.b16 %v859_v55, %v858_v54  ;;  %v968_v35 = vshrl.u32 %v3011_v61, 16  ;;  %v971_v3 = vshll.u32 %v3011_v61, 16  ;;  %v876_v24 = vrot.slane %v3011_v61, 2 }
  0x27   : > { %2531 = vmatmul.msk.bf16.gmra.mxu0 %vm321_vm0, %v290_v42  ;;  %2534 = vmatmul.msk.bf16.gmra.mxu2 %vm321_vm0, %v314_v43  ;;  %v663_v42 = vrot.slane %v661_v38, 2  ;;  %v763_v43 = vsel %vm756_vm3, %v760_v26, %v762_v39  ;;  %v673_v63 = vor.u32 %v672_v57, %v669_v56  ;;  %v1086_v38 = vrot.slane %v3011_v61, 3 }
  0x28   : > { %v960_v1 = vshrl.u32 %v869_v62, 16  ;;  %v963_v2 = vshll.u32 %v869_v62, 16  ;;  %v970_v9 = vrot.slane %v968_v35, 2  ;;  %v973_v11 = vrot.slane %v971_v3, 3 }
  0x29   : > { %v664_v29 = vor.u32 %v663_v42, %v660_v41  ;;  %v875_v23 = vrot.slane %v869_v62, 2 }
  0x2a   : > { %v962_v6 = vrot.slane %v960_v1, 2  ;;  %v965_v8 = vrot.slane %v963_v2, 3  ;;  %v974_v16 = vor.u32 %v973_v11, %v970_v9  ;;  %v951_v1 = vld [vmem:[%s2894_s8 + $0x30] sm:$0x7] }
  0x2b   : > { %v665_v47 = vsel %vm630_vm4, %v655_v31, %v664_v29  ;;  %v674_v4 = vsel %vm630_vm4, %v664_v29, %v673_v63  ;;  %v877_v28 = vsel %vm756_vm3, %v875_v23, %v876_v24  ;;  %v956_v35 = vunpack.c.l.b16 %v951_v1  ;;  %v843_v23 = vld [vmem:[%s2894_s8 + $0x30] sm:$0x3] }
  0x2c   : > { %v966_v15 = vor.u32 %v965_v8, %v962_v6 }
  0x2d   : > { %v957_v9 = vpack.c.b16 %v956_v35, %v956_v35  ;;  %v1185_v35 = vlaneseq }
  0x2e   : > { %v975_v20 = vsel %vm958_vm5, %v966_v15, %v974_v16 }
  0x2f   : > { %v1007_v15 = vshll.u32 %v957_v9, 16 }
  0x30   : > { %2541 = vmatmul.msk.bf16.gmra.mxu1 %vm321_vm0, %v2918_v25  ;;  %v552_v25 = vrot.slane %v2761_v21, 1  ;;  %v3023_v21 = vld [vmem:[%s2894_s8 + $0x18] sm:$0xff] }
  0x31   : > { %v977_v26 = vshrl.u32 %v3023_v21, 16  ;;  %v878_v39 = vrot.slane %v3023_v21, 2  ;;  %v1088_v54 = vrot.slane %v3023_v21, 3 }
  0x32   : > { %2577 = vmatmul.msk.bf16.vlgmr.msrb.gmra.mxu3 %vm321_vm0, %v549_v53  ;;  %v553_v7 = vsel %vm428_vm2, %v550_v5, %v552_v25  ;;  %v555_v44 = vsel %vm428_vm2, %v552_v25, %v554_v40  ;;  %v556_v53 = vrot.slane %v546_v48, 1  ;;  %v980_v25 = vshll.u32 %v3023_v21, 16 }
  0x33   : > { %v879_v45 = vsel %vm756_vm3, %v876_v24, %v878_v39  ;;  %v2774_v24 = vld [vmem:[%s3696_s3 + $0x8] sm:$0xff] }
  0x34   : > { %v982_v31 = vrot.slane %v980_v25, 3  ;;  %v868_v25 = vunpack.c.l.b16 %v843_v23  ;;  %1663 = vmatpush.bf16.msra.mxu1 %v2774_v24 }
  0x37   : > { %2532 = vmatmul.msk.bf16.gmra.mxu0 %vm321_vm0, %v298_v59  ;;  %2550 = vmatmul.msk.bf16.vlgmr.msrb.gmra.mxu2 %vm321_vm0, %v431_v60  ;;  %v623_v59 = vld [vmem:[%s2894_s8 + $0x2c] sm:$0x3]  ;;  %v557_v60 = vsel %vm428_vm2, %v554_v40, %v556_v53 }
  0x38   : > { %v628_v0 = vunpack.c.l.b16 %v623_v59  ;;  %v3056_v53 = vld [vmem:[%s2894_s8 + $0x28] sm:$0xff] }
  0x39   : > { %v995_v56 = vshrl.u32 %v3056_v53, 16  ;;  %v998_v57 = vshll.u32 %v3056_v53, 16 }
  0x3a   : > { %v629_v5 = vpack.c.b16 %v628_v0, %v628_v0 }
  0x3b   : > { %v1000_v0 = vrot.slane %v998_v57, 3 }
  0x3c   : > { %v766_v14 = vrot.slane %v629_v5, 2 }
  0x3e   : > { %v767_v19 = vsel %vm756_vm3, %v764_v52, %v766_v14  ;;  %v1004_v14 = vshrl.u32 %v957_v9, 16 }
  0x40   : > { %2599 = vmatmul.msk.bf16.vlgmr.msrb.gmra.mxu1 %vm321_vm0, %v759_v12  ;;  %v676_v12 = vshrl.u32 %v629_v5, 16  ;;  %v1006_v21 = vrot.slane %v1004_v14, 2 }
  0x42   : > { %2578 = vmatmul.msk.bf16.gmra.mxu3 %vm321_vm0, %v551_v13  ;;  %v679_v13 = vshll.u32 %v629_v5, 16 }
  0x47   : > { %2588 = vmatmul.msk.bf16.vlgmr.msrb.gmra.mxu0 %vm321_vm0, %v647_v17  ;;  %2551 = vmatmul.msk.bf16.gmra.mxu2 %vm321_vm0, %v433_v18  ;;  %v678_v17 = vrot.slane %v676_v12, 1  ;;  %v681_v18 = vrot.slane %v679_v13, 2  ;;  %v882_v13 = vrot.slane %v3056_v53, 2 }
  0x50   : > { %2600 = vmatmul.msk.bf16.gmra.mxu1 %vm321_vm0, %v761_v30  ;;  %v1077_v30 = vld [vmem:[%s2894_s8 + $0x8] sm:$0x8] }
  0x52   : > { %2579 = vmatmul.msk.bf16.gmra.mxu3 %vm321_vm0, %v553_v7  ;;  %v979_v7 = vrot.slane %v977_v26, 2 }
  0x57   : > { %2589 = vmatmul.msk.bf16.gmra.mxu0 %vm321_vm0, %v656_v10  ;;  %2552 = vmatmul.msk.bf16.gmra.mxu2 %vm321_vm0, %v435_v32  ;;  %v1082_v10 = vunpack.c.l.b16 %v1077_v30  ;;  %v983_v32 = vor.u32 %v982_v31, %v979_v7 }
  0x59   : > { %v1083_v33 = vpack.c.b16 %v859_v55, %v1082_v10  ;;  %v984_v34 = vsel %vm958_vm5, %v974_v16, %v983_v32 }
  0x5b   : > { %v1085_v37 = vrot.slane %v1083_v33, 3 }
  0x60   : > { %2601 = vmatmul.msk.bf16.gmra.mxu1 %vm321_vm0, %v763_v43  ;;  %v1087_v43 = vsel %vm1084_vm6, %v1085_v37, %v1086_v38 }
  0x62   : > { %2580 = vmatmul.msk.bf16.gmra.mxu3 %vm321_vm0, %v555_v44 }
  0x67   : > { %2590 = vmatmul.msk.bf16.gmra.mxu0 %vm321_vm0, %v665_v47  ;;  %2553 = vmatmul.msk.bf16.gmra.mxu2 %vm321_vm0, %v437_v22  ;;  %v682_v22 = vor.u32 %v681_v18, %v678_v17 }
  0x69   : > { %v683_v27 = vsel %vm630_vm4, %v673_v63, %v682_v22  ;;  %v997_v63 = vrot.slane %v995_v56, 2  ;;  %v1009_v22 = vrot.slane %v1007_v15, 3 }
  0x6b   : > { %v1001_v2 = vor.u32 %v1000_v0, %v997_v63 }
  0x70   : > { %2602 = vmatmul.msk.bf16.gmra.mxu1 %vm321_vm0, %v765_v58 }
  0x72   : > { %2581 = vmatmul.msk.bf16.gmra.mxu3 %vm321_vm0, %v557_v60  ;;  %v1089_v60 = vsel %vm1084_vm6, %v1086_v38, %v1088_v54 }
  0x77   : > { %2591 = vmatmul.msk.bf16.gmra.mxu0 %vm321_vm0, %v674_v4  ;;  %2554 = vmatmul.msk.bf16.gmra.mxu2 %vm321_vm0, %v439_v36  ;;  %v3037_v36 = vld [vmem:[%s2894_s8 + $0x20] sm:$0xff] }
  0x78   : > { %v986_v40 = vshrl.u32 %v3037_v36, 16  ;;  %v989_v41 = vshll.u32 %v3037_v36, 16  ;;  %v880_v55 = vrot.slane %v3037_v36, 2  ;;  %v1090_v12 = vrot.slane %v3037_v36, 3 }
  0x79   : > { %v1092_v36 = vrot.slane %v3056_v53, 3 }
  0x7a   : > { %v988_v29 = vrot.slane %v986_v40, 2  ;;  %v991_v46 = vrot.slane %v989_v41, 3  ;;  %v881_v62 = vsel %vm756_vm3, %v878_v39, %v880_v55  ;;  %v1091_v18 = vsel %vm1084_vm6, %v1088_v54, %v1090_v12 }
  0x7b   : > { %v1093_v41 = vsel %vm1084_vm6, %v1090_v12, %v1092_v36  ;;  %v1094_v54 = vrot.slane %v957_v9, 3 }
  0x7c   : > { %v992_v47 = vor.u32 %v991_v46, %v988_v29 }
  0x7d   : > { %v1095_v57 = vsel %vm1084_vm6, %v1092_v36, %v1094_v54  ;;  %v2833_v36 = vmov 0  }
  0x7e   : > { %v993_v52 = vsel %vm958_vm5, %v983_v32, %v992_v47  ;;  %v1002_v8 = vsel %vm958_vm5, %v992_v47, %v1001_v2  ;;  %v874_v32 = vpack.c.b16 %v868_v25, %v868_v25 }
  0x80   : > { %2603 = vmatmul.msk.bf16.gmra.mxu1 %vm321_vm0, %v767_v19  ;;  %v884_v37 = vrot.slane %v874_v32, 2 }
  0x82   : > { %2637 = vmatmul.msk.bf16.vlgmr.msra.gmra.mxu3 %vm321_vm0, %v975_v20  ;;  %v883_v20 = vsel %vm756_vm3, %v880_v55, %v882_v13 }
  0x87   : > { %2592 = vmatmul.msk.bf16.gmra.mxu0 %vm321_vm0, %v683_v27  ;;  %2626 = vmatmul.msk.bf16.vlgmr.msra.gmra.mxu2 %vm321_vm0, %v877_v28  ;;  %v1010_v28 = vor.u32 %v1009_v22, %v1006_v21 }
  0x8d   : > { %v396_v11 = vpop.f32.mrf.mxu1 }
  0x92   : > { %2638 = vmatmul.msk.bf16.gmra.mxu3 %vm321_vm0, %v984_v34  ;;  %v1011_v34 = vsel %vm958_vm5, %v1001_v2, %v1010_v28 }
  0x94   : > { %v346_v42 = vpop.f32.mrf.mxu0 }
  0x95   : > { %v411_v44 = vpop.f32.mrf.mxu3  ;;  %v3090_v26 = vpop.f32.mrf.mxu1  ;;  %v397_v27 = vadd.f32 %v396_v11, %v346_v42 }
  0x97   : > { %2648 = vmatmul.msk.bf16.vlgmr.msra.gmra.mxu0 %vm321_vm0, %v1087_v43  ;;  %2627 = vmatmul.msk.bf16.gmra.mxu2 %vm321_vm0, %v879_v45 }
  0x9a   : > { %v361_v48 = vpop.f32.mrf.mxu2 }
  0x9b   : > { %v3050_v50 = vadd.f32 %v411_v44, %v361_v48  ;;  %v885_v44 = vsel %vm756_vm3, %v882_v13, %v884_v37 }
  0x9c   : > { %v3048_v49 = vpop.f32.mrf.mxu0 }
  0x9d   : > { %v3052_v51 = vpop.f32.mrf.mxu3  ;;  %v401_v38 = vpop.f32.mrf.mxu1 }
  0xa2   : > { %2639 = vmatmul.msk.bf16.gmra.mxu3 %vm321_vm0, %v993_v52  ;;  %v3063_v58 = vpop.f32.mrf.mxu2 }
  0xa4   : > { %v351_v59 = vpop.f32.mrf.mxu0 }
  0xa5   : > { %v416_v61 = vpop.f32.mrf.mxu3  ;;  %v402_v45 = vadd.f32 %v401_v38, %v351_v59  ;;  %v3111_v52 = vpop.f32.mrf.mxu1 }
  0xa7   : > { %2649 = vmatmul.msk.bf16.gmra.mxu0 %vm321_vm0, %v1089_v60  ;;  %2628 = vmatmul.msk.bf16.gmra.mxu2 %vm321_vm0, %v881_v62 }
  0xaa   : > { %v366_v3 = vpop.f32.mrf.mxu2 }
  0xab   : > { %v3072_v5 = vadd.f32 %v416_v61, %v366_v3 }
  0xac   : > { %v3070_v4 = vpop.f32.mrf.mxu0 }
  0xad   : > { %v3074_v6 = vpop.f32.mrf.mxu3  ;;  %v406_v62 = vpop.f32.mrf.mxu1 }
  0xb2   : > { %2640 = vmatmul.msk.bf16.gmra.mxu3 %vm321_vm0, %v1002_v8  ;;  %v3080_v16 = vpop.f32.mrf.mxu2  ;;  %v3123_v8 = vshrl.u32 %v1185_v35, 7 }
  0xb4   : > { %v356_v17 = vpop.f32.mrf.mxu0  ;;  %v1199_v11 = vand.u32 65535, %v3123_v8  ;;  %v1200_v13 = vshrl.u32 %v3123_v8, 16  ;;  %v3134_v22 = vadd.s32 8, %v3123_v8 }
  0xb5   : > { %v588_v19 = vpop.f32.mrf.mxu3  ;;  %v407_v59 = vadd.f32 %v406_v62, %v356_v17  ;;  %v3125_v9 = vpop.f32.mrf.mxu1 }
  0xb6   : > { %v1203_v14 = vmul.u32 52428, %v1199_v11 }
  0xb7   : > { %2650 = vmatmul.msk.bf16.gmra.mxu0 %vm321_vm0, %v1091_v18  ;;  %2629 = vmatmul.msk.bf16.gmra.mxu2 %vm321_vm0, %v883_v20  ;;  %v1204_v20 = vmul.u32 52429, %v1200_v13 }
  0xb8   : > { %v1206_v21 = vshll.u32 %v1203_v14, 16 }
  0xb9   : > { %v1208_v24 = vshll.u32 %v1204_v20, 16 }
  0xba   : > { %v470_v30 = vpop.f32.mrf.mxu2 }
  0xbb   : > { %v495_v31 = vadd.f32 %v470_v30, %v397_v27  ;;  %v1228_v27 = vand.u32 65535, %v3134_v22  ;;  %v1205_v30 = vmul.u32 52428, %v1200_v13 }
  0xbc   : > { %v3092_v7 = vpop.f32.mrf.mxu0 }
  0xbd   : > { %v3094_v10 = vpop.f32.mrf.mxu3  ;;  %v613_v33 = vadd.f32 %v588_v19, %v495_v31  ;;  %v1202_v19 = vmul.u32 52429, %v1199_v11  ;;  %v3136_v23 = vpop.f32.mrf.mxu1  ;;  %v1229_v31 = vshrl.u32 %v3134_v22, 16  ;;  %v1232_v38 = vmul.u32 52428, %v1228_v27 }
  0xbf   : > { %vm1210_vm7 = vc.u32 %v1202_v19, %v1206_v21  ;;  %v1212_v25 = vadd.s32 %v1206_v21, %v1202_v19 }
  0xc0   : > { %v1211_v37 = vsel %vm1210_vm7, 1, %v2833_v36 }
  0xc1   : > { %vm1214_vm8 = vc.u32 %v1212_v25, %v1208_v24  ;;  %v1209_v25 = vshrl.u32 %v1204_v20, 16 }
  0xc2   : > { %2641 = vmatmul.msk.bf16.gmra.mxu3 %vm321_vm0, %v1011_v34  ;;  %v3099_v39 = vpop.f32.mrf.mxu2 }
  0xc4   : > { %v714_v40 = vpop.f32.mrf.mxu0 }
  0xc5   : > { %v593_v42 = vpop.f32.mrf.mxu3  ;;  %v3102_v43 = vadd.f32 %v714_v40, %v613_v33  ;;  %v1231_v40 = vmul.u32 52429, %v1228_v27 }
  0xc7   : > { %2651 = vmatmul.msk.bf16.gmra.mxu0 %vm321_vm0, %v1093_v41  ;;  %2630 = vmatmul.msk.bf16.gmra.mxu2 %vm321_vm0, %v885_v44  ;;  %v3146_v41 = vmul.u32 52429, %v1229_v31  ;;  %v1235_v44 = vshll.u32 %v1232_v38, 16 }
  0xc9   : > { %vm1239_vm9 = vc.u32 %v1231_v40, %v1235_v44  ;;  %v1241_v54 = vadd.s32 %v1235_v44, %v1231_v40  ;;  %v399_v40 = vadd.f32 %v3090_v26, %v3048_v49  ;;  %v1238_v20 = vshrl.u32 %v3146_v41, 16  ;;  %v2773_v49 = vld [vmem:[%s3696_s3] sm:$0xff] }
  0xca   : > { %v475_v29 = vpop.f32.mrf.mxu2  ;;  %1718 = vmatpush.bf16.msrb.mxu2 %v2773_v49 }
  0xcb   : > { %v497_v46 = vadd.f32 %v475_v29, %v402_v45  ;;  %v1213_v45 = vadd.s32 %v1211_v37, %v1205_v30  ;;  %v1237_v29 = vshll.u32 %v3146_v41, 16  ;;  %v1236_v30 = vshrl.u32 %v1232_v38, 16 }
  0xcc   : > { %v3107_v47 = vpop.f32.mrf.mxu0  ;;  %v3167_v37 = vadd.s32 24, %v3123_v8 }
  0xcd   : > { %v3109_v48 = vpop.f32.mrf.mxu3  ;;  %v615_v53 = vadd.f32 %v593_v42, %v497_v46  ;;  %v3150_v46 = vadd.s32 16, %v3123_v8  ;;  %vm1243_vm10 = vc.u32 %v1241_v54, %v1237_v29  ;;  %v2834_v29 = vmov 0.0  }
  0xce   : > { %1578 = vst.msk [vmem:[#allocation2 + $0x10] sm:$0xff] %vm321_vm0, %v2834_v29  ;;  %v1286_v41 = vand.u32 65535, %v3167_v37 }
  0xcf   : > { %1576 = vst.msk [vmem:[#allocation2] sm:$0xff] %vm321_vm0, %v2834_v29 }
  0xd0   : > { %1577 = vst.msk [vmem:[#allocation2 + $0x8] sm:$0xff] %vm321_vm0, %v2834_v29 }
  0xd1   : > { %1579 = vst.msk [vmem:[#allocation2 + $0x18] sm:$0xff] %vm321_vm0, %v2834_v29 }
  0xd2   : > { %v3113_v55 = vpop.f32.mrf.mxu2  ;;  %1580 = vst.msk [vmem:[#allocation2 + $0x20] sm:$0xff] %vm321_vm0, %v2834_v29 }
  0xd3   : > { %1581 = vst.msk [vmem:[#allocation2 + $0x28] sm:$0xff] %vm321_vm0, %v2834_v29 }
  0xd4   : > { %v719_v56 = vpop.f32.mrf.mxu0  ;;  %1582 = vst.msk [vmem:[#allocation2 + $0x30] sm:$0xff] %vm321_vm0, %v2834_v29 }
  0xd5   : > { %v598_v60 = vpop.f32.mrf.mxu3  ;;  %v3116_v61 = vadd.f32 %v719_v56, %v615_v53  ;;  %v1234_v53 = vmul.u32 52428, %v1229_v31  ;;  %v1240_v56 = vsel %vm1239_vm9, 1, %v2833_v36  ;;  %1583 = vst.msk [vmem:[#allocation2 + $0x38] sm:$0xff] %vm321_vm0, %v2834_v29 }
  0xd6   : > { %1584 = vst.msk [vmem:[#allocation2 + $0x40] sm:$0xff] %vm321_vm0, %v2834_v29 }
  0xd7   : > { %2652 = vmatmul.msk.bf16.gmra.mxu0 %vm321_vm0, %v1095_v57  ;;  %v1257_v57 = vand.u32 65535, %v3150_v46  ;;  %v1242_v13 = vadd.s32 %v1240_v56, %v1234_v53  ;;  %1585 = vst.msk [vmem:[#allocation2 + $0x48] sm:$0xff] %vm321_vm0, %v2834_v29 }
  0xd8   : > { %1586 = vst.msk [vmem:[#allocation2 + $0x50] sm:$0xff] %vm321_vm0, %v2834_v29 }
  0xd9   : > { %v1261_v35 = vmul.u32 52428, %v1257_v57  ;;  %v1260_v19 = vmul.u32 52429, %v1257_v57  ;;  %1587 = vst.msk [vmem:[#allocation2 + $0x58] sm:$0xff] %vm321_vm0, %v2834_v29 }
  0xda   : > { %v480_v63 = vpop.f32.mrf.mxu2  ;;  %1588 = vst.msk [vmem:[#allocation2 + $0x60] sm:$0xff] %vm321_vm0, %v2834_v29 }
  0xdb   : > { %v499_v0 = vadd.f32 %v480_v63, %v407_v59  ;;  %v1207_v59 = vshrl.u32 %v1203_v14, 16  ;;  %v1264_v24 = vshll.u32 %v1261_v35, 16  ;;  %1589 = vst.msk [vmem:[#allocation2 + $0x68] sm:$0xff] %vm321_vm0, %v2834_v29 }
  0xdc   : > { %v3119_v1 = vpop.f32.mrf.mxu0 }
  0xdd   : > { %v3121_v2 = vpop.f32.mrf.mxu3  ;;  %v617_v3 = vadd.f32 %v598_v60, %v499_v0  ;;  %v3155_v60 = vpop.f32.mrf.mxu1  ;;  %v1258_v0 = vshrl.u32 %v3150_v46, 16  ;;  %vm1268_vm11 = vc.u32 %v1260_v19, %v1264_v24 }
  0xdf   : > { %v3163_v21 = vmul.u32 52429, %v1258_v0 }
  0xe1   : > { %v1266_v14 = vshll.u32 %v3163_v21, 16 }
  0xe2   : > { %v3128_v12 = vpop.f32.mrf.mxu2 }
  0xe4   : > { %v724_v15 = vpop.f32.mrf.mxu0 }
  0xe5   : > { %v603_v17 = vpop.f32.mrf.mxu3  ;;  %v3131_v18 = vadd.f32 %v724_v15, %v617_v3 }
  0xea   : > { %v485_v28 = vpop.f32.mrf.mxu2 }
  0xeb   : > { %v501_v32 = vadd.f32 %v485_v28, %v3050_v50  ;;  %v1215_v50 = vsel %vm1214_vm8, 1, %v2833_v36  ;;  %v1263_v28 = vmul.u32 52428, %v1258_v0  ;;  %v496_v0 = vadd.f32 %v3099_v39, %v399_v40  ;;  %v2775_v39 = vld [vmem:[%s3696_s3 + $0x10] sm:$0xff] }
  0xec   : > { %v3141_v33 = vpop.f32.mrf.mxu0  ;;  %v1217_v63 = vadd.s32 %v1215_v50, %v1213_v45  ;;  %1791 = vmatpush.bf16.msrb.mxu3 %v2775_v39 }
  0xed   : > { %v3143_v34 = vpop.f32.mrf.mxu3  ;;  %v619_v42 = vadd.f32 %v603_v17, %v501_v32  ;;  %v1244_v17 = vsel %vm1243_vm10, 1, %v2833_v36  ;;  %v1270_v32 = vadd.s32 %v1264_v24, %v1260_v19 }
  0xee   : > { %v1218_v27 = vadd.s32 %v1217_v63, %v1207_v59  ;;  %v1246_v31 = vadd.s32 %v1244_v17, %v1242_v13  ;;  %v1287_v59 = vshrl.u32 %v3167_v37, 16  ;;  %v404_v63 = vadd.f32 %v3111_v52, %v3070_v4 }
  0xef   : > { %vm1272_vm12 = vc.u32 %v1270_v32, %v1266_v14  ;;  %v3195_v17 = vmul.u32 52428, %v1286_v41  ;;  %v1267_v52 = vshrl.u32 %v3163_v21, 16 }
  0xf0   : > { %v1219_v45 = vadd.s32 %v1218_v27, %v1209_v25  ;;  %v1247_v26 = vadd.s32 %v1246_v31, %v1236_v30  ;;  %v1273_v56 = vsel %vm1272_vm12, 1, %v2833_v36  ;;  %v3199_v24 = vmul.u32 52429, %v1287_v59 }
  0xf1   : > { %v498_v25 = vadd.f32 %v3113_v55, %v404_v63  ;;  %v1293_v27 = vshll.u32 %v3195_v17, 16  ;;  %v614_v55 = vadd.f32 %v3094_v10, %v496_v0  ;;  %v1292_v14 = vmul.u32 52428, %v1287_v59 }
  0xf2   : > { %v3157_v62 = vpop.f32.mrf.mxu2  ;;  %v1220_v19 = vshrl.u32 %v1219_v45, 3  ;;  %v1248_v4 = vadd.s32 %v1247_v26, %v1238_v20  ;;  %v3216_v30 = vadd.s32 32, %v3123_v8 }
  0xf3   : > { %v740_v40 = vadd.f32 %v3107_v47, %v614_v55  ;;  %v616_v10 = vadd.f32 %v3109_v48, %v498_v25  ;;  %v3235_v47 = vadd.f32 %v3052_v51, %v3063_v58  ;;  %v409_v48 = vadd.f32 %v3125_v9, %v3092_v7 }
  0xf4   : > { %v729_v3 = vpop.f32.mrf.mxu0  ;;  %v1221_v32 = vmul.u32 10, %v1220_v19  ;;  %v1315_v26 = vand.u32 65535, %v3216_v30  ;;  %v1316_v58 = vshrl.u32 %v3216_v30, 16  ;;  %v823_v7 = vadd.f32 %v3136_v23, %v3102_v43  ;;  %v2776_v43 = vld [vmem:[%s3696_s3 + $0x18] sm:$0xff] }
  0xf5   : > { %v608_v11 = vpop.f32.mrf.mxu3  ;;  %v3160_v15 = vadd.f32 %v729_v3, %v619_v42  ;;  %v1269_v42 = vsel %vm1268_vm11, 1, %v2833_v36  ;;  %v803_v3 = vpop.f32.mrf.mxu1  ;;  %v3253_v9 = vadd.f32 %v3155_v60, %v740_v40  ;;  %v1294_v60 = vshrl.u32 %v3195_v17, 16  ;;  %1874 = vmatpush.bf16.msrb.mxu0 %v2776_v43 }
  0xf6   : > { %v1271_v38 = vadd.s32 %v1269_v42, %v1263_v28  ;;  %v1295_v28 = vshll.u32 %v3199_v24, 16  ;;  %v3261_v59 = vadd.f32 %v803_v3, %v3116_v61  ;;  %v1318_v23 = vmul.u32 52429, %v1315_v26 }
  0xf7   : > { %v3267_v19 = vmul.u32 52429, %v1316_v58  ;;  %v1321_v61 = vmul.u32 52428, %v1316_v58  ;;  %v500_v3 = vadd.f32 %v3128_v12, %v409_v48 }
  0xf8   : > { %v1275_v57 = vadd.s32 %v1273_v56, %v1271_v38  ;;  %v1249_v38 = vshrl.u32 %v1248_v4, 3  ;;  %v742_v56 = vadd.f32 %v3119_v1, %v616_v10  ;;  %v1319_v1 = vmul.u32 52428, %v1315_v26 }
  0xf9   : > { %v3300_v26 = vadd.f32 %v3121_v2, %v500_v3  ;;  %v3313_v2 = vld [vmem:[%s3695_s2] ss:$0 sm:$0xff] }
  0xfa   : > { %v490_v44 = vpop.f32.mrf.mxu2  ;;  %v1250_v63 = vmul.u32 10, %v1249_v38  ;;  %v1322_v29 = vshll.u32 %v1319_v1, 16 }
  0xfb   : > { %v503_v50 = vadd.f32 %v490_v44, %v3072_v5  ;;  %v1265_v5 = vshrl.u32 %v1261_v35, 16  ;;  %v1289_v35 = vmul.u32 52429, %v1286_v41  ;;  %v3244_v41 = vsub.s32 %v3123_v8, %v1221_v32 }
  0xfc   : > { %v3176_v53 = vpop.f32.mrf.mxu0  ;;  %vm1326_vm2 = vc.u32 %v1318_v23, %v1322_v29  ;;  %v1328_v12 = vadd.s32 %v1322_v29, %v1318_v23  ;;  %v1296_v32 = vshrl.u32 %v3199_v24, 16  ;;  %v1325_v23 = vshrl.u32 %v3267_v19, 16 }
  0xfd   : > { %v3178_v54 = vpop.f32.mrf.mxu3  ;;  %v621_v13 = vadd.f32 %v608_v11, %v503_v50  ;;  %v1276_v11 = vadd.s32 %v1275_v57, %v1265_v5  ;;  %vm1297_vm13 = vc.u32 %v1289_v35, %v1293_v27  ;;  %v1299_v21 = vadd.s32 %v1293_v27, %v1289_v35  ;;  %v805_v5 = vpop.f32.mrf.mxu1 }
  0xfe   : > { %v1298_v45 = vsel %vm1297_vm13, 1, %v2833_v36  ;;  %v3258_v57 = vadd.s32 40, %v3123_v8  ;;  %v3269_v35 = vadd.f32 %v805_v5, %v742_v56  ;;  %vm1486_vm15 = vcmp.ne.s32.totalorder %v3244_v41, 0 }
  0xff   : > { %v1277_v50 = vadd.s32 %v1276_v11, %v1267_v52  ;;  %vm1301_vm14 = vc.u32 %v1299_v21, %v1295_v28  ;;  %v1300_v49 = vadd.s32 %v1298_v45, %v1292_v14  ;;  %vm1496_vm1 = vcmp.lt.s32.totalorder %v3244_v41, 0  ;;  %v2777_v52 = vld [vmem:[%s3696_s3 + $0x20] sm:$0xff] }
 0x100   : > { %v1302_v51 = vsel %vm1301_vm14, 1, %v2833_v36  ;;  %v1516_v17 = vadd.s32 10, %v3244_v41  ;;  %v1324_v11 = vshll.u32 %v3267_v19, 16  ;;  %v1344_v27 = vand.u32 65535, %v3258_v57  ;;  %vm3289_vm3 = vmand %vm1496_vm1, %vm1486_vm15  ;;  %1957 = vmatpush.bf16.msrb.mxu1 %v2777_v52 }
 0x101   : > { %v1278_v0 = vshrl.u32 %v1277_v50, 3  ;;  %v3285_v28 = vsub.s32 %v3134_v22, %v1250_v63  ;;  %v1327_v40 = vsel %vm1326_vm2, 1, %v2833_v36  ;;  %v1345_v10 = vshrl.u32 %v3258_v57, 16 }
 0x102   : > { %v3218_v31 = vpop.f32.mrf.mxu2  ;;  %v1323_v22 = vshrl.u32 %v1319_v1, 16  ;;  %v1329_v45 = vadd.s32 %v1327_v40, %v1321_v61  ;;  %vm1330_vm4 = vc.u32 %v1328_v12, %v1324_v11  ;;  %v1347_v50 = vmul.u32 52429, %v1344_v27  ;;  %v1617_v11 = vld [vmem:[#allocation2 + $0x6] sm:$0xff] }
 0x103   : > { %v1279_v55 = vmul.u32 10, %v1278_v0  ;;  %v1331_v38 = vsel %vm1330_vm4, 1, %v2833_v36  ;;  %v1348_v48 = vmul.u32 52428, %v1344_v27  ;;  %v1526_v24 = vsel %vm3289_vm3, %v1516_v17, %v3244_v41 }
 0x104   : > { %v734_v42 = vpop.f32.mrf.mxu0  ;;  %vm1487_vm5 = vcmp.ne.s32.totalorder %v3285_v28, 0  ;;  %vm1497_vm7 = vcmp.lt.s32.totalorder %v3285_v28, 0  ;;  %vm1536_vm13 = vcmp.lt.s32.totalorder %v1526_v24, 8 }
 0x105   : > { %v3224_v44 = vpop.f32.mrf.mxu3  ;;  %v3229_v20 = vadd.f32 %v734_v42, %v621_v13  ;;  %v1304_v13 = vadd.s32 %v1302_v51, %v1300_v49  ;;  %v3297_v49 = vmul.u32 52429, %v1345_v10  ;;  %v3306_v56 = vsub.s32 %v3150_v46, %v1279_v55  ;;  %vm3334_vm11 = vmand %vm1497_vm7, %vm1487_vm5 }
 0x106   : > { %v1333_v51 = vadd.s32 %v1331_v38, %v1329_v45  ;;  %v1351_v5 = vshll.u32 %v1348_v48, 16  ;;  %v3318_v46 = vadd.s32 48, %v3123_v8 }
 0x107   : > { %v1305_v21 = vadd.s32 %v1304_v13, %v1294_v60  ;;  %v1353_v41 = vshll.u32 %v3297_v49, 16  ;;  %vm1488_vm9 = vcmp.ne.s32.totalorder %v3306_v56, 0  ;;  %vm1498_vm10 = vcmp.lt.s32.totalorder %v3306_v56, 0 }
 0x108   : > { %v1334_v60 = vadd.s32 %v1333_v51, %v1323_v22  ;;  %vm1355_vm8 = vc.u32 %v1347_v50, %v1351_v5  ;;  %v1518_v61 = vadd.s32 10, %v3306_v56  ;;  %v1373_v27 = vand.u32 65535, %v3318_v46  ;;  %vm3339_vm14 = vmand %vm1498_vm10, %vm1488_vm9 }
 0x109   : > { %v1306_v58 = vadd.s32 %v1305_v21, %v1296_v32  ;;  %v1356_v29 = vsel %vm1355_vm8, 1, %v2833_v36  ;;  %v1374_v14 = vshrl.u32 %v3318_v46, 16  ;;  %v1352_v21 = vshrl.u32 %v1348_v48, 16 }
 0x10a   : > { %v916_v25 = vpop.f32.mrf.mxu2  ;;  %v1335_v12 = vadd.s32 %v1334_v60, %v1325_v23  ;;  %v1376_v22 = vmul.u32 52429, %v1373_v27  ;;  %v3351_v45 = vmul.u32 52428, %v1373_v27  ;;  %v1528_v48 = vsel %vm3339_vm14, %v1518_v61, %v3306_v56  ;;  %v1600_v27 = vld [vmem:[#allocation2 + $0x5] sm:$0xff] }
 0x10b   : > { %v941_v42 = vadd.f32 %v916_v25, %v823_v7  ;;  %v1350_v7 = vmul.u32 52428, %v1345_v10  ;;  %v1517_v25 = vadd.s32 10, %v3285_v28  ;;  %v1307_v3 = vshrl.u32 %v1306_v58, 3 }
 0x10c   : > { %v3274_v4 = vpop.f32.mrf.mxu0  ;;  %v3346_v10 = vadd.s32 56, %v3123_v8  ;;  %v3353_v38 = vmul.u32 52429, %v1374_v14  ;;  %v3369_v56 = vadd.f32 %v3141_v33, %v3300_v26  ;;  %vm3378_vm2 = vcmp.lt.s32.totalorder %v1528_v48, 8 }
 0x10d   : > { %v3276_v39 = vpop.f32.mrf.mxu3  ;;  %v1067_v63 = vadd.f32 %v3224_v44, %v941_v42  ;;  %v1357_v44 = vadd.s32 %v1351_v5, %v1347_v50  ;;  %v1358_v17 = vadd.s32 %v1356_v29, %v1350_v7  ;;  %v1527_v42 = vsel %vm3334_vm11, %v1517_v25, %v3285_v28  ;;  %v808_v50 = vpop.f32.mrf.mxu1 }
 0x10e   : > { %v1308_v7 = vmul.u32 10, %v1307_v3  ;;  %v1354_v28 = vshrl.u32 %v3297_v49, 16  ;;  %v1382_v60 = vshll.u32 %v3353_v38, 16  ;;  %vm3371_vm15 = vcmp.lt.s32.totalorder %v1527_v42, 8 }
 0x10f   : > { %vm1359_vm12 = vc.u32 %v1357_v44, %v1353_v41  ;;  %v1380_v41 = vshll.u32 %v3351_v45, 16  ;;  %v3365_v44 = vadd.f32 %v808_v50, %v3131_v18 }
 0x110   : > { %v3383_v33 = vsub.s32 %v3167_v37, %v1308_v7 }
 0x111   : > { %vm1384_vm1 = vc.u32 %v1376_v22, %v1380_v41  ;;  %v1386_v3 = vadd.s32 %v1380_v41, %v1376_v22 }
 0x112   : > { %v918_v1 = vpop.f32.mrf.mxu2  ;;  %v1385_v61 = vsel %vm1384_vm1, 1, %v2833_v36  ;;  %vm1489_vm4 = vcmp.ne.s32.totalorder %v3383_v33, 0  ;;  %vm1499_vm7 = vcmp.lt.s32.totalorder %v3383_v33, 0 }
 0x113   : > { %v942_v52 = vadd.f32 %v918_v1, %v3253_v9  ;;  %v1360_v9 = vsel %vm1359_vm12, 1, %v2833_v36  ;;  %v1336_v1 = vshrl.u32 %v1335_v12, 3  ;;  %vm1388_vm3 = vc.u32 %v1386_v3, %v1382_v60  ;;  %vm3420_vm10 = vmand %vm1499_vm7, %vm1489_vm4 }
 0x114   : > { %v1126_v0 = vpop.f32.mrf.mxu0  ;;  %v1362_v40 = vadd.s32 %v1360_v9, %v1358_v17  ;;  %v1381_v9 = vshrl.u32 %v3351_v45, 16 }
 0x115   : > { %v3320_v43 = vpop.f32.mrf.mxu3  ;;  %v1151_v13 = vadd.f32 %v1126_v0, %v1067_v63  ;;  %v1068_v58 = vadd.f32 %v3276_v39, %v942_v52  ;;  %v1379_v63 = vmul.u32 52428, %v1374_v14  ;;  %v1402_v39 = vand.u32 65535, %v3346_v10  ;;  %v810_v3 = vpop.f32.mrf.mxu1 }
 0x116   : > { %v1363_v23 = vadd.s32 %v1362_v40, %v1352_v21  ;;  %v1337_v26 = vmul.u32 10, %v1336_v1  ;;  %v1403_v52 = vshrl.u32 %v3346_v10, 16  ;;  %v1389_v14 = vsel %vm1388_vm3, 1, %v2833_v36 }
 0x117   : > { %v1165_v19 = vadd.f32 %v3313_v2, %v1151_v13  ;;  %v1387_v17 = vadd.s32 %v1385_v61, %v1379_v63  ;;  %v3386_v12 = vmul.u32 52428, %v1402_v39  ;;  %v3398_v1 = vadd.s32 64, %v3123_v8 }
 0x118   : > { %v1364_v55 = vadd.s32 %v1363_v23, %v1354_v28  ;;  %v3390_v21 = vmul.u32 52429, %v1403_v52 }
 0x119   : > { %v1175_v32 = vmax.f32 %v1165_v19, 0.0  ;;  %v1431_v61 = vand.u32 65535, %v3398_v1 }
 0x11a   : > { %v921_v51 = vpop.f32.mrf.mxu2  ;;  %v1365_v63 = vshrl.u32 %v1364_v55, 3  ;;  %v1411_v23 = vshll.u32 %v3390_v21, 16 }
 0x11b   : > { %v1566_v24 = vsel %vm1536_vm13, %v1175_v32, 0.0  ;;  %v943_v29 = vadd.f32 %v921_v51, %v3261_v59  ;;  %v1745_v59 = vld [vmem:[#allocation2 + $0x7] sm:$0xff]  ;;  %v1405_v32 = vmul.u32 52429, %v1402_v39  ;;  %v1391_v51 = vadd.s32 %v1389_v14, %v1387_v17 }
 0x11c   : > { %1590 = vst.msk [vmem:[#allocation2 + $0x10] sm:$0xff] %vm321_vm0, %v1566_v24  ;;  %v1128_v5 = vpop.f32.mrf.mxu0  ;;  %v1383_v39 = vshrl.u32 %v3353_v38, 16  ;;  %v1432_v17 = vshrl.u32 %v3398_v1, 16  ;;  %v1434_v14 = vmul.u32 52429, %v1431_v61 }
 0x11d   : > { %v1152_v0 = vadd.f32 %v1128_v5, %v1068_v58  ;;  %v1049_v49 = vpop.f32.mrf.mxu3  ;;  %v1069_v42 = vadd.f32 %v3320_v43, %v943_v29  ;;  %v1409_v58 = vshll.u32 %v3386_v12, 16  ;;  %v3402_v43 = vsub.s32 %v3216_v30, %v1337_v26 }
 0x11e   : > { %v1519_v30 = vadd.s32 10, %v3383_v33 }
 0x11f   : > { %v1166_v25 = vadd.f32 %v3313_v2, %v1152_v0  ;;  %v1408_v0 = vmul.u32 52428, %v1403_v52  ;;  %vm1413_vm5 = vc.u32 %v1405_v32, %v1409_v58  ;;  %vm1490_vm8 = vcmp.ne.s32.totalorder %v3402_v43, 0 }
 0x120   : > { %v1414_v29 = vsel %vm1413_vm5, 1, %v2833_v36  ;;  %vm1500_vm9 = vcmp.lt.s32.totalorder %v3402_v43, 0 }
 0x121   : > { %v1176_v19 = vmax.f32 %v1166_v25, 0.0  ;;  %v1415_v25 = vadd.s32 %v1409_v58, %v1405_v32  ;;  %v3429_v32 = vmul.u32 52428, %v1431_v61  ;;  %vm3442_vm12 = vmand %vm1500_vm9, %vm1490_vm8 }
 0x122   : > { %v923_v40 = vpop.f32.mrf.mxu2 }
 0x123   : > { %v1567_v37 = vsel %vm3371_vm15, %v1176_v19, 0.0  ;;  %v1618_v22 = vld [vmem:[#allocation2 + $0xe] sm:$0xff]  ;;  %v944_v41 = vadd.f32 %v923_v40, %v3269_v35  ;;  %v1392_v35 = vadd.s32 %v1391_v51, %v1381_v9  ;;  %v1366_v19 = vmul.u32 10, %v1365_v63 }
 0x124   : > { %v1601_v50 = vld [vmem:[#allocation2 + $0xd] sm:$0xff]  ;;  %1591 = vst.msk [vmem:[#allocation2 + $0x18] sm:$0xff] %vm321_vm0, %v1567_v37  ;;  %v1131_v45 = vpop.f32.mrf.mxu0  ;;  %v1627_v48 = vpack.c.bf16 %v1618_v22, %v1617_v11  ;;  %v1416_v11 = vadd.s32 %v1414_v29, %v1408_v0  ;;  %vm1417_vm11 = vc.u32 %v1415_v25, %v1411_v23 }
 0x125   : > { %v1746_v24 = vld [vmem:[#allocation2 + $0xf] sm:$0xff]  ;;  %v1610_v7 = vpack.c.bf16 %v1601_v50, %v1600_v27  ;;  %v1153_v28 = vadd.f32 %v1131_v45, %v1069_v42  ;;  %v1052_v13 = vpop.f32.mrf.mxu3  ;;  %v1070_v52 = vadd.f32 %v1049_v49, %v944_v41  ;;  %v1418_v9 = vsel %vm1417_vm11, 1, %v2833_v36 }
 0x126   : > { %v1755_v5 = vpack.c.bf16 %v1746_v24, %v1745_v59  ;;  %2659 = vmatmul.msk.bf16.vlgmr.msra.gmra.mxu1 %vm321_vm0, %v1627_v48  ;;  %v828_v49 = vadd.f32 %v810_v3, %v3369_v56  ;;  %v1520_v42 = vadd.s32 10, %v3402_v43  ;;  %v1393_v22 = vadd.s32 %v1392_v35, %v1383_v39 }
 0x127   : > { %2668 = vmatmul.msk.bf16.vlgmr.msrb.gmra.mxu2 %vm321_vm0, %v1610_v7  ;;  %v1167_v60 = vadd.f32 %v3313_v2, %v1153_v28  ;;  %v1529_v50 = vsel %vm3420_vm10, %v1519_v30, %v3383_v33  ;;  %v3446_v56 = vmul.u32 52429, %v1432_v17  ;;  %v3451_v58 = vsub.s32 %v3258_v57, %v1366_v19 }
 0x128   : > { %2679 = vmatmul.msk.bf16.vlgmr.msrb.gmra.mxu3 %vm321_vm0, %v1755_v5  ;;  %v1410_v45 = vshrl.u32 %v3386_v12, 16  ;;  %v1420_v33 = vadd.s32 %v1418_v9, %v1416_v11  ;;  %v1437_v48 = vmul.u32 52428, %v1432_v17  ;;  %vm1539_vm14 = vcmp.lt.s32.totalorder %v1529_v50, 8 }
 0x129   : > { %v1177_v26 = vmax.f32 %v1167_v60, 0.0  ;;  %v1440_v28 = vshll.u32 %v3446_v56, 16  ;;  %v1530_v63 = vsel %vm3442_vm12, %v1520_v42, %v3402_v43  ;;  %v1394_v41 = vshrl.u32 %v1393_v22, 3 }
 0x12a   : > { %v926_v59 = vpop.f32.mrf.mxu2  ;;  %v1412_v57 = vshrl.u32 %v3390_v21, 16  ;;  %v3463_v60 = vadd.s32 72, %v3123_v8  ;;  %vm1491_vm15 = vcmp.ne.s32.totalorder %v3451_v58, 0  ;;  %vm1501_vm1 = vcmp.lt.s32.totalorder %v3451_v58, 0  ;;  %v813_v8 = vpop.f32.mrf.mxu1 }
 0x12b   : > { %v1568_v27 = vsel %vm3378_vm2, %v1177_v26, 0.0  ;;  %v3426_v55 = vld [vmem:[#allocation2 + $0x17] sm:$0xff]  ;;  %v945_v7 = vadd.f32 %v926_v59, %v3365_v44  ;;  %v1421_v35 = vadd.s32 %v1420_v33, %v1410_v45  ;;  %v1439_v9 = vshrl.u32 %v3429_v32, 16  ;;  %vm3486_vm4 = vmand %vm1501_vm1, %vm1491_vm15 }
 0x12c   : > { %1592 = vst.msk [vmem:[#allocation2 + $0x20] sm:$0xff] %vm321_vm0, %v1568_v27  ;;  %v1133_v37 = vpop.f32.mrf.mxu0  ;;  %v1838_v40 = vpack.c.bf16 %v3426_v55, %v1746_v24  ;;  %v1438_v24 = vshll.u32 %v3429_v32, 16  ;;  %v1619_v30 = vld [vmem:[#allocation2 + $0x16] sm:$0xff]  ;;  %v1460_v17 = vand.u32 65535, %v3463_v60  ;;  %v1395_v27 = vmul.u32 10, %v1394_v41 }
 0x12d   : > { %v1154_v18 = vadd.f32 %v1133_v37, %v1070_v52  ;;  %v1054_v44 = vpop.f32.mrf.mxu3  ;;  %v1602_v39 = vld [vmem:[#allocation2 + $0x15] sm:$0xff]  ;;  %v1071_v61 = vadd.f32 %v1052_v13, %v945_v7  ;;  %v1422_v37 = vadd.s32 %v1421_v35, %v1412_v57  ;;  %v502_v32 = vadd.f32 %v3157_v62, %v3235_v47 }
 0x12e   : > { %2690 = vmatmul.msk.bf16.vlgmr.msrb.gmra.mxu0 %vm321_vm0, %v1838_v40  ;;  %vm1442_vm13 = vc.u32 %v1434_v14, %v1438_v24  ;;  %v1444_v23 = vadd.s32 %v1438_v24, %v1434_v14  ;;  %v1461_v14 = vshrl.u32 %v3463_v60, 16  ;;  %v1463_v42 = vmul.u32 52429, %v1460_v17 }
 0x12f   : > { %v1168_v5 = vadd.f32 %v3313_v2, %v1154_v18  ;;  %v1443_v12 = vsel %vm1442_vm13, 1, %v2833_v36  ;;  %v1464_v22 = vmul.u32 52428, %v1460_v17  ;;  %vm1540_vm3 = vcmp.lt.s32.totalorder %v1530_v63, 8 }
 0x130   : > { %v1445_v29 = vadd.s32 %v1443_v12, %v1437_v48  ;;  %vm1446_vm2 = vc.u32 %v1444_v23, %v1440_v28  ;;  %v1521_v51 = vadd.s32 10, %v3451_v58  ;;  %v3491_v33 = vsub.s32 %v3318_v46, %v1395_v27 }
 0x131   : > { %v1178_v0 = vmax.f32 %v1168_v5, 0.0  ;;  %v1447_v13 = vsel %vm1446_vm2, 1, %v2833_v36  ;;  %v1467_v24 = vshll.u32 %v1464_v22, 16  ;;  %v1441_v48 = vshrl.u32 %v3446_v56, 16 }
 0x132   : > { %v928_v25 = vpop.f32.mrf.mxu2  ;;  %v1449_v40 = vadd.s32 %v1447_v13, %v1445_v29  ;;  %v1466_v7 = vmul.u32 52428, %v1461_v14  ;;  %v1423_v62 = vshrl.u32 %v1422_v37, 3  ;;  %v829_v23 = vadd.f32 %v813_v8, %v3160_v15 }
 0x133   : > { %v1569_v43 = vsel %vm1539_vm14, %v1178_v0, 0.0  ;;  %v1620_v21 = vld [vmem:[#allocation2 + $0x1e] sm:$0xff]  ;;  %v946_v18 = vadd.f32 %v928_v25, %v828_v49  ;;  %vm1471_vm5 = vc.u32 %v1463_v42, %v1467_v24  ;;  %v1473_v12 = vadd.s32 %v1467_v24, %v1463_v42 }
 0x134   : > { %v1603_v3 = vld [vmem:[#allocation2 + $0x1d] sm:$0xff]  ;;  %1593 = vst.msk [vmem:[#allocation2 + $0x28] sm:$0xff] %vm321_vm0, %v1569_v43  ;;  %v1136_v52 = vpop.f32.mrf.mxu0  ;;  %v1628_v38 = vpack.c.bf16 %v1620_v21, %v1619_v30  ;;  %v1450_v47 = vadd.s32 %v1449_v40, %v1439_v9  ;;  %v1472_v0 = vsel %vm1471_vm5, 1, %v2833_v36  ;;  %v620_v46 = vadd.f32 %v3143_v34, %v502_v32  ;;  %v815_v43 = vpop.f32.mrf.mxu1 }
 0x135   : > { %v1748_v26 = vld [vmem:[#allocation2 + $0x1f] sm:$0xff]  ;;  %v1611_v19 = vpack.c.bf16 %v1603_v3, %v1602_v39  ;;  %v1155_v59 = vadd.f32 %v1136_v52, %v1071_v61  ;;  %v1072_v41 = vadd.f32 %v1054_v44, %v946_v18  ;;  %v1057_v56 = vpop.f32.mrf.mxu3  ;;  %v1531_v39 = vsel %vm3486_vm4, %v1521_v51, %v3451_v58 }
 0x136   : > { %v1756_v11 = vpack.c.bf16 %v1748_v26, %v3426_v55  ;;  %2660 = vmatmul.msk.bf16.gmra.mxu1 %vm321_vm0, %v1628_v38  ;;  %v3477_v55 = vmul.u32 52429, %v1461_v14  ;;  %vm1492_vm7 = vcmp.ne.s32.totalorder %v3491_v33, 0  ;;  %v1474_v44 = vadd.s32 %v1472_v0, %v1466_v7  ;;  %v2778_v7 = vld [vmem:[%s3696_s3 + $0x28] sm:$0xff] }
 0x137   : > { %2669 = vmatmul.msk.bf16.gmra.mxu2 %vm321_vm0, %v1611_v19  ;;  %v1169_v50 = vadd.f32 %v3313_v2, %v1155_v59  ;;  %vm1502_vm9 = vcmp.lt.s32.totalorder %v3491_v33, 0  ;;  %v1424_v34 = vmul.u32 10, %v1423_v62  ;;  %v1451_v15 = vadd.s32 %v1450_v47, %v1441_v48 }
 0x138   : > { %2680 = vmatmul.msk.bf16.gmra.mxu3 %vm321_vm0, %v1756_v11  ;;  %v1469_v5 = vshll.u32 %v3477_v55, 16  ;;  %v1468_v3 = vshrl.u32 %v1464_v22, 16  ;;  %vm1541_vm10 = vcmp.lt.s32.totalorder %v1531_v39, 8  ;;  %v1522_v8 = vadd.s32 10, %v3491_v33  ;;  %vm3511_vm11 = vmand %vm1502_vm9, %vm1492_vm7  ;;  %2040 = vmatpush.bf16.msra.mxu2 %v2778_v7 }
 0x139   : > { %v1179_v45 = vmax.f32 %v1169_v50, 0.0  ;;  %v1452_v11 = vshrl.u32 %v1451_v15, 3  ;;  %v1470_v37 = vshrl.u32 %v3477_v55, 16  ;;  %v419_v62 = vadd.f32 %v3074_v6, %v3080_v16 }
 0x13a   : > { %v931_v63 = vpop.f32.mrf.mxu2  ;;  %vm1475_vm8 = vc.u32 %v1473_v12, %v1469_v5 }
 0x13b   : > { %v1570_v28 = vsel %vm1540_vm3, %v1179_v45, 0.0  ;;  %v1831_v57 = vld [vmem:[#allocation2 + $0x27] sm:$0xff]  ;;  %v1476_v25 = vsel %vm1475_vm8, 1, %v2833_v36  ;;  %v947_v61 = vadd.f32 %v931_v63, %v829_v23  ;;  %v1425_v36 = vsub.s32 %v3346_v10, %v1424_v34 }
 0x13c   : > { %1594 = vst.msk [vmem:[#allocation2 + $0x30] sm:$0xff] %vm321_vm0, %v1570_v28  ;;  %v1138_v30 = vpop.f32.mrf.mxu0  ;;  %v1839_v35 = vpack.c.bf16 %v1831_v57, %v1748_v26  ;;  %v1478_v58 = vadd.s32 %v1476_v25, %v1474_v44  ;;  %v746_v26 = vadd.f32 %v3176_v53, %v620_v46  ;;  %v1621_v38 = vld [vmem:[#allocation2 + $0x26] sm:$0xff]  ;;  %v1532_v10 = vsel %vm3511_vm11, %v1522_v8, %v3491_v33  ;;  %v2779_v33 = vld [vmem:[%s3696_s3 + $0x30] sm:$0xff]  ;;  %v818_v47 = vpop.f32.mrf.mxu1 }
 0x13d   : > { %v1156_v29 = vadd.f32 %v1138_v30, %v1072_v41  ;;  %v1604_v19 = vld [vmem:[#allocation2 + $0x25] sm:$0xff]  ;;  %v1073_v9 = vadd.f32 %v1057_v56, %v947_v61  ;;  %v1059_v24 = vpop.f32.mrf.mxu3  ;;  %vm1493_vm12 = vcmp.ne.s32.totalorder %v1425_v36, 0  ;;  %v1453_v55 = vmul.u32 10, %v1452_v11  ;;  %2123 = vmatpush.bf16.msra.mxu3 %v2779_v33 }
 0x13e   : > { %2691 = vmatmul.msk.bf16.gmra.mxu0 %vm321_vm0, %v1839_v35  ;;  %v1479_v40 = vadd.s32 %v1478_v58, %v1468_v3  ;;  %v830_v32 = vadd.f32 %v815_v43, %v746_v26  ;;  %vm1503_vm13 = vcmp.lt.s32.totalorder %v1425_v36, 0  ;;  %vm1542_vm14 = vcmp.lt.s32.totalorder %v1532_v10, 8 }
 0x13f   : > { %v1170_v21 = vadd.f32 %v3313_v2, %v1156_v29  ;;  %v1523_v28 = vadd.s32 10, %v1425_v36  ;;  %v504_v63 = vadd.f32 %v3218_v31, %v419_v62  ;;  %vm3535_vm15 = vmand %vm1503_vm13, %vm1493_vm12  ;;  %v831_v30 = vadd.f32 %v818_v47, %v3229_v20 }
 0x140   : > { %v1480_v48 = vadd.s32 %v1479_v40, %v1470_v37 }
 0x141   : > { %v1180_v17 = vmax.f32 %v1170_v21, 0.0  ;;  %v1533_v31 = vsel %vm3535_vm15, %v1523_v28, %v1425_v36  ;;  %v622_v35 = vadd.f32 %v3178_v54, %v504_v63 }
 0x142   : > { %v933_v59 = vpop.f32.mrf.mxu2  ;;  %v1481_v6 = vshrl.u32 %v1480_v48, 3  ;;  %vm1543_vm3 = vcmp.lt.s32.totalorder %v1533_v31, 8 }
 0x143   : > { %v1571_v27 = vsel %vm1541_vm10, %v1180_v17, 0.0  ;;  %v1622_v13 = vld [vmem:[#allocation2 + $0x2e] sm:$0xff]  ;;  %v948_v45 = vadd.f32 %v933_v59, %v830_v32  ;;  %v748_v20 = vadd.f32 %v3274_v4, %v622_v35 }
 0x144   : > { %v1605_v14 = vld [vmem:[#allocation2 + $0x2d] sm:$0xff]  ;;  %1595 = vst.msk [vmem:[#allocation2 + $0x38] sm:$0xff] %vm321_vm0, %v1571_v27  ;;  %v1141_v42 = vpop.f32.mrf.mxu0  ;;  %v1629_v22 = vpack.c.bf16 %v1622_v13, %v1621_v38  ;;  %v1482_v43 = vmul.u32 10, %v1481_v6  ;;  %v820_v54 = vpop.f32.mrf.mxu1 }
 0x145   : > { %v1750_v53 = vld [vmem:[#allocation2 + $0x2f] sm:$0xff]  ;;  %v1612_v18 = vpack.c.bf16 %v1605_v14, %v1604_v19  ;;  %v1157_v51 = vadd.f32 %v1141_v42, %v1073_v9  ;;  %v1074_v23 = vadd.f32 %v1059_v24, %v948_v45  ;;  %v1062_v34 = vpop.f32.mrf.mxu3  ;;  %v832_v59 = vadd.f32 %v820_v54, %v748_v20 }
 0x146   : > { %v1757_v50 = vpack.c.bf16 %v1750_v53, %v1831_v57  ;;  %2661 = vmatmul.msk.bf16.gmra.mxu1 %vm321_vm0, %v1629_v22  ;;  %v1454_v57 = vsub.s32 %v3398_v1, %v1453_v55  ;;  %v2780_v1 = vld [vmem:[%s3696_s3 + $0x38] sm:$0xff]  ;;  %v1483_v38 = vsub.s32 %v3463_v60, %v1482_v43  ;;  %v2781_v60 = vld [vmem:[%s3696_s3 + $0x40] sm:$0xff]  ;;  %v1914_v35 = vld [vmem:[#allocation2 + $0x28] sm:$0xff] }
 0x147   : > { %2670 = vmatmul.msk.bf16.gmra.mxu2 %vm321_vm0, %v1612_v18  ;;  %v1171_v49 = vadd.f32 %v3313_v2, %v1157_v51  ;;  %2206 = vmatpush.bf16.msra.mxu0 %v2780_v1  ;;  %v1997_v1 = vld [vmem:[#allocation2 + $0x29] sm:$0xff] }
 0x148   : > { %2681 = vmatmul.msk.bf16.gmra.mxu3 %vm321_vm0, %v1757_v50  ;;  %vm1494_vm1 = vcmp.ne.s32.totalorder %v1454_v57, 0  ;;  %vm1504_vm2 = vcmp.lt.s32.totalorder %v1454_v57, 0  ;;  %v1524_v25 = vadd.s32 10, %v1454_v57  ;;  %vm1495_vm5 = vcmp.ne.s32.totalorder %v1483_v38, 0  ;;  %2289 = vmatpush.bf16.msra.mxu1 %v2781_v60 }
 0x149   : > { %v1181_v5 = vmax.f32 %v1171_v49, 0.0  ;;  %vm3551_vm4 = vmand %vm1504_vm2, %vm1494_vm1  ;;  %vm1505_vm7 = vcmp.lt.s32.totalorder %v1483_v38, 0  ;;  %v1525_v40 = vadd.s32 10, %v1483_v38 }
 0x14a   : > { %v936_v12 = vpop.f32.mrf.mxu2  ;;  %v1534_v13 = vsel %vm3551_vm4, %v1524_v25, %v1454_v57  ;;  %vm1515_vm9 = vmand %vm1505_vm7, %vm1495_vm5  ;;  %v1912_v57 = vld [vmem:[#allocation2 + $0x18] sm:$0xff]  ;;  %v2162_v25 = vld [vmem:[#allocation2 + $0x2a] sm:$0xff] }
 0x14b   : > { %v1572_v0 = vsel %vm1542_vm14, %v1181_v5, 0.0  ;;  %v1833_v46 = vld [vmem:[#allocation2 + $0x37] sm:$0xff]  ;;  %v949_v29 = vadd.f32 %v936_v12, %v831_v30  ;;  %vm1544_vm8 = vcmp.lt.s32.totalorder %v1534_v13, 8  ;;  %v1535_v24 = vsel %vm1515_vm9, %v1525_v40, %v1483_v38  ;;  %v2078_v12 = vld [vmem:[#allocation2 + $0x21] sm:$0xff] }
 0x14c   : > { %1596 = vst.msk [vmem:[#allocation2 + $0x40] sm:$0xff] %vm321_vm0, %v1572_v0  ;;  %v1143_v16 = vpop.f32.mrf.mxu0  ;;  %v1840_v56 = vpack.c.bf16 %v1833_v46, %v1750_v53  ;;  %v1623_v21 = vld [vmem:[#allocation2 + $0x36] sm:$0xff]  ;;  %vm1545_vm10 = vcmp.lt.s32.totalorder %v1535_v24, 8  ;;  %v2161_v30 = vld [vmem:[#allocation2 + $0x22] sm:$0xff] }
 0x14d   : > { %v1158_v39 = vadd.f32 %v1143_v16, %v1074_v23  ;;  %v1606_v3 = vld [vmem:[#allocation2 + $0x35] sm:$0xff]  ;;  %v1075_v26 = vadd.f32 %v1062_v34, %v949_v29  ;;  %v1064_v42 = vpop.f32.mrf.mxu3  ;;  %v2005_v34 = vpack.c.bf16 %v1997_v1, %v2078_v12 }
 0x14e   : > { %2692 = vmatmul.msk.bf16.gmra.mxu0 %vm321_vm0, %v1840_v56  ;;  %v1995_v0 = vld [vmem:[#allocation2 + $0x19] sm:$0xff]  ;;  %v1911_v23 = vld [vmem:[#allocation2 + $0x10] sm:$0xff] }
 0x14f   : > { %v1172_v44 = vadd.f32 %v3313_v2, %v1158_v39  ;;  %v1921_v6 = vpack.c.bf16 %v1912_v57, %v1911_v23  ;;  %v2087_v56 = vpack.c.bf16 %v2078_v12, %v1995_v0  ;;  %v2160_v39 = vld [vmem:[#allocation2 + $0x1a] sm:$0xff]  ;;  %v2080_v29 = vld [vmem:[#allocation2 + $0x31] sm:$0xff] }
 0x150   : > { %v2170_v31 = vpack.c.bf16 %v2161_v30, %v2160_v39  ;;  %v2088_v20 = vpack.c.bf16 %v2080_v29, %v1997_v1  ;;  %v1916_v61 = vld [vmem:[#allocation2 + $0x38] sm:$0xff] }
 0x151   : > { %v1182_v15 = vmax.f32 %v1172_v44, 0.0  ;;  %v1913_v44 = vld [vmem:[#allocation2 + $0x20] sm:$0xff] }
 0x152   : > { %v938_v19 = vpop.f32.mrf.mxu2  ;;  %v1922_v43 = vpack.c.bf16 %v1914_v35, %v1913_v44 }
 0x153   : > { %v1573_v58 = vsel %vm1543_vm3, %v1182_v15, 0.0  ;;  %v1624_v17 = vld [vmem:[#allocation2 + $0x3e] sm:$0xff]  ;;  %v950_v14 = vadd.f32 %v938_v19, %v832_v59  ;;  %v2163_v15 = vld [vmem:[#allocation2 + $0x32] sm:$0xff] }
 0x154   : > { %v1607_v8 = vld [vmem:[#allocation2 + $0x3d] sm:$0xff]  ;;  %1597 = vst.msk [vmem:[#allocation2 + $0x48] sm:$0xff] %vm321_vm0, %v1573_v58  ;;  %v1146_v4 = vpop.f32.mrf.mxu0  ;;  %v1630_v36 = vpack.c.bf16 %v1624_v17, %v1623_v21  ;;  %v2171_v54 = vpack.c.bf16 %v2163_v15, %v2162_v25  ;;  %v1915_v58 = vld [vmem:[#allocation2 + $0x30] sm:$0xff] }
 0x155   : > { %v1752_v52 = vld [vmem:[#allocation2 + $0x3f] sm:$0xff]  ;;  %v1613_v11 = vpack.c.bf16 %v1607_v8, %v1606_v3  ;;  %v1159_v9 = vadd.f32 %v1146_v4, %v1075_v26  ;;  %v1076_v18 = vadd.f32 %v1064_v42, %v950_v14  ;;  %v1923_v26 = vpack.c.bf16 %v1916_v61, %v1915_v58 }
 0x156   : > { %v1758_v27 = vpack.c.bf16 %v1752_v52, %v1833_v46  ;;  %2662 = vmatmul.msk.bf16.gmra.mxu1 %vm321_vm0, %v1630_v36  ;;  %v1994_v46 = vld [vmem:[#allocation2 + $0x11] sm:$0xff]  ;;  %v1999_v21 = vld [vmem:[#allocation2 + $0x39] sm:$0xff] }
 0x157   : > { %2671 = vmatmul.msk.bf16.gmra.mxu2 %vm321_vm0, %v1613_v11  ;;  %v1173_v53 = vadd.f32 %v3313_v2, %v1159_v9  ;;  %v2004_v16 = vpack.c.bf16 %v1995_v0, %v1994_v46  ;;  %v2006_v17 = vpack.c.bf16 %v1999_v21, %v2080_v29  ;;  %v2164_v38 = vld [vmem:[#allocation2 + $0x3a] sm:$0xff]  ;;  %v2169_v0 = vld [vmem:[#allocation2 + $0x62] sm:$0xff] }
 0x158   : > { %2682 = vmatmul.msk.bf16.gmra.mxu3 %vm321_vm0, %v1758_v27  ;;  %v1917_v59 = vld [vmem:[#allocation2 + $0x40] sm:$0xff] }
 0x159   : > { %v1183_v37 = vmax.f32 %v1173_v53, 0.0 }
 0x15b   : > { %v1574_v22 = vsel %vm1544_vm8, %v1183_v37, 0.0  ;;  %v1835_v50 = vld [vmem:[#allocation2 + $0x47] sm:$0xff] }
 0x15c   : > { %1598 = vst.msk [vmem:[#allocation2 + $0x50] sm:$0xff] %vm321_vm0, %v1574_v22  ;;  %v1148_v32 = vpop.f32.mrf.mxu0  ;;  %v1841_v51 = vpack.c.bf16 %v1835_v50, %v1752_v52  ;;  %v1625_v49 = vld [vmem:[#allocation2 + $0x46] sm:$0xff] }
 0x15d   : > { %v1160_v10 = vadd.f32 %v1148_v32, %v1076_v18  ;;  %v1608_v48 = vld [vmem:[#allocation2 + $0x45] sm:$0xff] }
 0x15e   : > { %2693 = vmatmul.msk.bf16.gmra.mxu0 %vm321_vm0, %v1841_v51  ;;  %v2082_v3 = vld [vmem:[#allocation2 + $0x41] sm:$0xff] }
 0x15f   : > { %v1174_v55 = vadd.f32 %v3313_v2, %v1160_v10  ;;  %v2089_v8 = vpack.c.bf16 %v2082_v3, %v1999_v21  ;;  %v2165_v52 = vld [vmem:[#allocation2 + $0x42] sm:$0xff] }
 0x160   : > { %v2172_v19 = vpack.c.bf16 %v2165_v52, %v2164_v38  ;;  %v1918_v4 = vld [vmem:[#allocation2 + $0x48] sm:$0xff] }
 0x161   : > { %v1184_v45 = vmax.f32 %v1174_v55, 0.0  ;;  %v1924_v9 = vpack.c.bf16 %v1918_v4, %v1917_v59 }
 0x163   : > { %v1575_v7 = vsel %vm1545_vm10, %v1184_v45, 0.0  ;;  %v1626_v33 = vld [vmem:[#allocation2 + $0x4e] sm:$0xff] }
 0x164   : > { %v1609_v62 = vld [vmem:[#allocation2 + $0x4d] sm:$0xff]  ;;  %1599 = vst.msk [vmem:[#allocation2 + $0x58] sm:$0xff] %vm321_vm0, %v1575_v7  ;;  %v1631_v5 = vpack.c.bf16 %v1626_v33, %v1625_v49 }
 0x165   : > { %v1754_v47 = vld [vmem:[#allocation2 + $0x4f] sm:$0xff]  ;;  %v1614_v28 = vpack.c.bf16 %v1609_v62, %v1608_v48  ;;  %v2086_v48 = vld [vmem:[#allocation2 + $0x61] sm:$0xff] }
 0x166   : > { %v1759_v63 = vpack.c.bf16 %v1754_v47, %v1835_v50  ;;  %2663 = vmatmul.msk.bf16.gmra.mxu1 %vm321_vm0, %v1631_v5  ;;  %v2001_v36 = vld [vmem:[#allocation2 + $0x49] sm:$0xff] }
 0x167   : > { %2672 = vmatmul.msk.bf16.gmra.mxu2 %vm321_vm0, %v1614_v28  ;;  %v2007_v13 = vpack.c.bf16 %v2001_v36, %v2082_v3  ;;  %v2166_v18 = vld [vmem:[#allocation2 + $0x4a] sm:$0xff] }
 0x168   : > { %2683 = vmatmul.msk.bf16.gmra.mxu3 %vm321_vm0, %v1759_v63  ;;  %v1919_v62 = vld [vmem:[#allocation2 + $0x50] sm:$0xff] }
 0x16b   : > { %v1837_v2 = vld [vmem:[#allocation2 + $0x57] sm:$0xff] }
 0x16c   : > { %v1842_v41 = vpack.c.bf16 %v1837_v2, %v1754_v47  ;;  %v2084_v11 = vld [vmem:[#allocation2 + $0x51] sm:$0xff]  ;;  %v2003_v55 = vld [vmem:[#allocation2 + $0x59] sm:$0xff] }
 0x16d   : > { %v2090_v14 = vpack.c.bf16 %v2084_v11, %v2001_v36  ;;  %v2167_v60 = vld [vmem:[#allocation2 + $0x52] sm:$0xff]  ;;  %v2008_v28 = vpack.c.bf16 %v2003_v55, %v2084_v11  ;;  %v2091_v63 = vpack.c.bf16 %v2086_v48, %v2003_v55  ;;  %v2168_v57 = vld [vmem:[#allocation2 + $0x5a] sm:$0xff] }
 0x16e   : > { %2694 = vmatmul.msk.bf16.gmra.mxu0 %vm321_vm0, %v1842_v41  ;;  %v2173_v32 = vpack.c.bf16 %v2167_v60, %v2166_v18  ;;  %v1920_v24 = vld [vmem:[#allocation2 + $0x58] sm:$0xff]  ;;  %v2245_v36 = vld [vmem:[#allocation2 + $0x2b] sm:$0xff] }
 0x16f   : > { %v1925_v5 = vpack.c.bf16 %v1920_v24, %v1919_v62  ;;  %v2247_v24 = vld [vmem:[#allocation2 + $0x3b] sm:$0xff] }
 0x176   : > { %2701 = vmatmul.msk.bf16.vlgmr.msrb.gmra.mxu1 %vm321_vm0, %v1921_v6 }
 0x177   : > { %2712 = vmatmul.msk.bf16.vlgmr.msra.gmra.mxu2 %vm321_vm0, %v2004_v16 }
 0x178   : > { %2723 = vmatmul.msk.bf16.vlgmr.msra.gmra.mxu3 %vm321_vm0, %v2087_v56  ;;  %v2174_v56 = vpack.c.bf16 %v2169_v0, %v2168_v57 }
 0x17e   : > { %2734 = vmatmul.msk.bf16.vlgmr.msra.gmra.mxu0 %vm321_vm0, %v2170_v31  ;;  %v2244_v31 = vld [vmem:[#allocation2 + $0x23] sm:$0xff] }
 0x186   : > { %2702 = vmatmul.msk.bf16.gmra.mxu1 %vm321_vm0, %v1922_v43  ;;  %v2243_v43 = vld [vmem:[#allocation2 + $0x1b] sm:$0xff] }
 0x187   : > { %2713 = vmatmul.msk.bf16.gmra.mxu2 %vm321_vm0, %v2005_v34 }
 0x188   : > { %2724 = vmatmul.msk.bf16.gmra.mxu3 %vm321_vm0, %v2088_v20  ;;  %v2253_v20 = vpack.c.bf16 %v2244_v31, %v2243_v43 }
 0x18e   : > { %2735 = vmatmul.msk.bf16.gmra.mxu0 %vm321_vm0, %v2171_v54 }
 0x196   : > { %2703 = vmatmul.msk.bf16.gmra.mxu1 %vm321_vm0, %v1923_v26 }
 0x197   : > { %2714 = vmatmul.msk.bf16.gmra.mxu2 %vm321_vm0, %v2006_v17 }
 0x198   : > { %2725 = vmatmul.msk.bf16.gmra.mxu3 %vm321_vm0, %v2089_v8  ;;  %v2246_v8 = vld [vmem:[#allocation2 + $0x33] sm:$0xff] }
 0x19e   : > { %2736 = vmatmul.msk.bf16.gmra.mxu0 %vm321_vm0, %v2172_v19 }
 0x1a3   : > { %v1665_v27 = vpop.f32.mrf.mxu1 }
 0x1a6   : > { %2704 = vmatmul.msk.bf16.gmra.mxu1 %vm321_vm0, %v1924_v9 }
 0x1a7   : > { %2715 = vmatmul.msk.bf16.gmra.mxu2 %vm321_vm0, %v2007_v13 }
 0x1a8   : > { %2726 = vmatmul.msk.bf16.gmra.mxu3 %vm321_vm0, %v2090_v14 }
 0x1aa   : > { %v1720_v53 = vpop.f32.mrf.mxu2 }
 0x1ab   : > { %v1721_v37 = vadd.f32 %v1720_v53, %v1665_v27  ;;  %v1793_v40 = vpop.f32.mrf.mxu3  ;;  %v1667_v42 = vpop.f32.mrf.mxu1  ;;  %v2254_v27 = vpack.c.bf16 %v2246_v8, %v2245_v36 }
 0x1ac   : > { %v1876_v22 = vpop.f32.mrf.mxu0 }
 0x1ad   : > { %v1818_v50 = vadd.f32 %v1793_v40, %v1721_v37 }
 0x1ae   : > { %2737 = vmatmul.msk.bf16.gmra.mxu0 %vm321_vm0, %v2173_v32 }
 0x1af   : > { %v3589_v51 = vadd.f32 %v1876_v22, %v1818_v50  ;;  %v2248_v22 = vld [vmem:[#allocation2 + $0x43] sm:$0xff] }
 0x1b2   : > { %v1722_v10 = vpop.f32.mrf.mxu2 }
 0x1b3   : > { %v1723_v45 = vadd.f32 %v1722_v10, %v1667_v42  ;;  %v1795_v49 = vpop.f32.mrf.mxu3  ;;  %v1670_v7 = vpop.f32.mrf.mxu1 }
 0x1b4   : > { %v1878_v33 = vpop.f32.mrf.mxu0 }
 0x1b5   : > { %v1819_v47 = vadd.f32 %v1795_v49, %v1723_v45  ;;  %v2255_v45 = vpack.c.bf16 %v2248_v22, %v2247_v24 }
 0x1b6   : > { %2705 = vmatmul.msk.bf16.gmra.mxu1 %vm321_vm0, %v1925_v5 }
 0x1b7   : > { %v3592_v2 = vadd.f32 %v1878_v33, %v1819_v47  ;;  %2716 = vmatmul.msk.bf16.gmra.mxu2 %vm321_vm0, %v2008_v28 }
 0x1b8   : > { %2727 = vmatmul.msk.bf16.gmra.mxu3 %vm321_vm0, %v2091_v63 }
 0x1ba   : > { %v1725_v41 = vpop.f32.mrf.mxu2 }
 0x1bb   : > { %v1726_v12 = vadd.f32 %v1725_v41, %v1670_v7  ;;  %v1798_v23 = vpop.f32.mrf.mxu3  ;;  %v1672_v46 = vpop.f32.mrf.mxu1  ;;  %v2250_v41 = vld [vmem:[#allocation2 + $0x53] sm:$0xff] }
 0x1bc   : > { %v1881_v6 = vpop.f32.mrf.mxu0 }
 0x1bd   : > { %v1820_v16 = vadd.f32 %v1798_v23, %v1726_v12  ;;  %v2249_v23 = vld [vmem:[#allocation2 + $0x4b] sm:$0xff] }
 0x1be   : > { %2738 = vmatmul.msk.bf16.gmra.mxu0 %vm321_vm0, %v2174_v56 }
 0x1bf   : > { %v3597_v30 = vadd.f32 %v1881_v6, %v1820_v16  ;;  %v2256_v16 = vpack.c.bf16 %v2250_v41, %v2249_v23  ;;  %v2806_v41 = vld [vmem:[%s2894_s8 + $0x10] sm:$0xff]  }
 0x1c2   : > { %v1727_v39 = vpop.f32.mrf.mxu2 }
 0x1c3   : > { %v1728_v35 = vadd.f32 %v1727_v39, %v1672_v46  ;;  %v1800_v1 = vpop.f32.mrf.mxu3  ;;  %v1675_v29 = vpop.f32.mrf.mxu1 }
 0x1c4   : > { %v1883_v44 = vpop.f32.mrf.mxu0 }
 0x1c5   : > { %v1821_v34 = vadd.f32 %v1800_v1, %v1728_v35  ;;  %v2251_v1 = vld [vmem:[#allocation2 + $0x5b] sm:$0xff] }
 0x1c6   : > { %2745 = vmatmul.msk.bf16.vlgmr.msra.gmra.mxu1 %vm321_vm0, %v2253_v20 }
 0x1c7   : > { %v3600_v15 = vadd.f32 %v1883_v44, %v1821_v34 }
 0x1ca   : > { %v1730_v25 = vpop.f32.mrf.mxu2 }
 0x1cb   : > { %v1731_v54 = vadd.f32 %v1730_v25, %v1675_v29  ;;  %v1803_v61 = vpop.f32.mrf.mxu3  ;;  %v1677_v21 = vpop.f32.mrf.mxu1  ;;  %v2252_v29 = vld [vmem:[#allocation2 + $0x63] sm:$0xff] }
 0x1cc   : > { %v1886_v3 = vpop.f32.mrf.mxu0  ;;  %v2257_v34 = vpack.c.bf16 %v2252_v29, %v2251_v1 }
 0x1cd   : > { %v1822_v58 = vadd.f32 %v1803_v61, %v1731_v54 }
 0x1cf   : > { %v1905_v26 = vadd.f32 %v1886_v3, %v1822_v58 }
 0x1d2   : > { %v1732_v17 = vpop.f32.mrf.mxu2 }
 0x1d3   : > { %v1733_v52 = vadd.f32 %v1732_v17, %v1677_v21  ;;  %v1805_v38 = vpop.f32.mrf.mxu3  ;;  %v1680_v19 = vpop.f32.mrf.mxu1 }
 0x1d4   : > { %v1888_v4 = vpop.f32.mrf.mxu0 }
 0x1d5   : > { %v1823_v11 = vadd.f32 %v1805_v38, %v1733_v52 }
 0x1d6   : > { %2746 = vmatmul.msk.bf16.gmra.mxu1 %vm321_vm0, %v2254_v27  ;;  %v2340_v27 = vld [vmem:[%s2894_s8 + $0x4] sm:$0xe] }
 0x1d7   : > { %v1906_v59 = vadd.f32 %v1888_v4, %v1823_v11 }
 0x1da   : > { %v1735_v9 = vpop.f32.mrf.mxu2 }
 0x1db   : > { %v1736_v13 = vadd.f32 %v1735_v9, %v1680_v19  ;;  %v1808_v14 = vpop.f32.mrf.mxu3  ;;  %v1682_v53 = vpop.f32.mrf.mxu1 }
 0x1dc   : > { %v1891_v60 = vpop.f32.mrf.mxu0 }
 0x1dd   : > { %v1824_v37 = vadd.f32 %v1808_v14, %v1736_v13 }
 0x1df   : > { %v1907_v40 = vadd.f32 %v1891_v60, %v1824_v37 }
 0x1e2   : > { %v1737_v42 = vpop.f32.mrf.mxu2 }
 0x1e3   : > { %v1738_v18 = vadd.f32 %v1737_v42, %v1682_v53  ;;  %v1810_v50 = vpop.f32.mrf.mxu3  ;;  %v1685_v32 = vpop.f32.mrf.mxu1  ;;  %v2351_v53 = vunpack.c.l.bf16 %v2340_v27 }
 0x1e4   : > { %v1893_v10 = vpop.f32.mrf.mxu0 }
 0x1e5   : > { %v1825_v55 = vadd.f32 %v1810_v50, %v1738_v18 }
 0x1e6   : > { %2747 = vmatmul.msk.bf16.gmra.mxu1 %vm321_vm0, %v2255_v45 }
 0x1e7   : > { %v1908_v49 = vadd.f32 %v1893_v10, %v1825_v55 }
 0x1ea   : > { %v1740_v48 = vpop.f32.mrf.mxu2 }
 0x1eb   : > { %v1741_v7 = vadd.f32 %v1740_v48, %v1685_v32  ;;  %v1813_v33 = vpop.f32.mrf.mxu3  ;;  %v1687_v62 = vpop.f32.mrf.mxu1  ;;  %v3630_v32 = vld [vmem:[%s3697_s4] ss:$0 sm:$0xff] }
 0x1ec   : > { %v1896_v47 = vpop.f32.mrf.mxu0 }
 0x1ed   : > { %v1826_v5 = vadd.f32 %v1813_v33, %v1741_v7 }
 0x1ef   : > { %v1909_v28 = vadd.f32 %v1896_v47, %v1826_v5 }
 0x1f2   : > { %v1742_v63 = vpop.f32.mrf.mxu2 }
 0x1f3   : > { %v1743_v57 = vadd.f32 %v1742_v63, %v1687_v62  ;;  %v1815_v0 = vpop.f32.mrf.mxu3  ;;  %v1959_v12 = vpop.f32.mrf.mxu1 }
 0x1f4   : > { %v1984_v6 = vadd.f32 %v1959_v12, %v3589_v51  ;;  %v1898_v56 = vpop.f32.mrf.mxu0 }
 0x1f5   : > { %v1827_v46 = vadd.f32 %v1815_v0, %v1743_v57 }
 0x1f6   : > { %2748 = vmatmul.msk.bf16.gmra.mxu1 %vm321_vm0, %v2256_v16  ;;  %v2792_v16 = vunpack.c.l.bf16 %v2806_v41 }
 0x1f7   : > { %v1910_v39 = vadd.f32 %v1898_v56, %v1827_v46 }
 0x1fa   : > { %v2042_v58 = vpop.f32.mrf.mxu2 }
 0x1fb   : > { %v1961_v31 = vpop.f32.mrf.mxu1  ;;  %v2067_v11 = vadd.f32 %v2042_v58, %v1984_v6 }
 0x1fc   : > { %v1985_v35 = vadd.f32 %v1961_v31, %v3592_v2  ;;  %v2208_v52 = vpop.f32.mrf.mxu0 }
 0x202   : > { %v2044_v38 = vpop.f32.mrf.mxu2 }
 0x203   : > { %v1964_v44 = vpop.f32.mrf.mxu1  ;;  %v2068_v18 = vadd.f32 %v2044_v38, %v1985_v35  ;;  %v2379_v35 = vrot.slane %v2792_v16, 3 }
 0x204   : > { %v1986_v43 = vadd.f32 %v1964_v44, %v3597_v30  ;;  %v2125_v30 = vpop.f32.mrf.mxu3  ;;  %v2210_v4 = vpop.f32.mrf.mxu0 }
 0x205   : > { %v2150_v60 = vadd.f32 %v2125_v30, %v2067_v11 }
 0x206   : > { %2749 = vmatmul.msk.bf16.gmra.mxu1 %vm321_vm0, %v2257_v34  ;;  %vm2435_vm0 = vcmask 125952  }
 0x207   : > { %v2233_v22 = vadd.f32 %v2208_v52, %v2150_v60 }
 0x20a   : > { %v2047_v36 = vpop.f32.mrf.mxu2 }
 0x20b   : > { %v1966_v20 = vpop.f32.mrf.mxu1 }
 0x20c   : > { %v3611_v25 = vadd.f32 %v1966_v20, %v3600_v15  ;;  %v2213_v50 = vpop.f32.mrf.mxu0 }
 0x212   : > { %v2049_v10 = vpop.f32.mrf.mxu2 }
 0x213   : > { %v1969_v51 = vpop.f32.mrf.mxu1  ;;  %v2070_v29 = vadd.f32 %v2049_v10, %v3611_v25 }
 0x214   : > { %v3613_v54 = vadd.f32 %v1969_v51, %v1905_v26  ;;  %v2127_v26 = vpop.f32.mrf.mxu3  ;;  %v2215_v0 = vpop.f32.mrf.mxu0 }
 0x215   : > { %v2151_v48 = vadd.f32 %v2127_v26, %v2068_v18 }
 0x217   : > { %v2234_v5 = vadd.f32 %v2210_v4, %v2151_v48 }
 0x21a   : > { %v2052_v46 = vpop.f32.mrf.mxu2 }
 0x21b   : > { %v1971_v61 = vpop.f32.mrf.mxu1  ;;  %v2071_v26 = vadd.f32 %v2052_v46, %v3613_v54 }
 0x21c   : > { %v3615_v21 = vadd.f32 %v1971_v61, %v1906_v59  ;;  %v2805_v59 = vld [vmem:[%s2894_s8 + $0x8] sm:$0xff]   ;;  %v2130_v37 = vpop.f32.mrf.mxu3  ;;  %v2218_v30 = vpop.f32.mrf.mxu0 }
 0x21d   : > { %v2788_v14 = vunpack.c.l.bf16 %v2805_v59 }
 0x21f   : > { %v2375_v42 = vrot.slane %v2788_v14, 3 }
 0x222   : > { %v2054_v52 = vpop.f32.mrf.mxu2 }
 0x223   : > { %v1974_v2 = vpop.f32.mrf.mxu1 }
 0x224   : > { %v3617_v3 = vadd.f32 %v1974_v2, %v1907_v40  ;;  %v2374_v40 = vrot.slane %v2351_v53, 3  ;;  %v2132_v62 = vpop.f32.mrf.mxu3  ;;  %v2793_v2 = vunpack.c.h.bf16 %v2806_v41 }
 0x225   : > { %v2153_v58 = vadd.f32 %v2132_v62, %v2070_v29 }
 0x226   : > { %v2376_v45 = vsel %vm1084_vm6, %v2374_v40, %v2375_v42  ;;  %v2220_v40 = vpop.f32.mrf.mxu0 }
 0x227   : > { %v2236_v25 = vadd.f32 %v2215_v0, %v2153_v58 }
 0x22b   : > { %v1976_v17 = vpop.f32.mrf.mxu1 }
 0x22c   : > { %v3619_v8 = vadd.f32 %v1976_v17, %v1908_v49  ;;  %v2789_v49 = vunpack.c.h.bf16 %v2805_v59 }
 0x22e   : > { %v2377_v47 = vrot.slane %v2789_v49, 3 }
 0x230   : > { %v2378_v6 = vsel %vm1084_vm6, %v2375_v42, %v2377_v47  ;;  %v2380_v61 = vsel %vm1084_vm6, %v2377_v47, %v2379_v35 }
 0x233   : > { %v1979_v15 = vpop.f32.mrf.mxu1 }
 0x234   : > { %v3621_v19 = vadd.f32 %v1979_v15, %v1909_v28  ;;  %v2069_v28 = vadd.f32 %v2047_v36, %v1986_v43  ;;  %v2135_v43 = vpop.f32.mrf.mxu3  ;;  %v2381_v15 = vrot.slane %v2793_v2, 3  ;;  %v2807_v36 = vld [vmem:[%s2894_s8 + $0x18] sm:$0xff]  }
 0x235   : > { %v2796_v53 = vunpack.c.l.bf16 %v2807_v36  ;;  %v2154_v60 = vadd.f32 %v2135_v43, %v2071_v26  ;;  %v2797_v48 = vunpack.c.h.bf16 %v2807_v36  ;;  %v2349_v26 = vld [vmem:[%s2894_s8 + $0x28] sm:$0xf] }
 0x236   : > { %v2152_v56 = vadd.f32 %v2130_v37, %v2069_v28  ;;  %v2382_v14 = vsel %vm1084_vm6, %v2379_v35, %v2381_v15 }
 0x237   : > { %v2383_v18 = vrot.slane %v2796_v53, 3  ;;  %v2237_v54 = vadd.f32 %v2218_v30, %v2154_v60 }
 0x238   : > { %v2235_v1 = vadd.f32 %v2213_v50, %v2152_v56  ;;  %v2072_v50 = vadd.f32 %v2054_v52, %v3615_v21 }
 0x239   : > { %v2384_v49 = vsel %vm1084_vm6, %v2381_v15, %v2383_v18 }
 0x23b   : > { %v1981_v9 = vpop.f32.mrf.mxu1 }
 0x23c   : > { %v3625_v13 = vadd.f32 %v1981_v9, %v1910_v39  ;;  %v2137_v9 = vpop.f32.mrf.mxu3 }
 0x243   : > { %v2291_v24 = vpop.f32.mrf.mxu1 }
 0x244   : > { %v2316_v55 = vadd.f32 %v2291_v24, %v2233_v22  ;;  %v2057_v22 = vpop.f32.mrf.mxu2  ;;  %v2140_v62 = vpop.f32.mrf.mxu3 }
 0x245   : > { %v2073_v21 = vadd.f32 %v2057_v22, %v3617_v3 }
 0x246   : > { %v2330_v7 = vadd.f32 %v3630_v32, %v2316_v55 }
 0x247   : > { %v2156_v56 = vadd.f32 %v2140_v62, %v2073_v21 }
 0x248   : > { %v2405_v33 = vadd.f32 %v2376_v45, %v2330_v7  ;;  %v2155_v7 = vadd.f32 %v2137_v9, %v2072_v50  ;;  %v2360_v9 = vunpack.c.l.bf16 %v2349_v26 }
 0x24a   : > { %v2415_v63 = vmax.f32 %v2405_v33, 0.0  ;;  %v2238_v28 = vadd.f32 %v2220_v40, %v2155_v7 }
 0x24b   : > { %v2293_v57 = vpop.f32.mrf.mxu1 }
 0x24c   : > { %v2425_v12 = vpack.c.bf16 %v2415_v63, %v2415_v63  ;;  %v2317_v23 = vadd.f32 %v2293_v57, %v2234_v5  ;;  %v2385_v5 = vrot.slane %v2797_v48, 3  ;;  %v2223_v63 = vpop.f32.mrf.mxu0  ;;  %v2808_v57 = vld [vmem:[%s2894_s8 + $0x20] sm:$0xff]   ;;  %v2059_v0 = vpop.f32.mrf.mxu2 }
 0x24d   : > { %v2800_v16 = vunpack.c.l.bf16 %v2808_v57  ;;  %v2142_v35 = vpop.f32.mrf.mxu3  ;;  %v2239_v3 = vadd.f32 %v2223_v63, %v2156_v56  ;;  %v2074_v29 = vadd.f32 %v2059_v0, %v3619_v8  ;;  %v2801_v58 = vunpack.c.h.bf16 %v2808_v57 }
 0x24e   : > { %2436 = vst.msk [vmem:[%s3639_s22] sm:$0xf] %vm2435_vm0, %v2425_v12  ;;  %v2331_v39 = vadd.f32 %v3630_v32, %v2317_v23 }
 0x24f   : > { %v2157_v30 = vadd.f32 %v2142_v35, %v2074_v29 }
 0x250   : > { %v2406_v31 = vadd.f32 %v2378_v6, %v2331_v39  ;;  %v2386_v6 = vsel %vm1084_vm6, %v2383_v18, %v2385_v5 }
 0x252   : > { %v2416_v44 = vmax.f32 %v2406_v31, 0.0 }
 0x253   : > { %v2296_v34 = vpop.f32.mrf.mxu1 }
 0x254   : > { %v2426_v20 = vpack.c.bf16 %v2416_v44, %v2416_v44  ;;  %v2318_v51 = vadd.f32 %v2296_v34, %v2235_v1  ;;  %v2387_v1 = vrot.slane %v2800_v16, 3 }
 0x256   : > { %2437 = vst.msk [vmem:[%s3639_s22 + $0x4] sm:$0xf] %vm2435_vm0, %v2426_v20  ;;  %v2332_v17 = vadd.f32 %v3630_v32, %v2318_v51  ;;  %v2225_v51 = vpop.f32.mrf.mxu0  ;;  %v2388_v2 = vsel %vm1084_vm6, %v2385_v5, %v2387_v1 }
 0x257   : > { %v2240_v15 = vadd.f32 %v2225_v51, %v2157_v30 }
 0x258   : > { %v2407_v38 = vadd.f32 %v2380_v61, %v2332_v17  ;;  %v2062_v61 = vpop.f32.mrf.mxu2 }
 0x259   : > { %v2075_v8 = vadd.f32 %v2062_v61, %v3621_v19  ;;  %v2391_v19 = vrot.slane %v2360_v9, 3 }
 0x25a   : > { %v2417_v4 = vmax.f32 %v2407_v38, 0.0  ;;  %v2389_v38 = vrot.slane %v2801_v58, 3 }
 0x25b   : > { %v2298_v11 = vpop.f32.mrf.mxu1 }
 0x25c   : > { %v2427_v27 = vpack.c.bf16 %v2417_v4, %v2417_v4  ;;  %v2319_v59 = vadd.f32 %v2298_v11, %v2236_v25  ;;  %v2145_v4 = vpop.f32.mrf.mxu3 }
 0x25e   : > { %2438 = vst.msk [vmem:[%s3639_s22 + $0x8] sm:$0xf] %vm2435_vm0, %v2427_v27  ;;  %v2333_v37 = vadd.f32 %v3630_v32, %v2319_v59  ;;  %v2390_v59 = vsel %vm1084_vm6, %v2387_v1, %v2389_v38  ;;  %v2228_v60 = vpop.f32.mrf.mxu0 }
 0x260   : > { %v2408_v42 = vadd.f32 %v2382_v14, %v2333_v37  ;;  %v2158_v14 = vadd.f32 %v2145_v4, %v2075_v8  ;;  %v2064_v37 = vpop.f32.mrf.mxu2 }
 0x261   : > { %v2076_v22 = vadd.f32 %v2064_v37, %v3625_v13 }
 0x262   : > { %v2418_v10 = vmax.f32 %v2408_v42, 0.0  ;;  %v2241_v42 = vadd.f32 %v2228_v60, %v2158_v14 }
 0x263   : > { %v2301_v24 = vpop.f32.mrf.mxu1 }
 0x264   : > { %v2428_v55 = vpack.c.bf16 %v2418_v10, %v2418_v10  ;;  %v2320_v45 = vadd.f32 %v2301_v24, %v2237_v54  ;;  %v2350_v54 = vld [vmem:[%s2894_s8 + $0x2c] sm:$0x3] }
 0x266   : > { %2439 = vst.msk [vmem:[%s3639_s22 + $0xc] sm:$0xf] %vm2435_vm0, %v2428_v55  ;;  %v2334_v33 = vadd.f32 %v3630_v32, %v2320_v45  ;;  %v2147_v55 = vpop.f32.mrf.mxu3  ;;  %v2392_v45 = vsel %vm1084_vm6, %v2389_v38, %v2391_v19  ;;  %v2230_v62 = vpop.f32.mrf.mxu0 }
 0x267   : > { %v2159_v48 = vadd.f32 %v2147_v55, %v2076_v22 }
 0x268   : > { %v2409_v47 = vadd.f32 %v2384_v49, %v2334_v33  ;;  %v2361_v49 = vunpack.c.l.bf16 %v2350_v54 }
 0x269   : > { %v2242_v13 = vadd.f32 %v2230_v62, %v2159_v48 }
 0x26a   : > { %v2419_v41 = vmax.f32 %v2409_v47, 0.0  ;;  %v2393_v47 = vrot.slane %v2361_v49, 3 }
 0x26b   : > { %v2303_v12 = vpop.f32.mrf.mxu1 }
 0x26c   : > { %v2429_v23 = vpack.c.bf16 %v2419_v41, %v2419_v41  ;;  %v2321_v46 = vadd.f32 %v2303_v12, %v2238_v28  ;;  %v2394_v41 = vsel %vm1084_vm6, %v2391_v19, %v2393_v47 }
 0x26e   : > { %2440 = vst.msk [vmem:[%s3639_s22 + $0x10] sm:$0xf] %vm2435_vm0, %v2429_v23  ;;  %v2335_v39 = vadd.f32 %v3630_v32, %v2321_v46 }
 0x270   : > { %v2410_v31 = vadd.f32 %v2386_v6, %v2335_v39 }
 0x272   : > { %v2420_v44 = vmax.f32 %v2410_v31, 0.0 }
 0x273   : > { %v2306_v43 = vpop.f32.mrf.mxu1 }
 0x274   : > { %v2430_v34 = vpack.c.bf16 %v2420_v44, %v2420_v44  ;;  %v2322_v20 = vadd.f32 %v2306_v43, %v2239_v3 }
 0x276   : > { %2441 = vst.msk [vmem:[%s3639_s22 + $0x14] sm:$0xf] %vm2435_vm0, %v2430_v34  ;;  %v2336_v17 = vadd.f32 %v3630_v32, %v2322_v20 }
 0x278   : > { %v2411_v52 = vadd.f32 %v2388_v2, %v2336_v17 }
 0x27a   : > { %v2421_v25 = vmax.f32 %v2411_v52, 0.0 }
 0x27b   : > { %v2308_v36 = vpop.f32.mrf.mxu1 }
 0x27c   : > { %v2431_v11 = vpack.c.bf16 %v2421_v25, %v2421_v25  ;;  %v2323_v27 = vadd.f32 %v2308_v36, %v2240_v15 }
 0x27e   : > { %2442 = vst.msk [vmem:[%s3639_s22 + $0x18] sm:$0xf] %vm2435_vm0, %v2431_v11  ;;  %v2337_v53 = vadd.f32 %v3630_v32, %v2323_v27 }
 0x280   : > { %v2412_v40 = vadd.f32 %v2390_v59, %v2337_v53 }
 0x282   : > { %v2422_v18 = vmax.f32 %v2412_v40, 0.0 }
 0x283   : > { %v2311_v50 = vpop.f32.mrf.mxu1 }
 0x284   : > { %v2432_v10 = vpack.c.bf16 %v2422_v18, %v2422_v18  ;;  %v2324_v24 = vadd.f32 %v2311_v50, %v2241_v42 }
 0x286   : > { %2443 = vst.msk [vmem:[%s3639_s22 + $0x1c] sm:$0xf] %vm2435_vm0, %v2432_v10  ;;  %v2338_v7 = vadd.f32 %v3630_v32, %v2324_v24 }
 0x288   : > { %v2413_v33 = vadd.f32 %v2392_v45, %v2338_v7 }
 0x28a   : > { %v2423_v5 = vmax.f32 %v2413_v33, 0.0 }
 0x28b   : > { %v2313_v28 = vpop.f32.mrf.mxu1 }
 0x28c   : > { %v2433_v21 = vpack.c.bf16 %v2423_v5, %v2423_v5  ;;  %v2325_v63 = vadd.f32 %v2313_v28, %v2242_v13 }
 0x28e   : > { %2444 = vst.msk [vmem:[%s3639_s22 + $0x20] sm:$0xf] %vm2435_vm0, %v2433_v21  ;;  %v2339_v57 = vadd.f32 %v3630_v32, %v2325_v63 }
 0x290   : > { %v2414_v0 = vadd.f32 %v2394_v41, %v2339_v57 }
 0x292   : > { %v2424_v12 = vmax.f32 %v2414_v0, 0.0 }
 0x294   : > { %v2434_v23 = vpack.c.bf16 %v2424_v12, %v2424_v12 }
 0x296   : > { %2445 = vst.msk [vmem:[%s3639_s22 + $0x24] sm:$0xf] %vm2435_vm0, %v2434_v23 }
 0x297 PF: > { %s15_s18 = sadd.s32 1, %s2831_s18  }
 0x298   : > { %p12_p4 = scmp.ge.s32.totalorder %s15_s18, 4  }
 0x29a   :  { %14 = sbr.rel (!%p12_p4) target bundleno = 1 (0x1), region = 86 }

// kernel: resnet_forward.10
= control target key start
LH: loop header
LB: loop body
LE: loop exit
PB: predicated region body
PF: predicated region fallthrough
CT: control target
= control target key end

     0   :  { %s1668_s24 = smov 0   ;;  %s1892_s0 = inlined_call_operand.vmem [shape: bf16[2,128,16], index: 0, kind: input, shape index: {}]   ;;  %s1893_s1 = inlined_call_operand.vmem [shape: bf16[9,16,16], index: 1, kind: input, shape index: {}]   ;;  %s1894_s2 = inlined_call_operand.vmem [shape: f32[1,16], index: 2, kind: input, shape index: {}]   ;;  %s1895_s3 = inlined_call_operand.vmem [shape: bf16[9,16,16], index: 3, kind: input, shape index: {}]   ;;  %s1896_s4 = inlined_call_operand.vmem [shape: f32[1,16], index: 4, kind: input, shape index: {}]   ;;  %s1897_s5 = inlined_call_operand.vmem [shape: bf16[16,16], index: 5, kind: input, shape index: {}]   ;;  %s1898_s6 = inlined_call_operand.vmem [shape: f32[1,16], index: 6, kind: input, shape index: {}]   ;;  %s1899_s7 = inlined_call_operand.vmem [shape: bf16[2,24,16], index: 7, kind: output, shape index: {}]  }
   0x1 LB: > { %s1375_s25 = sadd.s32 4294967295, %s1624_s24   ;;  %p1379_p0 = scmp.ge.s32.totalorder %s1624_s24, 1  ;;  %s1624_s24 = sphi %s1668_s24, %s17_s24  }
   0x2   : > { %p237_p1 = scmp.lt.s32.totalorder %s1624_s24, 3 }
   0x4   : > { %p238_p2 = pnand %p1379_p0, %p237_p1 }
   0x5   : > { %p269_p3 = scmp.lt.s32.totalorder (!%p238_p2), %s1375_s25, 1 }
   0x6   : > { %241 = sbr.rel (%p238_p2) target bundleno = 448 (0x1c0), region = 48 }
   0xb   : > { %v1569_v0 = vld [vmem:[%s1893_s1] sm:$0xff]  ;;  %v1571_v1 = vld [vmem:[%s1893_s1 + $0x8] sm:$0xff]  ;;  %v1574_v2 = vld [vmem:[%s1893_s1 + $0x18] sm:$0xff]  ;;  %s1901_s25 = smov (!%p269_p3, %s1375_s25), 1  ;;  %vm305_vm0 = vcmask 130048   ;;  %vm604_vm2 = vcmask 1044480  }
   0xc   : > { %v1572_v3 = vld [vmem:[%s1893_s1 + $0x10] sm:$0xff]  ;;  %v1576_v4 = vld [vmem:[%s1893_s1 + $0x20] sm:$0xff]  ;;  %357 = vmatpush.bf16.msra.mxu1 %v1569_v0  ;;  %319 = vmatpush.bf16.msra.mxu0 %v1571_v1  ;;  %v1579_v6 = vld [vmem:[%s1893_s1 + $0x28] sm:$0xff]  ;;  %s1567_s17 = sshll.u32 %s1901_s25, 6  ;;  %vm385_vm1 = vsmask.f32 7424 }
   0xd   : > { %v1580_v5 = vld [vmem:[%s1893_s1 + $0x30] sm:$0xff]  ;;  %1603 = vmatpush.bf16.msra.mxu3 %v1571_v1  ;;  %420 = vmatpush.bf16.msra.mxu2 %v1572_v3  ;;  %s1703_s20 = scalar_lea.vmem %s1892_s0, %s1567_s17  ;;  %v1584_v7 = vld [vmem:[%s1893_s1 + $0x40] sm:$0xff]  ;;  %v1583_v19 = vld [vmem:[%s1893_s1 + $0x38] sm:$0xff]  ;;  %vm701_vm3 = vsmask.f32 4352  ;;  %s1604_s9 = smul.u32 12, %s1901_s25 }
   0xe   : > { %v1568_v8 = vld [vmem:[%s1703_s20] sm:$0xff]  ;;  %v1570_v9 = vld [vmem:[%s1703_s20 + $0x10] sm:$0xff]  ;;  %v287_v10 = vld [vmem:[%s1703_s20 + $0x18] sm:$0xf] }
   0xf   : > { %v296_v11 = vunpack.c.l.b16 %v287_v10  ;;  %v1597_v12 = vld [vmem:[%s1703_s20] sm:$0xff]   ;;  %v1713_v13 = vld [vmem:[%s1703_s20 + $0x8] sm:$0xff]   ;;  %1403 = vmatmul.msk.bf16.vlgmr.msra.gmra.mxu1 %vm305_vm0, %v1568_v8  ;;  %1393 = vmatmul.msk.bf16.vlgmr.msra.gmra.mxu0 %vm305_vm0, %v1570_v9  ;;  %v1575_v30 = vld [vmem:[%s1703_s20 + $0x30] sm:$0xff]  ;;  %s278_s12 = scalar_lea.vmem %s1899_s7, %s1604_s9 }
  0x10   : > { %514 = vmatpush.bf16.msrb.mxu0 %v1576_v4  ;;  %579 = vmatpush.bf16.msrb.mxu1 %v1579_v6  ;;  %v371_v14 = vld [vmem:[%s1703_s20 + $0xc] sm:$0x1]  ;;  %v381_v15 = vunpack.c.l.b16 %v1713_v13  ;;  %v387_v17 = vshrl.u32 %v1597_v12, 16  ;;  %v389_v18 = vshll.u32 %v1597_v12, 16  ;;  %v282_v25 = vld [vmem:[%s1703_s20 + $0x8] sm:$0xf] }
  0x11   : > { %467 = vmatpush.bf16.msrb.mxu3 %v1574_v2  ;;  %627 = vmatpush.bf16.msrb.mxu2 %v1580_v5  ;;  %v382_v16 = vunpack.c.l.b16 %v371_v14  ;;  %v298_v20 = vpack.c.b16 %v296_v11, %v296_v11  ;;  %v335_v28 = vunpack.c.l.b16 %v282_v25  ;;  %v1577_v31 = vld [vmem:[%s1703_s20 + $0x20] sm:$0xff]  ;;  %v1445_v32 = vld [vmem:[%s1703_s20 + $0x28] sm:$0xf]  ;;  %v1578_v33 = vld [vmem:[%s1703_s20 + $0x28] sm:$0x10]  ;;  %v711_v59 = vshrl.u32 %v1713_v13, 16 }
  0x12   : > { %v391_v22 = vrot.slane %v389_v18, 1  ;;  %v1573_v34 = vld [vmem:[%s1703_s20 + $0x20] sm:$0xff]  ;;  %v1446_v36 = vor.u32 %v1578_v33, %v1445_v32  ;;  %v548_v37 = vshll.u32 %v1577_v31, 16  ;;  %v546_v39 = vshrl.u32 %v1577_v31, 16  ;;  %v483_v42 = vld [vmem:[%s1703_s20 + $0x38] sm:$0xf] }
  0x13   : > { %v384_v21 = vpack.c.b16 %v382_v16, %v381_v15  ;;  %1394 = vmatmul.msk.bf16.vlgmr.msra.gmra.mxu3 %vm305_vm0, %v298_v20  ;;  %v337_v29 = vpack.c.b16 %v335_v28, %v335_v28  ;;  %v594_v43 = vld [vmem:[%s1703_s20 + $0xc] sm:$0x7]  ;;  %v436_v44 = vld [vmem:[%s1703_s20 + $0x28] sm:$0xf]  ;;  %v492_v45 = vunpack.c.l.b16 %v483_v42  ;;  %v1600_v50 = vld [vmem:[%s1703_s20] sm:$0xf0]  ;;  %v762_v20 = vlaneseq }
  0x14   : > { %738 = vmatpush.bf16.msra.mxu0 %v1584_v7  ;;  %v392_v23 = vor.u32 %v391_v22, %v387_v17  ;;  %v550_v40 = vrot.slane %v548_v37, 1  ;;  %v553_v41 = vshll.u32 %v1446_v36, 16  ;;  %v601_v48 = vunpack.c.l.b16 %v594_v43  ;;  %v1601_v51 = vld [vmem:[%s1703_s20] sm:$0x8]  ;;  %v1465_v63 = vld [vmem:[%s1703_s20 + $0x10] sm:$0x8] }
  0x15   : > { %v394_v24 = vshll.u32 %v384_v21, 16  ;;  %680 = vmatpush.bf16.msra.mxu3 %v1583_v19  ;;  %v398_v35 = vshrl.u32 %v384_v21, 16  ;;  %v445_v49 = vunpack.c.l.b16 %v436_v44  ;;  %v494_v52 = vpack.c.b16 %v492_v45, %v492_v45  ;;  %v1581_v0 = vld [vmem:[%s1703_s20 + $0x10] sm:$0xf0]  ;;  %v1469_v1 = vld [vmem:[%s1703_s20 + $0x18] sm:$0xf] }
  0x16   : > { %v551_v46 = vor.u32 %v550_v40, %v546_v39  ;;  %v555_v47 = vrot.slane %v553_v41, 1  ;;  %v1602_v54 = vor.u32 %v1601_v51, %v1600_v50  ;;  %v603_v55 = vpack.c.b16 %v601_v48, %v381_v15  ;;  %v1582_v2 = vld [vmem:[%s1703_s20 + $0x18] sm:$0x70]  ;;  %v1586_v50 = vld [vmem:[%s1895_s3 + $0x8] sm:$0xff] }
  0x17   : > { %v396_v26 = vrot.slane %v394_v24, 1  ;;  %v447_v56 = vpack.c.b16 %v445_v49, %v445_v49  ;;  %v714_v60 = vshll.u32 %v1713_v13, 16  ;;  %v713_v5 = vrot.slane %v711_v59, 3  ;;  %922 = vmatpush.bf16.msra.mxu1 %v1586_v50 }
  0x18   : > { %v556_v53 = vsel %vm385_vm1, %v551_v46, %v555_v47  ;;  %v703_v57 = vshrl.u32 %v1602_v54, 16  ;;  %v706_v58 = vshll.u32 %v1602_v54, 16  ;;  %v605_v61 = vrot.slane %v1602_v54, 3 }
  0x19   : > { %v397_v27 = vsel %vm385_vm1, %v392_v23, %v396_v26  ;;  %v400_v38 = vor.u32 %v398_v35, %v396_v26  ;;  %v606_v62 = vrot.slane %v603_v55, 3  ;;  %v716_v6 = vrot.slane %v714_v60, 4 }
  0x1a   : > { %1411 = vmatmul.msk.bf16.vlgmr.msra.gmra.mxu2 %vm305_vm0, %v397_v27  ;;  %v705_v3 = vrot.slane %v703_v57, 3  ;;  %v708_v4 = vrot.slane %v706_v58, 4  ;;  %v557_v8 = vshrl.u32 %v1446_v36, 16  ;;  %v1466_v9 = vor.u32 %v1581_v0, %v1465_v63  ;;  %v1585_v36 = vld [vmem:[%s1895_s3] sm:$0xff] }
  0x1b   : > { %v607_v7 = vsel %vm604_vm2, %v605_v61, %v606_v62  ;;  %v1470_v10 = vor.u32 %v1582_v2, %v1469_v1  ;;  %v717_v12 = vor.u32 %v716_v6, %v713_v5  ;;  %v1763_v21 = vshrl.u32 %v762_v20, 7  ;;  %952 = vmatpush.bf16.msra.mxu2 %v1585_v36 }
  0x1c   : > { %v709_v11 = vor.u32 %v708_v4, %v705_v3  ;;  %v559_v13 = vor.u32 %v557_v8, %v555_v47  ;;  %v658_v14 = vrot.slane %v1466_v9, 3  ;;  %v1626_v43 = vmov 0  }
  0x1d   : > { %v659_v15 = vrot.slane %v1470_v10, 3  ;;  %v769_v25 = vand.u32 65535, %v1763_v21  ;;  %v770_v26 = vshrl.u32 %v1763_v21, 16  ;;  %v1790_v47 = vadd.s32 16, %v1763_v21 }
  0x1e   : > { %v718_v16 = vsel %vm701_vm3, %v709_v11, %v717_v12  ;;  %v1627_v11 = vmov 0.0  }
  0x1f   : > { %1404 = vmatmul.msk.bf16.gmra.mxu1 %vm305_vm0, %v337_v29  ;;  %1435 = vmatmul.msk.bf16.vlgmr.msrb.gmra.mxu0 %vm305_vm0, %v1575_v30  ;;  %v660_v17 = vsel %vm604_vm2, %v658_v14, %v659_v15  ;;  %v773_v27 = vmul.u32 43690, %v769_v25  ;;  %v774_v28 = vmul.u32 43691, %v770_v26  ;;  %v772_v30 = vmul.u32 43691, %v769_v25  ;;  %880 = vst.msk [vmem:[#allocation2] sm:$0xff] %vm305_vm0, %v1627_v11 }
  0x20   : > { %v775_v42 = vmul.u32 43690, %v770_v26  ;;  %v827_v55 = vand.u32 65535, %v1790_v47  ;;  %v828_v59 = vshrl.u32 %v1790_v47, 16  ;;  %881 = vst.msk [vmem:[#allocation2 + $0x8] sm:$0xff] %vm305_vm0, %v1627_v11 }
  0x21   : > { %v776_v31 = vshll.u32 %v773_v27, 16  ;;  %v778_v37 = vshll.u32 %v774_v28, 16  ;;  %v777_v61 = vshrl.u32 %v773_v27, 16  ;;  %v779_v8 = vshrl.u32 %v774_v28, 16  ;;  %884 = vst.msk [vmem:[#allocation2 + $0x20] sm:$0xff] %vm305_vm0, %v1627_v11 }
  0x22   : > { %v831_v60 = vmul.u32 43690, %v827_v55  ;;  %v830_v4 = vmul.u32 43691, %v827_v55  ;;  %v832_v5 = vmul.u32 43691, %v828_v59  ;;  %882 = vst.msk [vmem:[#allocation2 + $0x10] sm:$0xff] %vm305_vm0, %v1627_v11  ;;  %v833_v20 = vmul.u32 43690, %v828_v59 }
  0x23   : > { %1423 = vmatmul.msk.bf16.vlgmr.msrb.gmra.mxu3 %vm305_vm0, %v1573_v34  ;;  %v1780_v34 = vadd.s32 8, %v1763_v21  ;;  %vm780_vm4 = vc.u32 %v772_v30, %v776_v31  ;;  %v782_v39 = vadd.s32 %v776_v31, %v772_v30  ;;  %883 = vst.msk [vmem:[#allocation2 + $0x18] sm:$0xff] %vm305_vm0, %v1627_v11 }
  0x24   : > { %v781_v44 = vsel %vm780_vm4, 1, %v1626_v43  ;;  %v834_v6 = vshll.u32 %v831_v60, 16 }
  0x25   : > { %v799_v40 = vshrl.u32 %v1780_v34, 16  ;;  %vm784_vm5 = vc.u32 %v782_v39, %v778_v37  ;;  %v783_v54 = vadd.s32 %v781_v44, %v775_v42  ;;  %v835_v44 = vshrl.u32 %v831_v60, 16 }
  0x26   : > { %vm838_vm8 = vc.u32 %v830_v4, %v834_v6  ;;  %v840_v14 = vadd.s32 %v834_v6, %v830_v4 }
  0x27   : > { %v803_v46 = vmul.u32 43691, %v799_v40  ;;  %v804_v63 = vmul.u32 43690, %v799_v40  ;;  %v839_v26 = vsel %vm838_vm8, 1, %v1626_v43 }
  0x29   : > { %v807_v57 = vshll.u32 %v803_v46, 16  ;;  %v808_v36 = vshrl.u32 %v803_v46, 16 }
  0x2a   : > { %1412 = vmatmul.msk.bf16.gmra.mxu2 %vm305_vm0, %v400_v38  ;;  %v798_v38 = vand.u32 65535, %v1780_v34 }
  0x2c   : > { %v802_v41 = vmul.u32 43690, %v798_v38  ;;  %v801_v51 = vmul.u32 43691, %v798_v38  ;;  %v841_v38 = vadd.s32 %v839_v26, %v833_v20 }
  0x2f   : > { %1451 = vmatmul.msk.bf16.vlgmr.msrb.gmra.mxu1 %vm305_vm0, %v556_v53  ;;  %1436 = vmatmul.msk.bf16.gmra.mxu0 %vm305_vm0, %v494_v52  ;;  %v805_v52 = vshll.u32 %v802_v41, 16 }
  0x31   : > { %vm809_vm6 = vc.u32 %v801_v51, %v805_v52  ;;  %v811_v58 = vadd.s32 %v805_v52, %v801_v51 }
  0x32   : > { %v810_v1 = vsel %vm809_vm6, 1, %v1626_v43 }
  0x33   : > { %1424 = vmatmul.msk.bf16.gmra.mxu3 %vm305_vm0, %v447_v56  ;;  %v785_v56 = vsel %vm784_vm5, 1, %v1626_v43  ;;  %vm813_vm7 = vc.u32 %v811_v58, %v807_v57  ;;  %v812_v10 = vadd.s32 %v810_v1, %v804_v63 }
  0x3a   : > { %1459 = vmatmul.msk.bf16.vlgmr.msrb.gmra.mxu2 %vm305_vm0, %v607_v7 }
  0x3f   : > { %1452 = vmatmul.msk.bf16.gmra.mxu1 %vm305_vm0, %v559_v13  ;;  %1483 = vmatmul.msk.bf16.vlgmr.msra.gmra.mxu0 %vm305_vm0, %v718_v16  ;;  %v836_v13 = vshll.u32 %v832_v5, 16  ;;  %v806_v16 = vshrl.u32 %v802_v41, 16 }
  0x41   : > { %vm842_vm9 = vc.u32 %v840_v14, %v836_v13 }
  0x42   : > { %v843_v39 = vsel %vm842_vm9, 1, %v1626_v43 }
  0x43   : > { %1475 = vmatmul.msk.bf16.vlgmr.msra.gmra.mxu3 %vm305_vm0, %v660_v17 }
  0x4a   : > { %1460 = vmatmul.msk.bf16.gmra.mxu2 %vm305_vm0, %v606_v62  ;;  %v787_v62 = vadd.s32 %v785_v56, %v783_v54 }
  0x4c   : > { %v788_v9 = vadd.s32 %v787_v62, %v777_v61  ;;  %v1590_v61 = vld [vmem:[%s1895_s3 + $0x28] sm:$0xff]  ;;  %v1589_v62 = vld [vmem:[%s1895_s3 + $0x20] sm:$0xff] }
  0x4d   : > { %1113 = vmatpush.bf16.msrb.mxu2 %v1590_v61  ;;  %1072 = vmatpush.bf16.msrb.mxu1 %v1589_v62  ;;  %v1595_v61 = vld [vmem:[%s1897_s5] sm:$0xff] }
  0x4e   : > { %v1593_v62 = vld [vmem:[%s1895_s3 + $0x40] sm:$0xff] }
  0x4f   : > { %1484 = vmatmul.msk.bf16.gmra.mxu0 %vm305_vm0, %v717_v12  ;;  %v814_v12 = vsel %vm813_vm7, 1, %v1626_v43 }
  0x50   : > { %v816_v17 = vadd.s32 %v814_v12, %v812_v10 }
  0x52   : > { %v817_v37 = vadd.s32 %v816_v17, %v806_v16 }
  0x53   : > { %1476 = vmatmul.msk.bf16.gmra.mxu3 %vm305_vm0, %v659_v15  ;;  %v789_v15 = vadd.s32 %v788_v9, %v779_v8 }
  0x54   : > { %v818_v42 = vadd.s32 %v817_v37, %v808_v36  ;;  %v1592_v37 = vld [vmem:[%s1895_s3 + $0x38] sm:$0xff] }
  0x55   : > { %v790_v31 = vshrl.u32 %v789_v15, 2 }
  0x56   : > { %v819_v43 = vshrl.u32 %v818_v42, 2 }
  0x57   : > { %v791_v40 = vmul.u32 6, %v790_v31 }
  0x58   : > { %v820_v59 = vmul.u32 6, %v819_v43 }
  0x59   : > { %v792_v56 = vsub.s32 %v1763_v21, %v791_v40 }
  0x5a   : > { %v821_v6 = vsub.s32 %v1780_v34, %v820_v59 }
  0x5b   : > { %vm853_vm10 = vcmp.ne.s32.totalorder %v792_v56, 0  ;;  %vm856_vm11 = vcmp.lt.s32.totalorder %v792_v56, 0  ;;  %v862_v1 = vadd.s32 6, %v792_v56 }
  0x5c   : > { %vm859_vm12 = vmand %vm856_vm11, %vm853_vm10  ;;  %vm854_vm13 = vcmp.ne.s32.totalorder %v821_v6, 0  ;;  %vm857_vm14 = vcmp.lt.s32.totalorder %v821_v6, 0 }
  0x5d   : > { %v865_v11 = vsel %vm859_vm12, %v862_v1, %v792_v56  ;;  %vm860_vm1 = vmand %vm857_vm14, %vm854_vm13 }
  0x5e   : > { %vm868_vm15 = vcmp.lt.s32.totalorder %v865_v11, 4 }
  0x8c   : > { %v1759_v18 = vpop.f32.mrf.mxu1  ;;  %v1761_v19 = vpop.f32.mrf.mxu0 }
  0x94   : > { %v1765_v22 = vpop.f32.mrf.mxu1  ;;  %v1767_v23 = vpop.f32.mrf.mxu0 }
  0x95   : > { %v362_v57 = vadd.f32 %v1765_v22, %v1767_v23 }
  0x96   : > { %v1769_v24 = vpop.f32.mrf.mxu3 }
  0x9c   : > { %v1775_v32 = vpop.f32.mrf.mxu1  ;;  %v1777_v33 = vpop.f32.mrf.mxu0 }
  0x9d   : > { %v1773_v29 = vpop.f32.mrf.mxu2 }
  0x9e   : > { %v328_v35 = vpop.f32.mrf.mxu3 }
  0x9f   : > { %v360_v35 = vadd.f32 %v1759_v18, %v1761_v19  ;;  %v1587_v18 = vld [vmem:[%s1895_s3 + $0x10] sm:$0xff]  ;;  %v1588_v19 = vld [vmem:[%s1895_s3 + $0x18] sm:$0xff] }
  0xa0   : > { %990 = vmatpush.bf16.msrb.mxu3 %v1587_v18  ;;  %1031 = vmatpush.bf16.msrb.mxu0 %v1588_v19 }
  0xa1   : > { %v431_v41 = vadd.f32 %v1773_v29, %v360_v35  ;;  %v837_v29 = vshrl.u32 %v832_v5, 16  ;;  %v1615_v5 = vld [vmem:[%s1894_s2] ss:$0 sm:$0xff] }
  0xa4   : > { %v366_v48 = vpop.f32.mrf.mxu1  ;;  %v1792_v49 = vpop.f32.mrf.mxu0  ;;  %1195 = vmatpush.bf16.msra.mxu0 %v1592_v37 }
  0xa5   : > { %v1787_v45 = vpop.f32.mrf.mxu2  ;;  %v845_v48 = vadd.s32 %v843_v39, %v841_v38 }
  0xa6   : > { %v469_v53 = vpop.f32.mrf.mxu3  ;;  %v432_v21 = vadd.f32 %v1787_v45, %v362_v57 }
  0xa7   : > { %v478_v51 = vadd.f32 %v469_v53, %v431_v41  ;;  %v846_v46 = vadd.s32 %v845_v48, %v835_v44 }
  0xa9   : > { %v525_v53 = vadd.f32 %v1777_v33, %v478_v51  ;;  %v847_v60 = vadd.s32 %v846_v46, %v837_v29 }
  0xab   : > { %v848_v8 = vshrl.u32 %v847_v60, 2 }
  0xac   : > { %v581_v2 = vpop.f32.mrf.mxu1  ;;  %v1801_v3 = vpop.f32.mrf.mxu0 }
  0xad   : > { %v1799_v0 = vpop.f32.mrf.mxu2  ;;  %v590_v58 = vadd.f32 %v581_v2, %v525_v53  ;;  %v849_v15 = vmul.u32 6, %v848_v8 }
  0xae   : > { %v471_v7 = vpop.f32.mrf.mxu3 }
  0xaf   : > { %v479_v22 = vadd.f32 %v471_v7, %v432_v21  ;;  %v365_v7 = vadd.f32 %v1775_v32, %v1769_v24 }
  0xb1   : > { %v526_v9 = vadd.f32 %v1792_v49, %v479_v22  ;;  %v433_v12 = vadd.f32 %v1799_v0, %v365_v7  ;;  %v850_v49 = vsub.s32 %v1790_v47, %v849_v15 }
  0xb3   : > { %vm855_vm2 = vcmp.ne.s32.totalorder %v850_v49, 0  ;;  %vm858_vm3 = vcmp.lt.s32.totalorder %v850_v49, 0  ;;  %v864_v40 = vadd.s32 6, %v850_v49 }
  0xb4   : > { %v583_v27 = vpop.f32.mrf.mxu1  ;;  %v523_v28 = vpop.f32.mrf.mxu0  ;;  %vm861_vm5 = vmand %vm858_vm3, %vm855_vm2 }
  0xb5   : > { %v429_v25 = vpop.f32.mrf.mxu2  ;;  %v591_v13 = vadd.f32 %v583_v27, %v526_v9 }
  0xb6   : > { %v474_v30 = vpop.f32.mrf.mxu3  ;;  %v863_v25 = vadd.s32 6, %v821_v6 }
  0xb7   : > { %v480_v17 = vadd.f32 %v474_v30, %v433_v12  ;;  %v1591_v30 = vld [vmem:[%s1895_s3 + $0x30] sm:$0xff] }
  0xb8   : > { %v866_v31 = vsel %vm860_vm1, %v863_v25, %v821_v6  ;;  %1154 = vmatpush.bf16.msra.mxu3 %v1591_v30 }
  0xb9   : > { %v527_v0 = vadd.f32 %v1801_v3, %v480_v17  ;;  %vm869_vm4 = vcmp.lt.s32.totalorder %v866_v31, 4 }
  0xbc   : > { %v586_v52 = vpop.f32.mrf.mxu1  ;;  %v740_v54 = vpop.f32.mrf.mxu0 }
  0xbd   : > { %v629_v50 = vpop.f32.mrf.mxu2  ;;  %v592_v35 = vadd.f32 %v586_v52, %v527_v0 }
  0xbe   : > { %v476_v55 = vpop.f32.mrf.mxu3  ;;  %v638_v63 = vadd.f32 %v629_v50, %v590_v58  ;;  %v867_v50 = vsel %vm861_vm5, %v864_v40, %v850_v49  ;;  %v1259_v49 = vld [vmem:[%s1703_s20 + $0x38] sm:$0xf] }
  0xbf   : > { %vm870_vm6 = vcmp.lt.s32.totalorder %v867_v50, 4  ;;  %v1267_v0 = vunpack.c.l.b16 %v1259_v49 }
  0xc1   : > { %v1269_v31 = vpack.c.b16 %v1267_v0, %v1267_v0 }
  0xc4   : > { %v742_v33 = vpop.f32.mrf.mxu0  ;;  %v588_v4 = vpop.f32.mrf.mxu1 }
  0xc5   : > { %v631_v23 = vpop.f32.mrf.mxu2 }
  0xc6   : > { %v682_v45 = vpop.f32.mrf.mxu3  ;;  %v639_v20 = vadd.f32 %v631_v23, %v591_v13 }
  0xc7   : > { %v691_v2 = vadd.f32 %v682_v45, %v638_v63 }
  0xc9   : > { %v749_v10 = vadd.f32 %v740_v54, %v691_v2 }
  0xcb   : > { %v756_v14 = vadd.f32 %v1615_v5, %v749_v10 }
  0xcc   : > { %v745_v26 = vpop.f32.mrf.mxu0 }
  0xcd   : > { %v634_v16 = vpop.f32.mrf.mxu2  ;;  %v759_v34 = vmax.f32 %v756_v14, 0.0 }
  0xce   : > { %v684_v28 = vpop.f32.mrf.mxu3  ;;  %v640_v38 = vadd.f32 %v634_v16, %v592_v35 }
  0xcf   : > { %v877_v24 = vsel %vm868_vm15, %v759_v34, 0.0  ;;  %v692_v32 = vadd.f32 %v684_v28, %v639_v20 }
  0xd0   : > { %885 = vst.msk [vmem:[#allocation2 + $0x8] sm:$0xff] %vm305_vm0, %v877_v24  ;;  %v1594_v24 = vld [vmem:[%s1703_s20 + $0x30] sm:$0xff] }
  0xd1   : > { %v750_v27 = vadd.f32 %v742_v33, %v692_v32 }
  0xd3   : > { %v757_v36 = vadd.f32 %v1615_v5, %v750_v27 }
  0xd4   : > { %v747_v3 = vpop.f32.mrf.mxu0 }
  0xd5   : > { %v636_v47 = vpop.f32.mrf.mxu2  ;;  %v760_v39 = vmax.f32 %v757_v36, 0.0 }
  0xd6   : > { %v687_v41 = vpop.f32.mrf.mxu3 }
  0xd7   : > { %v878_v42 = vsel %vm869_vm4, %v760_v39, 0.0  ;;  %v693_v44 = vadd.f32 %v687_v41, %v640_v38  ;;  %v895_v55 = vld [vmem:[#allocation2 + $0x2] sm:$0xff] }
  0xd8   : > { %886 = vst.msk [vmem:[#allocation2 + $0x10] sm:$0xff] %vm305_vm0, %v878_v42  ;;  %v888_v56 = vld [vmem:[#allocation2 + $0x1] sm:$0xff] }
  0xd9   : > { %v751_v48 = vadd.f32 %v745_v26, %v693_v44  ;;  %v963_v18 = vld [vmem:[#allocation2 + $0x3] sm:$0xff] }
  0xda   : > { %v1004_v58 = vld [vmem:[#allocation2 + $0x7] sm:$0xff] }
  0xdb   : > { %v758_v51 = vadd.f32 %v1615_v5, %v751_v48  ;;  %v1045_v7 = vld [vmem:[#allocation2 + $0x8] sm:$0xff] }
  0xdd   : > { %v761_v52 = vmax.f32 %v758_v51, 0.0 }
  0xde   : > { %v689_v54 = vpop.f32.mrf.mxu3 }
  0xdf   : > { %v879_v19 = vsel %vm870_vm6, %v761_v52, 0.0  ;;  %v896_v43 = vld [vmem:[#allocation2 + $0xa] sm:$0xff] }
  0xe0   : > { %v889_v29 = vld [vmem:[#allocation2 + $0x9] sm:$0xff]  ;;  %887 = vst.msk [vmem:[#allocation2 + $0x18] sm:$0xff] %vm305_vm0, %v879_v19  ;;  %v898_v57 = vpack.c.bf16 %v896_v43, %v895_v55 }
  0xe1   : > { %v964_v46 = vld [vmem:[#allocation2 + $0xb] sm:$0xff]  ;;  %v891_v53 = vpack.c.bf16 %v889_v29, %v888_v56 }
  0xe2   : > { %v966_v21 = vpack.c.bf16 %v964_v46, %v963_v18  ;;  %v1005_v59 = vld [vmem:[#allocation2 + $0xf] sm:$0xff]  ;;  %1491 = vmatmul.msk.bf16.vlgmr.msra.gmra.mxu1 %vm305_vm0, %v898_v57 }
  0xe3   : > { %v1007_v60 = vpack.c.bf16 %v1005_v59, %v1004_v58  ;;  %1497 = vmatmul.msk.bf16.vlgmr.msra.gmra.mxu2 %vm305_vm0, %v891_v53  ;;  %1236 = vmatpush.bf16.msra.mxu1 %v1593_v62  ;;  %v1046_v5 = vld [vmem:[#allocation2 + $0x10] sm:$0xff] }
  0xe4   : > { %1505 = vmatmul.msk.bf16.vlgmr.msrb.gmra.mxu3 %vm305_vm0, %v966_v21  ;;  %1289 = vmatpush.bf16.msra.mxu2 %v1595_v61  ;;  %v1048_v9 = vpack.c.bf16 %v1046_v5, %v1045_v7  ;;  %v1127_v11 = vld [vmem:[#allocation2 + $0xd] sm:$0xff] }
  0xe5   : > { %1513 = vmatmul.msk.bf16.vlgmr.msrb.gmra.mxu0 %vm305_vm0, %v1007_v60  ;;  %v1168_v12 = vld [vmem:[#allocation2 + $0xe] sm:$0xff] }
  0xe7   : > { %v897_v22 = vld [vmem:[#allocation2 + $0x12] sm:$0xff]  ;;  %v1129_v17 = vld [vmem:[#allocation2 + $0x1d] sm:$0xff] }
  0xe8   : > { %v890_v23 = vld [vmem:[#allocation2 + $0x11] sm:$0xff]  ;;  %v899_v33 = vpack.c.bf16 %v897_v22, %v897_v22  ;;  %v1088_v16 = vld [vmem:[#allocation2 + $0x19] sm:$0xff]  ;;  %v1131_v26 = vpack.c.bf16 %v1129_v17, %v1129_v17 }
  0xe9   : > { %v965_v63 = vld [vmem:[#allocation2 + $0x13] sm:$0xff]  ;;  %v892_v4 = vpack.c.bf16 %v890_v23, %v890_v23  ;;  %v1089_v10 = vpack.c.bf16 %v890_v23, %v889_v29  ;;  %v1170_v20 = vld [vmem:[#allocation2 + $0x1e] sm:$0xff]  ;;  %v1090_v25 = vpack.c.bf16 %v1088_v16, %v1088_v16 }
  0xea   : > { %v1006_v1 = vld [vmem:[#allocation2 + $0x17] sm:$0xff]  ;;  %v967_v45 = vpack.c.bf16 %v965_v63, %v965_v63  ;;  %v1172_v28 = vpack.c.bf16 %v1170_v20, %v1170_v20  ;;  %v1211_v27 = vld [vmem:[#allocation2 + $0x1f] sm:$0xff] }
  0xeb   : > { %v1008_v2 = vpack.c.bf16 %v1006_v1, %v1006_v1  ;;  %v1128_v6 = vld [vmem:[#allocation2 + $0x15] sm:$0xff]  ;;  %v1212_v32 = vpack.c.bf16 %v1006_v1, %v1005_v59  ;;  %v1213_v35 = vpack.c.bf16 %v1211_v27, %v1211_v27 }
  0xec   : > { %v1169_v8 = vld [vmem:[#allocation2 + $0x16] sm:$0xff]  ;;  %v1130_v13 = vpack.c.bf16 %v1128_v6, %v1127_v11 }
  0xed   : > { %v1171_v14 = vpack.c.bf16 %v1169_v8, %v1168_v12  ;;  %v1047_v15 = vld [vmem:[#allocation2 + $0x18] sm:$0xff] }
  0xee   : > { %v1049_v34 = vpack.c.bf16 %v1047_v15, %v1047_v15 }
  0xf2   : > { %1492 = vmatmul.msk.bf16.gmra.mxu1 %vm305_vm0, %v899_v33 }
  0xf3   : > { %1498 = vmatmul.msk.bf16.gmra.mxu2 %vm305_vm0, %v892_v4 }
  0xf4   : > { %1506 = vmatmul.msk.bf16.gmra.mxu3 %vm305_vm0, %v967_v45 }
  0xf5   : > { %1514 = vmatmul.msk.bf16.gmra.mxu0 %vm305_vm0, %v1008_v2 }
 0x102   : > { %1521 = vmatmul.msk.bf16.vlgmr.msrb.gmra.mxu1 %vm305_vm0, %v1048_v9 }
 0x103   : > { %1529 = vmatmul.msk.bf16.vlgmr.msrb.gmra.mxu2 %vm305_vm0, %v1089_v10 }
 0x104   : > { %1537 = vmatmul.msk.bf16.vlgmr.msra.gmra.mxu3 %vm305_vm0, %v1130_v13 }
 0x105   : > { %1545 = vmatmul.msk.bf16.vlgmr.msra.gmra.mxu0 %vm305_vm0, %v1171_v14  ;;  %v1616_v14 = vld [vmem:[%s1896_s4] ss:$0 sm:$0xff] }
 0x112   : > { %1522 = vmatmul.msk.bf16.gmra.mxu1 %vm305_vm0, %v1049_v34  ;;  %v1617_v34 = vld [vmem:[%s1898_s6] ss:$0 sm:$0xff] }
 0x113   : > { %1530 = vmatmul.msk.bf16.gmra.mxu2 %vm305_vm0, %v1090_v25 }
 0x114   : > { %1538 = vmatmul.msk.bf16.gmra.mxu3 %vm305_vm0, %v1131_v26 }
 0x115   : > { %1546 = vmatmul.msk.bf16.gmra.mxu0 %vm305_vm0, %v1172_v28 }
 0x122   : > { %1553 = vmatmul.msk.bf16.vlgmr.msra.gmra.mxu1 %vm305_vm0, %v1212_v32 }
 0x123   : > { %1563 = vmatmul.msk.bf16.vlgmr.msra.gmra.mxu2 %vm305_vm0, %v1594_v24 }
 0x132   : > { %1554 = vmatmul.msk.bf16.gmra.mxu1 %vm305_vm0, %v1213_v35 }
 0x133   : > { %1564 = vmatmul.msk.bf16.gmra.mxu2 %vm305_vm0, %v1269_v31  ;;  %vm1316_vm0 = vcmask 125952  }
 0x15f   : > { %v924_v36 = vpop.f32.mrf.mxu1 }
 0x162   : > { %v1033_v30 = vpop.f32.mrf.mxu0 }
 0x166   : > { %v954_v37 = vpop.f32.mrf.mxu2 }
 0x167   : > { %v992_v47 = vpop.f32.mrf.mxu3  ;;  %v926_v38 = vpop.f32.mrf.mxu1  ;;  %v955_v46 = vadd.f32 %v954_v37, %v924_v36 }
 0x169   : > { %v1001_v53 = vadd.f32 %v992_v47, %v955_v46 }
 0x16a   : > { %v1035_v39 = vpop.f32.mrf.mxu0 }
 0x16b   : > { %v1042_v61 = vadd.f32 %v1033_v30, %v1001_v53 }
 0x16e   : > { %v956_v40 = vpop.f32.mrf.mxu2 }
 0x16f   : > { %v994_v3 = vpop.f32.mrf.mxu3  ;;  %v929_v41 = vpop.f32.mrf.mxu1  ;;  %v957_v60 = vadd.f32 %v956_v40, %v926_v38 }
 0x171   : > { %v1002_v23 = vadd.f32 %v994_v3, %v957_v60 }
 0x172   : > { %v1038_v42 = vpop.f32.mrf.mxu0 }
 0x173   : > { %v1043_v5 = vadd.f32 %v1035_v39, %v1002_v23 }
 0x176   : > { %v959_v44 = vpop.f32.mrf.mxu2 }
 0x177   : > { %v997_v48 = vpop.f32.mrf.mxu3  ;;  %v931_v50 = vpop.f32.mrf.mxu1  ;;  %v960_v45 = vadd.f32 %v959_v44, %v929_v41 }
 0x179   : > { %v1003_v7 = vadd.f32 %v997_v48, %v960_v45 }
 0x17a   : > { %v1040_v51 = vpop.f32.mrf.mxu0 }
 0x17b   : > { %v1044_v16 = vadd.f32 %v1038_v42, %v1003_v7 }
 0x17e   : > { %v961_v52 = vpop.f32.mrf.mxu2 }
 0x17f   : > { %v999_v54 = vpop.f32.mrf.mxu3  ;;  %v1074_v55 = vpop.f32.mrf.mxu1 }
 0x180   : > { %v1083_v62 = vadd.f32 %v1074_v55, %v1042_v61 }
 0x182   : > { %v1197_v56 = vpop.f32.mrf.mxu0 }
 0x186   : > { %v1115_v18 = vpop.f32.mrf.mxu2 }
 0x187   : > { %v1156_v19 = vpop.f32.mrf.mxu3  ;;  %v1076_v43 = vpop.f32.mrf.mxu1  ;;  %v1124_v63 = vadd.f32 %v1115_v18, %v1083_v62 }
 0x188   : > { %v1084_v6 = vadd.f32 %v1076_v43, %v1043_v5 }
 0x189   : > { %v1165_v2 = vadd.f32 %v1156_v19, %v1124_v63 }
 0x18a   : > { %v1199_v29 = vpop.f32.mrf.mxu0 }
 0x18b   : > { %v1206_v11 = vadd.f32 %v1197_v56, %v1165_v2 }
 0x18e   : > { %v1117_v57 = vpop.f32.mrf.mxu2 }
 0x18f   : > { %v1158_v21 = vpop.f32.mrf.mxu3  ;;  %v1079_v58 = vpop.f32.mrf.mxu1  ;;  %v1125_v9 = vadd.f32 %v1117_v57, %v1084_v6 }
 0x190   : > { %v1085_v17 = vadd.f32 %v1079_v58, %v1044_v16 }
 0x191   : > { %v1166_v15 = vadd.f32 %v1158_v21, %v1125_v9 }
 0x192   : > { %v1202_v59 = vpop.f32.mrf.mxu0 }
 0x193   : > { %v1207_v24 = vadd.f32 %v1199_v29, %v1166_v15 }
 0x196   : > { %v1120_v22 = vpop.f32.mrf.mxu2 }
 0x197   : > { %v1161_v1 = vpop.f32.mrf.mxu3  ;;  %v1081_v33 = vpop.f32.mrf.mxu1  ;;  %v1126_v26 = vadd.f32 %v1120_v22, %v1085_v17 }
 0x199   : > { %v1167_v27 = vadd.f32 %v1161_v1, %v1126_v26 }
 0x19a   : > { %v1204_v4 = vpop.f32.mrf.mxu0 }
 0x19b   : > { %v1208_v47 = vadd.f32 %v1202_v59, %v1167_v27 }
 0x19e   : > { %v1122_v8 = vpop.f32.mrf.mxu2 }
 0x19f   : > { %v1163_v10 = vpop.f32.mrf.mxu3  ;;  %v1238_v12 = vpop.f32.mrf.mxu1 }
 0x1a0   : > { %v1247_v13 = vadd.f32 %v1238_v12, %v1206_v11 }
 0x1a2   : > { %v1254_v20 = vadd.f32 %v1616_v14, %v1247_v13 }
 0x1a6   : > { %v1291_v25 = vpop.f32.mrf.mxu2 }
 0x1a7   : > { %v1300_v28 = vadd.f32 %v1291_v25, %v1254_v20  ;;  %v1240_v32 = vpop.f32.mrf.mxu1 }
 0x1a8   : > { %v1248_v0 = vadd.f32 %v1240_v32, %v1207_v24 }
 0x1a9   : > { %v1307_v49 = vadd.f32 %v1617_v34, %v1300_v28 }
 0x1aa   : > { %v1255_v36 = vadd.f32 %v1616_v14, %v1248_v0 }
 0x1ab   : > { %v1310_v31 = vmax.f32 %v1307_v49, 0.0 }
 0x1ad   : > { %v1313_v35 = vpack.c.bf16 %v1310_v31, %v1310_v31 }
 0x1ae   : > { %v1293_v30 = vpop.f32.mrf.mxu2 }
 0x1af   : > { %1317 = vst.msk [vmem:[%s278_s12] sm:$0xf] %vm1316_vm0, %v1313_v35  ;;  %v1301_v37 = vadd.f32 %v1293_v30, %v1255_v36  ;;  %v1243_v38 = vpop.f32.mrf.mxu1 }
 0x1b0   : > { %v1249_v40 = vadd.f32 %v1243_v38, %v1208_v47 }
 0x1b1   : > { %v1308_v39 = vadd.f32 %v1617_v34, %v1301_v37 }
 0x1b2   : > { %v1256_v42 = vadd.f32 %v1616_v14, %v1249_v40 }
 0x1b3   : > { %v1311_v3 = vmax.f32 %v1308_v39, 0.0 }
 0x1b5   : > { %v1314_v41 = vpack.c.bf16 %v1311_v3, %v1311_v3 }
 0x1b6   : > { %v1296_v44 = vpop.f32.mrf.mxu2 }
 0x1b7   : > { %1318 = vst.msk [vmem:[%s278_s12 + $0x4] sm:$0xf] %vm1316_vm0, %v1314_v41  ;;  %v1302_v48 = vadd.f32 %v1296_v44, %v1256_v42  ;;  %v1245_v50 = vpop.f32.mrf.mxu1 }
 0x1b9   : > { %v1309_v51 = vadd.f32 %v1617_v34, %v1302_v48 }
 0x1bb   : > { %v1312_v52 = vmax.f32 %v1309_v51, 0.0 }
 0x1bd   : > { %v1315_v54 = vpack.c.bf16 %v1312_v52, %v1312_v52 }
 0x1be   : > { %v1298_v55 = vpop.f32.mrf.mxu2 }
 0x1bf   : > { %1319 = vst.msk [vmem:[%s278_s12 + $0x8] sm:$0xf] %vm1316_vm0, %v1315_v54 }
 0x1c0 PF: > { %s17_s24 = sadd.s32 1, %s1624_s24  }
 0x1c1   : > { %p14_p4 = scmp.ge.s32.totalorder %s17_s24, 4  }
 0x1c3   :  { %16 = sbr.rel (!%p14_p4) target bundleno = 1 (0x1), region = 94 }

// kernel: resnet_forward.11
= control target key start
LH: loop header
LB: loop body
LE: loop exit
PB: predicated region body
PF: predicated region fallthrough
CT: control target
= control target key end

     0   :  { %s1307_s24 = smov 0   ;;  %s1460_s0 = inlined_call_operand.vmem [shape: bf16[2,64,16], index: 0, kind: input, shape index: {}]   ;;  %s1461_s1 = inlined_call_operand.vmem [shape: bf16[9,16,32], index: 1, kind: input, shape index: {}]   ;;  %s1462_s2 = inlined_call_operand.vmem [shape: f32[1,32], index: 2, kind: input, shape index: {}]   ;;  %s1463_s3 = inlined_call_operand.vmem [shape: bf16[9,32,32], index: 3, kind: input, shape index: {}]   ;;  %s1464_s4 = inlined_call_operand.vmem [shape: f32[1,32], index: 4, kind: input, shape index: {}]   ;;  %s1465_s5 = inlined_call_operand.vmem [shape: bf16[16,32], index: 5, kind: input, shape index: {}]   ;;  %s1466_s6 = inlined_call_operand.vmem [shape: f32[1,32], index: 6, kind: input, shape index: {}]   ;;  %s1467_s7 = inlined_call_operand.vmem [shape: bf16[2,8,32], index: 7, kind: output, shape index: {}]  }
   0x1 LB: > { %s1013_s25 = sadd.s32 4294967295, %s1264_s24   ;;  %p1017_p0 = scmp.ge.s32.totalorder %s1264_s24, 1  ;;  %s1264_s24 = sphi %s1307_s24, %s17_s24  }
   0x2   : > { %p237_p1 = scmp.lt.s32.totalorder %s1264_s24, 3 }
   0x4   : > { %p238_p2 = pnand %p1017_p0, %p237_p1 }
   0x5   : > { %p268_p3 = scmp.lt.s32.totalorder (!%p238_p2), %s1013_s25, 1 }
   0x6   : > { %241 = sbr.rel (%p238_p2) target bundleno = 367 (0x16f), region = 48 }
   0xb   : > { %v1216_v0 = vld [vmem:[%s1461_s1 + $0x8] sm:$0xff]  ;;  %v1215_v1 = vld [vmem:[%s1461_s1] sm:$0xff]  ;;  %v1219_v2 = vld [vmem:[%s1461_s1 + $0x18] sm:$0xff]  ;;  %s1469_s25 = smov (!%p268_p3, %s1013_s25), 1  ;;  %vm291_vm0 = vcmask 130048   ;;  %vm594_vm1 = vcmask 261120  }
   0xc   : > { %v1220_v3 = vld [vmem:[%s1461_s1 + $0x20] sm:$0xff]  ;;  %v1218_v4 = vld [vmem:[%s1461_s1 + $0x10] sm:$0xff]  ;;  %302 = vmatpush.bf16.msra.mxu0 %v1216_v0  ;;  %324 = vmatpush.bf16.msra.mxu1 %v1215_v1  ;;  %v1225_v6 = vld [vmem:[%s1461_s1 + $0x38] sm:$0xff]  ;;  %s1214_s19 = sshll.u32 %s1469_s25, 5  ;;  %v1266_v50 = vmov 0.0   ;;  %s1020_s30 = sshll.u32 %s1469_s25, 2 }
   0xd   : > { %v1223_v5 = vld [vmem:[%s1461_s1 + $0x30] sm:$0xff]  ;;  %v1222_v7 = vld [vmem:[%s1461_s1 + $0x28] sm:$0xff]  ;;  %390 = vmatpush.bf16.msra.mxu3 %v1219_v2  ;;  %363 = vmatpush.bf16.msra.mxu2 %v1218_v4  ;;  %v1226_v8 = vld [vmem:[%s1461_s1 + $0x40] sm:$0xff]  ;;  %s1348_s26 = scalar_lea.vmem %s1460_s0, %s1214_s19  ;;  %595 = vst.msk [vmem:[#allocation2] sm:$0xff] %vm594_vm1, %v1266_v50  ;;  %s276_s10 = scalar_lea.vmem %s1467_s7, %s1020_s30  ;;  %vm958_vm3 = vcmask 257024  }
   0xe   : > { %v281_v9 = vld [vmem:[%s1348_s26 + $0x8] sm:$0xf]  ;;  %v278_v10 = vld [vmem:[%s1348_s26] sm:$0xf]  ;;  %v370_v11 = vld [vmem:[%s1348_s26 + $0x10] sm:$0xf] }
   0xf   : > { %1027 = vmatmul.msk.bf16.vlgmr.msra.gmra.mxu0 %vm291_vm0, %v281_v9  ;;  %1032 = vmatmul.msk.bf16.vlgmr.msra.gmra.mxu1 %vm291_vm0, %v278_v10  ;;  %v1037_v12 = vld [vmem:[%s1348_s26] sm:$0xf]  ;;  %v1217_v13 = vld [vmem:[%s1348_s26] sm:$0x10]  ;;  %v1062_v15 = vld [vmem:[%s1348_s26 + $0x10] sm:$0xf] }
  0x10   : > { %417 = vmatpush.bf16.msrb.mxu0 %v1220_v3  ;;  %457 = vmatpush.bf16.msrb.mxu1 %v1222_v7  ;;  %v1038_v14 = vor.u32 %v1217_v13, %v1037_v12  ;;  %v1221_v16 = vld [vmem:[%s1348_s26 + $0x10] sm:$0x10]  ;;  %v1080_v22 = vld [vmem:[%s1348_s26 + $0x8] sm:$0xc]  ;;  %v1224_v23 = vld [vmem:[%s1348_s26 + $0x8] sm:$0x30] }
  0x11   : > { %525 = vmatpush.bf16.msrb.mxu3 %v1225_v6  ;;  %491 = vmatpush.bf16.msrb.mxu2 %v1223_v5  ;;  %v1063_v19 = vor.u32 %v1221_v16, %v1062_v15  ;;  %v1081_v27 = vor.u32 %v1224_v23, %v1080_v22  ;;  %v532_v28 = vld [vmem:[%s1348_s26 + $0x4] sm:$0x7]  ;;  %v464_v29 = vld [vmem:[%s1348_s26] sm:$0xc]  ;;  %v397_v33 = vld [vmem:[%s1348_s26 + $0x18] sm:$0xf]  ;;  %v576_v15 = vlaneseq }
  0x12   : > { %1050 = vmatmul.msk.bf16.vlgmr.msra.gmra.mxu3 %vm291_vm0, %v370_v11  ;;  %v341_v17 = vshrl.u32 %v1038_v14, 16  ;;  %v343_v18 = vshll.u32 %v1038_v14, 16  ;;  %v465_v30 = vld [vmem:[%s1348_s26 + $0x4] sm:$0x3]  ;;  %v537_v32 = vunpack.c.l.b16 %v532_v28  ;;  %v471_v35 = vunpack.c.l.b16 %v464_v29  ;;  %596 = vst.msk [vmem:[#allocation2 + $0x8] sm:$0xff] %vm594_vm1, %v1266_v50  ;;  %v1228_v51 = vld [vmem:[%s1463_s3 + $0x8] sm:$0xff] }
  0x13   : > { %v437_v21 = vshll.u32 %v1063_v19, 16  ;;  %v435_v25 = vshrl.u32 %v1063_v19, 16  ;;  %v508_v34 = vrot.slane %v1081_v27, 2  ;;  %v472_v36 = vunpack.c.l.b16 %v465_v30  ;;  %v1230_v52 = vld [vmem:[%s1463_s3 + $0x18] sm:$0xff]  ;;  %597 = vst.msk [vmem:[#allocation2 + $0x10] sm:$0xff] %vm594_vm1, %v1266_v50  ;;  %v1232_v53 = vld [vmem:[%s1463_s3 + $0x28] sm:$0xff] }
  0x14   : > { %563 = vmatpush.bf16.msra.mxu0 %v1226_v8  ;;  %v345_v20 = vrot.slane %v343_v18, 1  ;;  %v538_v37 = vpack.c.b16 %v537_v32, %v471_v35  ;;  %v1234_v54 = vld [vmem:[%s1463_s3 + $0x38] sm:$0xff]  ;;  %633 = vmatpush.bf16.msra.mxu1 %v1230_v52  ;;  %v1227_v55 = vld [vmem:[%s1463_s3] sm:$0xff]  ;;  %v1229_v56 = vld [vmem:[%s1463_s3 + $0x10] sm:$0xff]  ;;  %v577_v19 = vshrl.u32 %v576_v15, 7 }
  0x15   : > { %v439_v26 = vrot.slane %v437_v21, 1  ;;  %v473_v38 = vpack.c.b16 %v472_v36, %v471_v35  ;;  %696 = vmatpush.bf16.msra.mxu3 %v1232_v53  ;;  %v1231_v57 = vld [vmem:[%s1463_s3 + $0x20] sm:$0xff]  ;;  %v1233_v58 = vld [vmem:[%s1463_s3 + $0x30] sm:$0xff]  ;;  %v1238_v2 = vld [vmem:[%s1463_s3 + $0x58] sm:$0xff] }
  0x16   : > { %v346_v24 = vor.u32 %v345_v20, %v341_v17  ;;  %v540_v39 = vshrl.u32 %v538_v37, 16  ;;  %v543_v40 = vshll.u32 %v538_v37, 16  ;;  %v1236_v3 = vld [vmem:[%s1463_s3 + $0x48] sm:$0xff]  ;;  %v1242_v7 = vld [vmem:[%s1463_s3 + $0x78] sm:$0xff]  ;;  %v1237_v10 = vld [vmem:[%s1463_s3 + $0x50] sm:$0xff] }
  0x17   : > { %v440_v31 = vor.u32 %v439_v26, %v435_v25  ;;  %v474_v41 = vrot.slane %v473_v38, 2  ;;  %v1240_v6 = vld [vmem:[%s1463_s3 + $0x68] sm:$0xff]  ;;  %v1235_v11 = vld [vmem:[%s1463_s3 + $0x40] sm:$0xff]  ;;  %v1241_v13 = vld [vmem:[%s1463_s3 + $0x70] sm:$0xff] }
  0x18   : > { %1043 = vmatmul.msk.bf16.vlgmr.msra.gmra.mxu2 %vm291_vm0, %v346_v24  ;;  %v542_v42 = vrot.slane %v540_v39, 2  ;;  %v545_v43 = vrot.slane %v543_v40, 3  ;;  %634 = vmatpush.bf16.msra.mxu1 %v1229_v56  ;;  %v1239_v12 = vld [vmem:[%s1463_s3 + $0x60] sm:$0xff]  ;;  %v582_v24 = vand.u32 3, %v577_v19  ;;  %v1244_v39 = vld [vmem:[%s1463_s3 + $0x88] sm:$0xff] }
  0x19   : > { %661 = vmatpush.bf16.msra.mxu2 %v1228_v51  ;;  %697 = vmatpush.bf16.msra.mxu3 %v1231_v57  ;;  %v1255_v23 = vld [vmem:[%s1462_s2] ss:$0 sm:$0xff]  ;;  %v925_v51 = vld [vmem:[%s1348_s26 + $0x18] sm:$0xf] }
  0x1a   : > { %v546_v44 = vor.u32 %v545_v43, %v542_v42  ;;  %vm590_vm2 = vcmp.lt.s32.totalorder %v582_v24, 2  ;;  %v1245_v38 = vld [vmem:[%s1465_s5] sm:$0xff] }
  0x1d   : > { %662 = vmatpush.bf16.msra.mxu2 %v1227_v55 }
  0x1f   : > { %1057 = vmatmul.msk.bf16.vlgmr.msrb.gmra.mxu0 %vm291_vm0, %v397_v33  ;;  %1068 = vmatmul.msk.bf16.vlgmr.msrb.gmra.mxu1 %vm291_vm0, %v440_v31 }
  0x20   : > { %732 = vmatpush.bf16.msrb.mxu0 %v1234_v54  ;;  %768 = vmatpush.bf16.msrb.mxu1 %v1236_v3 }
  0x22   : > { %1086 = vmatmul.msk.bf16.vlgmr.msrb.gmra.mxu3 %vm291_vm0, %v508_v34 }
  0x23   : > { %840 = vmatpush.bf16.msrb.mxu3 %v1240_v6 }
  0x24   : > { %733 = vmatpush.bf16.msrb.mxu0 %v1233_v58  ;;  %769 = vmatpush.bf16.msrb.mxu1 %v1235_v11 }
  0x27   : > { %841 = vmatpush.bf16.msrb.mxu3 %v1239_v12 }
  0x28   : > { %1075 = vmatmul.msk.bf16.vlgmr.msrb.gmra.mxu2 %vm291_vm0, %v474_v41  ;;  %v1243_v41 = vld [vmem:[%s1463_s3 + $0x80] sm:$0xff] }
  0x29   : > { %804 = vmatpush.bf16.msrb.mxu2 %v1238_v2 }
  0x2d   : > { %805 = vmatpush.bf16.msrb.mxu2 %v1237_v10 }
  0x2f   : > { %1093 = vmatmul.msk.bf16.vlgmr.msra.gmra.mxu0 %vm291_vm0, %v546_v44 }
  0x30   : > { %876 = vmatpush.bf16.msra.mxu0 %v1242_v7 }
  0x34   : > { %877 = vmatpush.bf16.msra.mxu0 %v1241_v13 }
  0x8c   : > { %v304_v45 = vpop.f32.mrf.mxu0  ;;  %v326_v46 = vpop.f32.mrf.mxu1 }
  0x8d   : > { %v327_v61 = vadd.f32 %v326_v46, %v304_v45 }
  0x94   : > { %v306_v48 = vpop.f32.mrf.mxu0  ;;  %v328_v49 = vpop.f32.mrf.mxu1 }
  0x95   : > { %v392_v47 = vpop.f32.mrf.mxu3 }
  0x9b   : > { %v365_v59 = vpop.f32.mrf.mxu2 }
  0x9c   : > { %v419_v62 = vpop.f32.mrf.mxu0  ;;  %v459_v63 = vpop.f32.mrf.mxu1  ;;  %v369_v0 = vadd.f32 %v365_v59, %v327_v61 }
  0x9d   : > { %v394_v60 = vpop.f32.mrf.mxu3 }
  0x9e   : > { %v396_v1 = vadd.f32 %v392_v47, %v369_v0 }
  0xa0   : > { %v423_v14 = vadd.f32 %v419_v62, %v396_v1 }
  0xa2   : > { %v463_v16 = vadd.f32 %v459_v63, %v423_v14  ;;  %v1256_v14 = vld [vmem:[%s1464_s4] ss:$0 sm:$0xff] }
  0xa3   : > { %v367_v4 = vpop.f32.mrf.mxu2 }
  0xa4   : > { %v421_v8 = vpop.f32.mrf.mxu0  ;;  %v461_v9 = vpop.f32.mrf.mxu1 }
  0xa5   : > { %v527_v5 = vpop.f32.mrf.mxu3 }
  0xab   : > { %v493_v17 = vpop.f32.mrf.mxu2 }
  0xac   : > { %v497_v20 = vadd.f32 %v493_v17, %v463_v16  ;;  %v565_v21 = vpop.f32.mrf.mxu0  ;;  %v1257_v16 = vld [vmem:[%s1466_s6] ss:$0 sm:$0xff] }
  0xad   : > { %v529_v18 = vpop.f32.mrf.mxu3 }
  0xae   : > { %v531_v22 = vadd.f32 %v527_v5, %v497_v20 }
  0xb0   : > { %v569_v25 = vadd.f32 %v565_v21, %v531_v22 }
  0xb2   : > { %v574_v26 = vadd.f32 %v1255_v23, %v569_v25 }
  0xb3   : > { %v495_v27 = vpop.f32.mrf.mxu2 }
  0xb4   : > { %v575_v28 = vmax.f32 %v574_v26, 0.0  ;;  %v567_v29 = vpop.f32.mrf.mxu0 }
  0xb6   : > { %v593_v30 = vsel %vm590_vm2, %v575_v28, 0.0 }
  0xb7   : > { %598 = vst.msk [vmem:[#allocation2 + $0x8] sm:$0xff] %vm594_vm1, %v593_v30 }
  0xbe   : > { %v605_v31 = vld [vmem:[#allocation2 + $0x4] sm:$0xff]  ;;  %v848_v45 = vld [vmem:[#allocation2 + $0xc] sm:$0xff] }
  0xbf   : > { %v599_v32 = vld [vmem:[#allocation2 + $0x3] sm:$0xff]  ;;  %v606_v34 = vpack.c.bf16 %v605_v31, %v605_v31  ;;  %v812_v44 = vld [vmem:[#allocation2 + $0xb] sm:$0xff]  ;;  %v849_v49 = vpack.c.bf16 %v848_v45, %v848_v45 }
  0xc0   : > { %v668_v33 = vld [vmem:[#allocation2 + $0x5] sm:$0xff]  ;;  %v600_v35 = vpack.c.bf16 %v599_v32, %v599_v32  ;;  %v813_v48 = vpack.c.bf16 %v812_v44, %v812_v44  ;;  %v884_v50 = vld [vmem:[#allocation2 + $0xd] sm:$0xff] }
  0xc1   : > { %v669_v36 = vpack.c.bf16 %v668_v33, %v668_v33  ;;  %v704_v37 = vld [vmem:[#allocation2 + $0x7] sm:$0xff]  ;;  %1106 = vmatmul.msk.bf16.vlgmr.msra.gmra.mxu1 %vm594_vm1, %v606_v34  ;;  %v885_v52 = vpack.c.bf16 %v884_v50, %v884_v50 }
  0xc2   : > { %v705_v40 = vpack.c.bf16 %v704_v37, %v704_v37  ;;  %1115 = vmatmul.msk.bf16.vlgmr.msra.gmra.mxu2 %vm594_vm1, %v600_v35  ;;  %912 = vmatpush.bf16.msra.mxu1 %v1244_v39  ;;  %v740_v42 = vld [vmem:[#allocation2 + $0x8] sm:$0xff] }
  0xc3   : > { %1128 = vmatmul.msk.bf16.vlgmr.msra.gmra.mxu3 %vm594_vm1, %v669_v36  ;;  %944 = vmatpush.bf16.msra.mxu2 %v1245_v38  ;;  %v776_v43 = vld [vmem:[#allocation2 + $0x9] sm:$0xff]  ;;  %v741_v46 = vpack.c.bf16 %v740_v42, %v740_v42 }
  0xc4   : > { %1141 = vmatmul.msk.bf16.vlgmr.msrb.gmra.mxu0 %vm594_vm1, %v705_v40  ;;  %v777_v47 = vpack.c.bf16 %v776_v43, %v776_v43 }
  0xc6   : > { %913 = vmatpush.bf16.msra.mxu1 %v1243_v41 }
  0xd1   : > { %1154 = vmatmul.msk.bf16.vlgmr.msrb.gmra.mxu1 %vm594_vm1, %v741_v46 }
  0xd2   : > { %1167 = vmatmul.msk.bf16.vlgmr.msrb.gmra.mxu2 %vm594_vm1, %v777_v47 }
  0xd3   : > { %1180 = vmatmul.msk.bf16.vlgmr.msrb.gmra.mxu3 %vm594_vm1, %v813_v48 }
  0xd4   : > { %1193 = vmatmul.msk.bf16.vlgmr.msra.gmra.mxu0 %vm594_vm1, %v849_v49 }
  0xe1   : > { %1206 = vmatmul.msk.bf16.vlgmr.msra.gmra.mxu1 %vm594_vm1, %v885_v52 }
  0xe2   : > { %1211 = vmatmul.msk.bf16.vlgmr.msra.gmra.mxu2 %vm291_vm0, %v925_v51 }
 0x13e   : > { %v636_v53 = vpop.f32.mrf.mxu1 }
 0x141   : > { %v735_v54 = vpop.f32.mrf.mxu0 }
 0x145   : > { %v664_v55 = vpop.f32.mrf.mxu2 }
 0x146   : > { %v699_v56 = vpop.f32.mrf.mxu3  ;;  %v638_v57 = vpop.f32.mrf.mxu1  ;;  %v665_v59 = vadd.f32 %v664_v55, %v636_v53 }
 0x148   : > { %v703_v61 = vadd.f32 %v699_v56, %v665_v59 }
 0x149   : > { %v737_v58 = vpop.f32.mrf.mxu0 }
 0x14a   : > { %v739_v1 = vadd.f32 %v735_v54, %v703_v61 }
 0x14d   : > { %v666_v60 = vpop.f32.mrf.mxu2 }
 0x14e   : > { %v701_v62 = vpop.f32.mrf.mxu3  ;;  %v771_v63 = vpop.f32.mrf.mxu1 }
 0x14f   : > { %v775_v2 = vadd.f32 %v771_v63, %v739_v1 }
 0x151   : > { %v879_v0 = vpop.f32.mrf.mxu0 }
 0x155   : > { %v807_v3 = vpop.f32.mrf.mxu2 }
 0x156   : > { %v811_v4 = vadd.f32 %v807_v3, %v775_v2  ;;  %v843_v5 = vpop.f32.mrf.mxu3  ;;  %v773_v6 = vpop.f32.mrf.mxu1 }
 0x158   : > { %v847_v8 = vadd.f32 %v843_v5, %v811_v4 }
 0x159   : > { %v881_v7 = vpop.f32.mrf.mxu0 }
 0x15a   : > { %v883_v11 = vadd.f32 %v879_v0, %v847_v8 }
 0x15d   : > { %v809_v9 = vpop.f32.mrf.mxu2 }
 0x15e   : > { %v845_v10 = vpop.f32.mrf.mxu3  ;;  %v915_v12 = vpop.f32.mrf.mxu1 }
 0x15f   : > { %v919_v13 = vadd.f32 %v915_v12, %v883_v11 }
 0x161   : > { %v924_v15 = vadd.f32 %v1256_v14, %v919_v13 }
 0x165   : > { %v946_v17 = vpop.f32.mrf.mxu2 }
 0x166   : > { %v950_v18 = vadd.f32 %v946_v17, %v924_v15  ;;  %v917_v19 = vpop.f32.mrf.mxu1 }
 0x168   : > { %v955_v20 = vadd.f32 %v1257_v16, %v950_v18 }
 0x16a   : > { %v956_v21 = vmax.f32 %v955_v20, 0.0 }
 0x16c   : > { %v957_v22 = vpack.c.bf16 %v956_v21, %v956_v21 }
 0x16d   : > { %v948_v23 = vpop.f32.mrf.mxu2 }
 0x16e   : > { %959 = vst.msk [vmem:[%s276_s10] sm:$0xf] %vm958_vm3, %v957_v22 }
 0x16f PF: > { %s17_s24 = sadd.s32 1, %s1264_s24  }
 0x170   : > { %p14_p4 = scmp.ge.s32.totalorder %s17_s24, 4  }
 0x172   :  { %16 = sbr.rel (!%p14_p4) target bundleno = 1 (0x1), region = 94 }

// kernel: resnet_forward.13
= control target key start
LH: loop header
LB: loop body
LE: loop exit
PB: predicated region body
PF: predicated region fallthrough
CT: control target
= control target key end

     0   :  { %vm66_vm0 = vcmask 1041409   ;;  %vm68_vm1 = vcmask 1042434   ;;  %vm70_vm2 = vcmask 1043459   ;;  %vm72_vm3 = vcmask 1044484   ;;  %s186_s1 = inlined_call_operand.vmem [shape: f32[64,128], index: 1, kind: input, shape index: {}]   ;;  %s187_s0 = inlined_call_operand.vmem [shape: bf16[8,1,64], index: 0, kind: input, shape index: {}]   ;;  %s188_s2 = inlined_call_operand.vmem [shape: f32[1,128], index: 2, kind: input, shape index: {}]   ;;  %s189_s3 = inlined_call_operand.vmem [shape: f32[8,128], index: 3, kind: output, shape index: {}]  }
   0x1   :  { %v45_v0 = vld [vmem:[%s186_s1 + $0x38] sm:$0xff]  ;;  %v44_v1 = vld [vmem:[%s186_s1 + $0x30] sm:$0xff]  ;;  %v43_v2 = vld [vmem:[%s186_s1 + $0x28] sm:$0xff]  ;;  %vm74_vm4 = vcmask 1045509   ;;  %vm76_vm5 = vcmask 1046534   ;;  %vm78_vm6 = vcmask 1047559  }
   0x2   :  { %91 = vmatpush.msra.mxu0 %v45_v0  ;;  %v42_v3 = vld [vmem:[%s186_s1 + $0x20] sm:$0xff]  ;;  %v41_v20 = vld [vmem:[%s186_s1 + $0x18] sm:$0xff]  ;;  %v40_v26 = vld [vmem:[%s186_s1 + $0x10] sm:$0xff]  ;;  %vm80_vm7 = vcmask 523264  }
   0x3   :  { %v14_v4 = vld [vmem:[%s187_s0] sm:$0x1]  ;;  %v15_v5 = vld [vmem:[%s187_s0 + $0x1] sm:$0x1]  ;;  %v16_v6 = vld [vmem:[%s187_s0 + $0x2] sm:$0x1] }
   0x4   :  { %92 = vmatpush.msra.mxu0 %v44_v1  ;;  %v17_v7 = vld [vmem:[%s187_s0 + $0x3] sm:$0x1]  ;;  %v22_v8 = vunpack.c.l.bf16 %v14_v4  ;;  %v18_v9 = vld [vmem:[%s187_s0 + $0x4] sm:$0x1]  ;;  %v19_v10 = vld [vmem:[%s187_s0 + $0x5] sm:$0x1]  ;;  %v23_v12 = vunpack.c.l.bf16 %v15_v5  ;;  %v24_v13 = vunpack.c.l.bf16 %v16_v6 }
   0x5   :  { %v20_v11 = vld [vmem:[%s187_s0 + $0x6] sm:$0x1]  ;;  %v25_v14 = vunpack.c.l.bf16 %v17_v7  ;;  %v21_v15 = vld [vmem:[%s187_s0 + $0x7] sm:$0x1]  ;;  %v26_v16 = vunpack.c.l.bf16 %v18_v9  ;;  %v27_v17 = vunpack.c.l.bf16 %v19_v10  ;;  %v39_v31 = vld [vmem:[%s186_s1 + $0x8] sm:$0xff] }
   0x6   :  { %93 = vmatpush.msra.mxu0 %v43_v2  ;;  %v28_v18 = vunpack.c.l.bf16 %v20_v11  ;;  %v58_v19 = vperm.slane %v22_v8, 0  ;;  %v29_v21 = vunpack.c.l.bf16 %v21_v15  ;;  %v59_v22 = vperm.slane %v23_v12, 0  ;;  %v38_v35 = vld [vmem:[%s186_s1] sm:$0xff] }
   0x7   :  { %v60_v23 = vperm.slane %v24_v13, 0  ;;  %v61_v24 = vperm.slane %v25_v14, 0  ;;  %v62_v25 = vperm.slane %v26_v16, 0  ;;  %v63_v27 = vperm.slane %v27_v17, 0  ;;  %v109_v39 = vld [vmem:[%s188_s2] ss:$0 sm:$0xff] }
   0x8   :  { %94 = vmatpush.msra.mxu0 %v42_v3  ;;  %v67_v28 = vsel %vm66_vm0, %v59_v22, %v58_v19  ;;  %v64_v29 = vperm.slane %v28_v18, 0  ;;  %v65_v32 = vperm.slane %v29_v21, 0 }
   0x9   :  { %v69_v30 = vsel %vm68_vm1, %v60_v23, %v67_v28 }
   0xa   :  { %95 = vmatpush.msra.mxu0 %v41_v20  ;;  %v71_v33 = vsel %vm70_vm2, %v61_v24, %v69_v30 }
   0xb   :  { %v73_v34 = vsel %vm72_vm3, %v62_v25, %v71_v33 }
   0xc   :  { %96 = vmatpush.msra.mxu0 %v40_v26  ;;  %v75_v36 = vsel %vm74_vm4, %v63_v27, %v73_v34 }
   0xd   :  { %v77_v37 = vsel %vm76_vm5, %v64_v29, %v75_v36 }
   0xe   :  { %97 = vmatpush.msra.mxu0 %v39_v31  ;;  %v79_v38 = vsel %vm78_vm6, %v65_v32, %v77_v37 }
  0x10   :  { %98 = vmatpush.msra.mxu0 %v38_v35 }
  0x11   :  { %108 = vmatmul.msk.f32.vlgmr.msra.gmra.mxu0 %vm80_vm7, %v79_v38 }
  0x8e   :  { %v100_v40 = vpop.f32.mrf.mxu0 }
  0x8f   :  { %v101_v41 = vadd.f32 %v109_v39, %v100_v40 }
  0x91   :  { %103 = vst [vmem:[%s189_s3] sm:$0xff] %v101_v41 }

// kernel: resnet_forward.12
= control target key start
LH: loop header
LB: loop body
LE: loop exit
PB: predicated region body
PF: predicated region fallthrough
CT: control target
= control target key end

     0   :  { %s1750_s24 = smov 0   ;;  %s1999_s0 = inlined_call_operand.vmem [shape: bf16[2,64,32], index: 0, kind: input, shape index: {}]   ;;  %s2000_s1 = inlined_call_operand.vmem [shape: bf16[9,32,64], index: 1, kind: input, shape index: {}]   ;;  %s2001_s2 = inlined_call_operand.vmem [shape: f32[1,64], index: 2, kind: input, shape index: {}]   ;;  %s2002_s3 = inlined_call_operand.vmem [shape: bf16[9,64,64], index: 3, kind: input, shape index: {}]   ;;  %s2003_s4 = inlined_call_operand.vmem [shape: f32[1,64], index: 4, kind: input, shape index: {}]   ;;  %s2004_s5 = inlined_call_operand.vmem [shape: bf16[32,64], index: 5, kind: input, shape index: {}]   ;;  %s2005_s6 = inlined_call_operand.vmem [shape: f32[1,64], index: 6, kind: input, shape index: {}]   ;;  %s2006_s7 = inlined_call_operand.vmem [shape: bf16[2,8,64], index: 7, kind: output, shape index: {}]  }
   0x1 LB: > { %s1266_s25 = sadd.s32 4294967295, %s1706_s24   ;;  %p1270_p0 = scmp.ge.s32.totalorder %s1706_s24, 1  ;;  %s1706_s24 = sphi %s1750_s24, %s17_s24  }
   0x2   : > { %p237_p1 = scmp.lt.s32.totalorder %s1706_s24, 3 }
   0x4   : > { %p238_p2 = pnand %p1270_p0, %p237_p1 }
   0x5   : > { %p268_p3 = scmp.lt.s32.totalorder (!%p238_p2), %s1266_s25, 1 }
   0x6   : > { %241 = sbr.rel (%p238_p2) target bundleno = 369 (0x171), region = 48 }
   0xb   : > { %v1631_v0 = vld [vmem:[%s2000_s1 + $0x18] sm:$0xff]  ;;  %v1629_v1 = vld [vmem:[%s2000_s1 + $0x8] sm:$0xff]  ;;  %v1630_v3 = vld [vmem:[%s2000_s1 + $0x10] sm:$0xff]  ;;  %s2010_s25 = smov (!%p268_p3, %s1266_s25), 1  ;;  %vm301_vm0 = vcmask 261120   ;;  %v655_v58 = vlaneseq  ;;  %vm695_vm3 = vcmask 523264  }
   0xc   : > { %v1636_v2 = vld [vmem:[%s2000_s1 + $0x38] sm:$0xff]  ;;  %311 = vmatpush.bf16.msra.mxu0 %v1631_v0  ;;  %339 = vmatpush.bf16.msra.mxu1 %v1629_v1  ;;  %v1628_v4 = vld [vmem:[%s2000_s1] sm:$0xff]  ;;  %v1634_v5 = vld [vmem:[%s2000_s1 + $0x28] sm:$0xff]  ;;  %s1627_s19 = sshll.u32 %s2010_s25, 5  ;;  %s1273_s23 = sshll.u32 %s2010_s25, 2  ;;  %vm1211_vm10 = vcmask 519168  }
   0xd   : > { %421 = vmatpush.bf16.msra.mxu3 %v1636_v2  ;;  %v1635_v6 = vld [vmem:[%s2000_s1 + $0x30] sm:$0xff]  ;;  %v1638_v7 = vld [vmem:[%s2000_s1 + $0x48] sm:$0xff]  ;;  %386 = vmatpush.bf16.msra.mxu2 %v1634_v5  ;;  %v1633_v8 = vld [vmem:[%s2000_s1 + $0x20] sm:$0xff]  ;;  %s1794_s28 = scalar_lea.vmem %s1999_s0, %s1627_s19  ;;  %v1842_v59 = vshrl.u32 %v655_v58, 7  ;;  %v1708_v5 = vmov 0   ;;  %s276_s29 = scalar_lea.vmem %s2006_s7, %s1273_s23 }
   0xe   : > { %v1646_v9 = vld [vmem:[%s2000_s1 + $0x78] sm:$0xff]  ;;  %v1643_v10 = vld [vmem:[%s2000_s1 + $0x68] sm:$0xff]  ;;  %v1637_v11 = vld [vmem:[%s2000_s1 + $0x40] sm:$0xff] }
   0xf   : > { %v1641_v12 = vld [vmem:[%s2000_s1 + $0x58] sm:$0xff]  ;;  %v283_v13 = vld [vmem:[%s1794_s28 + $0x8] sm:$0xf]  ;;  %v278_v14 = vld [vmem:[%s1794_s28] sm:$0xf]  ;;  %v660_v60 = vand.u32 65535, %v1842_v59 }
  0x10   : > { %312 = vmatpush.bf16.msra.mxu0 %v1630_v3  ;;  %340 = vmatpush.bf16.msra.mxu1 %v1628_v4  ;;  %v1645_v15 = vld [vmem:[%s2000_s1 + $0x70] sm:$0xff]  ;;  %v1648_v16 = vld [vmem:[%s2000_s1 + $0x88] sm:$0xff]  ;;  %v1302_v18 = vld [vmem:[%s1794_s28] sm:$0xf]  ;;  %v661_v61 = vshrl.u32 %v1842_v59, 16  ;;  %vm692_vm8 = vcmp.lt.s32.totalorder %v1842_v59, 3 }
  0x11   : > { %422 = vmatpush.bf16.msra.mxu3 %v1635_v6  ;;  %v394_v17 = vld [vmem:[%s1794_s28 + $0x10] sm:$0xf]  ;;  %v1632_v19 = vld [vmem:[%s1794_s28] sm:$0x10]  ;;  %387 = vmatpush.bf16.msra.mxu2 %v1633_v8  ;;  %v1375_v21 = vld [vmem:[%s1794_s28 + $0x8] sm:$0xe] }
  0x12   : > { %v1303_v20 = vor.u32 %v1632_v19, %v1302_v18  ;;  %v1644_v22 = vld [vmem:[%s1794_s28 + $0x8] sm:$0x30]  ;;  %v1345_v23 = vld [vmem:[%s1794_s28 + $0x10] sm:$0xf]  ;;  %v1639_v24 = vld [vmem:[%s1794_s28 + $0x10] sm:$0x10] }
  0x13   : > { %1286 = vmatmul.msk.bf16.vlgmr.msra.gmra.mxu0 %vm301_vm0, %v283_v13  ;;  %1295 = vmatmul.msk.bf16.vlgmr.msra.gmra.mxu1 %vm301_vm0, %v278_v14  ;;  %v512_v25 = vld [vmem:[%s1794_s28] sm:$0xe]  ;;  %v513_v26 = vld [vmem:[%s1794_s28 + $0x4] sm:$0x3]  ;;  %v1376_v30 = vor.u32 %v1644_v22, %v1375_v21  ;;  %v1346_v31 = vor.u32 %v1639_v24, %v1345_v23  ;;  %v1640_v32 = vld [vmem:[%s2000_s1 + $0x50] sm:$0xff]  ;;  %v664_v62 = vmul.u32 43690, %v660_v60 }
  0x14   : > { %456 = vmatpush.bf16.msrb.mxu0 %v1638_v7  ;;  %1325 = vmatmul.msk.bf16.vlgmr.msra.gmra.mxu3 %vm301_vm0, %v394_v17  ;;  %v359_v27 = vshrl.u32 %v1303_v20, 16  ;;  %v361_v28 = vshll.u32 %v1303_v20, 16  ;;  %v1642_v29 = vld [vmem:[%s2000_s1 + $0x60] sm:$0xff]  ;;  %v521_v34 = vunpack.c.l.b16 %v512_v25  ;;  %v522_v35 = vunpack.c.l.b16 %v513_v26  ;;  %v429_v49 = vld [vmem:[%s1794_s28 + $0x18] sm:$0xf]  ;;  %v1651_v19 = vld [vmem:[%s2002_s3 + $0x10] sm:$0xff] }
  0x15   : > { %602 = vmatpush.bf16.msrb.mxu3 %v1646_v9  ;;  %553 = vmatpush.bf16.msrb.mxu2 %v1643_v10  ;;  %v1647_v36 = vld [vmem:[%s2000_s1 + $0x80] sm:$0xff]  ;;  %v479_v37 = vshll.u32 %v1346_v31, 16  ;;  %v574_v39 = vshrl.u32 %v1376_v30, 16  ;;  %v577_v40 = vshll.u32 %v1376_v30, 16  ;;  %v477_v42 = vshrl.u32 %v1346_v31, 16  ;;  %v1652_v13 = vld [vmem:[%s2002_s3 + $0x18] sm:$0xff] }
  0x16   : > { %504 = vmatpush.bf16.msrb.mxu1 %v1641_v12  ;;  %v363_v33 = vrot.slane %v361_v28, 1  ;;  %v523_v41 = vpack.c.b16 %v522_v35, %v521_v34  ;;  %v610_v53 = vld [vmem:[%s1794_s28] sm:$0xc]  ;;  %v663_v63 = vmul.u32 43691, %v660_v60  ;;  %v665_v0 = vmul.u32 43691, %v661_v61  ;;  %v1656_v14 = vld [vmem:[%s2002_s3 + $0x38] sm:$0xff] }
  0x17   : > { %v481_v43 = vrot.slane %v479_v37, 1  ;;  %v576_v44 = vrot.slane %v574_v39, 1  ;;  %v579_v45 = vrot.slane %v577_v40, 2  ;;  %v617_v55 = vunpack.c.l.b16 %v610_v53  ;;  %v1655_v20 = vld [vmem:[%s2002_s3 + $0x30] sm:$0xff]  ;;  %v1650_v28 = vld [vmem:[%s2002_s3 + $0x8] sm:$0xff]  ;;  %v1661_v37 = vld [vmem:[%s2002_s3 + $0x60] sm:$0xff] }
  0x18   : > { %457 = vmatpush.bf16.msrb.mxu0 %v1637_v11  ;;  %v364_v38 = vor.u32 %v363_v33, %v359_v27  ;;  %v525_v46 = vshrl.u32 %v523_v41, 16  ;;  %v528_v47 = vshll.u32 %v523_v41, 16  ;;  %v667_v1 = vshll.u32 %v664_v62, 16  ;;  %v1659_v21 = vld [vmem:[%s2002_s3 + $0x50] sm:$0xff]  ;;  %v1658_v30 = vld [vmem:[%s2002_s3 + $0x48] sm:$0xff]  ;;  %v1653_v33 = vld [vmem:[%s2002_s3 + $0x20] sm:$0xff] }
  0x19   : > { %603 = vmatpush.bf16.msrb.mxu3 %v1645_v15  ;;  %554 = vmatpush.bf16.msrb.mxu2 %v1642_v29  ;;  %v482_v48 = vor.u32 %v481_v43, %v477_v42  ;;  %v580_v50 = vor.u32 %v579_v45, %v576_v44  ;;  %v618_v56 = vpack.c.b16 %v522_v35, %v617_v55  ;;  %v669_v2 = vshll.u32 %v665_v0, 16  ;;  %v1660_v15 = vld [vmem:[%s2002_s3 + $0x58] sm:$0xff]  ;;  %v1663_v23 = vld [vmem:[%s2002_s3 + $0x70] sm:$0xff]  ;;  %v1654_v29 = vld [vmem:[%s2002_s3 + $0x28] sm:$0xff] }
  0x1a   : > { %505 = vmatpush.bf16.msrb.mxu1 %v1640_v32  ;;  %1312 = vmatmul.msk.bf16.vlgmr.msra.gmra.mxu2 %vm301_vm0, %v364_v38  ;;  %v527_v51 = vrot.slane %v525_v46, 1  ;;  %v530_v52 = vrot.slane %v528_v47, 2  ;;  %vm671_vm1 = vc.u32 %v663_v63, %v667_v1  ;;  %v673_v3 = vadd.s32 %v667_v1, %v663_v63  ;;  %v1662_v31 = vld [vmem:[%s2002_s3 + $0x68] sm:$0xff]  ;;  %v1649_v32 = vld [vmem:[%s2002_s3] sm:$0xff]  ;;  %v1672_v44 = vld [vmem:[%s2002_s3 + $0xb8] sm:$0xff] }
  0x1b   : > { %v619_v57 = vrot.slane %v618_v56, 2  ;;  %v666_v4 = vmul.u32 43690, %v661_v61  ;;  %v672_v6 = vsel %vm671_vm1, 1, %v1708_v5  ;;  %v668_v11 = vshrl.u32 %v664_v62, 16  ;;  %v1668_v45 = vld [vmem:[%s2002_s3 + $0x98] sm:$0xff]  ;;  %v1675_v53 = vld [vmem:[%s2002_s3 + $0xd0] sm:$0xff] }
  0x1c   : > { %641 = vmatpush.bf16.msra.mxu0 %v1648_v16  ;;  %v531_v54 = vor.u32 %v530_v52, %v527_v51  ;;  %vm675_vm2 = vc.u32 %v673_v3, %v669_v2  ;;  %v1664_v16 = vld [vmem:[%s2002_s3 + $0x78] sm:$0xff]  ;;  %v670_v17 = vshrl.u32 %v665_v0, 16  ;;  %v1709_v26 = vmov 0.0   ;;  %v1671_v51 = vld [vmem:[%s2002_s3 + $0xb0] sm:$0xff]  ;;  %v1670_v60 = vld [vmem:[%s2002_s3 + $0xa8] sm:$0xff] }
  0x1d   : > { %v674_v7 = vadd.s32 %v672_v6, %v666_v4  ;;  %v676_v8 = vsel %vm675_vm2, 1, %v1708_v5  ;;  %792 = vmatpush.bf16.msra.mxu2 %v1652_v13  ;;  %843 = vmatpush.bf16.msra.mxu3 %v1660_v15  ;;  %696 = vst.msk [vmem:[#allocation2] sm:$0xff] %vm695_vm3, %v1709_v26  ;;  %v1676_v46 = vld [vmem:[%s2002_s3 + $0xd8] sm:$0xff]  ;;  %v1667_v52 = vld [vmem:[%s2002_s3 + $0x90] sm:$0xff]  ;;  %v1666_v61 = vld [vmem:[%s2002_s3 + $0x88] sm:$0xff] }
  0x1e   : > { %752 = vmatpush.bf16.msra.mxu1 %v1656_v14  ;;  %697 = vst.msk [vmem:[#allocation2 + $0x8] sm:$0xff] %vm695_vm3, %v1709_v26  ;;  %v1674_v62 = vld [vmem:[%s2002_s3 + $0xc8] sm:$0xff]  ;;  %v1669_v4 = vld [vmem:[%s2002_s3 + $0xa0] sm:$0xff] }
  0x1f   : > { %v678_v12 = vadd.s32 %v676_v8, %v674_v7  ;;  %698 = vst.msk [vmem:[#allocation2 + $0x10] sm:$0xff] %vm695_vm3, %v1709_v26  ;;  %v1678_v63 = vld [vmem:[%s2002_s3 + $0xe8] sm:$0xff]  ;;  %v1665_v5 = vld [vmem:[%s2002_s3 + $0x80] sm:$0xff] }
  0x20   : > { %642 = vmatpush.bf16.msra.mxu0 %v1647_v36  ;;  %v1657_v36 = vld [vmem:[%s2002_s3 + $0x40] sm:$0xff] }
  0x21   : > { %v679_v18 = vadd.s32 %v678_v12, %v668_v11  ;;  %793 = vmatpush.bf16.msra.mxu2 %v1651_v19  ;;  %844 = vmatpush.bf16.msra.mxu3 %v1659_v21  ;;  %v1673_v7 = vld [vmem:[%s2002_s3 + $0xc0] sm:$0xff] }
  0x22   : > { %753 = vmatpush.bf16.msra.mxu1 %v1655_v20  ;;  %v1677_v8 = vld [vmem:[%s2002_s3 + $0xe0] sm:$0xff] }
  0x23   : > { %1338 = vmatmul.msk.bf16.vlgmr.msrb.gmra.mxu0 %vm301_vm0, %v429_v49  ;;  %1355 = vmatmul.msk.bf16.vlgmr.msrb.gmra.mxu1 %vm301_vm0, %v482_v48  ;;  %v680_v27 = vadd.s32 %v679_v18, %v670_v17  ;;  %v1680_v48 = vld [vmem:[%s2002_s3 + $0xf8] sm:$0xff]  ;;  %v1697_v13 = vld [vmem:[%s2001_s2] ss:$0 sm:$0xff] }
  0x24   : > { %1385 = vmatmul.msk.bf16.vlgmr.msrb.gmra.mxu3 %vm301_vm0, %v580_v50  ;;  %895 = vmatpush.bf16.msrb.mxu0 %v1664_v16 }
  0x25   : > { %794 = vmatpush.bf16.msra.mxu2 %v1650_v28  ;;  %v681_v35 = vshrl.u32 %v680_v27, 1  ;;  %845 = vmatpush.bf16.msra.mxu3 %v1658_v30  ;;  %v1684_v27 = vld [vmem:[%s2002_s3 + $0x118] sm:$0xff]  ;;  %v1685_v30 = vld [vmem:[%s2004_s5] sm:$0xff] }
  0x26   : > { %754 = vmatpush.bf16.msra.mxu1 %v1654_v29  ;;  %v1683_v29 = vld [vmem:[%s2002_s3 + $0x110] sm:$0xff] }
  0x27   : > { %v682_v43 = vmul.u32 3, %v681_v35 }
  0x28   : > { %896 = vmatpush.bf16.msrb.mxu0 %v1663_v23 }
  0x29   : > { %795 = vmatpush.bf16.msra.mxu2 %v1649_v32  ;;  %846 = vmatpush.bf16.msra.mxu3 %v1657_v36  ;;  %v683_v50 = vsub.s32 %v1842_v59, %v682_v43  ;;  %v1686_v59 = vld [vmem:[%s2004_s5 + $0x8] sm:$0xff]  ;;  %v1681_v32 = vld [vmem:[%s2002_s3 + $0x100] sm:$0xff] }
  0x2a   : > { %1368 = vmatmul.msk.bf16.vlgmr.msrb.gmra.mxu2 %vm301_vm0, %v531_v54  ;;  %755 = vmatpush.bf16.msra.mxu1 %v1653_v33  ;;  %v1679_v54 = vld [vmem:[%s2002_s3 + $0xf0] sm:$0xff] }
  0x2b   : > { %vm686_vm4 = vcmp.ne.s32.totalorder %v683_v50, 0  ;;  %vm687_vm5 = vcmp.lt.s32.totalorder %v683_v50, 0  ;;  %v689_v0 = vadd.s32 3, %v683_v50 }
  0x2c   : > { %897 = vmatpush.bf16.msrb.mxu0 %v1662_v31  ;;  %vm1934_vm6 = vmand %vm687_vm5, %vm686_vm4  ;;  %v1682_v31 = vld [vmem:[%s2002_s3 + $0x108] sm:$0xff] }
  0x2d   : > { %999 = vmatpush.bf16.msrb.mxu2 %v1672_v44  ;;  %1051 = vmatpush.bf16.msrb.mxu3 %v1676_v46 }
  0x2e   : > { %947 = vmatpush.bf16.msrb.mxu1 %v1668_v45 }
  0x30   : > { %898 = vmatpush.bf16.msrb.mxu0 %v1661_v37 }
  0x31   : > { %1000 = vmatpush.bf16.msrb.mxu2 %v1671_v51  ;;  %1052 = vmatpush.bf16.msrb.mxu3 %v1675_v53 }
  0x32   : > { %948 = vmatpush.bf16.msrb.mxu1 %v1667_v52 }
  0x33   : > { %1398 = vmatmul.msk.bf16.vlgmr.msra.gmra.mxu0 %vm301_vm0, %v619_v57 }
  0x34   : > { %1103 = vmatpush.bf16.msra.mxu0 %v1680_v48 }
  0x35   : > { %1001 = vmatpush.bf16.msrb.mxu2 %v1670_v60  ;;  %1053 = vmatpush.bf16.msrb.mxu3 %v1674_v62 }
  0x36   : > { %949 = vmatpush.bf16.msrb.mxu1 %v1666_v61 }
  0x38   : > { %1104 = vmatpush.bf16.msra.mxu0 %v1679_v54 }
  0x39   : > { %1002 = vmatpush.bf16.msrb.mxu2 %v1669_v4  ;;  %1054 = vmatpush.bf16.msrb.mxu3 %v1673_v7 }
  0x3a   : > { %950 = vmatpush.bf16.msrb.mxu1 %v1665_v5 }
  0x3c   : > { %1105 = vmatpush.bf16.msra.mxu0 %v1678_v63 }
  0x40   : > { %1106 = vmatpush.bf16.msra.mxu0 %v1677_v8  ;;  %v1699_v8 = vld [vmem:[%s2005_s6] ss:$0 sm:$0xff] }
  0x90   : > { %v314_v9 = vpop.f32.mrf.mxu0  ;;  %v342_v10 = vpop.f32.mrf.mxu1 }
  0x91   : > { %v343_v38 = vadd.f32 %v342_v10, %v314_v9  ;;  %v690_v10 = vsel %vm1934_vm6, %v689_v0, %v683_v50 }
  0x92   : > { %vm691_vm7 = vcmp.lt.s32.totalorder %v690_v10, 1 }
  0x93   : > { %vm693_vm9 = vmand %vm691_vm7, %vm692_vm8 }
  0x97   : > { %v424_v22 = vpop.f32.mrf.mxu3 }
  0x98   : > { %v316_v24 = vpop.f32.mrf.mxu0  ;;  %v344_v25 = vpop.f32.mrf.mxu1 }
  0x9d   : > { %v389_v34 = vpop.f32.mrf.mxu2 }
  0x9e   : > { %v393_v40 = vadd.f32 %v389_v34, %v343_v38 }
  0x9f   : > { %v426_v39 = vpop.f32.mrf.mxu3 }
  0xa0   : > { %v459_v41 = vpop.f32.mrf.mxu0  ;;  %v507_v42 = vpop.f32.mrf.mxu1  ;;  %v428_v47 = vadd.f32 %v424_v22, %v393_v40 }
  0xa2   : > { %v463_v56 = vadd.f32 %v459_v41, %v428_v47 }
  0xa4   : > { %v511_v1 = vadd.f32 %v507_v42, %v463_v56  ;;  %v1170_v42 = vld [vmem:[%s1794_s28 + $0x18] sm:$0xf] }
  0xa5   : > { %v391_v49 = vpop.f32.mrf.mxu2 }
  0xa7   : > { %v605_v55 = vpop.f32.mrf.mxu3 }
  0xa8   : > { %v461_v57 = vpop.f32.mrf.mxu0  ;;  %v509_v58 = vpop.f32.mrf.mxu1 }
  0xad   : > { %v556_v3 = vpop.f32.mrf.mxu2 }
  0xae   : > { %v560_v6 = vadd.f32 %v556_v3, %v511_v1 }
  0xaf   : > { %v607_v9 = vpop.f32.mrf.mxu3 }
  0xb0   : > { %v609_v11 = vadd.f32 %v605_v55, %v560_v6  ;;  %v644_v12 = vpop.f32.mrf.mxu0  ;;  %v1698_v6 = vld [vmem:[%s2003_s4] ss:$0 sm:$0xff] }
  0xb2   : > { %v648_v14 = vadd.f32 %v644_v12, %v609_v11 }
  0xb4   : > { %v653_v15 = vadd.f32 %v1697_v13, %v648_v14 }
  0xb5   : > { %v558_v16 = vpop.f32.mrf.mxu2 }
  0xb6   : > { %v654_v17 = vmax.f32 %v653_v15, 0.0 }
  0xb8   : > { %v694_v18 = vsel %vm693_vm9, %v654_v17, 0.0  ;;  %v646_v19 = vpop.f32.mrf.mxu0 }
  0xb9   : > { %699 = vst.msk [vmem:[#allocation2 + $0x8] sm:$0xff] %vm695_vm3, %v694_v18 }
  0xc0   : > { %v710_v20 = vld [vmem:[#allocation2 + $0x5] sm:$0xff] }
  0xc1   : > { %v700_v21 = vld [vmem:[#allocation2 + $0x4] sm:$0xff]  ;;  %v711_v23 = vpack.c.bf16 %v710_v20, %v710_v20  ;;  %v1113_v41 = vld [vmem:[#allocation2 + $0xc] sm:$0xff] }
  0xc2   : > { %v801_v22 = vld [vmem:[#allocation2 + $0x6] sm:$0xff]  ;;  %v701_v24 = vpack.c.bf16 %v700_v21, %v700_v21  ;;  %v1114_v43 = vpack.c.bf16 %v1113_v41, %v1113_v41 }
  0xc3   : > { %v802_v25 = vpack.c.bf16 %v801_v22, %v801_v22  ;;  %v853_v26 = vld [vmem:[#allocation2 + $0x7] sm:$0xff]  ;;  %1423 = vmatmul.msk.bf16.vlgmr.msra.gmra.mxu1 %vm695_vm3, %v711_v23 }
  0xc4   : > { %v854_v28 = vpack.c.bf16 %v853_v26, %v853_v26  ;;  %1440 = vmatmul.msk.bf16.vlgmr.msra.gmra.mxu2 %vm695_vm3, %v701_v24  ;;  %1155 = vmatpush.bf16.msra.mxu1 %v1684_v27  ;;  %v905_v33 = vld [vmem:[#allocation2 + $0x8] sm:$0xff] }
  0xc5   : > { %1465 = vmatmul.msk.bf16.vlgmr.msra.gmra.mxu3 %vm695_vm3, %v802_v25  ;;  %1196 = vmatpush.bf16.msra.mxu2 %v1686_v59  ;;  %v957_v34 = vld [vmem:[#allocation2 + $0x9] sm:$0xff]  ;;  %v906_v37 = vpack.c.bf16 %v905_v33, %v905_v33 }
  0xc6   : > { %1490 = vmatmul.msk.bf16.vlgmr.msrb.gmra.mxu0 %vm695_vm3, %v854_v28  ;;  %v1009_v35 = vld [vmem:[#allocation2 + $0xa] sm:$0xff]  ;;  %v958_v38 = vpack.c.bf16 %v957_v34, %v957_v34 }
  0xc7   : > { %v1061_v36 = vld [vmem:[#allocation2 + $0xb] sm:$0xff]  ;;  %v1010_v39 = vpack.c.bf16 %v1009_v35, %v1009_v35 }
  0xc8   : > { %1156 = vmatpush.bf16.msra.mxu1 %v1683_v29  ;;  %v1062_v40 = vpack.c.bf16 %v1061_v36, %v1061_v36 }
  0xc9   : > { %1197 = vmatpush.bf16.msra.mxu2 %v1685_v30 }
  0xcc   : > { %1157 = vmatpush.bf16.msra.mxu1 %v1682_v31 }
  0xd0   : > { %1158 = vmatpush.bf16.msra.mxu1 %v1681_v32 }
  0xd3   : > { %1515 = vmatmul.msk.bf16.vlgmr.msrb.gmra.mxu1 %vm695_vm3, %v906_v37 }
  0xd4   : > { %1540 = vmatmul.msk.bf16.vlgmr.msrb.gmra.mxu2 %vm695_vm3, %v958_v38 }
  0xd5   : > { %1565 = vmatmul.msk.bf16.vlgmr.msrb.gmra.mxu3 %vm695_vm3, %v1010_v39 }
  0xd6   : > { %1590 = vmatmul.msk.bf16.vlgmr.msra.gmra.mxu0 %vm695_vm3, %v1062_v40 }
  0xe3   : > { %1615 = vmatmul.msk.bf16.vlgmr.msra.gmra.mxu1 %vm695_vm3, %v1114_v43 }
  0xe4   : > { %1624 = vmatmul.msk.bf16.vlgmr.msra.gmra.mxu2 %vm301_vm0, %v1170_v42 }
 0x140   : > { %v757_v44 = vpop.f32.mrf.mxu1 }
 0x143   : > { %v900_v45 = vpop.f32.mrf.mxu0 }
 0x147   : > { %v797_v46 = vpop.f32.mrf.mxu2 }
 0x148   : > { %v848_v47 = vpop.f32.mrf.mxu3  ;;  %v759_v48 = vpop.f32.mrf.mxu1  ;;  %v798_v50 = vadd.f32 %v797_v46, %v757_v44 }
 0x14a   : > { %v852_v52 = vadd.f32 %v848_v47, %v798_v50 }
 0x14b   : > { %v902_v49 = vpop.f32.mrf.mxu0 }
 0x14c   : > { %v904_v56 = vadd.f32 %v900_v45, %v852_v52 }
 0x14f   : > { %v799_v51 = vpop.f32.mrf.mxu2 }
 0x150   : > { %v850_v53 = vpop.f32.mrf.mxu3  ;;  %v952_v54 = vpop.f32.mrf.mxu1 }
 0x151   : > { %v956_v57 = vadd.f32 %v952_v54, %v904_v56 }
 0x153   : > { %v1108_v55 = vpop.f32.mrf.mxu0 }
 0x157   : > { %v1004_v58 = vpop.f32.mrf.mxu2 }
 0x158   : > { %v1008_v60 = vadd.f32 %v1004_v58, %v956_v57  ;;  %v1056_v61 = vpop.f32.mrf.mxu3  ;;  %v954_v62 = vpop.f32.mrf.mxu1 }
 0x15a   : > { %v1060_v0 = vadd.f32 %v1056_v61, %v1008_v60 }
 0x15b   : > { %v1110_v63 = vpop.f32.mrf.mxu0 }
 0x15c   : > { %v1112_v3 = vadd.f32 %v1108_v55, %v1060_v0 }
 0x15f   : > { %v1006_v1 = vpop.f32.mrf.mxu2 }
 0x160   : > { %v1058_v2 = vpop.f32.mrf.mxu3  ;;  %v1160_v4 = vpop.f32.mrf.mxu1 }
 0x161   : > { %v1164_v5 = vadd.f32 %v1160_v4, %v1112_v3 }
 0x163   : > { %v1169_v7 = vadd.f32 %v1698_v6, %v1164_v5 }
 0x167   : > { %v1199_v9 = vpop.f32.mrf.mxu2 }
 0x168   : > { %v1203_v10 = vadd.f32 %v1199_v9, %v1169_v7  ;;  %v1162_v11 = vpop.f32.mrf.mxu1 }
 0x16a   : > { %v1208_v12 = vadd.f32 %v1699_v8, %v1203_v10 }
 0x16c   : > { %v1209_v13 = vmax.f32 %v1208_v12, 0.0 }
 0x16e   : > { %v1210_v14 = vpack.c.bf16 %v1209_v13, %v1209_v13 }
 0x16f   : > { %v1201_v15 = vpop.f32.mrf.mxu2 }
 0x170   : > { %1212 = vst.msk [vmem:[%s276_s29] sm:$0xf] %vm1211_vm10, %v1210_v14 }
 0x171 PF: > { %s17_s24 = sadd.s32 1, %s1706_s24  }
 0x172   : > { %p14_p4 = scmp.ge.s32.totalorder %s17_s24, 4  }
 0x174   :  { %16 = sbr.rel (!%p14_p4) target bundleno = 1 (0x1), region = 94 }

</bundles_post_ra>
